<compile_context>
chip_gen: v7x
topology: tpu7x:2x2x1
jax: 0.10.0
libtpu: 0.0.40
codegen_flags: <defaults>
</compile_context>

<pallas_src>
import numpy as np

import jax
import jax.numpy as jnp
from jax.experimental import pallas as pl
from jax.experimental.pallas import tpu as pltpu


_COMPILER_PARAMS = pltpu.CompilerParams(
    # batch axis: independent blocks -> shard across the 2 TCs on v7x.
    dimension_semantics=("parallel",),
    # Per-step footprint here is well under 1 MiB; 32 MiB is safe on every
    # generation (v7x physical VMEM is 64 MiB).
    vmem_limit_bytes=32 * 1024 * 1024,
)


# ------------------------------ Pallas kernels ------------------------------

def _make_conv_kernel(KH, KW, W, pad, HW, has_taps, norm_silu, res_mode,
                      use_tanh, scale):
    """Fused conv (+bias +RMSNorm +SiLU +residual +tanh) kernel factory.

    Ref order: xp, w, b, [masks], [g], [x_res], [res_w, res_b], out
      xp  : (1, Cin, L)   zero-padded flat-row input, L = HW + 2*(pad*W + pad)
      w   : (Cout, KH*KW*Cin) bf16, tap-major (kh, kw, cin) ordering
      out : (1, Cout, HW) f32
    """

    def kernel(*refs):
        it = iter(refs)
        xp_ref = next(it)
        w_ref = next(it)
        b_ref = next(it)
        mask_ref = next(it) if has_taps else None
        g_ref = next(it) if norm_silu else None
        xr_ref = next(it) if res_mode else None
        if res_mode == "conv":
            rw_ref = next(it)
            rb_ref = next(it)
        o_ref = next(it)

        x = xp_ref[0]                                       # (Cin, L) f32

        if has_taps:
            taps = []
            for kh in range(KH):
                for kw in range(KW):
                    off = kh * W + kw
                    t = x[:, off:off + HW]                  # contiguous lane slice
                    if kw != pad:                           # zero row-wrap columns
                        t = t * mask_ref[kw:kw + 1, :]
                    taps.append(t)
            patches = jnp.concatenate(taps, axis=0)         # (KH*KW*Cin, HW)
        else:
            patches = x                                     # 1x1 conv

        # Single big-K im2col matmul, bf16 operands, f32 accumulation.
        acc = jnp.dot(w_ref[...], patches.astype(jnp.bfloat16),
                      preferred_element_type=jnp.float32)   # (Cout, HW)
        acc = acc + b_ref[...]

        if norm_silu:
            # RMSNorm == F.normalize(x, dim=channel, eps=1e-12) * g * sqrt(C).
            ssq = jnp.sum(acc * acc, axis=0, keepdims=True)         # sublane reduce
            y = acc * jax.lax.rsqrt(jnp.maximum(ssq, 1e-24))        # EUP rsqrt
            y = y * (g_ref[...] * scale)
            acc = y * jax.nn.sigmoid(y)                             # SiLU (EUP)
            # dropout(p=0.0) is identity.

        if res_mode == "identity":
            acc = acc + xr_ref[0]
        elif res_mode == "conv":
            acc = acc + jnp.dot(rw_ref[...], xr_ref[0].astype(jnp.bfloat16),
                                preferred_element_type=jnp.float32)
            acc = acc + rb_ref[...]

        if use_tanh:
            acc = jnp.tanh(acc)

        o_ref[0] = acc.astype(o_ref.dtype)

    return kernel


def _vae_head_kernel(z_ref, wmu_ref, bmu_ref, wlv_ref, blv_ref, eps_ref,
                     mu_ref, lv_ref, zs_ref):
    """Fused mu/logvar 1x1 convs + clamp + reparameterization (3 outputs)."""
    z = z_ref[0].astype(jnp.bfloat16)                               # (Cl, HW)
    mu = jnp.dot(wmu_ref[...], z, preferred_element_type=jnp.float32) + bmu_ref[...]
    lv = jnp.dot(wlv_ref[...], z, preferred_element_type=jnp.float32) + blv_ref[...]
    lv = jnp.clip(lv, -10.0, 10.0)
    zs = mu + eps_ref[0] * jnp.exp(0.5 * lv)
    mu_ref[0] = mu
    lv_ref[0] = lv
    zs_ref[0] = zs


# ----------------------------- kernel wrappers ------------------------------

def fused_conv(x, w, b, *, ksize, pad, H, W, g=None, residual=None,
               res_w=None, res_b=None, use_tanh=False):
    """x: (N, Cin, H*W) f32.  w: (Cout, ksize*ksize*Cin) tap-major.

    Returns (N, Cout, H*W) f32 = optional_tanh( [silu(rmsnorm(conv(x)+b))]
                                                 [+ residual / 1x1(residual)] ).
    """
    N, Cin, HW = x.shape
    assert HW == H * W
    Cout = w.shape[0]
    KH = KW = ksize
    has_taps = ksize > 1

    # Align channel groups to full sublanes for the concat (hits the 3-channel
    # init conv only); zero channels / zero weight columns keep results exact.
    if has_taps and Cin % 8 != 0:
        cpad = (-Cin) % 8
        x = jnp.pad(x, ((0, 0), (0, cpad), (0, 0)))
        w = jnp.pad(w.reshape(Cout, KH * KW, Cin), ((0, 0), (0, 0), (0, cpad)))
        w = w.reshape(Cout, KH * KW * (Cin + cpad))
        Cin = Cin + cpad
    K = KH * KW * Cin

    args = []
    in_specs = []

    if has_taps:
        pw = pad * W + pad                       # vertical pad rows + edge slack
        L = HW + 2 * pw
        xp = jnp.pad(x, ((0, 0), (0, 0), (pw, pw)))
        # Static per-kw masks that zero the columns which would wrap to the
        # neighbouring image row in the flattened layout.
        wcol = np.arange(HW) % W
        masks = np.stack(
            [((wcol + kw_ - pad >= 0) & (wcol + kw_ - pad < W))
             for kw_ in range(KW)]).astype(np.float32)
    else:
        L = HW
        xp = x
        masks = None

    args += [xp, w.astype(jnp.bfloat16), b.reshape(Cout, 1)]
    in_specs += [
        pl.BlockSpec((1, Cin, L), lambda n: (n, 0, 0)),
        pl.BlockSpec((Cout, K), lambda n: (0, 0)),
        pl.BlockSpec((Cout, 1), lambda n: (0, 0)),
    ]
    if has_taps:
        args.append(jnp.asarray(masks))
        in_specs.append(pl.BlockSpec((KW, HW), lambda n: (0, 0)))

    norm_silu = g is not None
    if norm_silu:
        args.append(g.reshape(Cout, 1))
        in_specs.append(pl.BlockSpec((Cout, 1), lambda n: (0, 0)))

    res_mode = None
    if residual is not None:
        Cr = residual.shape[1]
        args.append(residual)
        in_specs.append(pl.BlockSpec((1, Cr, HW), lambda n: (n, 0, 0)))
        if res_w is not None:
            res_mode = "conv"
            args += [res_w.astype(jnp.bfloat16), res_b.reshape(Cout, 1)]
            in_specs += [pl.BlockSpec((Cout, Cr), lambda n: (0, 0)),
                         pl.BlockSpec((Cout, 1), lambda n: (0, 0))]
        else:
            res_mode = "identity"

    kernel = _make_conv_kernel(KH, KW, W, pad, HW, has_taps, norm_silu,
                               res_mode, use_tanh, float(Cout) ** 0.5)

    return pl.pallas_call(
        kernel,
        out_shape=jax.ShapeDtypeStruct((N, Cout, HW), jnp.float32),
        grid=(N,),
        in_specs=in_specs,
        out_specs=pl.BlockSpec((1, Cout, HW), lambda n: (n, 0, 0)),
        compiler_params=_COMPILER_PARAMS,
    )(*args)


def vae_head(z, mu_p, lv_p, eps):
    """Fused mu/logvar 1x1 convs + clamp + reparameterization."""
    N, Cl, HW = z.shape
    w_mu, b_mu = mu_p
    w_lv, b_lv = lv_p
    act_spec = pl.BlockSpec((1, Cl, HW), lambda n: (n, 0, 0))
    w_spec = pl.BlockSpec((Cl, Cl), lambda n: (0, 0))
    b_spec = pl.BlockSpec((Cl, 1), lambda n: (0, 0))
    sds = jax.ShapeDtypeStruct((N, Cl, HW), jnp.float32)
    return pl.pallas_call(
        _vae_head_kernel,
        out_shape=(sds, sds, sds),
        grid=(N,),
        in_specs=[act_spec, w_spec, b_spec, w_spec, b_spec, act_spec],
        out_specs=(act_spec, act_spec, act_spec),
        compiler_params=_COMPILER_PARAMS,
    )(z, w_mu.astype(jnp.bfloat16), b_mu.reshape(Cl, 1),
      w_lv.astype(jnp.bfloat16), b_lv.reshape(Cl, 1), eps)


# ------------------------------ glue (plain JAX) ----------------------------

def pixel_unshuffle(x, H, W):
    # Rearrange 'b c (h p1) (w p2) -> b (c p1 p2) h w' on (N, C, H*W) tensors.
    N, C, _ = x.shape
    x = x.reshape(N, C, H // 2, 2, W // 2, 2)
    x = x.transpose(0, 1, 3, 5, 2, 4)           # N, C, p1, p2, H/2, W/2
    return x.reshape(N, C * 4, (H // 2) * (W // 2))


def upsample_nearest(x, H, W):
    N, C, HW = x.shape
    x = x.reshape(N, C, H, W)
    x = jnp.repeat(jnp.repeat(x, 2, axis=2), 2, axis=3)
    return x.reshape(N, C, 4 * HW)


# ------------------------------ parameter init ------------------------------

def init_conv(key, k, cin, cout):
    k_w, k_b = jax.random.split(key)
    fan_in = k * k * cin
    # Weight stored directly in matmul layout (Cout, KH*KW*Cin), (kh, kw, cin)
    # tap-major ordering to match the kernel's patch construction.
    w = jax.random.normal(k_w, (cout, k * k * cin), jnp.float32) * fan_in ** -0.5
    b = jax.random.normal(k_b, (cout,), jnp.float32) * 0.01
    return w, b


def init_resnet(key, cin, cout):
    ks = jax.random.split(key, 3)
    p = {}
    p['w1'], p['b1'] = init_conv(ks[0], 3, cin, cout)
    p['g1'] = jnp.ones((cout,), jnp.float32)
    p['w2'], p['b2'] = init_conv(ks[1], 3, cout, cout)
    p['g2'] = jnp.ones((cout,), jnp.float32)
    if cin != cout:
        p['rw'], p['rb'] = init_conv(ks[2], 1, cin, cout)
    return p


def init_encoder(key, dim, dim_mults, dim_latent, image_channels):
    dims = [dim] + [dim * m for m in dim_mults]
    stages = list(zip(dims[:-1], dims[1:]))
    keys = iter(jax.random.split(key, 4 * len(stages) + 8))
    p = {'init_conv': init_conv(next(keys), 7, image_channels, dim), 'down': []}
    for cin, cout in stages:
        p['down'].append({
            'res1': init_resnet(next(keys), cin, cin),
            'res2': init_resnet(next(keys), cin, cin),
            'down_conv': init_conv(next(keys), 1, cin * 4, cout),
        })
    p['mid'] = init_resnet(next(keys), dims[-1], dim_latent)
    p['mu'] = init_conv(next(keys), 1, dim_latent, dim_latent)
    p['logvar'] = init_conv(next(keys), 1, dim_latent, dim_latent)
    return p


def init_decoder(key, dim, dim_mults, dim_latent, image_channels):
    dims = [dim] + [dim * m for m in dim_mults]
    stages = list(zip(reversed(dims[1:]), reversed(dims[:-1])))
    keys = iter(jax.random.split(key, 4 * len(stages) + 8))
    p = {'z_in': init_conv(next(keys), 1, dim_latent, dim_latent),
         'mid': init_resnet(next(keys), dim_latent, dims[-1]),
         'up': []}
    for cin, cout in stages:
        p['up'].append({
            'res1': init_resnet(next(keys), cin, cin),
            'res2': init_resnet(next(keys), cin, cin),
            'up_conv': init_conv(next(keys), 3, cin, cout),
        })
    p['final_res'] = init_resnet(next(keys), dim, dim)
    p['final_conv'] = init_conv(next(keys), 1, dim, image_channels)
    return p


def init_vae(key, dim, dim_mults, dim_latent, image_channels):
    k_enc, k_dec = jax.random.split(key)
    return {
        'enc': init_encoder(k_enc, dim, dim_mults, dim_latent, image_channels),
        'dec': init_decoder(k_dec, dim, dim_mults, dim_latent, image_channels),
    }


# ------------------------------ forward pass --------------------------------

def resnet_block(x, p, H, W):
    # call 1: conv3x3 + bias + RMSNorm + SiLU
    z = fused_conv(x, p['w1'], p['b1'], ksize=3, pad=1, H=H, W=W, g=p['g1'])
    # call 2: conv3x3 + bias + RMSNorm + SiLU + residual (identity or 1x1 conv)
    return fused_conv(z, p['w2'], p['b2'], ksize=3, pad=1, H=H, W=W, g=p['g2'],
                      residual=x, res_w=p.get('rw'), res_b=p.get('rb'))


def encoder_forward(p, x, H, W):
    z = fused_conv(x, *p['init_conv'], ksize=7, pad=3, H=H, W=W)
    h, w = H, W
    for st in p['down']:
        z = resnet_block(z, st['res1'], h, w)
        z = resnet_block(z, st['res2'], h, w)
        z = pixel_unshuffle(z, h, w)          # TODO(synk): fuse into down_conv
        h, w = h // 2, w // 2
        z = fused_conv(z, *st['down_conv'], ksize=1, pad=0, H=h, W=w)
    z = resnet_block(z, p['mid'], h, w)
    return z, h, w


def decoder_forward(p, z, h, w):
    z = fused_conv(z, *p['z_in'], ksize=1, pad=0, H=h, W=w)
    z = resnet_block(z, p['mid'], h, w)
    for st in p['up']:
        z = resnet_block(z, st['res1'], h, w)
        z = resnet_block(z, st['res2'], h, w)
        z = upsample_nearest(z, h, w)         # TODO(synk): fuse into up_conv
        h, w = 2 * h, 2 * w
        z = fused_conv(z, *st['up_conv'], ksize=3, pad=1, H=h, W=w)
    z = resnet_block(z, p['final_res'], h, w)
    z = fused_conv(z, *p['final_conv'], ksize=1, pad=0, H=h, W=w, use_tanh=True)
    return z


@jax.jit
def vae_forward(params, x_nchw, eps_nchw):
    N, C, H, W = x_nchw.shape
    # NCHW -> (N, C, H*W): pure reshape, no transpose needed for this layout.
    x = x_nchw.reshape(N, C, H * W)
    z, h, w = encoder_forward(params['enc'], x, H, W)
    Cl = eps_nchw.shape[1]
    eps = eps_nchw.reshape(N, Cl, h * w)
    mu, logvar, z_s = vae_head(z, params['enc']['mu'], params['enc']['logvar'], eps)
    x_recon = decoder_forward(params['dec'], z_s, h, w)
    return (x_recon.reshape(N, x_recon.shape[1], H, W),
            mu.reshape(N, Cl, h, w),
            logvar.reshape(N, Cl, h, w))


# ---------------------------------- main -------------------------------------

if __name__ == "__main__":
    dim = 8
    dim_mults = (1, 2)
    dim_latent = 8
    image_channels = 3
    batch, spatial = 2, 16      # spatial divisible by 2**len(dim_mults)

    root = jax.random.PRNGKey(0)
    k_params, k_input, k_eps = jax.random.split(root, 3)

    params = init_vae(k_params, dim, dim_mults, dim_latent, image_channels)
    x = jax.random.normal(k_input, (batch, image_channels, spatial, spatial),
                          jnp.float32)

    latent_spatial = spatial // (2 ** len(dim_mults))
    eps = jax.random.normal(
        k_eps, (batch, dim_latent, latent_spatial, latent_spatial), jnp.float32)

    x_recon, mu, logvar = vae_forward(params, x, eps)
    jax.block_until_ready((x_recon, mu, logvar))

    assert x_recon.shape == (batch, image_channels, spatial, spatial)
    assert mu.shape == (batch, dim_latent, latent_spatial, latent_spatial)
    assert logvar.shape == (batch, dim_latent, latent_spatial, latent_spatial)
    assert bool(jnp.all(jnp.isfinite(x_recon)))
    assert bool(jnp.all(jnp.abs(logvar) <= 10.0))

    print("KERNEL_OK")
</pallas_src>

<mosaic_0001>
module attributes {stable_mosaic.version = 11 : i64} {
  func.func @kernel(%arg0: i32, %arg1: memref<1x8x290xf32, #tpu.memory_space<vmem>>, %arg2: memref<8x72xbf16, #tpu.memory_space<vmem>>, %arg3: memref<8x1xf32, #tpu.memory_space<vmem>>, %arg4: memref<3x256xf32, #tpu.memory_space<vmem>>, %arg5: memref<8x1xf32, #tpu.memory_space<vmem>>, %arg6: memref<1x8x256xf32, #tpu.memory_space<vmem>>) attributes {dimension_semantics = [#tpu.dimension_semantics<parallel>], iteration_bounds = array<i64: 2>, scalar_prefetch = 0 : i64, scratch_operands = 0 : i64, tpu.core_type = #tpu.core_type<tc>, window_params = [{transform_indices = @transform_0, window_bounds = array<i64: 1, 8, 290>}, {pipeline_mode = #tpu.pipeline_mode<synchronous>, transform_indices = @transform_1, window_bounds = array<i64: 8, 72>}, {pipeline_mode = #tpu.pipeline_mode<synchronous>, transform_indices = @transform_2, window_bounds = array<i64: 8, 1>}, {pipeline_mode = #tpu.pipeline_mode<synchronous>, transform_indices = @transform_3, window_bounds = array<i64: 3, 256>}, {pipeline_mode = #tpu.pipeline_mode<synchronous>, transform_indices = @transform_4, window_bounds = array<i64: 8, 1>}, {transform_indices = @transform_5, window_bounds = array<i64: 1, 8, 256>}]} {
    %c0 = arith.constant 0 : index
    %c0_0 = arith.constant 0 : index
    %c0_1 = arith.constant 0 : index
    %0 = vector.load %arg1[%c0, %c0_0, %c0_1] : memref<1x8x290xf32, #tpu.memory_space<vmem>>, vector<1x8x290xf32>
    %1 = vector.shape_cast %0 : vector<1x8x290xf32> to vector<8x290xf32>
    %2 = vector.extract_strided_slice %1 {offsets = [0, 0], sizes = [8, 256], strides = [1, 1]} : vector<8x290xf32> to vector<8x256xf32>
    %c0_2 = arith.constant 0 : index
    %c0_3 = arith.constant 0 : index
    %3 = vector.load %arg4[%c0_2, %c0_3] : memref<3x256xf32, #tpu.memory_space<vmem>>, vector<1x256xf32>
    %4 = vector.broadcast %3 : vector<1x256xf32> to vector<8x256xf32>
    %5 = arith.mulf %2, %4 : vector<8x256xf32>
    %6 = vector.extract_strided_slice %1 {offsets = [0, 1], sizes = [8, 256], strides = [1, 1]} : vector<8x290xf32> to vector<8x256xf32>
    %7 = vector.extract_strided_slice %1 {offsets = [0, 2], sizes = [8, 256], strides = [1, 1]} : vector<8x290xf32> to vector<8x256xf32>
    %c2 = arith.constant 2 : index
    %c0_4 = arith.constant 0 : index
    %8 = vector.load %arg4[%c2, %c0_4] : memref<3x256xf32, #tpu.memory_space<vmem>>, vector<1x256xf32>
    %9 = vector.broadcast %8 : vector<1x256xf32> to vector<8x256xf32>
    %10 = arith.mulf %7, %9 : vector<8x256xf32>
    %11 = vector.extract_strided_slice %1 {offsets = [0, 16], sizes = [8, 256], strides = [1, 1]} : vector<8x290xf32> to vector<8x256xf32>
    %c0_5 = arith.constant 0 : index
    %c0_6 = arith.constant 0 : index
    %12 = vector.load %arg4[%c0_5, %c0_6] : memref<3x256xf32, #tpu.memory_space<vmem>>, vector<1x256xf32>
    %13 = vector.broadcast %12 : vector<1x256xf32> to vector<8x256xf32>
    %14 = arith.mulf %11, %13 : vector<8x256xf32>
    %15 = vector.extract_strided_slice %1 {offsets = [0, 17], sizes = [8, 256], strides = [1, 1]} : vector<8x290xf32> to vector<8x256xf32>
    %16 = vector.extract_strided_slice %1 {offsets = [0, 18], sizes = [8, 256], strides = [1, 1]} : vector<8x290xf32> to vector<8x256xf32>
    %c2_7 = arith.constant 2 : index
    %c0_8 = arith.constant 0 : index
    %17 = vector.load %arg4[%c2_7, %c0_8] : memref<3x256xf32, #tpu.memory_space<vmem>>, vector<1x256xf32>
    %18 = vector.broadcast %17 : vector<1x256xf32> to vector<8x256xf32>
    %19 = arith.mulf %16, %18 : vector<8x256xf32>
    %20 = vector.extract_strided_slice %1 {offsets = [0, 32], sizes = [8, 256], strides = [1, 1]} : vector<8x290xf32> to vector<8x256xf32>
    %c0_9 = arith.constant 0 : index
    %c0_10 = arith.constant 0 : index
    %21 = vector.load %arg4[%c0_9, %c0_10] : memref<3x256xf32, #tpu.memory_space<vmem>>, vector<1x256xf32>
    %22 = vector.broadcast %21 : vector<1x256xf32> to vector<8x256xf32>
    %23 = arith.mulf %20, %22 : vector<8x256xf32>
    %24 = vector.extract_strided_slice %1 {offsets = [0, 33], sizes = [8, 256], strides = [1, 1]} : vector<8x290xf32> to vector<8x256xf32>
    %25 = vector.extract_strided_slice %1 {offsets = [0, 34], sizes = [8, 256], strides = [1, 1]} : vector<8x290xf32> to vector<8x256xf32>
    %c2_11 = arith.constant 2 : index
    %c0_12 = arith.constant 0 : index
    %26 = vector.load %arg4[%c2_11, %c0_12] : memref<3x256xf32, #tpu.memory_space<vmem>>, vector<1x256xf32>
    %27 = vector.broadcast %26 : vector<1x256xf32> to vector<8x256xf32>
    %28 = arith.mulf %25, %27 : vector<8x256xf32>
    %29 = tpu.concatenate %5, %6, %10, %14, %15, %19, %23, %24, %28 in 0 : vector<8x256xf32>, vector<8x256xf32>, vector<8x256xf32>, vector<8x256xf32>, vector<8x256xf32>, vector<8x256xf32>, vector<8x256xf32>, vector<8x256xf32>, vector<8x256xf32> -> vector<72x256xf32>
    %c0_13 = arith.constant 0 : index
    %c0_14 = arith.constant 0 : index
    %30 = vector.load %arg2[%c0_13, %c0_14] : memref<8x72xbf16, #tpu.memory_space<vmem>>, vector<8x72xbf16>
    %31 = arith.truncf %29 : vector<72x256xf32> to vector<72x256xbf16>
    %cst = arith.constant dense<0.000000e+00> : vector<8x256xf32>
    %32 = tpu.matmul %30, %31, %cst {dimension_numbers = #tpu.dot_dimension_numbers<[1], [0], [0], [1], [0, 0, 1, 1], [], []>} : vector<8x72xbf16>, vector<72x256xbf16>, vector<8x256xf32> -> vector<8x256xf32>
    %c0_15 = arith.constant 0 : index
    %c0_16 = arith.constant 0 : index
    %33 = vector.load %arg3[%c0_15, %c0_16] : memref<8x1xf32, #tpu.memory_space<vmem>>, vector<8x1xf32>
    %34 = vector.broadcast %33 : vector<8x1xf32> to vector<8x256xf32>
    %35 = arith.addf %32, %34 : vector<8x256xf32>
    %36 = arith.mulf %35, %35 : vector<8x256xf32>
    %cst_17 = arith.constant dense<0.000000e+00> : vector<256xf32>
    %37 = vector.multi_reduction <add>, %36, %cst_17 [0] : vector<8x256xf32> to vector<256xf32>
    %38 = vector.shape_cast %37 : vector<256xf32> to vector<1x256xf32>
    %cst_18 = arith.constant 1.000000e-24 : f32
    %39 = vector.broadcast %cst_18 : f32 to vector<1x256xf32>
    %40 = arith.maximumf %38, %39 : vector<1x256xf32>
    %41 = math.rsqrt %40 : vector<1x256xf32>
    %42 = vector.broadcast %41 : vector<1x256xf32> to vector<8x256xf32>
    %43 = arith.mulf %35, %42 : vector<8x256xf32>
    %c0_19 = arith.constant 0 : index
    %c0_20 = arith.constant 0 : index
    %44 = vector.load %arg5[%c0_19, %c0_20] : memref<8x1xf32, #tpu.memory_space<vmem>>, vector<8x1xf32>
    %cst_21 = arith.constant 2.82842708 : f32
    %45 = vector.broadcast %cst_21 : f32 to vector<8x1xf32>
    %46 = arith.mulf %44, %45 : vector<8x1xf32>
    %47 = vector.broadcast %46 : vector<8x1xf32> to vector<8x256xf32>
    %48 = arith.mulf %43, %47 : vector<8x256xf32>
    %49 = arith.negf %48 : vector<8x256xf32>
    %50 = math.exp %49 : vector<8x256xf32>
    %cst_22 = arith.constant 1.000000e+00 : f32
    %51 = vector.broadcast %cst_22 : f32 to vector<8x256xf32>
    %52 = arith.addf %51, %50 : vector<8x256xf32>
    %53 = arith.divf %51, %52 : vector<8x256xf32>
    %54 = arith.mulf %48, %53 : vector<8x256xf32>
    %c0_23 = arith.constant 0 : index
    %c0_24 = arith.constant 0 : index
    %c0_25 = arith.constant 0 : index
    %55 = vector.load %arg6[%c0_23, %c0_24, %c0_25] : memref<1x8x256xf32, #tpu.memory_space<vmem>>, vector<1x8x256xf32>
    %56 = vector.shape_cast %55 : vector<1x8x256xf32> to vector<8x256xf32>
    %57 = vector.shape_cast %54 : vector<8x256xf32> to vector<1x8x256xf32>
    tpu.vector_store %arg6[%c0_23, %c0_24, %c0_25], %57 {strides = array<i32>} : memref<1x8x256xf32, #tpu.memory_space<vmem>>, vector<1x8x256xf32>,
    return
  }
  func.func @transform_0(%arg0: i32) -> (i32, i32, i32) {
    %c0_i32 = arith.constant 0 : i32
    %c0_i32_0 = arith.constant 0 : i32
    %c0_i32_1 = arith.constant 0 : i32
    return %arg0, %c0_i32, %c0_i32_0 : i32, i32, i32
  }
  func.func @transform_1(%arg0: i32) -> (i32, i32) {
    %c0_i32 = arith.constant 0 : i32
    %c0_i32_0 = arith.constant 0 : i32
    %c0_i32_1 = arith.constant 0 : i32
    return %c0_i32, %c0_i32_0 : i32, i32
  }
  func.func @transform_2(%arg0: i32) -> (i32, i32) {
    %c0_i32 = arith.constant 0 : i32
    %c0_i32_0 = arith.constant 0 : i32
    %c0_i32_1 = arith.constant 0 : i32
    return %c0_i32, %c0_i32_0 : i32, i32
  }
  func.func @transform_3(%arg0: i32) -> (i32, i32) {
    %c0_i32 = arith.constant 0 : i32
    %c0_i32_0 = arith.constant 0 : i32
    %c0_i32_1 = arith.constant 0 : i32
    return %c0_i32, %c0_i32_0 : i32, i32
  }
  func.func @transform_4(%arg0: i32) -> (i32, i32) {
    %c0_i32 = arith.constant 0 : i32
    %c0_i32_0 = arith.constant 0 : i32
    %c0_i32_1 = arith.constant 0 : i32
    return %c0_i32, %c0_i32_0 : i32, i32
  }
  func.func @transform_5(%arg0: i32) -> (i32, i32, i32) {
    %c0_i32 = arith.constant 0 : i32
    %c0_i32_0 = arith.constant 0 : i32
    %c0_i32_1 = arith.constant 0 : i32
    return %arg0, %c0_i32, %c0_i32_0 : i32, i32, i32
  }
}

module attributes {stable_mosaic.version = 11 : i64} {
  func.func @kernel(%arg0: i32, %arg1: memref<1x8x358xf32, #tpu.memory_space<vmem>>, %arg2: memref<8x392xbf16, #tpu.memory_space<vmem>>, %arg3: memref<8x1xf32, #tpu.memory_space<vmem>>, %arg4: memref<7x256xf32, #tpu.memory_space<vmem>>, %arg5: memref<1x8x256xf32, #tpu.memory_space<vmem>>) attributes {dimension_semantics = [#tpu.dimension_semantics<parallel>], iteration_bounds = array<i64: 2>, scalar_prefetch = 0 : i64, scratch_operands = 0 : i64, tpu.core_type = #tpu.core_type<tc>, window_params = [{transform_indices = @transform_0, window_bounds = array<i64: 1, 8, 358>}, {pipeline_mode = #tpu.pipeline_mode<synchronous>, transform_indices = @transform_1, window_bounds = array<i64: 8, 392>}, {pipeline_mode = #tpu.pipeline_mode<synchronous>, transform_indices = @transform_2, window_bounds = array<i64: 8, 1>}, {pipeline_mode = #tpu.pipeline_mode<synchronous>, transform_indices = @transform_3, window_bounds = array<i64: 7, 256>}, {transform_indices = @transform_4, window_bounds = array<i64: 1, 8, 256>}]} {
    %c0 = arith.constant 0 : index
    %c0_0 = arith.constant 0 : index
    %c0_1 = arith.constant 0 : index
    %0 = vector.load %arg1[%c0, %c0_0, %c0_1] : memref<1x8x358xf32, #tpu.memory_space<vmem>>, vector<1x8x358xf32>
    %1 = vector.shape_cast %0 : vector<1x8x358xf32> to vector<8x358xf32>
    %2 = vector.extract_strided_slice %1 {offsets = [0, 0], sizes = [8, 256], strides = [1, 1]} : vector<8x358xf32> to vector<8x256xf32>
    %c0_2 = arith.constant 0 : index
    %c0_3 = arith.constant 0 : index
    %3 = vector.load %arg4[%c0_2, %c0_3] : memref<7x256xf32, #tpu.memory_space<vmem>>, vector<1x256xf32>
    %4 = vector.broadcast %3 : vector<1x256xf32> to vector<8x256xf32>
    %5 = arith.mulf %2, %4 : vector<8x256xf32>
    %6 = vector.extract_strided_slice %1 {offsets = [0, 1], sizes = [8, 256], strides = [1, 1]} : vector<8x358xf32> to vector<8x256xf32>
    %c1 = arith.constant 1 : index
    %c0_4 = arith.constant 0 : index
    %7 = vector.load %arg4[%c1, %c0_4] : memref<7x256xf32, #tpu.memory_space<vmem>>, vector<1x256xf32>
    %8 = vector.broadcast %7 : vector<1x256xf32> to vector<8x256xf32>
    %9 = arith.mulf %6, %8 : vector<8x256xf32>
    %10 = vector.extract_strided_slice %1 {offsets = [0, 2], sizes = [8, 256], strides = [1, 1]} : vector<8x358xf32> to vector<8x256xf32>
    %c2 = arith.constant 2 : index
    %c0_5 = arith.constant 0 : index
    %11 = vector.load %arg4[%c2, %c0_5] : memref<7x256xf32, #tpu.memory_space<vmem>>, vector<1x256xf32>
    %12 = vector.broadcast %11 : vector<1x256xf32> to vector<8x256xf32>
    %13 = arith.mulf %10, %12 : vector<8x256xf32>
    %14 = vector.extract_strided_slice %1 {offsets = [0, 3], sizes = [8, 256], strides = [1, 1]} : vector<8x358xf32> to vector<8x256xf32>
    %15 = vector.extract_strided_slice %1 {offsets = [0, 4], sizes = [8, 256], strides = [1, 1]} : vector<8x358xf32> to vector<8x256xf32>
    %c4 = arith.constant 4 : index
    %c0_6 = arith.constant 0 : index
    %16 = vector.load %arg4[%c4, %c0_6] : memref<7x256xf32, #tpu.memory_space<vmem>>, vector<1x256xf32>
    %17 = vector.broadcast %16 : vector<1x256xf32> to vector<8x256xf32>
    %18 = arith.mulf %15, %17 : vector<8x256xf32>
    %19 = vector.extract_strided_slice %1 {offsets = [0, 5], sizes = [8, 256], strides = [1, 1]} : vector<8x358xf32> to vector<8x256xf32>
    %c5 = arith.constant 5 : index
    %c0_7 = arith.constant 0 : index
    %20 = vector.load %arg4[%c5, %c0_7] : memref<7x256xf32, #tpu.memory_space<vmem>>, vector<1x256xf32>
    %21 = vector.broadcast %20 : vector<1x256xf32> to vector<8x256xf32>
    %22 = arith.mulf %19, %21 : vector<8x256xf32>
    %23 = vector.extract_strided_slice %1 {offsets = [0, 6], sizes = [8, 256], strides = [1, 1]} : vector<8x358xf32> to vector<8x256xf32>
    %c6 = arith.constant 6 : index
    %c0_8 = arith.constant 0 : index
    %24 = vector.load %arg4[%c6, %c0_8] : memref<7x256xf32, #tpu.memory_space<vmem>>, vector<1x256xf32>
    %25 = vector.broadcast %24 : vector<1x256xf32> to vector<8x256xf32>
    %26 = arith.mulf %23, %25 : vector<8x256xf32>
    %27 = vector.extract_strided_slice %1 {offsets = [0, 16], sizes = [8, 256], strides = [1, 1]} : vector<8x358xf32> to vector<8x256xf32>
    %c0_9 = arith.constant 0 : index
    %c0_10 = arith.constant 0 : index
    %28 = vector.load %arg4[%c0_9, %c0_10] : memref<7x256xf32, #tpu.memory_space<vmem>>, vector<1x256xf32>
    %29 = vector.broadcast %28 : vector<1x256xf32> to vector<8x256xf32>
    %30 = arith.mulf %27, %29 : vector<8x256xf32>
    %31 = vector.extract_strided_slice %1 {offsets = [0, 17], sizes = [8, 256], strides = [1, 1]} : vector<8x358xf32> to vector<8x256xf32>
    %c1_11 = arith.constant 1 : index
    %c0_12 = arith.constant 0 : index
    %32 = vector.load %arg4[%c1_11, %c0_12] : memref<7x256xf32, #tpu.memory_space<vmem>>, vector<1x256xf32>
    %33 = vector.broadcast %32 : vector<1x256xf32> to vector<8x256xf32>
    %34 = arith.mulf %31, %33 : vector<8x256xf32>
    %35 = vector.extract_strided_slice %1 {offsets = [0, 18], sizes = [8, 256], strides = [1, 1]} : vector<8x358xf32> to vector<8x256xf32>
    %c2_13 = arith.constant 2 : index
    %c0_14 = arith.constant 0 : index
    %36 = vector.load %arg4[%c2_13, %c0_14] : memref<7x256xf32, #tpu.memory_space<vmem>>, vector<1x256xf32>
    %37 = vector.broadcast %36 : vector<1x256xf32> to vector<8x256xf32>
    %38 = arith.mulf %35, %37 : vector<8x256xf32>
    %39 = vector.extract_strided_slice %1 {offsets = [0, 19], sizes = [8, 256], strides = [1, 1]} : vector<8x358xf32> to vector<8x256xf32>
    %40 = vector.extract_strided_slice %1 {offsets = [0, 20], sizes = [8, 256], strides = [1, 1]} : vector<8x358xf32> to vector<8x256xf32>
    %c4_15 = arith.constant 4 : index
    %c0_16 = arith.constant 0 : index
    %41 = vector.load %arg4[%c4_15, %c0_16] : memref<7x256xf32, #tpu.memory_space<vmem>>, vector<1x256xf32>
    %42 = vector.broadcast %41 : vector<1x256xf32> to vector<8x256xf32>
    %43 = arith.mulf %40, %42 : vector<8x256xf32>
    %44 = vector.extract_strided_slice %1 {offsets = [0, 21], sizes = [8, 256], strides = [1, 1]} : vector<8x358xf32> to vector<8x256xf32>
    %c5_17 = arith.constant 5 : index
    %c0_18 = arith.constant 0 : index
    %45 = vector.load %arg4[%c5_17, %c0_18] : memref<7x256xf32, #tpu.memory_space<vmem>>, vector<1x256xf32>
    %46 = vector.broadcast %45 : vector<1x256xf32> to vector<8x256xf32>
    %47 = arith.mulf %44, %46 : vector<8x256xf32>
    %48 = vector.extract_strided_slice %1 {offsets = [0, 22], sizes = [8, 256], strides = [1, 1]} : vector<8x358xf32> to vector<8x256xf32>
    %c6_19 = arith.constant 6 : index
    %c0_20 = arith.constant 0 : index
    %49 = vector.load %arg4[%c6_19, %c0_20] : memref<7x256xf32, #tpu.memory_space<vmem>>, vector<1x256xf32>
    %50 = vector.broadcast %49 : vector<1x256xf32> to vector<8x256xf32>
    %51 = arith.mulf %48, %50 : vector<8x256xf32>
    %52 = vector.extract_strided_slice %1 {offsets = [0, 32], sizes = [8, 256], strides = [1, 1]} : vector<8x358xf32> to vector<8x256xf32>
    %c0_21 = arith.constant 0 : index
    %c0_22 = arith.constant 0 : index
    %53 = vector.load %arg4[%c0_21, %c0_22] : memref<7x256xf32, #tpu.memory_space<vmem>>, vector<1x256xf32>
    %54 = vector.broadcast %53 : vector<1x256xf32> to vector<8x256xf32>
    %55 = arith.mulf %52, %54 : vector<8x256xf32>
    %56 = vector.extract_strided_slice %1 {offsets = [0, 33], sizes = [8, 256], strides = [1, 1]} : vector<8x358xf32> to vector<8x256xf32>
    %c1_23 = arith.constant 1 : index
    %c0_24 = arith.constant 0 : index
    %57 = vector.load %arg4[%c1_23, %c0_24] : memref<7x256xf32, #tpu.memory_space<vmem>>, vector<1x256xf32>
    %58 = vector.broadcast %57 : vector<1x256xf32> to vector<8x256xf32>
    %59 = arith.mulf %56, %58 : vector<8x256xf32>
    %60 = vector.extract_strided_slice %1 {offsets = [0, 34], sizes = [8, 256], strides = [1, 1]} : vector<8x358xf32> to vector<8x256xf32>
    %c2_25 = arith.constant 2 : index
    %c0_26 = arith.constant 0 : index
    %61 = vector.load %arg4[%c2_25, %c0_26] : memref<7x256xf32, #tpu.memory_space<vmem>>, vector<1x256xf32>
    %62 = vector.broadcast %61 : vector<1x256xf32> to vector<8x256xf32>
    %63 = arith.mulf %60, %62 : vector<8x256xf32>
    %64 = vector.extract_strided_slice %1 {offsets = [0, 35], sizes = [8, 256], strides = [1, 1]} : vector<8x358xf32> to vector<8x256xf32>
    %65 = vector.extract_strided_slice %1 {offsets = [0, 36], sizes = [8, 256], strides = [1, 1]} : vector<8x358xf32> to vector<8x256xf32>
    %c4_27 = arith.constant 4 : index
    %c0_28 = arith.constant 0 : index
    %66 = vector.load %arg4[%c4_27, %c0_28] : memref<7x256xf32, #tpu.memory_space<vmem>>, vector<1x256xf32>
    %67 = vector.broadcast %66 : vector<1x256xf32> to vector<8x256xf32>
    %68 = arith.mulf %65, %67 : vector<8x256xf32>
    %69 = vector.extract_strided_slice %1 {offsets = [0, 37], sizes = [8, 256], strides = [1, 1]} : vector<8x358xf32> to vector<8x256xf32>
    %c5_29 = arith.constant 5 : index
    %c0_30 = arith.constant 0 : index
    %70 = vector.load %arg4[%c5_29, %c0_30] : memref<7x256xf32, #tpu.memory_space<vmem>>, vector<1x256xf32>
    %71 = vector.broadcast %70 : vector<1x256xf32> to vector<8x256xf32>
    %72 = arith.mulf %69, %71 : vector<8x256xf32>
    %73 = vector.extract_strided_slice %1 {offsets = [0, 38], sizes = [8, 256], strides = [1, 1]} : vector<8x358xf32> to vector<8x256xf32>
    %c6_31 = arith.constant 6 : index
    %c0_32 = arith.constant 0 : index
    %74 = vector.load %arg4[%c6_31, %c0_32] : memref<7x256xf32, #tpu.memory_space<vmem>>, vector<1x256xf32>
    %75 = vector.broadcast %74 : vector<1x256xf32> to vector<8x256xf32>
    %76 = arith.mulf %73, %75 : vector<8x256xf32>
    %77 = vector.extract_strided_slice %1 {offsets = [0, 48], sizes = [8, 256], strides = [1, 1]} : vector<8x358xf32> to vector<8x256xf32>
    %c0_33 = arith.constant 0 : index
    %c0_34 = arith.constant 0 : index
    %78 = vector.load %arg4[%c0_33, %c0_34] : memref<7x256xf32, #tpu.memory_space<vmem>>, vector<1x256xf32>
    %79 = vector.broadcast %78 : vector<1x256xf32> to vector<8x256xf32>
    %80 = arith.mulf %77, %79 : vector<8x256xf32>
    %81 = vector.extract_strided_slice %1 {offsets = [0, 49], sizes = [8, 256], strides = [1, 1]} : vector<8x358xf32> to vector<8x256xf32>
    %c1_35 = arith.constant 1 : index
    %c0_36 = arith.constant 0 : index
    %82 = vector.load %arg4[%c1_35, %c0_36] : memref<7x256xf32, #tpu.memory_space<vmem>>, vector<1x256xf32>
    %83 = vector.broadcast %82 : vector<1x256xf32> to vector<8x256xf32>
    %84 = arith.mulf %81, %83 : vector<8x256xf32>
    %85 = vector.extract_strided_slice %1 {offsets = [0, 50], sizes = [8, 256], strides = [1, 1]} : vector<8x358xf32> to vector<8x256xf32>
    %c2_37 = arith.constant 2 : index
    %c0_38 = arith.constant 0 : index
    %86 = vector.load %arg4[%c2_37, %c0_38] : memref<7x256xf32, #tpu.memory_space<vmem>>, vector<1x256xf32>
    %87 = vector.broadcast %86 : vector<1x256xf32> to vector<8x256xf32>
    %88 = arith.mulf %85, %87 : vector<8x256xf32>
    %89 = vector.extract_strided_slice %1 {offsets = [0, 51], sizes = [8, 256], strides = [1, 1]} : vector<8x358xf32> to vector<8x256xf32>
    %90 = vector.extract_strided_slice %1 {offsets = [0, 52], sizes = [8, 256], strides = [1, 1]} : vector<8x358xf32> to vector<8x256xf32>
    %c4_39 = arith.constant 4 : index
    %c0_40 = arith.constant 0 : index
    %91 = vector.load %arg4[%c4_39, %c0_40] : memref<7x256xf32, #tpu.memory_space<vmem>>, vector<1x256xf32>
    %92 = vector.broadcast %91 : vector<1x256xf32> to vector<8x256xf32>
    %93 = arith.mulf %90, %92 : vector<8x256xf32>
    %94 = vector.extract_strided_slice %1 {offsets = [0, 53], sizes = [8, 256], strides = [1, 1]} : vector<8x358xf32> to vector<8x256xf32>
    %c5_41 = arith.constant 5 : index
    %c0_42 = arith.constant 0 : index
    %95 = vector.load %arg4[%c5_41, %c0_42] : memref<7x256xf32, #tpu.memory_space<vmem>>, vector<1x256xf32>
    %96 = vector.broadcast %95 : vector<1x256xf32> to vector<8x256xf32>
    %97 = arith.mulf %94, %96 : vector<8x256xf32>
    %98 = vector.extract_strided_slice %1 {offsets = [0, 54], sizes = [8, 256], strides = [1, 1]} : vector<8x358xf32> to vector<8x256xf32>
    %c6_43 = arith.constant 6 : index
    %c0_44 = arith.constant 0 : index
    %99 = vector.load %arg4[%c6_43, %c0_44] : memref<7x256xf32, #tpu.memory_space<vmem>>, vector<1x256xf32>
    %100 = vector.broadcast %99 : vector<1x256xf32> to vector<8x256xf32>
    %101 = arith.mulf %98, %100 : vector<8x256xf32>
    %102 = vector.extract_strided_slice %1 {offsets = [0, 64], sizes = [8, 256], strides = [1, 1]} : vector<8x358xf32> to vector<8x256xf32>
    %c0_45 = arith.constant 0 : index
    %c0_46 = arith.constant 0 : index
    %103 = vector.load %arg4[%c0_45, %c0_46] : memref<7x256xf32, #tpu.memory_space<vmem>>, vector<1x256xf32>
    %104 = vector.broadcast %103 : vector<1x256xf32> to vector<8x256xf32>
    %105 = arith.mulf %102, %104 : vector<8x256xf32>
    %106 = vector.extract_strided_slice %1 {offsets = [0, 65], sizes = [8, 256], strides = [1, 1]} : vector<8x358xf32> to vector<8x256xf32>
    %c1_47 = arith.constant 1 : index
    %c0_48 = arith.constant 0 : index
    %107 = vector.load %arg4[%c1_47, %c0_48] : memref<7x256xf32, #tpu.memory_space<vmem>>, vector<1x256xf32>
    %108 = vector.broadcast %107 : vector<1x256xf32> to vector<8x256xf32>
    %109 = arith.mulf %106, %108 : vector<8x256xf32>
    %110 = vector.extract_strided_slice %1 {offsets = [0, 66], sizes = [8, 256], strides = [1, 1]} : vector<8x358xf32> to vector<8x256xf32>
    %c2_49 = arith.constant 2 : index
    %c0_50 = arith.constant 0 : index
    %111 = vector.load %arg4[%c2_49, %c0_50] : memref<7x256xf32, #tpu.memory_space<vmem>>, vector<1x256xf32>
    %112 = vector.broadcast %111 : vector<1x256xf32> to vector<8x256xf32>
    %113 = arith.mulf %110, %112 : vector<8x256xf32>
    %114 = vector.extract_strided_slice %1 {offsets = [0, 67], sizes = [8, 256], strides = [1, 1]} : vector<8x358xf32> to vector<8x256xf32>
    %115 = vector.extract_strided_slice %1 {offsets = [0, 68], sizes = [8, 256], strides = [1, 1]} : vector<8x358xf32> to vector<8x256xf32>
    %c4_51 = arith.constant 4 : index
    %c0_52 = arith.constant 0 : index
    %116 = vector.load %arg4[%c4_51, %c0_52] : memref<7x256xf32, #tpu.memory_space<vmem>>, vector<1x256xf32>
    %117 = vector.broadcast %116 : vector<1x256xf32> to vector<8x256xf32>
    %118 = arith.mulf %115, %117 : vector<8x256xf32>
    %119 = vector.extract_strided_slice %1 {offsets = [0, 69], sizes = [8, 256], strides = [1, 1]} : vector<8x358xf32> to vector<8x256xf32>
    %c5_53 = arith.constant 5 : index
    %c0_54 = arith.constant 0 : index
    %120 = vector.load %arg4[%c5_53, %c0_54] : memref<7x256xf32, #tpu.memory_space<vmem>>, vector<1x256xf32>
    %121 = vector.broadcast %120 : vector<1x256xf32> to vector<8x256xf32>
    %122 = arith.mulf %119, %121 : vector<8x256xf32>
    %123 = vector.extract_strided_slice %1 {offsets = [0, 70], sizes = [8, 256], strides = [1, 1]} : vector<8x358xf32> to vector<8x256xf32>
    %c6_55 = arith.constant 6 : index
    %c0_56 = arith.constant 0 : index
    %124 = vector.load %arg4[%c6_55, %c0_56] : memref<7x256xf32, #tpu.memory_space<vmem>>, vector<1x256xf32>
    %125 = vector.broadcast %124 : vector<1x256xf32> to vector<8x256xf32>
    %126 = arith.mulf %123, %125 : vector<8x256xf32>
    %127 = vector.extract_strided_slice %1 {offsets = [0, 80], sizes = [8, 256], strides = [1, 1]} : vector<8x358xf32> to vector<8x256xf32>
    %c0_57 = arith.constant 0 : index
    %c0_58 = arith.constant 0 : index
    %128 = vector.load %arg4[%c0_57, %c0_58] : memref<7x256xf32, #tpu.memory_space<vmem>>, vector<1x256xf32>
    %129 = vector.broadcast %128 : vector<1x256xf32> to vector<8x256xf32>
    %130 = arith.mulf %127, %129 : vector<8x256xf32>
    %131 = vector.extract_strided_slice %1 {offsets = [0, 81], sizes = [8, 256], strides = [1, 1]} : vector<8x358xf32> to vector<8x256xf32>
    %c1_59 = arith.constant 1 : index
    %c0_60 = arith.constant 0 : index
    %132 = vector.load %arg4[%c1_59, %c0_60] : memref<7x256xf32, #tpu.memory_space<vmem>>, vector<1x256xf32>
    %133 = vector.broadcast %132 : vector<1x256xf32> to vector<8x256xf32>
    %134 = arith.mulf %131, %133 : vector<8x256xf32>
    %135 = vector.extract_strided_slice %1 {offsets = [0, 82], sizes = [8, 256], strides = [1, 1]} : vector<8x358xf32> to vector<8x256xf32>
    %c2_61 = arith.constant 2 : index
    %c0_62 = arith.constant 0 : index
    %136 = vector.load %arg4[%c2_61, %c0_62] : memref<7x256xf32, #tpu.memory_space<vmem>>, vector<1x256xf32>
    %137 = vector.broadcast %136 : vector<1x256xf32> to vector<8x256xf32>
    %138 = arith.mulf %135, %137 : vector<8x256xf32>
    %139 = vector.extract_strided_slice %1 {offsets = [0, 83], sizes = [8, 256], strides = [1, 1]} : vector<8x358xf32> to vector<8x256xf32>
    %140 = vector.extract_strided_slice %1 {offsets = [0, 84], sizes = [8, 256], strides = [1, 1]} : vector<8x358xf32> to vector<8x256xf32>
    %c4_63 = arith.constant 4 : index
    %c0_64 = arith.constant 0 : index
    %141 = vector.load %arg4[%c4_63, %c0_64] : memref<7x256xf32, #tpu.memory_space<vmem>>, vector<1x256xf32>
    %142 = vector.broadcast %141 : vector<1x256xf32> to vector<8x256xf32>
    %143 = arith.mulf %140, %142 : vector<8x256xf32>
    %144 = vector.extract_strided_slice %1 {offsets = [0, 85], sizes = [8, 256], strides = [1, 1]} : vector<8x358xf32> to vector<8x256xf32>
    %c5_65 = arith.constant 5 : index
    %c0_66 = arith.constant 0 : index
    %145 = vector.load %arg4[%c5_65, %c0_66] : memref<7x256xf32, #tpu.memory_space<vmem>>, vector<1x256xf32>
    %146 = vector.broadcast %145 : vector<1x256xf32> to vector<8x256xf32>
    %147 = arith.mulf %144, %146 : vector<8x256xf32>
    %148 = vector.extract_strided_slice %1 {offsets = [0, 86], sizes = [8, 256], strides = [1, 1]} : vector<8x358xf32> to vector<8x256xf32>
    %c6_67 = arith.constant 6 : index
    %c0_68 = arith.constant 0 : index
    %149 = vector.load %arg4[%c6_67, %c0_68] : memref<7x256xf32, #tpu.memory_space<vmem>>, vector<1x256xf32>
    %150 = vector.broadcast %149 : vector<1x256xf32> to vector<8x256xf32>
    %151 = arith.mulf %148, %150 : vector<8x256xf32>
    %152 = vector.extract_strided_slice %1 {offsets = [0, 96], sizes = [8, 256], strides = [1, 1]} : vector<8x358xf32> to vector<8x256xf32>
    %c0_69 = arith.constant 0 : index
    %c0_70 = arith.constant 0 : index
    %153 = vector.load %arg4[%c0_69, %c0_70] : memref<7x256xf32, #tpu.memory_space<vmem>>, vector<1x256xf32>
    %154 = vector.broadcast %153 : vector<1x256xf32> to vector<8x256xf32>
    %155 = arith.mulf %152, %154 : vector<8x256xf32>
    %156 = vector.extract_strided_slice %1 {offsets = [0, 97], sizes = [8, 256], strides = [1, 1]} : vector<8x358xf32> to vector<8x256xf32>
    %c1_71 = arith.constant 1 : index
    %c0_72 = arith.constant 0 : index
    %157 = vector.load %arg4[%c1_71, %c0_72] : memref<7x256xf32, #tpu.memory_space<vmem>>, vector<1x256xf32>
    %158 = vector.broadcast %157 : vector<1x256xf32> to vector<8x256xf32>
    %159 = arith.mulf %156, %158 : vector<8x256xf32>
    %160 = vector.extract_strided_slice %1 {offsets = [0, 98], sizes = [8, 256], strides = [1, 1]} : vector<8x358xf32> to vector<8x256xf32>
    %c2_73 = arith.constant 2 : index
    %c0_74 = arith.constant 0 : index
    %161 = vector.load %arg4[%c2_73, %c0_74] : memref<7x256xf32, #tpu.memory_space<vmem>>, vector<1x256xf32>
    %162 = vector.broadcast %161 : vector<1x256xf32> to vector<8x256xf32>
    %163 = arith.mulf %160, %162 : vector<8x256xf32>
    %164 = vector.extract_strided_slice %1 {offsets = [0, 99], sizes = [8, 256], strides = [1, 1]} : vector<8x358xf32> to vector<8x256xf32>
    %165 = vector.extract_strided_slice %1 {offsets = [0, 100], sizes = [8, 256], strides = [1, 1]} : vector<8x358xf32> to vector<8x256xf32>
    %c4_75 = arith.constant 4 : index
    %c0_76 = arith.constant 0 : index
    %166 = vector.load %arg4[%c4_75, %c0_76] : memref<7x256xf32, #tpu.memory_space<vmem>>, vector<1x256xf32>
    %167 = vector.broadcast %166 : vector<1x256xf32> to vector<8x256xf32>
    %168 = arith.mulf %165, %167 : vector<8x256xf32>
    %169 = vector.extract_strided_slice %1 {offsets = [0, 101], sizes = [8, 256], strides = [1, 1]} : vector<8x358xf32> to vector<8x256xf32>
    %c5_77 = arith.constant 5 : index
    %c0_78 = arith.constant 0 : index
    %170 = vector.load %arg4[%c5_77, %c0_78] : memref<7x256xf32, #tpu.memory_space<vmem>>, vector<1x256xf32>
    %171 = vector.broadcast %170 : vector<1x256xf32> to vector<8x256xf32>
    %172 = arith.mulf %169, %171 : vector<8x256xf32>
    %173 = vector.extract_strided_slice %1 {offsets = [0, 102], sizes = [8, 256], strides = [1, 1]} : vector<8x358xf32> to vector<8x256xf32>
    %c6_79 = arith.constant 6 : index
    %c0_80 = arith.constant 0 : index
    %174 = vector.load %arg4[%c6_79, %c0_80] : memref<7x256xf32, #tpu.memory_space<vmem>>, vector<1x256xf32>
    %175 = vector.broadcast %174 : vector<1x256xf32> to vector<8x256xf32>
    %176 = arith.mulf %173, %175 : vector<8x256xf32>
    %177 = tpu.concatenate %5, %9, %13, %14, %18, %22, %26, %30, %34, %38, %39, %43, %47, %51, %55, %59 in 0 : vector<8x256xf32>, vector<8x256xf32>, vector<8x256xf32>, vector<8x256xf32>, vector<8x256xf32>, vector<8x256xf32>, vector<8x256xf32>, vector<8x256xf32>, vector<8x256xf32>, vector<8x256xf32>, vector<8x256xf32>, vector<8x256xf32>, vector<8x256xf32>, vector<8x256xf32>, vector<8x256xf32>, vector<8x256xf32> -> vector<128x256xf32>
    %178 = tpu.concatenate %63, %64, %68, %72, %76, %80, %84, %88, %89, %93, %97, %101, %105, %109, %113, %114 in 0 : vector<8x256xf32>, vector<8x256xf32>, vector<8x256xf32>, vector<8x256xf32>, vector<8x256xf32>, vector<8x256xf32>, vector<8x256xf32>, vector<8x256xf32>, vector<8x256xf32>, vector<8x256xf32>, vector<8x256xf32>, vector<8x256xf32>, vector<8x256xf32>, vector<8x256xf32>, vector<8x256xf32>, vector<8x256xf32> -> vector<128x256xf32>
    %179 = tpu.concatenate %118, %122, %126, %130, %134, %138, %139, %143, %147, %151, %155, %159, %163, %164, %168, %172 in 0 : vector<8x256xf32>, vector<8x256xf32>, vector<8x256xf32>, vector<8x256xf32>, vector<8x256xf32>, vector<8x256xf32>, vector<8x256xf32>, vector<8x256xf32>, vector<8x256xf32>, vector<8x256xf32>, vector<8x256xf32>, vector<8x256xf32>, vector<8x256xf32>, vector<8x256xf32>, vector<8x256xf32>, vector<8x256xf32> -> vector<128x256xf32>
    %180 = tpu.concatenate %177, %178, %179, %176 in 0 : vector<128x256xf32>, vector<128x256xf32>, vector<128x256xf32>, vector<8x256xf32> -> vector<392x256xf32>
    %c0_81 = arith.constant 0 : index
    %c0_82 = arith.constant 0 : index
    %181 = vector.load %arg2[%c0_81, %c0_82] : memref<8x392xbf16, #tpu.memory_space<vmem>>, vector<8x392xbf16>
    %182 = arith.truncf %180 : vector<392x256xf32> to vector<392x256xbf16>
    %cst = arith.constant dense<0.000000e+00> : vector<8x256xf32>
    %183 = tpu.matmul %181, %182, %cst {dimension_numbers = #tpu.dot_dimension_numbers<[1], [0], [0], [1], [0, 0, 1, 1], [], []>} : vector<8x392xbf16>, vector<392x256xbf16>, vector<8x256xf32> -> vector<8x256xf32>
    %c0_83 = arith.constant 0 : index
    %c0_84 = arith.constant 0 : index
    %184 = vector.load %arg3[%c0_83, %c0_84] : memref<8x1xf32, #tpu.memory_space<vmem>>, vector<8x1xf32>
    %185 = vector.broadcast %184 : vector<8x1xf32> to vector<8x256xf32>
    %186 = arith.addf %183, %185 : vector<8x256xf32>
    %c0_85 = arith.constant 0 : index
    %c0_86 = arith.constant 0 : index
    %c0_87 = arith.constant 0 : index
    %187 = vector.load %arg5[%c0_85, %c0_86, %c0_87] : memref<1x8x256xf32, #tpu.memory_space<vmem>>, vector<1x8x256xf32>
    %188 = vector.shape_cast %187 : vector<1x8x256xf32> to vector<8x256xf32>
    %189 = vector.shape_cast %186 : vector<8x256xf32> to vector<1x8x256xf32>
    tpu.vector_store %arg5[%c0_85, %c0_86, %c0_87], %189 {strides = array<i32>} : memref<1x8x256xf32, #tpu.memory_space<vmem>>, vector<1x8x256xf32>,
    return
  }
  func.func @transform_0(%arg0: i32) -> (i32, i32, i32) {
    %c0_i32 = arith.constant 0 : i32
    %c0_i32_0 = arith.constant 0 : i32
    %c0_i32_1 = arith.constant 0 : i32
    return %arg0, %c0_i32, %c0_i32_0 : i32, i32, i32
  }
  func.func @transform_1(%arg0: i32) -> (i32, i32) {
    %c0_i32 = arith.constant 0 : i32
    %c0_i32_0 = arith.constant 0 : i32
    %c0_i32_1 = arith.constant 0 : i32
    return %c0_i32, %c0_i32_0 : i32, i32
  }
  func.func @transform_2(%arg0: i32) -> (i32, i32) {
    %c0_i32 = arith.constant 0 : i32
    %c0_i32_0 = arith.constant 0 : i32
    %c0_i32_1 = arith.constant 0 : i32
    return %c0_i32, %c0_i32_0 : i32, i32
  }
  func.func @transform_3(%arg0: i32) -> (i32, i32) {
    %c0_i32 = arith.constant 0 : i32
    %c0_i32_0 = arith.constant 0 : i32
    %c0_i32_1 = arith.constant 0 : i32
    return %c0_i32, %c0_i32_0 : i32, i32
  }
  func.func @transform_4(%arg0: i32) -> (i32, i32, i32) {
    %c0_i32 = arith.constant 0 : i32
    %c0_i32_0 = arith.constant 0 : i32
    %c0_i32_1 = arith.constant 0 : i32
    return %arg0, %c0_i32, %c0_i32_0 : i32, i32, i32
  }
}

module attributes {stable_mosaic.version = 11 : i64} {
  func.func @kernel(%arg0: i32, %arg1: memref<1x8x290xf32, #tpu.memory_space<vmem>>, %arg2: memref<8x72xbf16, #tpu.memory_space<vmem>>, %arg3: memref<8x1xf32, #tpu.memory_space<vmem>>, %arg4: memref<3x256xf32, #tpu.memory_space<vmem>>, %arg5: memref<8x1xf32, #tpu.memory_space<vmem>>, %arg6: memref<1x8x256xf32, #tpu.memory_space<vmem>>, %arg7: memref<1x8x256xf32, #tpu.memory_space<vmem>>) attributes {dimension_semantics = [#tpu.dimension_semantics<parallel>], iteration_bounds = array<i64: 2>, scalar_prefetch = 0 : i64, scratch_operands = 0 : i64, tpu.core_type = #tpu.core_type<tc>, window_params = [{transform_indices = @transform_0, window_bounds = array<i64: 1, 8, 290>}, {pipeline_mode = #tpu.pipeline_mode<synchronous>, transform_indices = @transform_1, window_bounds = array<i64: 8, 72>}, {pipeline_mode = #tpu.pipeline_mode<synchronous>, transform_indices = @transform_2, window_bounds = array<i64: 8, 1>}, {pipeline_mode = #tpu.pipeline_mode<synchronous>, transform_indices = @transform_3, window_bounds = array<i64: 3, 256>}, {pipeline_mode = #tpu.pipeline_mode<synchronous>, transform_indices = @transform_4, window_bounds = array<i64: 8, 1>}, {transform_indices = @transform_5, window_bounds = array<i64: 1, 8, 256>}, {transform_indices = @transform_6, window_bounds = array<i64: 1, 8, 256>}]} {
    %c0 = arith.constant 0 : index
    %c0_0 = arith.constant 0 : index
    %c0_1 = arith.constant 0 : index
    %0 = vector.load %arg1[%c0, %c0_0, %c0_1] : memref<1x8x290xf32, #tpu.memory_space<vmem>>, vector<1x8x290xf32>
    %1 = vector.shape_cast %0 : vector<1x8x290xf32> to vector<8x290xf32>
    %2 = vector.extract_strided_slice %1 {offsets = [0, 0], sizes = [8, 256], strides = [1, 1]} : vector<8x290xf32> to vector<8x256xf32>
    %c0_2 = arith.constant 0 : index
    %c0_3 = arith.constant 0 : index
    %3 = vector.load %arg4[%c0_2, %c0_3] : memref<3x256xf32, #tpu.memory_space<vmem>>, vector<1x256xf32>
    %4 = vector.broadcast %3 : vector<1x256xf32> to vector<8x256xf32>
    %5 = arith.mulf %2, %4 : vector<8x256xf32>
    %6 = vector.extract_strided_slice %1 {offsets = [0, 1], sizes = [8, 256], strides = [1, 1]} : vector<8x290xf32> to vector<8x256xf32>
    %7 = vector.extract_strided_slice %1 {offsets = [0, 2], sizes = [8, 256], strides = [1, 1]} : vector<8x290xf32> to vector<8x256xf32>
    %c2 = arith.constant 2 : index
    %c0_4 = arith.constant 0 : index
    %8 = vector.load %arg4[%c2, %c0_4] : memref<3x256xf32, #tpu.memory_space<vmem>>, vector<1x256xf32>
    %9 = vector.broadcast %8 : vector<1x256xf32> to vector<8x256xf32>
    %10 = arith.mulf %7, %9 : vector<8x256xf32>
    %11 = vector.extract_strided_slice %1 {offsets = [0, 16], sizes = [8, 256], strides = [1, 1]} : vector<8x290xf32> to vector<8x256xf32>
    %c0_5 = arith.constant 0 : index
    %c0_6 = arith.constant 0 : index
    %12 = vector.load %arg4[%c0_5, %c0_6] : memref<3x256xf32, #tpu.memory_space<vmem>>, vector<1x256xf32>
    %13 = vector.broadcast %12 : vector<1x256xf32> to vector<8x256xf32>
    %14 = arith.mulf %11, %13 : vector<8x256xf32>
    %15 = vector.extract_strided_slice %1 {offsets = [0, 17], sizes = [8, 256], strides = [1, 1]} : vector<8x290xf32> to vector<8x256xf32>
    %16 = vector.extract_strided_slice %1 {offsets = [0, 18], sizes = [8, 256], strides = [1, 1]} : vector<8x290xf32> to vector<8x256xf32>
    %c2_7 = arith.constant 2 : index
    %c0_8 = arith.constant 0 : index
    %17 = vector.load %arg4[%c2_7, %c0_8] : memref<3x256xf32, #tpu.memory_space<vmem>>, vector<1x256xf32>
    %18 = vector.broadcast %17 : vector<1x256xf32> to vector<8x256xf32>
    %19 = arith.mulf %16, %18 : vector<8x256xf32>
    %20 = vector.extract_strided_slice %1 {offsets = [0, 32], sizes = [8, 256], strides = [1, 1]} : vector<8x290xf32> to vector<8x256xf32>
    %c0_9 = arith.constant 0 : index
    %c0_10 = arith.constant 0 : index
    %21 = vector.load %arg4[%c0_9, %c0_10] : memref<3x256xf32, #tpu.memory_space<vmem>>, vector<1x256xf32>
    %22 = vector.broadcast %21 : vector<1x256xf32> to vector<8x256xf32>
    %23 = arith.mulf %20, %22 : vector<8x256xf32>
    %24 = vector.extract_strided_slice %1 {offsets = [0, 33], sizes = [8, 256], strides = [1, 1]} : vector<8x290xf32> to vector<8x256xf32>
    %25 = vector.extract_strided_slice %1 {offsets = [0, 34], sizes = [8, 256], strides = [1, 1]} : vector<8x290xf32> to vector<8x256xf32>
    %c2_11 = arith.constant 2 : index
    %c0_12 = arith.constant 0 : index
    %26 = vector.load %arg4[%c2_11, %c0_12] : memref<3x256xf32, #tpu.memory_space<vmem>>, vector<1x256xf32>
    %27 = vector.broadcast %26 : vector<1x256xf32> to vector<8x256xf32>
    %28 = arith.mulf %25, %27 : vector<8x256xf32>
    %29 = tpu.concatenate %5, %6, %10, %14, %15, %19, %23, %24, %28 in 0 : vector<8x256xf32>, vector<8x256xf32>, vector<8x256xf32>, vector<8x256xf32>, vector<8x256xf32>, vector<8x256xf32>, vector<8x256xf32>, vector<8x256xf32>, vector<8x256xf32> -> vector<72x256xf32>
    %c0_13 = arith.constant 0 : index
    %c0_14 = arith.constant 0 : index
    %30 = vector.load %arg2[%c0_13, %c0_14] : memref<8x72xbf16, #tpu.memory_space<vmem>>, vector<8x72xbf16>
    %31 = arith.truncf %29 : vector<72x256xf32> to vector<72x256xbf16>
    %cst = arith.constant dense<0.000000e+00> : vector<8x256xf32>
    %32 = tpu.matmul %30, %31, %cst {dimension_numbers = #tpu.dot_dimension_numbers<[1], [0], [0], [1], [0, 0, 1, 1], [], []>} : vector<8x72xbf16>, vector<72x256xbf16>, vector<8x256xf32> -> vector<8x256xf32>
    %c0_15 = arith.constant 0 : index
    %c0_16 = arith.constant 0 : index
    %33 = vector.load %arg3[%c0_15, %c0_16] : memref<8x1xf32, #tpu.memory_space<vmem>>, vector<8x1xf32>
    %34 = vector.broadcast %33 : vector<8x1xf32> to vector<8x256xf32>
    %35 = arith.addf %32, %34 : vector<8x256xf32>
    %36 = arith.mulf %35, %35 : vector<8x256xf32>
    %cst_17 = arith.constant dense<0.000000e+00> : vector<256xf32>
    %37 = vector.multi_reduction <add>, %36, %cst_17 [0] : vector<8x256xf32> to vector<256xf32>
    %38 = vector.shape_cast %37 : vector<256xf32> to vector<1x256xf32>
    %cst_18 = arith.constant 1.000000e-24 : f32
    %39 = vector.broadcast %cst_18 : f32 to vector<1x256xf32>
    %40 = arith.maximumf %38, %39 : vector<1x256xf32>
    %41 = math.rsqrt %40 : vector<1x256xf32>
    %42 = vector.broadcast %41 : vector<1x256xf32> to vector<8x256xf32>
    %43 = arith.mulf %35, %42 : vector<8x256xf32>
    %c0_19 = arith.constant 0 : index
    %c0_20 = arith.constant 0 : index
    %44 = vector.load %arg5[%c0_19, %c0_20] : memref<8x1xf32, #tpu.memory_space<vmem>>, vector<8x1xf32>
    %cst_21 = arith.constant 2.82842708 : f32
    %45 = vector.broadcast %cst_21 : f32 to vector<8x1xf32>
    %46 = arith.mulf %44, %45 : vector<8x1xf32>
    %47 = vector.broadcast %46 : vector<8x1xf32> to vector<8x256xf32>
    %48 = arith.mulf %43, %47 : vector<8x256xf32>
    %49 = arith.negf %48 : vector<8x256xf32>
    %50 = math.exp %49 : vector<8x256xf32>
    %cst_22 = arith.constant 1.000000e+00 : f32
    %51 = vector.broadcast %cst_22 : f32 to vector<8x256xf32>
    %52 = arith.addf %51, %50 : vector<8x256xf32>
    %53 = arith.divf %51, %52 : vector<8x256xf32>
    %54 = arith.mulf %48, %53 : vector<8x256xf32>
    %c0_23 = arith.constant 0 : index
    %c0_24 = arith.constant 0 : index
    %c0_25 = arith.constant 0 : index
    %55 = vector.load %arg6[%c0_23, %c0_24, %c0_25] : memref<1x8x256xf32, #tpu.memory_space<vmem>>, vector<1x8x256xf32>
    %56 = vector.shape_cast %55 : vector<1x8x256xf32> to vector<8x256xf32>
    %57 = arith.addf %54, %56 : vector<8x256xf32>
    %c0_26 = arith.constant 0 : index
    %c0_27 = arith.constant 0 : index
    %c0_28 = arith.constant 0 : index
    %58 = vector.load %arg7[%c0_26, %c0_27, %c0_28] : memref<1x8x256xf32, #tpu.memory_space<vmem>>, vector<1x8x256xf32>
    %59 = vector.shape_cast %58 : vector<1x8x256xf32> to vector<8x256xf32>
    %60 = vector.shape_cast %57 : vector<8x256xf32> to vector<1x8x256xf32>
    tpu.vector_store %arg7[%c0_26, %c0_27, %c0_28], %60 {strides = array<i32>} : memref<1x8x256xf32, #tpu.memory_space<vmem>>, vector<1x8x256xf32>,
    return
  }
  func.func @transform_0(%arg0: i32) -> (i32, i32, i32) {
    %c0_i32 = arith.constant 0 : i32
    %c0_i32_0 = arith.constant 0 : i32
    %c0_i32_1 = arith.constant 0 : i32
    return %arg0, %c0_i32, %c0_i32_0 : i32, i32, i32
  }
  func.func @transform_1(%arg0: i32) -> (i32, i32) {
    %c0_i32 = arith.constant 0 : i32
    %c0_i32_0 = arith.constant 0 : i32
    %c0_i32_1 = arith.constant 0 : i32
    return %c0_i32, %c0_i32_0 : i32, i32
  }
  func.func @transform_2(%arg0: i32) -> (i32, i32) {
    %c0_i32 = arith.constant 0 : i32
    %c0_i32_0 = arith.constant 0 : i32
    %c0_i32_1 = arith.constant 0 : i32
    return %c0_i32, %c0_i32_0 : i32, i32
  }
  func.func @transform_3(%arg0: i32) -> (i32, i32) {
    %c0_i32 = arith.constant 0 : i32
    %c0_i32_0 = arith.constant 0 : i32
    %c0_i32_1 = arith.constant 0 : i32
    return %c0_i32, %c0_i32_0 : i32, i32
  }
  func.func @transform_4(%arg0: i32) -> (i32, i32) {
    %c0_i32 = arith.constant 0 : i32
    %c0_i32_0 = arith.constant 0 : i32
    %c0_i32_1 = arith.constant 0 : i32
    return %c0_i32, %c0_i32_0 : i32, i32
  }
  func.func @transform_5(%arg0: i32) -> (i32, i32, i32) {
    %c0_i32 = arith.constant 0 : i32
    %c0_i32_0 = arith.constant 0 : i32
    %c0_i32_1 = arith.constant 0 : i32
    return %arg0, %c0_i32, %c0_i32_0 : i32, i32, i32
  }
  func.func @transform_6(%arg0: i32) -> (i32, i32, i32) {
    %c0_i32 = arith.constant 0 : i32
    %c0_i32_0 = arith.constant 0 : i32
    %c0_i32_1 = arith.constant 0 : i32
    return %arg0, %c0_i32, %c0_i32_0 : i32, i32, i32
  }
}

module attributes {stable_mosaic.version = 11 : i64} {
  func.func @kernel(%arg0: i32, %arg1: memref<1x32x64xf32, #tpu.memory_space<vmem>>, %arg2: memref<8x32xbf16, #tpu.memory_space<vmem>>, %arg3: memref<8x1xf32, #tpu.memory_space<vmem>>, %arg4: memref<1x8x64xf32, #tpu.memory_space<vmem>>) attributes {dimension_semantics = [#tpu.dimension_semantics<parallel>], iteration_bounds = array<i64: 2>, scalar_prefetch = 0 : i64, scratch_operands = 0 : i64, tpu.core_type = #tpu.core_type<tc>, window_params = [{transform_indices = @transform_0, window_bounds = array<i64: 1, 32, 64>}, {pipeline_mode = #tpu.pipeline_mode<synchronous>, transform_indices = @transform_1, window_bounds = array<i64: 8, 32>}, {pipeline_mode = #tpu.pipeline_mode<synchronous>, transform_indices = @transform_2, window_bounds = array<i64: 8, 1>}, {transform_indices = @transform_3, window_bounds = array<i64: 1, 8, 64>}]} {
    %c0 = arith.constant 0 : index
    %c0_0 = arith.constant 0 : index
    %c0_1 = arith.constant 0 : index
    %0 = vector.load %arg1[%c0, %c0_0, %c0_1] : memref<1x32x64xf32, #tpu.memory_space<vmem>>, vector<1x32x64xf32>
    %1 = vector.shape_cast %0 : vector<1x32x64xf32> to vector<32x64xf32>
    %c0_2 = arith.constant 0 : index
    %c0_3 = arith.constant 0 : index
    %2 = vector.load %arg2[%c0_2, %c0_3] : memref<8x32xbf16, #tpu.memory_space<vmem>>, vector<8x32xbf16>
    %3 = arith.truncf %1 : vector<32x64xf32> to vector<32x64xbf16>
    %cst = arith.constant dense<0.000000e+00> : vector<8x64xf32>
    %4 = tpu.matmul %2, %3, %cst {dimension_numbers = #tpu.dot_dimension_numbers<[1], [0], [0], [1], [0, 0, 1, 1], [], []>} : vector<8x32xbf16>, vector<32x64xbf16>, vector<8x64xf32> -> vector<8x64xf32>
    %c0_4 = arith.constant 0 : index
    %c0_5 = arith.constant 0 : index
    %5 = vector.load %arg3[%c0_4, %c0_5] : memref<8x1xf32, #tpu.memory_space<vmem>>, vector<8x1xf32>
    %6 = vector.broadcast %5 : vector<8x1xf32> to vector<8x64xf32>
    %7 = arith.addf %4, %6 : vector<8x64xf32>
    %c0_6 = arith.constant 0 : index
    %c0_7 = arith.constant 0 : index
    %c0_8 = arith.constant 0 : index
    %8 = vector.load %arg4[%c0_6, %c0_7, %c0_8] : memref<1x8x64xf32, #tpu.memory_space<vmem>>, vector<1x8x64xf32>
    %9 = vector.shape_cast %8 : vector<1x8x64xf32> to vector<8x64xf32>
    %10 = vector.shape_cast %7 : vector<8x64xf32> to vector<1x8x64xf32>
    tpu.vector_store %arg4[%c0_6, %c0_7, %c0_8], %10 {strides = array<i32>} : memref<1x8x64xf32, #tpu.memory_space<vmem>>, vector<1x8x64xf32>,
    return
  }
  func.func @transform_0(%arg0: i32) -> (i32, i32, i32) {
    %c0_i32 = arith.constant 0 : i32
    %c0_i32_0 = arith.constant 0 : i32
    %c0_i32_1 = arith.constant 0 : i32
    return %arg0, %c0_i32, %c0_i32_0 : i32, i32, i32
  }
  func.func @transform_1(%arg0: i32) -> (i32, i32) {
    %c0_i32 = arith.constant 0 : i32
    %c0_i32_0 = arith.constant 0 : i32
    %c0_i32_1 = arith.constant 0 : i32
    return %c0_i32, %c0_i32_0 : i32, i32
  }
  func.func @transform_2(%arg0: i32) -> (i32, i32) {
    %c0_i32 = arith.constant 0 : i32
    %c0_i32_0 = arith.constant 0 : i32
    %c0_i32_1 = arith.constant 0 : i32
    return %c0_i32, %c0_i32_0 : i32, i32
  }
  func.func @transform_3(%arg0: i32) -> (i32, i32, i32) {
    %c0_i32 = arith.constant 0 : i32
    %c0_i32_0 = arith.constant 0 : i32
    %c0_i32_1 = arith.constant 0 : i32
    return %arg0, %c0_i32, %c0_i32_0 : i32, i32, i32
  }
}

module attributes {stable_mosaic.version = 11 : i64} {
  func.func @kernel(%arg0: i32, %arg1: memref<1x8x82xf32, #tpu.memory_space<vmem>>, %arg2: memref<8x72xbf16, #tpu.memory_space<vmem>>, %arg3: memref<8x1xf32, #tpu.memory_space<vmem>>, %arg4: memref<3x64xf32, #tpu.memory_space<vmem>>, %arg5: memref<8x1xf32, #tpu.memory_space<vmem>>, %arg6: memref<1x8x64xf32, #tpu.memory_space<vmem>>) attributes {dimension_semantics = [#tpu.dimension_semantics<parallel>], iteration_bounds = array<i64: 2>, scalar_prefetch = 0 : i64, scratch_operands = 0 : i64, tpu.core_type = #tpu.core_type<tc>, window_params = [{transform_indices = @transform_0, window_bounds = array<i64: 1, 8, 82>}, {pipeline_mode = #tpu.pipeline_mode<synchronous>, transform_indices = @transform_1, window_bounds = array<i64: 8, 72>}, {pipeline_mode = #tpu.pipeline_mode<synchronous>, transform_indices = @transform_2, window_bounds = array<i64: 8, 1>}, {pipeline_mode = #tpu.pipeline_mode<synchronous>, transform_indices = @transform_3, window_bounds = array<i64: 3, 64>}, {pipeline_mode = #tpu.pipeline_mode<synchronous>, transform_indices = @transform_4, window_bounds = array<i64: 8, 1>}, {transform_indices = @transform_5, window_bounds = array<i64: 1, 8, 64>}]} {
    %c0 = arith.constant 0 : index
    %c0_0 = arith.constant 0 : index
    %c0_1 = arith.constant 0 : index
    %0 = vector.load %arg1[%c0, %c0_0, %c0_1] : memref<1x8x82xf32, #tpu.memory_space<vmem>>, vector<1x8x82xf32>
    %1 = vector.shape_cast %0 : vector<1x8x82xf32> to vector<8x82xf32>
    %2 = vector.extract_strided_slice %1 {offsets = [0, 0], sizes = [8, 64], strides = [1, 1]} : vector<8x82xf32> to vector<8x64xf32>
    %c0_2 = arith.constant 0 : index
    %c0_3 = arith.constant 0 : index
    %3 = vector.load %arg4[%c0_2, %c0_3] : memref<3x64xf32, #tpu.memory_space<vmem>>, vector<1x64xf32>
    %4 = vector.broadcast %3 : vector<1x64xf32> to vector<8x64xf32>
    %5 = arith.mulf %2, %4 : vector<8x64xf32>
    %6 = vector.extract_strided_slice %1 {offsets = [0, 1], sizes = [8, 64], strides = [1, 1]} : vector<8x82xf32> to vector<8x64xf32>
    %7 = vector.extract_strided_slice %1 {offsets = [0, 2], sizes = [8, 64], strides = [1, 1]} : vector<8x82xf32> to vector<8x64xf32>
    %c2 = arith.constant 2 : index
    %c0_4 = arith.constant 0 : index
    %8 = vector.load %arg4[%c2, %c0_4] : memref<3x64xf32, #tpu.memory_space<vmem>>, vector<1x64xf32>
    %9 = vector.broadcast %8 : vector<1x64xf32> to vector<8x64xf32>
    %10 = arith.mulf %7, %9 : vector<8x64xf32>
    %11 = vector.extract_strided_slice %1 {offsets = [0, 8], sizes = [8, 64], strides = [1, 1]} : vector<8x82xf32> to vector<8x64xf32>
    %c0_5 = arith.constant 0 : index
    %c0_6 = arith.constant 0 : index
    %12 = vector.load %arg4[%c0_5, %c0_6] : memref<3x64xf32, #tpu.memory_space<vmem>>, vector<1x64xf32>
    %13 = vector.broadcast %12 : vector<1x64xf32> to vector<8x64xf32>
    %14 = arith.mulf %11, %13 : vector<8x64xf32>
    %15 = vector.extract_strided_slice %1 {offsets = [0, 9], sizes = [8, 64], strides = [1, 1]} : vector<8x82xf32> to vector<8x64xf32>
    %16 = vector.extract_strided_slice %1 {offsets = [0, 10], sizes = [8, 64], strides = [1, 1]} : vector<8x82xf32> to vector<8x64xf32>
    %c2_7 = arith.constant 2 : index
    %c0_8 = arith.constant 0 : index
    %17 = vector.load %arg4[%c2_7, %c0_8] : memref<3x64xf32, #tpu.memory_space<vmem>>, vector<1x64xf32>
    %18 = vector.broadcast %17 : vector<1x64xf32> to vector<8x64xf32>
    %19 = arith.mulf %16, %18 : vector<8x64xf32>
    %20 = vector.extract_strided_slice %1 {offsets = [0, 16], sizes = [8, 64], strides = [1, 1]} : vector<8x82xf32> to vector<8x64xf32>
    %c0_9 = arith.constant 0 : index
    %c0_10 = arith.constant 0 : index
    %21 = vector.load %arg4[%c0_9, %c0_10] : memref<3x64xf32, #tpu.memory_space<vmem>>, vector<1x64xf32>
    %22 = vector.broadcast %21 : vector<1x64xf32> to vector<8x64xf32>
    %23 = arith.mulf %20, %22 : vector<8x64xf32>
    %24 = vector.extract_strided_slice %1 {offsets = [0, 17], sizes = [8, 64], strides = [1, 1]} : vector<8x82xf32> to vector<8x64xf32>
    %25 = vector.extract_strided_slice %1 {offsets = [0, 18], sizes = [8, 64], strides = [1, 1]} : vector<8x82xf32> to vector<8x64xf32>
    %c2_11 = arith.constant 2 : index
    %c0_12 = arith.constant 0 : index
    %26 = vector.load %arg4[%c2_11, %c0_12] : memref<3x64xf32, #tpu.memory_space<vmem>>, vector<1x64xf32>
    %27 = vector.broadcast %26 : vector<1x64xf32> to vector<8x64xf32>
    %28 = arith.mulf %25, %27 : vector<8x64xf32>
    %29 = tpu.concatenate %5, %6, %10, %14, %15, %19, %23, %24, %28 in 0 : vector<8x64xf32>, vector<8x64xf32>, vector<8x64xf32>, vector<8x64xf32>, vector<8x64xf32>, vector<8x64xf32>, vector<8x64xf32>, vector<8x64xf32>, vector<8x64xf32> -> vector<72x64xf32>
    %c0_13 = arith.constant 0 : index
    %c0_14 = arith.constant 0 : index
    %30 = vector.load %arg2[%c0_13, %c0_14] : memref<8x72xbf16, #tpu.memory_space<vmem>>, vector<8x72xbf16>
    %31 = arith.truncf %29 : vector<72x64xf32> to vector<72x64xbf16>
    %cst = arith.constant dense<0.000000e+00> : vector<8x64xf32>
    %32 = tpu.matmul %30, %31, %cst {dimension_numbers = #tpu.dot_dimension_numbers<[1], [0], [0], [1], [0, 0, 1, 1], [], []>} : vector<8x72xbf16>, vector<72x64xbf16>, vector<8x64xf32> -> vector<8x64xf32>
    %c0_15 = arith.constant 0 : index
    %c0_16 = arith.constant 0 : index
    %33 = vector.load %arg3[%c0_15, %c0_16] : memref<8x1xf32, #tpu.memory_space<vmem>>, vector<8x1xf32>
    %34 = vector.broadcast %33 : vector<8x1xf32> to vector<8x64xf32>
    %35 = arith.addf %32, %34 : vector<8x64xf32>
    %36 = arith.mulf %35, %35 : vector<8x64xf32>
    %cst_17 = arith.constant dense<0.000000e+00> : vector<64xf32>
    %37 = vector.multi_reduction <add>, %36, %cst_17 [0] : vector<8x64xf32> to vector<64xf32>
    %38 = vector.shape_cast %37 : vector<64xf32> to vector<1x64xf32>
    %cst_18 = arith.constant 1.000000e-24 : f32
    %39 = vector.broadcast %cst_18 : f32 to vector<1x64xf32>
    %40 = arith.maximumf %38, %39 : vector<1x64xf32>
    %41 = math.rsqrt %40 : vector<1x64xf32>
    %42 = vector.broadcast %41 : vector<1x64xf32> to vector<8x64xf32>
    %43 = arith.mulf %35, %42 : vector<8x64xf32>
    %c0_19 = arith.constant 0 : index
    %c0_20 = arith.constant 0 : index
    %44 = vector.load %arg5[%c0_19, %c0_20] : memref<8x1xf32, #tpu.memory_space<vmem>>, vector<8x1xf32>
    %cst_21 = arith.constant 2.82842708 : f32
    %45 = vector.broadcast %cst_21 : f32 to vector<8x1xf32>
    %46 = arith.mulf %44, %45 : vector<8x1xf32>
    %47 = vector.broadcast %46 : vector<8x1xf32> to vector<8x64xf32>
    %48 = arith.mulf %43, %47 : vector<8x64xf32>
    %49 = arith.negf %48 : vector<8x64xf32>
    %50 = math.exp %49 : vector<8x64xf32>
    %cst_22 = arith.constant 1.000000e+00 : f32
    %51 = vector.broadcast %cst_22 : f32 to vector<8x64xf32>
    %52 = arith.addf %51, %50 : vector<8x64xf32>
    %53 = arith.divf %51, %52 : vector<8x64xf32>
    %54 = arith.mulf %48, %53 : vector<8x64xf32>
    %c0_23 = arith.constant 0 : index
    %c0_24 = arith.constant 0 : index
    %c0_25 = arith.constant 0 : index
    %55 = vector.load %arg6[%c0_23, %c0_24, %c0_25] : memref<1x8x64xf32, #tpu.memory_space<vmem>>, vector<1x8x64xf32>
    %56 = vector.shape_cast %55 : vector<1x8x64xf32> to vector<8x64xf32>
    %57 = vector.shape_cast %54 : vector<8x64xf32> to vector<1x8x64xf32>
    tpu.vector_store %arg6[%c0_23, %c0_24, %c0_25], %57 {strides = array<i32>} : memref<1x8x64xf32, #tpu.memory_space<vmem>>, vector<1x8x64xf32>,
    return
  }
  func.func @transform_0(%arg0: i32) -> (i32, i32, i32) {
    %c0_i32 = arith.constant 0 : i32
    %c0_i32_0 = arith.constant 0 : i32
    %c0_i32_1 = arith.constant 0 : i32
    return %arg0, %c0_i32, %c0_i32_0 : i32, i32, i32
  }
  func.func @transform_1(%arg0: i32) -> (i32, i32) {
    %c0_i32 = arith.constant 0 : i32
    %c0_i32_0 = arith.constant 0 : i32
    %c0_i32_1 = arith.constant 0 : i32
    return %c0_i32, %c0_i32_0 : i32, i32
  }
  func.func @transform_2(%arg0: i32) -> (i32, i32) {
    %c0_i32 = arith.constant 0 : i32
    %c0_i32_0 = arith.constant 0 : i32
    %c0_i32_1 = arith.constant 0 : i32
    return %c0_i32, %c0_i32_0 : i32, i32
  }
  func.func @transform_3(%arg0: i32) -> (i32, i32) {
    %c0_i32 = arith.constant 0 : i32
    %c0_i32_0 = arith.constant 0 : i32
    %c0_i32_1 = arith.constant 0 : i32
    return %c0_i32, %c0_i32_0 : i32, i32
  }
  func.func @transform_4(%arg0: i32) -> (i32, i32) {
    %c0_i32 = arith.constant 0 : i32
    %c0_i32_0 = arith.constant 0 : i32
    %c0_i32_1 = arith.constant 0 : i32
    return %c0_i32, %c0_i32_0 : i32, i32
  }
  func.func @transform_5(%arg0: i32) -> (i32, i32, i32) {
    %c0_i32 = arith.constant 0 : i32
    %c0_i32_0 = arith.constant 0 : i32
    %c0_i32_1 = arith.constant 0 : i32
    return %arg0, %c0_i32, %c0_i32_0 : i32, i32, i32
  }
}

module attributes {stable_mosaic.version = 11 : i64} {
  func.func @kernel(%arg0: i32, %arg1: memref<1x8x82xf32, #tpu.memory_space<vmem>>, %arg2: memref<8x72xbf16, #tpu.memory_space<vmem>>, %arg3: memref<8x1xf32, #tpu.memory_space<vmem>>, %arg4: memref<3x64xf32, #tpu.memory_space<vmem>>, %arg5: memref<8x1xf32, #tpu.memory_space<vmem>>, %arg6: memref<1x8x64xf32, #tpu.memory_space<vmem>>, %arg7: memref<1x8x64xf32, #tpu.memory_space<vmem>>) attributes {dimension_semantics = [#tpu.dimension_semantics<parallel>], iteration_bounds = array<i64: 2>, scalar_prefetch = 0 : i64, scratch_operands = 0 : i64, tpu.core_type = #tpu.core_type<tc>, window_params = [{transform_indices = @transform_0, window_bounds = array<i64: 1, 8, 82>}, {pipeline_mode = #tpu.pipeline_mode<synchronous>, transform_indices = @transform_1, window_bounds = array<i64: 8, 72>}, {pipeline_mode = #tpu.pipeline_mode<synchronous>, transform_indices = @transform_2, window_bounds = array<i64: 8, 1>}, {pipeline_mode = #tpu.pipeline_mode<synchronous>, transform_indices = @transform_3, window_bounds = array<i64: 3, 64>}, {pipeline_mode = #tpu.pipeline_mode<synchronous>, transform_indices = @transform_4, window_bounds = array<i64: 8, 1>}, {transform_indices = @transform_5, window_bounds = array<i64: 1, 8, 64>}, {transform_indices = @transform_6, window_bounds = array<i64: 1, 8, 64>}]} {
    %c0 = arith.constant 0 : index
    %c0_0 = arith.constant 0 : index
    %c0_1 = arith.constant 0 : index
    %0 = vector.load %arg1[%c0, %c0_0, %c0_1] : memref<1x8x82xf32, #tpu.memory_space<vmem>>, vector<1x8x82xf32>
    %1 = vector.shape_cast %0 : vector<1x8x82xf32> to vector<8x82xf32>
    %2 = vector.extract_strided_slice %1 {offsets = [0, 0], sizes = [8, 64], strides = [1, 1]} : vector<8x82xf32> to vector<8x64xf32>
    %c0_2 = arith.constant 0 : index
    %c0_3 = arith.constant 0 : index
    %3 = vector.load %arg4[%c0_2, %c0_3] : memref<3x64xf32, #tpu.memory_space<vmem>>, vector<1x64xf32>
    %4 = vector.broadcast %3 : vector<1x64xf32> to vector<8x64xf32>
    %5 = arith.mulf %2, %4 : vector<8x64xf32>
    %6 = vector.extract_strided_slice %1 {offsets = [0, 1], sizes = [8, 64], strides = [1, 1]} : vector<8x82xf32> to vector<8x64xf32>
    %7 = vector.extract_strided_slice %1 {offsets = [0, 2], sizes = [8, 64], strides = [1, 1]} : vector<8x82xf32> to vector<8x64xf32>
    %c2 = arith.constant 2 : index
    %c0_4 = arith.constant 0 : index
    %8 = vector.load %arg4[%c2, %c0_4] : memref<3x64xf32, #tpu.memory_space<vmem>>, vector<1x64xf32>
    %9 = vector.broadcast %8 : vector<1x64xf32> to vector<8x64xf32>
    %10 = arith.mulf %7, %9 : vector<8x64xf32>
    %11 = vector.extract_strided_slice %1 {offsets = [0, 8], sizes = [8, 64], strides = [1, 1]} : vector<8x82xf32> to vector<8x64xf32>
    %c0_5 = arith.constant 0 : index
    %c0_6 = arith.constant 0 : index
    %12 = vector.load %arg4[%c0_5, %c0_6] : memref<3x64xf32, #tpu.memory_space<vmem>>, vector<1x64xf32>
    %13 = vector.broadcast %12 : vector<1x64xf32> to vector<8x64xf32>
    %14 = arith.mulf %11, %13 : vector<8x64xf32>
    %15 = vector.extract_strided_slice %1 {offsets = [0, 9], sizes = [8, 64], strides = [1, 1]} : vector<8x82xf32> to vector<8x64xf32>
    %16 = vector.extract_strided_slice %1 {offsets = [0, 10], sizes = [8, 64], strides = [1, 1]} : vector<8x82xf32> to vector<8x64xf32>
    %c2_7 = arith.constant 2 : index
    %c0_8 = arith.constant 0 : index
    %17 = vector.load %arg4[%c2_7, %c0_8] : memref<3x64xf32, #tpu.memory_space<vmem>>, vector<1x64xf32>
    %18 = vector.broadcast %17 : vector<1x64xf32> to vector<8x64xf32>
    %19 = arith.mulf %16, %18 : vector<8x64xf32>
    %20 = vector.extract_strided_slice %1 {offsets = [0, 16], sizes = [8, 64], strides = [1, 1]} : vector<8x82xf32> to vector<8x64xf32>
    %c0_9 = arith.constant 0 : index
    %c0_10 = arith.constant 0 : index
    %21 = vector.load %arg4[%c0_9, %c0_10] : memref<3x64xf32, #tpu.memory_space<vmem>>, vector<1x64xf32>
    %22 = vector.broadcast %21 : vector<1x64xf32> to vector<8x64xf32>
    %23 = arith.mulf %20, %22 : vector<8x64xf32>
    %24 = vector.extract_strided_slice %1 {offsets = [0, 17], sizes = [8, 64], strides = [1, 1]} : vector<8x82xf32> to vector<8x64xf32>
    %25 = vector.extract_strided_slice %1 {offsets = [0, 18], sizes = [8, 64], strides = [1, 1]} : vector<8x82xf32> to vector<8x64xf32>
    %c2_11 = arith.constant 2 : index
    %c0_12 = arith.constant 0 : index
    %26 = vector.load %arg4[%c2_11, %c0_12] : memref<3x64xf32, #tpu.memory_space<vmem>>, vector<1x64xf32>
    %27 = vector.broadcast %26 : vector<1x64xf32> to vector<8x64xf32>
    %28 = arith.mulf %25, %27 : vector<8x64xf32>
    %29 = tpu.concatenate %5, %6, %10, %14, %15, %19, %23, %24, %28 in 0 : vector<8x64xf32>, vector<8x64xf32>, vector<8x64xf32>, vector<8x64xf32>, vector<8x64xf32>, vector<8x64xf32>, vector<8x64xf32>, vector<8x64xf32>, vector<8x64xf32> -> vector<72x64xf32>
    %c0_13 = arith.constant 0 : index
    %c0_14 = arith.constant 0 : index
    %30 = vector.load %arg2[%c0_13, %c0_14] : memref<8x72xbf16, #tpu.memory_space<vmem>>, vector<8x72xbf16>
    %31 = arith.truncf %29 : vector<72x64xf32> to vector<72x64xbf16>
    %cst = arith.constant dense<0.000000e+00> : vector<8x64xf32>
    %32 = tpu.matmul %30, %31, %cst {dimension_numbers = #tpu.dot_dimension_numbers<[1], [0], [0], [1], [0, 0, 1, 1], [], []>} : vector<8x72xbf16>, vector<72x64xbf16>, vector<8x64xf32> -> vector<8x64xf32>
    %c0_15 = arith.constant 0 : index
    %c0_16 = arith.constant 0 : index
    %33 = vector.load %arg3[%c0_15, %c0_16] : memref<8x1xf32, #tpu.memory_space<vmem>>, vector<8x1xf32>
    %34 = vector.broadcast %33 : vector<8x1xf32> to vector<8x64xf32>
    %35 = arith.addf %32, %34 : vector<8x64xf32>
    %36 = arith.mulf %35, %35 : vector<8x64xf32>
    %cst_17 = arith.constant dense<0.000000e+00> : vector<64xf32>
    %37 = vector.multi_reduction <add>, %36, %cst_17 [0] : vector<8x64xf32> to vector<64xf32>
    %38 = vector.shape_cast %37 : vector<64xf32> to vector<1x64xf32>
    %cst_18 = arith.constant 1.000000e-24 : f32
    %39 = vector.broadcast %cst_18 : f32 to vector<1x64xf32>
    %40 = arith.maximumf %38, %39 : vector<1x64xf32>
    %41 = math.rsqrt %40 : vector<1x64xf32>
    %42 = vector.broadcast %41 : vector<1x64xf32> to vector<8x64xf32>
    %43 = arith.mulf %35, %42 : vector<8x64xf32>
    %c0_19 = arith.constant 0 : index
    %c0_20 = arith.constant 0 : index
    %44 = vector.load %arg5[%c0_19, %c0_20] : memref<8x1xf32, #tpu.memory_space<vmem>>, vector<8x1xf32>
    %cst_21 = arith.constant 2.82842708 : f32
    %45 = vector.broadcast %cst_21 : f32 to vector<8x1xf32>
    %46 = arith.mulf %44, %45 : vector<8x1xf32>
    %47 = vector.broadcast %46 : vector<8x1xf32> to vector<8x64xf32>
    %48 = arith.mulf %43, %47 : vector<8x64xf32>
    %49 = arith.negf %48 : vector<8x64xf32>
    %50 = math.exp %49 : vector<8x64xf32>
    %cst_22 = arith.constant 1.000000e+00 : f32
    %51 = vector.broadcast %cst_22 : f32 to vector<8x64xf32>
    %52 = arith.addf %51, %50 : vector<8x64xf32>
    %53 = arith.divf %51, %52 : vector<8x64xf32>
    %54 = arith.mulf %48, %53 : vector<8x64xf32>
    %c0_23 = arith.constant 0 : index
    %c0_24 = arith.constant 0 : index
    %c0_25 = arith.constant 0 : index
    %55 = vector.load %arg6[%c0_23, %c0_24, %c0_25] : memref<1x8x64xf32, #tpu.memory_space<vmem>>, vector<1x8x64xf32>
    %56 = vector.shape_cast %55 : vector<1x8x64xf32> to vector<8x64xf32>
    %57 = arith.addf %54, %56 : vector<8x64xf32>
    %c0_26 = arith.constant 0 : index
    %c0_27 = arith.constant 0 : index
    %c0_28 = arith.constant 0 : index
    %58 = vector.load %arg7[%c0_26, %c0_27, %c0_28] : memref<1x8x64xf32, #tpu.memory_space<vmem>>, vector<1x8x64xf32>
    %59 = vector.shape_cast %58 : vector<1x8x64xf32> to vector<8x64xf32>
    %60 = vector.shape_cast %57 : vector<8x64xf32> to vector<1x8x64xf32>
    tpu.vector_store %arg7[%c0_26, %c0_27, %c0_28], %60 {strides = array<i32>} : memref<1x8x64xf32, #tpu.memory_space<vmem>>, vector<1x8x64xf32>,
    return
  }
  func.func @transform_0(%arg0: i32) -> (i32, i32, i32) {
    %c0_i32 = arith.constant 0 : i32
    %c0_i32_0 = arith.constant 0 : i32
    %c0_i32_1 = arith.constant 0 : i32
    return %arg0, %c0_i32, %c0_i32_0 : i32, i32, i32
  }
  func.func @transform_1(%arg0: i32) -> (i32, i32) {
    %c0_i32 = arith.constant 0 : i32
    %c0_i32_0 = arith.constant 0 : i32
    %c0_i32_1 = arith.constant 0 : i32
    return %c0_i32, %c0_i32_0 : i32, i32
  }
  func.func @transform_2(%arg0: i32) -> (i32, i32) {
    %c0_i32 = arith.constant 0 : i32
    %c0_i32_0 = arith.constant 0 : i32
    %c0_i32_1 = arith.constant 0 : i32
    return %c0_i32, %c0_i32_0 : i32, i32
  }
  func.func @transform_3(%arg0: i32) -> (i32, i32) {
    %c0_i32 = arith.constant 0 : i32
    %c0_i32_0 = arith.constant 0 : i32
    %c0_i32_1 = arith.constant 0 : i32
    return %c0_i32, %c0_i32_0 : i32, i32
  }
  func.func @transform_4(%arg0: i32) -> (i32, i32) {
    %c0_i32 = arith.constant 0 : i32
    %c0_i32_0 = arith.constant 0 : i32
    %c0_i32_1 = arith.constant 0 : i32
    return %c0_i32, %c0_i32_0 : i32, i32
  }
  func.func @transform_5(%arg0: i32) -> (i32, i32, i32) {
    %c0_i32 = arith.constant 0 : i32
    %c0_i32_0 = arith.constant 0 : i32
    %c0_i32_1 = arith.constant 0 : i32
    return %arg0, %c0_i32, %c0_i32_0 : i32, i32, i32
  }
  func.func @transform_6(%arg0: i32) -> (i32, i32, i32) {
    %c0_i32 = arith.constant 0 : i32
    %c0_i32_0 = arith.constant 0 : i32
    %c0_i32_1 = arith.constant 0 : i32
    return %arg0, %c0_i32, %c0_i32_0 : i32, i32, i32
  }
}

module attributes {stable_mosaic.version = 11 : i64} {
  func.func @kernel(%arg0: i32, %arg1: memref<1x32x16xf32, #tpu.memory_space<vmem>>, %arg2: memref<16x32xbf16, #tpu.memory_space<vmem>>, %arg3: memref<16x1xf32, #tpu.memory_space<vmem>>, %arg4: memref<1x16x16xf32, #tpu.memory_space<vmem>>) attributes {dimension_semantics = [#tpu.dimension_semantics<parallel>], iteration_bounds = array<i64: 2>, scalar_prefetch = 0 : i64, scratch_operands = 0 : i64, tpu.core_type = #tpu.core_type<tc>, window_params = [{transform_indices = @transform_0, window_bounds = array<i64: 1, 32, 16>}, {pipeline_mode = #tpu.pipeline_mode<synchronous>, transform_indices = @transform_1, window_bounds = array<i64: 16, 32>}, {pipeline_mode = #tpu.pipeline_mode<synchronous>, transform_indices = @transform_2, window_bounds = array<i64: 16, 1>}, {transform_indices = @transform_3, window_bounds = array<i64: 1, 16, 16>}]} {
    %c0 = arith.constant 0 : index
    %c0_0 = arith.constant 0 : index
    %c0_1 = arith.constant 0 : index
    %0 = vector.load %arg1[%c0, %c0_0, %c0_1] : memref<1x32x16xf32, #tpu.memory_space<vmem>>, vector<1x32x16xf32>
    %1 = vector.shape_cast %0 : vector<1x32x16xf32> to vector<32x16xf32>
    %c0_2 = arith.constant 0 : index
    %c0_3 = arith.constant 0 : index
    %2 = vector.load %arg2[%c0_2, %c0_3] : memref<16x32xbf16, #tpu.memory_space<vmem>>, vector<16x32xbf16>
    %3 = arith.truncf %1 : vector<32x16xf32> to vector<32x16xbf16>
    %cst = arith.constant dense<0.000000e+00> : vector<16x16xf32>
    %4 = tpu.matmul %2, %3, %cst {dimension_numbers = #tpu.dot_dimension_numbers<[1], [0], [0], [1], [0, 0, 1, 1], [], []>} : vector<16x32xbf16>, vector<32x16xbf16>, vector<16x16xf32> -> vector<16x16xf32>
    %c0_4 = arith.constant 0 : index
    %c0_5 = arith.constant 0 : index
    %5 = vector.load %arg3[%c0_4, %c0_5] : memref<16x1xf32, #tpu.memory_space<vmem>>, vector<16x1xf32>
    %6 = vector.broadcast %5 : vector<16x1xf32> to vector<16x16xf32>
    %7 = arith.addf %4, %6 : vector<16x16xf32>
    %c0_6 = arith.constant 0 : index
    %c0_7 = arith.constant 0 : index
    %c0_8 = arith.constant 0 : index
    %8 = vector.load %arg4[%c0_6, %c0_7, %c0_8] : memref<1x16x16xf32, #tpu.memory_space<vmem>>, vector<1x16x16xf32>
    %9 = vector.shape_cast %8 : vector<1x16x16xf32> to vector<16x16xf32>
    %10 = vector.shape_cast %7 : vector<16x16xf32> to vector<1x16x16xf32>
    tpu.vector_store %arg4[%c0_6, %c0_7, %c0_8], %10 {strides = array<i32>} : memref<1x16x16xf32, #tpu.memory_space<vmem>>, vector<1x16x16xf32>,
    return
  }
  func.func @transform_0(%arg0: i32) -> (i32, i32, i32) {
    %c0_i32 = arith.constant 0 : i32
    %c0_i32_0 = arith.constant 0 : i32
    %c0_i32_1 = arith.constant 0 : i32
    return %arg0, %c0_i32, %c0_i32_0 : i32, i32, i32
  }
  func.func @transform_1(%arg0: i32) -> (i32, i32) {
    %c0_i32 = arith.constant 0 : i32
    %c0_i32_0 = arith.constant 0 : i32
    %c0_i32_1 = arith.constant 0 : i32
    return %c0_i32, %c0_i32_0 : i32, i32
  }
  func.func @transform_2(%arg0: i32) -> (i32, i32) {
    %c0_i32 = arith.constant 0 : i32
    %c0_i32_0 = arith.constant 0 : i32
    %c0_i32_1 = arith.constant 0 : i32
    return %c0_i32, %c0_i32_0 : i32, i32
  }
  func.func @transform_3(%arg0: i32) -> (i32, i32, i32) {
    %c0_i32 = arith.constant 0 : i32
    %c0_i32_0 = arith.constant 0 : i32
    %c0_i32_1 = arith.constant 0 : i32
    return %arg0, %c0_i32, %c0_i32_0 : i32, i32, i32
  }
}

module attributes {stable_mosaic.version = 11 : i64} {
  func.func @kernel(%arg0: i32, %arg1: memref<1x8x26xf32, #tpu.memory_space<vmem>>, %arg2: memref<8x72xbf16, #tpu.memory_space<vmem>>, %arg3: memref<8x1xf32, #tpu.memory_space<vmem>>, %arg4: memref<3x16xf32, #tpu.memory_space<vmem>>, %arg5: memref<8x1xf32, #tpu.memory_space<vmem>>, %arg6: memref<1x16x16xf32, #tpu.memory_space<vmem>>, %arg7: memref<8x16xbf16, #tpu.memory_space<vmem>>, %arg8: memref<8x1xf32, #tpu.memory_space<vmem>>, %arg9: memref<1x8x16xf32, #tpu.memory_space<vmem>>) attributes {dimension_semantics = [#tpu.dimension_semantics<parallel>], iteration_bounds = array<i64: 2>, scalar_prefetch = 0 : i64, scratch_operands = 0 : i64, tpu.core_type = #tpu.core_type<tc>, window_params = [{transform_indices = @transform_0, window_bounds = array<i64: 1, 8, 26>}, {pipeline_mode = #tpu.pipeline_mode<synchronous>, transform_indices = @transform_1, window_bounds = array<i64: 8, 72>}, {pipeline_mode = #tpu.pipeline_mode<synchronous>, transform_indices = @transform_2, window_bounds = array<i64: 8, 1>}, {pipeline_mode = #tpu.pipeline_mode<synchronous>, transform_indices = @transform_3, window_bounds = array<i64: 3, 16>}, {pipeline_mode = #tpu.pipeline_mode<synchronous>, transform_indices = @transform_4, window_bounds = array<i64: 8, 1>}, {transform_indices = @transform_5, window_bounds = array<i64: 1, 16, 16>}, {pipeline_mode = #tpu.pipeline_mode<synchronous>, transform_indices = @transform_6, window_bounds = array<i64: 8, 16>}, {pipeline_mode = #tpu.pipeline_mode<synchronous>, transform_indices = @transform_7, window_bounds = array<i64: 8, 1>}, {transform_indices = @transform_8, window_bounds = array<i64: 1, 8, 16>}]} {
    %c0 = arith.constant 0 : index
    %c0_0 = arith.constant 0 : index
    %c0_1 = arith.constant 0 : index
    %0 = vector.load %arg1[%c0, %c0_0, %c0_1] : memref<1x8x26xf32, #tpu.memory_space<vmem>>, vector<1x8x26xf32>
    %1 = vector.shape_cast %0 : vector<1x8x26xf32> to vector<8x26xf32>
    %2 = vector.extract_strided_slice %1 {offsets = [0, 0], sizes = [8, 16], strides = [1, 1]} : vector<8x26xf32> to vector<8x16xf32>
    %c0_2 = arith.constant 0 : index
    %c0_3 = arith.constant 0 : index
    %3 = vector.load %arg4[%c0_2, %c0_3] : memref<3x16xf32, #tpu.memory_space<vmem>>, vector<1x16xf32>
    %4 = vector.broadcast %3 : vector<1x16xf32> to vector<8x16xf32>
    %5 = arith.mulf %2, %4 : vector<8x16xf32>
    %6 = vector.extract_strided_slice %1 {offsets = [0, 1], sizes = [8, 16], strides = [1, 1]} : vector<8x26xf32> to vector<8x16xf32>
    %7 = vector.extract_strided_slice %1 {offsets = [0, 2], sizes = [8, 16], strides = [1, 1]} : vector<8x26xf32> to vector<8x16xf32>
    %c2 = arith.constant 2 : index
    %c0_4 = arith.constant 0 : index
    %8 = vector.load %arg4[%c2, %c0_4] : memref<3x16xf32, #tpu.memory_space<vmem>>, vector<1x16xf32>
    %9 = vector.broadcast %8 : vector<1x16xf32> to vector<8x16xf32>
    %10 = arith.mulf %7, %9 : vector<8x16xf32>
    %11 = vector.extract_strided_slice %1 {offsets = [0, 4], sizes = [8, 16], strides = [1, 1]} : vector<8x26xf32> to vector<8x16xf32>
    %c0_5 = arith.constant 0 : index
    %c0_6 = arith.constant 0 : index
    %12 = vector.load %arg4[%c0_5, %c0_6] : memref<3x16xf32, #tpu.memory_space<vmem>>, vector<1x16xf32>
    %13 = vector.broadcast %12 : vector<1x16xf32> to vector<8x16xf32>
    %14 = arith.mulf %11, %13 : vector<8x16xf32>
    %15 = vector.extract_strided_slice %1 {offsets = [0, 5], sizes = [8, 16], strides = [1, 1]} : vector<8x26xf32> to vector<8x16xf32>
    %16 = vector.extract_strided_slice %1 {offsets = [0, 6], sizes = [8, 16], strides = [1, 1]} : vector<8x26xf32> to vector<8x16xf32>
    %c2_7 = arith.constant 2 : index
    %c0_8 = arith.constant 0 : index
    %17 = vector.load %arg4[%c2_7, %c0_8] : memref<3x16xf32, #tpu.memory_space<vmem>>, vector<1x16xf32>
    %18 = vector.broadcast %17 : vector<1x16xf32> to vector<8x16xf32>
    %19 = arith.mulf %16, %18 : vector<8x16xf32>
    %20 = vector.extract_strided_slice %1 {offsets = [0, 8], sizes = [8, 16], strides = [1, 1]} : vector<8x26xf32> to vector<8x16xf32>
    %c0_9 = arith.constant 0 : index
    %c0_10 = arith.constant 0 : index
    %21 = vector.load %arg4[%c0_9, %c0_10] : memref<3x16xf32, #tpu.memory_space<vmem>>, vector<1x16xf32>
    %22 = vector.broadcast %21 : vector<1x16xf32> to vector<8x16xf32>
    %23 = arith.mulf %20, %22 : vector<8x16xf32>
    %24 = vector.extract_strided_slice %1 {offsets = [0, 9], sizes = [8, 16], strides = [1, 1]} : vector<8x26xf32> to vector<8x16xf32>
    %25 = vector.extract_strided_slice %1 {offsets = [0, 10], sizes = [8, 16], strides = [1, 1]} : vector<8x26xf32> to vector<8x16xf32>
    %c2_11 = arith.constant 2 : index
    %c0_12 = arith.constant 0 : index
    %26 = vector.load %arg4[%c2_11, %c0_12] : memref<3x16xf32, #tpu.memory_space<vmem>>, vector<1x16xf32>
    %27 = vector.broadcast %26 : vector<1x16xf32> to vector<8x16xf32>
    %28 = arith.mulf %25, %27 : vector<8x16xf32>
    %29 = tpu.concatenate %5, %6, %10, %14, %15, %19, %23, %24, %28 in 0 : vector<8x16xf32>, vector<8x16xf32>, vector<8x16xf32>, vector<8x16xf32>, vector<8x16xf32>, vector<8x16xf32>, vector<8x16xf32>, vector<8x16xf32>, vector<8x16xf32> -> vector<72x16xf32>
    %c0_13 = arith.constant 0 : index
    %c0_14 = arith.constant 0 : index
    %30 = vector.load %arg2[%c0_13, %c0_14] : memref<8x72xbf16, #tpu.memory_space<vmem>>, vector<8x72xbf16>
    %31 = arith.truncf %29 : vector<72x16xf32> to vector<72x16xbf16>
    %cst = arith.constant dense<0.000000e+00> : vector<8x16xf32>
    %32 = tpu.matmul %30, %31, %cst {dimension_numbers = #tpu.dot_dimension_numbers<[1], [0], [0], [1], [0, 0, 1, 1], [], []>} : vector<8x72xbf16>, vector<72x16xbf16>, vector<8x16xf32> -> vector<8x16xf32>
    %c0_15 = arith.constant 0 : index
    %c0_16 = arith.constant 0 : index
    %33 = vector.load %arg3[%c0_15, %c0_16] : memref<8x1xf32, #tpu.memory_space<vmem>>, vector<8x1xf32>
    %34 = vector.broadcast %33 : vector<8x1xf32> to vector<8x16xf32>
    %35 = arith.addf %32, %34 : vector<8x16xf32>
    %36 = arith.mulf %35, %35 : vector<8x16xf32>
    %cst_17 = arith.constant dense<0.000000e+00> : vector<16xf32>
    %37 = vector.multi_reduction <add>, %36, %cst_17 [0] : vector<8x16xf32> to vector<16xf32>
    %38 = vector.shape_cast %37 : vector<16xf32> to vector<1x16xf32>
    %cst_18 = arith.constant 1.000000e-24 : f32
    %39 = vector.broadcast %cst_18 : f32 to vector<1x16xf32>
    %40 = arith.maximumf %38, %39 : vector<1x16xf32>
    %41 = math.rsqrt %40 : vector<1x16xf32>
    %42 = vector.broadcast %41 : vector<1x16xf32> to vector<8x16xf32>
    %43 = arith.mulf %35, %42 : vector<8x16xf32>
    %c0_19 = arith.constant 0 : index
    %c0_20 = arith.constant 0 : index
    %44 = vector.load %arg5[%c0_19, %c0_20] : memref<8x1xf32, #tpu.memory_space<vmem>>, vector<8x1xf32>
    %cst_21 = arith.constant 2.82842708 : f32
    %45 = vector.broadcast %cst_21 : f32 to vector<8x1xf32>
    %46 = arith.mulf %44, %45 : vector<8x1xf32>
    %47 = vector.broadcast %46 : vector<8x1xf32> to vector<8x16xf32>
    %48 = arith.mulf %43, %47 : vector<8x16xf32>
    %49 = arith.negf %48 : vector<8x16xf32>
    %50 = math.exp %49 : vector<8x16xf32>
    %cst_22 = arith.constant 1.000000e+00 : f32
    %51 = vector.broadcast %cst_22 : f32 to vector<8x16xf32>
    %52 = arith.addf %51, %50 : vector<8x16xf32>
    %53 = arith.divf %51, %52 : vector<8x16xf32>
    %54 = arith.mulf %48, %53 : vector<8x16xf32>
    %c0_23 = arith.constant 0 : index
    %c0_24 = arith.constant 0 : index
    %55 = vector.load %arg7[%c0_23, %c0_24] : memref<8x16xbf16, #tpu.memory_space<vmem>>, vector<8x16xbf16>
    %c0_25 = arith.constant 0 : index
    %c0_26 = arith.constant 0 : index
    %c0_27 = arith.constant 0 : index
    %56 = vector.load %arg6[%c0_25, %c0_26, %c0_27] : memref<1x16x16xf32, #tpu.memory_space<vmem>>, vector<1x16x16xf32>
    %57 = vector.shape_cast %56 : vector<1x16x16xf32> to vector<16x16xf32>
    %58 = arith.truncf %57 : vector<16x16xf32> to vector<16x16xbf16>
    %cst_28 = arith.constant dense<0.000000e+00> : vector<8x16xf32>
    %59 = tpu.matmul %55, %58, %cst_28 {dimension_numbers = #tpu.dot_dimension_numbers<[1], [0], [0], [1], [0, 0, 1, 1], [], []>} : vector<8x16xbf16>, vector<16x16xbf16>, vector<8x16xf32> -> vector<8x16xf32>
    %60 = arith.addf %54, %59 : vector<8x16xf32>
    %c0_29 = arith.constant 0 : index
    %c0_30 = arith.constant 0 : index
    %61 = vector.load %arg8[%c0_29, %c0_30] : memref<8x1xf32, #tpu.memory_space<vmem>>, vector<8x1xf32>
    %62 = vector.broadcast %61 : vector<8x1xf32> to vector<8x16xf32>
    %63 = arith.addf %60, %62 : vector<8x16xf32>
    %c0_31 = arith.constant 0 : index
    %c0_32 = arith.constant 0 : index
    %c0_33 = arith.constant 0 : index
    %64 = vector.load %arg9[%c0_31, %c0_32, %c0_33] : memref<1x8x16xf32, #tpu.memory_space<vmem>>, vector<1x8x16xf32>
    %65 = vector.shape_cast %64 : vector<1x8x16xf32> to vector<8x16xf32>
    %66 = vector.shape_cast %63 : vector<8x16xf32> to vector<1x8x16xf32>
    tpu.vector_store %arg9[%c0_31, %c0_32, %c0_33], %66 {strides = array<i32>} : memref<1x8x16xf32, #tpu.memory_space<vmem>>, vector<1x8x16xf32>,
    return
  }
  func.func @transform_0(%arg0: i32) -> (i32, i32, i32) {
    %c0_i32 = arith.constant 0 : i32
    %c0_i32_0 = arith.constant 0 : i32
    %c0_i32_1 = arith.constant 0 : i32
    return %arg0, %c0_i32, %c0_i32_0 : i32, i32, i32
  }
  func.func @transform_1(%arg0: i32) -> (i32, i32) {
    %c0_i32 = arith.constant 0 : i32
    %c0_i32_0 = arith.constant 0 : i32
    %c0_i32_1 = arith.constant 0 : i32
    return %c0_i32, %c0_i32_0 : i32, i32
  }
  func.func @transform_2(%arg0: i32) -> (i32, i32) {
    %c0_i32 = arith.constant 0 : i32
    %c0_i32_0 = arith.constant 0 : i32
    %c0_i32_1 = arith.constant 0 : i32
    return %c0_i32, %c0_i32_0 : i32, i32
  }
  func.func @transform_3(%arg0: i32) -> (i32, i32) {
    %c0_i32 = arith.constant 0 : i32
    %c0_i32_0 = arith.constant 0 : i32
    %c0_i32_1 = arith.constant 0 : i32
    return %c0_i32, %c0_i32_0 : i32, i32
  }
  func.func @transform_4(%arg0: i32) -> (i32, i32) {
    %c0_i32 = arith.constant 0 : i32
    %c0_i32_0 = arith.constant 0 : i32
    %c0_i32_1 = arith.constant 0 : i32
    return %c0_i32, %c0_i32_0 : i32, i32
  }
  func.func @transform_5(%arg0: i32) -> (i32, i32, i32) {
    %c0_i32 = arith.constant 0 : i32
    %c0_i32_0 = arith.constant 0 : i32
    %c0_i32_1 = arith.constant 0 : i32
    return %arg0, %c0_i32, %c0_i32_0 : i32, i32, i32
  }
  func.func @transform_6(%arg0: i32) -> (i32, i32) {
    %c0_i32 = arith.constant 0 : i32
    %c0_i32_0 = arith.constant 0 : i32
    %c0_i32_1 = arith.constant 0 : i32
    return %c0_i32, %c0_i32_0 : i32, i32
  }
  func.func @transform_7(%arg0: i32) -> (i32, i32) {
    %c0_i32 = arith.constant 0 : i32
    %c0_i32_0 = arith.constant 0 : i32
    %c0_i32_1 = arith.constant 0 : i32
    return %c0_i32, %c0_i32_0 : i32, i32
  }
  func.func @transform_8(%arg0: i32) -> (i32, i32, i32) {
    %c0_i32 = arith.constant 0 : i32
    %c0_i32_0 = arith.constant 0 : i32
    %c0_i32_1 = arith.constant 0 : i32
    return %arg0, %c0_i32, %c0_i32_0 : i32, i32, i32
  }
}

module attributes {stable_mosaic.version = 11 : i64} {
  func.func @kernel(%arg0: i32, %arg1: memref<1x16x26xf32, #tpu.memory_space<vmem>>, %arg2: memref<8x144xbf16, #tpu.memory_space<vmem>>, %arg3: memref<8x1xf32, #tpu.memory_space<vmem>>, %arg4: memref<3x16xf32, #tpu.memory_space<vmem>>, %arg5: memref<8x1xf32, #tpu.memory_space<vmem>>, %arg6: memref<1x8x16xf32, #tpu.memory_space<vmem>>) attributes {dimension_semantics = [#tpu.dimension_semantics<parallel>], iteration_bounds = array<i64: 2>, scalar_prefetch = 0 : i64, scratch_operands = 0 : i64, tpu.core_type = #tpu.core_type<tc>, window_params = [{transform_indices = @transform_0, window_bounds = array<i64: 1, 16, 26>}, {pipeline_mode = #tpu.pipeline_mode<synchronous>, transform_indices = @transform_1, window_bounds = array<i64: 8, 144>}, {pipeline_mode = #tpu.pipeline_mode<synchronous>, transform_indices = @transform_2, window_bounds = array<i64: 8, 1>}, {pipeline_mode = #tpu.pipeline_mode<synchronous>, transform_indices = @transform_3, window_bounds = array<i64: 3, 16>}, {pipeline_mode = #tpu.pipeline_mode<synchronous>, transform_indices = @transform_4, window_bounds = array<i64: 8, 1>}, {transform_indices = @transform_5, window_bounds = array<i64: 1, 8, 16>}]} {
    %c0 = arith.constant 0 : index
    %c0_0 = arith.constant 0 : index
    %c0_1 = arith.constant 0 : index
    %0 = vector.load %arg1[%c0, %c0_0, %c0_1] : memref<1x16x26xf32, #tpu.memory_space<vmem>>, vector<1x16x26xf32>
    %1 = vector.shape_cast %0 : vector<1x16x26xf32> to vector<16x26xf32>
    %2 = vector.extract_strided_slice %1 {offsets = [0, 0], sizes = [16, 16], strides = [1, 1]} : vector<16x26xf32> to vector<16x16xf32>
    %c0_2 = arith.constant 0 : index
    %c0_3 = arith.constant 0 : index
    %3 = vector.load %arg4[%c0_2, %c0_3] : memref<3x16xf32, #tpu.memory_space<vmem>>, vector<1x16xf32>
    %4 = vector.broadcast %3 : vector<1x16xf32> to vector<16x16xf32>
    %5 = arith.mulf %2, %4 : vector<16x16xf32>
    %6 = vector.extract_strided_slice %1 {offsets = [0, 1], sizes = [16, 16], strides = [1, 1]} : vector<16x26xf32> to vector<16x16xf32>
    %7 = vector.extract_strided_slice %1 {offsets = [0, 2], sizes = [16, 16], strides = [1, 1]} : vector<16x26xf32> to vector<16x16xf32>
    %c2 = arith.constant 2 : index
    %c0_4 = arith.constant 0 : index
    %8 = vector.load %arg4[%c2, %c0_4] : memref<3x16xf32, #tpu.memory_space<vmem>>, vector<1x16xf32>
    %9 = vector.broadcast %8 : vector<1x16xf32> to vector<16x16xf32>
    %10 = arith.mulf %7, %9 : vector<16x16xf32>
    %11 = vector.extract_strided_slice %1 {offsets = [0, 4], sizes = [16, 16], strides = [1, 1]} : vector<16x26xf32> to vector<16x16xf32>
    %c0_5 = arith.constant 0 : index
    %c0_6 = arith.constant 0 : index
    %12 = vector.load %arg4[%c0_5, %c0_6] : memref<3x16xf32, #tpu.memory_space<vmem>>, vector<1x16xf32>
    %13 = vector.broadcast %12 : vector<1x16xf32> to vector<16x16xf32>
    %14 = arith.mulf %11, %13 : vector<16x16xf32>
    %15 = vector.extract_strided_slice %1 {offsets = [0, 5], sizes = [16, 16], strides = [1, 1]} : vector<16x26xf32> to vector<16x16xf32>
    %16 = vector.extract_strided_slice %1 {offsets = [0, 6], sizes = [16, 16], strides = [1, 1]} : vector<16x26xf32> to vector<16x16xf32>
    %c2_7 = arith.constant 2 : index
    %c0_8 = arith.constant 0 : index
    %17 = vector.load %arg4[%c2_7, %c0_8] : memref<3x16xf32, #tpu.memory_space<vmem>>, vector<1x16xf32>
    %18 = vector.broadcast %17 : vector<1x16xf32> to vector<16x16xf32>
    %19 = arith.mulf %16, %18 : vector<16x16xf32>
    %20 = vector.extract_strided_slice %1 {offsets = [0, 8], sizes = [16, 16], strides = [1, 1]} : vector<16x26xf32> to vector<16x16xf32>
    %c0_9 = arith.constant 0 : index
    %c0_10 = arith.constant 0 : index
    %21 = vector.load %arg4[%c0_9, %c0_10] : memref<3x16xf32, #tpu.memory_space<vmem>>, vector<1x16xf32>
    %22 = vector.broadcast %21 : vector<1x16xf32> to vector<16x16xf32>
    %23 = arith.mulf %20, %22 : vector<16x16xf32>
    %24 = vector.extract_strided_slice %1 {offsets = [0, 9], sizes = [16, 16], strides = [1, 1]} : vector<16x26xf32> to vector<16x16xf32>
    %25 = vector.extract_strided_slice %1 {offsets = [0, 10], sizes = [16, 16], strides = [1, 1]} : vector<16x26xf32> to vector<16x16xf32>
    %c2_11 = arith.constant 2 : index
    %c0_12 = arith.constant 0 : index
    %26 = vector.load %arg4[%c2_11, %c0_12] : memref<3x16xf32, #tpu.memory_space<vmem>>, vector<1x16xf32>
    %27 = vector.broadcast %26 : vector<1x16xf32> to vector<16x16xf32>
    %28 = arith.mulf %25, %27 : vector<16x16xf32>
    %29 = tpu.concatenate %5, %6, %10, %14, %15, %19, %23, %24, %28 in 0 : vector<16x16xf32>, vector<16x16xf32>, vector<16x16xf32>, vector<16x16xf32>, vector<16x16xf32>, vector<16x16xf32>, vector<16x16xf32>, vector<16x16xf32>, vector<16x16xf32> -> vector<144x16xf32>
    %c0_13 = arith.constant 0 : index
    %c0_14 = arith.constant 0 : index
    %30 = vector.load %arg2[%c0_13, %c0_14] : memref<8x144xbf16, #tpu.memory_space<vmem>>, vector<8x144xbf16>
    %31 = arith.truncf %29 : vector<144x16xf32> to vector<144x16xbf16>
    %cst = arith.constant dense<0.000000e+00> : vector<8x16xf32>
    %32 = tpu.matmul %30, %31, %cst {dimension_numbers = #tpu.dot_dimension_numbers<[1], [0], [0], [1], [0, 0, 1, 1], [], []>} : vector<8x144xbf16>, vector<144x16xbf16>, vector<8x16xf32> -> vector<8x16xf32>
    %c0_15 = arith.constant 0 : index
    %c0_16 = arith.constant 0 : index
    %33 = vector.load %arg3[%c0_15, %c0_16] : memref<8x1xf32, #tpu.memory_space<vmem>>, vector<8x1xf32>
    %34 = vector.broadcast %33 : vector<8x1xf32> to vector<8x16xf32>
    %35 = arith.addf %32, %34 : vector<8x16xf32>
    %36 = arith.mulf %35, %35 : vector<8x16xf32>
    %cst_17 = arith.constant dense<0.000000e+00> : vector<16xf32>
    %37 = vector.multi_reduction <add>, %36, %cst_17 [0] : vector<8x16xf32> to vector<16xf32>
    %38 = vector.shape_cast %37 : vector<16xf32> to vector<1x16xf32>
    %cst_18 = arith.constant 1.000000e-24 : f32
    %39 = vector.broadcast %cst_18 : f32 to vector<1x16xf32>
    %40 = arith.maximumf %38, %39 : vector<1x16xf32>
    %41 = math.rsqrt %40 : vector<1x16xf32>
    %42 = vector.broadcast %41 : vector<1x16xf32> to vector<8x16xf32>
    %43 = arith.mulf %35, %42 : vector<8x16xf32>
    %c0_19 = arith.constant 0 : index
    %c0_20 = arith.constant 0 : index
    %44 = vector.load %arg5[%c0_19, %c0_20] : memref<8x1xf32, #tpu.memory_space<vmem>>, vector<8x1xf32>
    %cst_21 = arith.constant 2.82842708 : f32
    %45 = vector.broadcast %cst_21 : f32 to vector<8x1xf32>
    %46 = arith.mulf %44, %45 : vector<8x1xf32>
    %47 = vector.broadcast %46 : vector<8x1xf32> to vector<8x16xf32>
    %48 = arith.mulf %43, %47 : vector<8x16xf32>
    %49 = arith.negf %48 : vector<8x16xf32>
    %50 = math.exp %49 : vector<8x16xf32>
    %cst_22 = arith.constant 1.000000e+00 : f32
    %51 = vector.broadcast %cst_22 : f32 to vector<8x16xf32>
    %52 = arith.addf %51, %50 : vector<8x16xf32>
    %53 = arith.divf %51, %52 : vector<8x16xf32>
    %54 = arith.mulf %48, %53 : vector<8x16xf32>
    %c0_23 = arith.constant 0 : index
    %c0_24 = arith.constant 0 : index
    %c0_25 = arith.constant 0 : index
    %55 = vector.load %arg6[%c0_23, %c0_24, %c0_25] : memref<1x8x16xf32, #tpu.memory_space<vmem>>, vector<1x8x16xf32>
    %56 = vector.shape_cast %55 : vector<1x8x16xf32> to vector<8x16xf32>
    %57 = vector.shape_cast %54 : vector<8x16xf32> to vector<1x8x16xf32>
    tpu.vector_store %arg6[%c0_23, %c0_24, %c0_25], %57 {strides = array<i32>} : memref<1x8x16xf32, #tpu.memory_space<vmem>>, vector<1x8x16xf32>,
    return
  }
  func.func @transform_0(%arg0: i32) -> (i32, i32, i32) {
    %c0_i32 = arith.constant 0 : i32
    %c0_i32_0 = arith.constant 0 : i32
    %c0_i32_1 = arith.constant 0 : i32
    return %arg0, %c0_i32, %c0_i32_0 : i32, i32, i32
  }
  func.func @transform_1(%arg0: i32) -> (i32, i32) {
    %c0_i32 = arith.constant 0 : i32
    %c0_i32_0 = arith.constant 0 : i32
    %c0_i32_1 = arith.constant 0 : i32
    return %c0_i32, %c0_i32_0 : i32, i32
  }
  func.func @transform_2(%arg0: i32) -> (i32, i32) {
    %c0_i32 = arith.constant 0 : i32
    %c0_i32_0 = arith.constant 0 : i32
    %c0_i32_1 = arith.constant 0 : i32
    return %c0_i32, %c0_i32_0 : i32, i32
  }
  func.func @transform_3(%arg0: i32) -> (i32, i32) {
    %c0_i32 = arith.constant 0 : i32
    %c0_i32_0 = arith.constant 0 : i32
    %c0_i32_1 = arith.constant 0 : i32
    return %c0_i32, %c0_i32_0 : i32, i32
  }
  func.func @transform_4(%arg0: i32) -> (i32, i32) {
    %c0_i32 = arith.constant 0 : i32
    %c0_i32_0 = arith.constant 0 : i32
    %c0_i32_1 = arith.constant 0 : i32
    return %c0_i32, %c0_i32_0 : i32, i32
  }
  func.func @transform_5(%arg0: i32) -> (i32, i32, i32) {
    %c0_i32 = arith.constant 0 : i32
    %c0_i32_0 = arith.constant 0 : i32
    %c0_i32_1 = arith.constant 0 : i32
    return %arg0, %c0_i32, %c0_i32_0 : i32, i32, i32
  }
}

module attributes {stable_mosaic.version = 11 : i64} {
  func.func @_vae_head_kernel(%arg0: i32, %arg1: memref<1x8x16xf32, #tpu.memory_space<vmem>>, %arg2: memref<8x8xbf16, #tpu.memory_space<vmem>>, %arg3: memref<8x1xf32, #tpu.memory_space<vmem>>, %arg4: memref<8x8xbf16, #tpu.memory_space<vmem>>, %arg5: memref<8x1xf32, #tpu.memory_space<vmem>>, %arg6: memref<1x8x16xf32, #tpu.memory_space<vmem>>, %arg7: memref<1x8x16xf32, #tpu.memory_space<vmem>>, %arg8: memref<1x8x16xf32, #tpu.memory_space<vmem>>, %arg9: memref<1x8x16xf32, #tpu.memory_space<vmem>>) attributes {dimension_semantics = [#tpu.dimension_semantics<parallel>], iteration_bounds = array<i64: 2>, scalar_prefetch = 0 : i64, scratch_operands = 0 : i64, tpu.core_type = #tpu.core_type<tc>, window_params = [{transform_indices = @transform_0, window_bounds = array<i64: 1, 8, 16>}, {pipeline_mode = #tpu.pipeline_mode<synchronous>, transform_indices = @transform_1, window_bounds = array<i64: 8, 8>}, {pipeline_mode = #tpu.pipeline_mode<synchronous>, transform_indices = @transform_2, window_bounds = array<i64: 8, 1>}, {pipeline_mode = #tpu.pipeline_mode<synchronous>, transform_indices = @transform_3, window_bounds = array<i64: 8, 8>}, {pipeline_mode = #tpu.pipeline_mode<synchronous>, transform_indices = @transform_4, window_bounds = array<i64: 8, 1>}, {transform_indices = @transform_5, window_bounds = array<i64: 1, 8, 16>}, {transform_indices = @transform_6, window_bounds = array<i64: 1, 8, 16>}, {transform_indices = @transform_7, window_bounds = array<i64: 1, 8, 16>}, {transform_indices = @transform_8, window_bounds = array<i64: 1, 8, 16>}]} {
    %c0 = arith.constant 0 : index
    %c0_0 = arith.constant 0 : index
    %c0_1 = arith.constant 0 : index
    %0 = vector.load %arg1[%c0, %c0_0, %c0_1] : memref<1x8x16xf32, #tpu.memory_space<vmem>>, vector<1x8x16xf32>
    %1 = vector.shape_cast %0 : vector<1x8x16xf32> to vector<8x16xf32>
    %2 = arith.truncf %1 : vector<8x16xf32> to vector<8x16xbf16>
    %c0_2 = arith.constant 0 : index
    %c0_3 = arith.constant 0 : index
    %3 = vector.load %arg2[%c0_2, %c0_3] : memref<8x8xbf16, #tpu.memory_space<vmem>>, vector<8x8xbf16>
    %cst = arith.constant dense<0.000000e+00> : vector<8x16xf32>
    %4 = tpu.matmul %3, %2, %cst {dimension_numbers = #tpu.dot_dimension_numbers<[1], [0], [0], [1], [0, 0, 1, 1], [], []>} : vector<8x8xbf16>, vector<8x16xbf16>, vector<8x16xf32> -> vector<8x16xf32>
    %c0_4 = arith.constant 0 : index
    %c0_5 = arith.constant 0 : index
    %5 = vector.load %arg3[%c0_4, %c0_5] : memref<8x1xf32, #tpu.memory_space<vmem>>, vector<8x1xf32>
    %6 = vector.broadcast %5 : vector<8x1xf32> to vector<8x16xf32>
    %7 = arith.addf %4, %6 : vector<8x16xf32>
    %c0_6 = arith.constant 0 : index
    %c0_7 = arith.constant 0 : index
    %8 = vector.load %arg4[%c0_6, %c0_7] : memref<8x8xbf16, #tpu.memory_space<vmem>>, vector<8x8xbf16>
    %cst_8 = arith.constant dense<0.000000e+00> : vector<8x16xf32>
    %9 = tpu.matmul %8, %2, %cst_8 {dimension_numbers = #tpu.dot_dimension_numbers<[1], [0], [0], [1], [0, 0, 1, 1], [], []>} : vector<8x8xbf16>, vector<8x16xbf16>, vector<8x16xf32> -> vector<8x16xf32>
    %c0_9 = arith.constant 0 : index
    %c0_10 = arith.constant 0 : index
    %10 = vector.load %arg5[%c0_9, %c0_10] : memref<8x1xf32, #tpu.memory_space<vmem>>, vector<8x1xf32>
    %11 = vector.broadcast %10 : vector<8x1xf32> to vector<8x16xf32>
    %12 = arith.addf %9, %11 : vector<8x16xf32>
    %cst_11 = arith.constant -1.000000e+01 : f32
    %cst_12 = arith.constant 1.000000e+01 : f32
    %13 = vector.broadcast %cst_11 : f32 to vector<8x16xf32>
    %14 = arith.maximumf %13, %12 : vector<8x16xf32>
    %15 = vector.broadcast %cst_12 : f32 to vector<8x16xf32>
    %16 = arith.minimumf %15, %14 : vector<8x16xf32>
    %c0_13 = arith.constant 0 : index
    %c0_14 = arith.constant 0 : index
    %c0_15 = arith.constant 0 : index
    %17 = vector.load %arg6[%c0_13, %c0_14, %c0_15] : memref<1x8x16xf32, #tpu.memory_space<vmem>>, vector<1x8x16xf32>
    %18 = vector.shape_cast %17 : vector<1x8x16xf32> to vector<8x16xf32>
    %cst_16 = arith.constant 5.000000e-01 : f32
    %19 = vector.broadcast %cst_16 : f32 to vector<8x16xf32>
    %20 = arith.mulf %19, %16 : vector<8x16xf32>
    %21 = math.exp %20 : vector<8x16xf32>
    %22 = arith.mulf %18, %21 : vector<8x16xf32>
    %23 = arith.addf %7, %22 : vector<8x16xf32>
    %c0_17 = arith.constant 0 : index
    %c0_18 = arith.constant 0 : index
    %c0_19 = arith.constant 0 : index
    %24 = vector.load %arg7[%c0_17, %c0_18, %c0_19] : memref<1x8x16xf32, #tpu.memory_space<vmem>>, vector<1x8x16xf32>
    %25 = vector.shape_cast %24 : vector<1x8x16xf32> to vector<8x16xf32>
    %26 = vector.shape_cast %7 : vector<8x16xf32> to vector<1x8x16xf32>
    tpu.vector_store %arg7[%c0_17, %c0_18, %c0_19], %26 {strides = array<i32>} : memref<1x8x16xf32, #tpu.memory_space<vmem>>, vector<1x8x16xf32>,
    %c0_20 = arith.constant 0 : index
    %c0_21 = arith.constant 0 : index
    %c0_22 = arith.constant 0 : index
    %27 = vector.load %arg8[%c0_20, %c0_21, %c0_22] : memref<1x8x16xf32, #tpu.memory_space<vmem>>, vector<1x8x16xf32>
    %28 = vector.shape_cast %27 : vector<1x8x16xf32> to vector<8x16xf32>
    %29 = vector.shape_cast %16 : vector<8x16xf32> to vector<1x8x16xf32>
    tpu.vector_store %arg8[%c0_20, %c0_21, %c0_22], %29 {strides = array<i32>} : memref<1x8x16xf32, #tpu.memory_space<vmem>>, vector<1x8x16xf32>,
    %c0_23 = arith.constant 0 : index
    %c0_24 = arith.constant 0 : index
    %c0_25 = arith.constant 0 : index
    %30 = vector.load %arg9[%c0_23, %c0_24, %c0_25] : memref<1x8x16xf32, #tpu.memory_space<vmem>>, vector<1x8x16xf32>
    %31 = vector.shape_cast %30 : vector<1x8x16xf32> to vector<8x16xf32>
    %32 = vector.shape_cast %23 : vector<8x16xf32> to vector<1x8x16xf32>
    tpu.vector_store %arg9[%c0_23, %c0_24, %c0_25], %32 {strides = array<i32>} : memref<1x8x16xf32, #tpu.memory_space<vmem>>, vector<1x8x16xf32>,
    return
  }
  func.func @transform_0(%arg0: i32) -> (i32, i32, i32) {
    %c0_i32 = arith.constant 0 : i32
    %c0_i32_0 = arith.constant 0 : i32
    %c0_i32_1 = arith.constant 0 : i32
    return %arg0, %c0_i32, %c0_i32_0 : i32, i32, i32
  }
  func.func @transform_1(%arg0: i32) -> (i32, i32) {
    %c0_i32 = arith.constant 0 : i32
    %c0_i32_0 = arith.constant 0 : i32
    %c0_i32_1 = arith.constant 0 : i32
    return %c0_i32, %c0_i32_0 : i32, i32
  }
  func.func @transform_2(%arg0: i32) -> (i32, i32) {
    %c0_i32 = arith.constant 0 : i32
    %c0_i32_0 = arith.constant 0 : i32
    %c0_i32_1 = arith.constant 0 : i32
    return %c0_i32, %c0_i32_0 : i32, i32
  }
  func.func @transform_3(%arg0: i32) -> (i32, i32) {
    %c0_i32 = arith.constant 0 : i32
    %c0_i32_0 = arith.constant 0 : i32
    %c0_i32_1 = arith.constant 0 : i32
    return %c0_i32, %c0_i32_0 : i32, i32
  }
  func.func @transform_4(%arg0: i32) -> (i32, i32) {
    %c0_i32 = arith.constant 0 : i32
    %c0_i32_0 = arith.constant 0 : i32
    %c0_i32_1 = arith.constant 0 : i32
    return %c0_i32, %c0_i32_0 : i32, i32
  }
  func.func @transform_5(%arg0: i32) -> (i32, i32, i32) {
    %c0_i32 = arith.constant 0 : i32
    %c0_i32_0 = arith.constant 0 : i32
    %c0_i32_1 = arith.constant 0 : i32
    return %arg0, %c0_i32, %c0_i32_0 : i32, i32, i32
  }
  func.func @transform_6(%arg0: i32) -> (i32, i32, i32) {
    %c0_i32 = arith.constant 0 : i32
    %c0_i32_0 = arith.constant 0 : i32
    %c0_i32_1 = arith.constant 0 : i32
    return %arg0, %c0_i32, %c0_i32_0 : i32, i32, i32
  }
  func.func @transform_7(%arg0: i32) -> (i32, i32, i32) {
    %c0_i32 = arith.constant 0 : i32
    %c0_i32_0 = arith.constant 0 : i32
    %c0_i32_1 = arith.constant 0 : i32
    return %arg0, %c0_i32, %c0_i32_0 : i32, i32, i32
  }
  func.func @transform_8(%arg0: i32) -> (i32, i32, i32) {
    %c0_i32 = arith.constant 0 : i32
    %c0_i32_0 = arith.constant 0 : i32
    %c0_i32_1 = arith.constant 0 : i32
    return %arg0, %c0_i32, %c0_i32_0 : i32, i32, i32
  }
}

module attributes {stable_mosaic.version = 11 : i64} {
  func.func @kernel(%arg0: i32, %arg1: memref<1x8x16xf32, #tpu.memory_space<vmem>>, %arg2: memref<8x8xbf16, #tpu.memory_space<vmem>>, %arg3: memref<8x1xf32, #tpu.memory_space<vmem>>, %arg4: memref<1x8x16xf32, #tpu.memory_space<vmem>>) attributes {dimension_semantics = [#tpu.dimension_semantics<parallel>], iteration_bounds = array<i64: 2>, scalar_prefetch = 0 : i64, scratch_operands = 0 : i64, tpu.core_type = #tpu.core_type<tc>, window_params = [{transform_indices = @transform_0, window_bounds = array<i64: 1, 8, 16>}, {pipeline_mode = #tpu.pipeline_mode<synchronous>, transform_indices = @transform_1, window_bounds = array<i64: 8, 8>}, {pipeline_mode = #tpu.pipeline_mode<synchronous>, transform_indices = @transform_2, window_bounds = array<i64: 8, 1>}, {transform_indices = @transform_3, window_bounds = array<i64: 1, 8, 16>}]} {
    %c0 = arith.constant 0 : index
    %c0_0 = arith.constant 0 : index
    %c0_1 = arith.constant 0 : index
    %0 = vector.load %arg1[%c0, %c0_0, %c0_1] : memref<1x8x16xf32, #tpu.memory_space<vmem>>, vector<1x8x16xf32>
    %1 = vector.shape_cast %0 : vector<1x8x16xf32> to vector<8x16xf32>
    %c0_2 = arith.constant 0 : index
    %c0_3 = arith.constant 0 : index
    %2 = vector.load %arg2[%c0_2, %c0_3] : memref<8x8xbf16, #tpu.memory_space<vmem>>, vector<8x8xbf16>
    %3 = arith.truncf %1 : vector<8x16xf32> to vector<8x16xbf16>
    %cst = arith.constant dense<0.000000e+00> : vector<8x16xf32>
    %4 = tpu.matmul %2, %3, %cst {dimension_numbers = #tpu.dot_dimension_numbers<[1], [0], [0], [1], [0, 0, 1, 1], [], []>} : vector<8x8xbf16>, vector<8x16xbf16>, vector<8x16xf32> -> vector<8x16xf32>
    %c0_4 = arith.constant 0 : index
    %c0_5 = arith.constant 0 : index
    %5 = vector.load %arg3[%c0_4, %c0_5] : memref<8x1xf32, #tpu.memory_space<vmem>>, vector<8x1xf32>
    %6 = vector.broadcast %5 : vector<8x1xf32> to vector<8x16xf32>
    %7 = arith.addf %4, %6 : vector<8x16xf32>
    %c0_6 = arith.constant 0 : index
    %c0_7 = arith.constant 0 : index
    %c0_8 = arith.constant 0 : index
    %8 = vector.load %arg4[%c0_6, %c0_7, %c0_8] : memref<1x8x16xf32, #tpu.memory_space<vmem>>, vector<1x8x16xf32>
    %9 = vector.shape_cast %8 : vector<1x8x16xf32> to vector<8x16xf32>
    %10 = vector.shape_cast %7 : vector<8x16xf32> to vector<1x8x16xf32>
    tpu.vector_store %arg4[%c0_6, %c0_7, %c0_8], %10 {strides = array<i32>} : memref<1x8x16xf32, #tpu.memory_space<vmem>>, vector<1x8x16xf32>,
    return
  }
  func.func @transform_0(%arg0: i32) -> (i32, i32, i32) {
    %c0_i32 = arith.constant 0 : i32
    %c0_i32_0 = arith.constant 0 : i32
    %c0_i32_1 = arith.constant 0 : i32
    return %arg0, %c0_i32, %c0_i32_0 : i32, i32, i32
  }
  func.func @transform_1(%arg0: i32) -> (i32, i32) {
    %c0_i32 = arith.constant 0 : i32
    %c0_i32_0 = arith.constant 0 : i32
    %c0_i32_1 = arith.constant 0 : i32
    return %c0_i32, %c0_i32_0 : i32, i32
  }
  func.func @transform_2(%arg0: i32) -> (i32, i32) {
    %c0_i32 = arith.constant 0 : i32
    %c0_i32_0 = arith.constant 0 : i32
    %c0_i32_1 = arith.constant 0 : i32
    return %c0_i32, %c0_i32_0 : i32, i32
  }
  func.func @transform_3(%arg0: i32) -> (i32, i32, i32) {
    %c0_i32 = arith.constant 0 : i32
    %c0_i32_0 = arith.constant 0 : i32
    %c0_i32_1 = arith.constant 0 : i32
    return %arg0, %c0_i32, %c0_i32_0 : i32, i32, i32
  }
}

module attributes {stable_mosaic.version = 11 : i64} {
  func.func @kernel(%arg0: i32, %arg1: memref<1x8x26xf32, #tpu.memory_space<vmem>>, %arg2: memref<16x72xbf16, #tpu.memory_space<vmem>>, %arg3: memref<16x1xf32, #tpu.memory_space<vmem>>, %arg4: memref<3x16xf32, #tpu.memory_space<vmem>>, %arg5: memref<16x1xf32, #tpu.memory_space<vmem>>, %arg6: memref<1x16x16xf32, #tpu.memory_space<vmem>>) attributes {dimension_semantics = [#tpu.dimension_semantics<parallel>], iteration_bounds = array<i64: 2>, scalar_prefetch = 0 : i64, scratch_operands = 0 : i64, tpu.core_type = #tpu.core_type<tc>, window_params = [{transform_indices = @transform_0, window_bounds = array<i64: 1, 8, 26>}, {pipeline_mode = #tpu.pipeline_mode<synchronous>, transform_indices = @transform_1, window_bounds = array<i64: 16, 72>}, {pipeline_mode = #tpu.pipeline_mode<synchronous>, transform_indices = @transform_2, window_bounds = array<i64: 16, 1>}, {pipeline_mode = #tpu.pipeline_mode<synchronous>, transform_indices = @transform_3, window_bounds = array<i64: 3, 16>}, {pipeline_mode = #tpu.pipeline_mode<synchronous>, transform_indices = @transform_4, window_bounds = array<i64: 16, 1>}, {transform_indices = @transform_5, window_bounds = array<i64: 1, 16, 16>}]} {
    %c0 = arith.constant 0 : index
    %c0_0 = arith.constant 0 : index
    %c0_1 = arith.constant 0 : index
    %0 = vector.load %arg1[%c0, %c0_0, %c0_1] : memref<1x8x26xf32, #tpu.memory_space<vmem>>, vector<1x8x26xf32>
    %1 = vector.shape_cast %0 : vector<1x8x26xf32> to vector<8x26xf32>
    %2 = vector.extract_strided_slice %1 {offsets = [0, 0], sizes = [8, 16], strides = [1, 1]} : vector<8x26xf32> to vector<8x16xf32>
    %c0_2 = arith.constant 0 : index
    %c0_3 = arith.constant 0 : index
    %3 = vector.load %arg4[%c0_2, %c0_3] : memref<3x16xf32, #tpu.memory_space<vmem>>, vector<1x16xf32>
    %4 = vector.broadcast %3 : vector<1x16xf32> to vector<8x16xf32>
    %5 = arith.mulf %2, %4 : vector<8x16xf32>
    %6 = vector.extract_strided_slice %1 {offsets = [0, 1], sizes = [8, 16], strides = [1, 1]} : vector<8x26xf32> to vector<8x16xf32>
    %7 = vector.extract_strided_slice %1 {offsets = [0, 2], sizes = [8, 16], strides = [1, 1]} : vector<8x26xf32> to vector<8x16xf32>
    %c2 = arith.constant 2 : index
    %c0_4 = arith.constant 0 : index
    %8 = vector.load %arg4[%c2, %c0_4] : memref<3x16xf32, #tpu.memory_space<vmem>>, vector<1x16xf32>
    %9 = vector.broadcast %8 : vector<1x16xf32> to vector<8x16xf32>
    %10 = arith.mulf %7, %9 : vector<8x16xf32>
    %11 = vector.extract_strided_slice %1 {offsets = [0, 4], sizes = [8, 16], strides = [1, 1]} : vector<8x26xf32> to vector<8x16xf32>
    %c0_5 = arith.constant 0 : index
    %c0_6 = arith.constant 0 : index
    %12 = vector.load %arg4[%c0_5, %c0_6] : memref<3x16xf32, #tpu.memory_space<vmem>>, vector<1x16xf32>
    %13 = vector.broadcast %12 : vector<1x16xf32> to vector<8x16xf32>
    %14 = arith.mulf %11, %13 : vector<8x16xf32>
    %15 = vector.extract_strided_slice %1 {offsets = [0, 5], sizes = [8, 16], strides = [1, 1]} : vector<8x26xf32> to vector<8x16xf32>
    %16 = vector.extract_strided_slice %1 {offsets = [0, 6], sizes = [8, 16], strides = [1, 1]} : vector<8x26xf32> to vector<8x16xf32>
    %c2_7 = arith.constant 2 : index
    %c0_8 = arith.constant 0 : index
    %17 = vector.load %arg4[%c2_7, %c0_8] : memref<3x16xf32, #tpu.memory_space<vmem>>, vector<1x16xf32>
    %18 = vector.broadcast %17 : vector<1x16xf32> to vector<8x16xf32>
    %19 = arith.mulf %16, %18 : vector<8x16xf32>
    %20 = vector.extract_strided_slice %1 {offsets = [0, 8], sizes = [8, 16], strides = [1, 1]} : vector<8x26xf32> to vector<8x16xf32>
    %c0_9 = arith.constant 0 : index
    %c0_10 = arith.constant 0 : index
    %21 = vector.load %arg4[%c0_9, %c0_10] : memref<3x16xf32, #tpu.memory_space<vmem>>, vector<1x16xf32>
    %22 = vector.broadcast %21 : vector<1x16xf32> to vector<8x16xf32>
    %23 = arith.mulf %20, %22 : vector<8x16xf32>
    %24 = vector.extract_strided_slice %1 {offsets = [0, 9], sizes = [8, 16], strides = [1, 1]} : vector<8x26xf32> to vector<8x16xf32>
    %25 = vector.extract_strided_slice %1 {offsets = [0, 10], sizes = [8, 16], strides = [1, 1]} : vector<8x26xf32> to vector<8x16xf32>
    %c2_11 = arith.constant 2 : index
    %c0_12 = arith.constant 0 : index
    %26 = vector.load %arg4[%c2_11, %c0_12] : memref<3x16xf32, #tpu.memory_space<vmem>>, vector<1x16xf32>
    %27 = vector.broadcast %26 : vector<1x16xf32> to vector<8x16xf32>
    %28 = arith.mulf %25, %27 : vector<8x16xf32>
    %29 = tpu.concatenate %5, %6, %10, %14, %15, %19, %23, %24, %28 in 0 : vector<8x16xf32>, vector<8x16xf32>, vector<8x16xf32>, vector<8x16xf32>, vector<8x16xf32>, vector<8x16xf32>, vector<8x16xf32>, vector<8x16xf32>, vector<8x16xf32> -> vector<72x16xf32>
    %c0_13 = arith.constant 0 : index
    %c0_14 = arith.constant 0 : index
    %30 = vector.load %arg2[%c0_13, %c0_14] : memref<16x72xbf16, #tpu.memory_space<vmem>>, vector<16x72xbf16>
    %31 = arith.truncf %29 : vector<72x16xf32> to vector<72x16xbf16>
    %cst = arith.constant dense<0.000000e+00> : vector<16x16xf32>
    %32 = tpu.matmul %30, %31, %cst {dimension_numbers = #tpu.dot_dimension_numbers<[1], [0], [0], [1], [0, 0, 1, 1], [], []>} : vector<16x72xbf16>, vector<72x16xbf16>, vector<16x16xf32> -> vector<16x16xf32>
    %c0_15 = arith.constant 0 : index
    %c0_16 = arith.constant 0 : index
    %33 = vector.load %arg3[%c0_15, %c0_16] : memref<16x1xf32, #tpu.memory_space<vmem>>, vector<16x1xf32>
    %34 = vector.broadcast %33 : vector<16x1xf32> to vector<16x16xf32>
    %35 = arith.addf %32, %34 : vector<16x16xf32>
    %36 = arith.mulf %35, %35 : vector<16x16xf32>
    %cst_17 = arith.constant dense<0.000000e+00> : vector<16xf32>
    %37 = vector.multi_reduction <add>, %36, %cst_17 [0] : vector<16x16xf32> to vector<16xf32>
    %38 = vector.shape_cast %37 : vector<16xf32> to vector<1x16xf32>
    %cst_18 = arith.constant 1.000000e-24 : f32
    %39 = vector.broadcast %cst_18 : f32 to vector<1x16xf32>
    %40 = arith.maximumf %38, %39 : vector<1x16xf32>
    %41 = math.rsqrt %40 : vector<1x16xf32>
    %42 = vector.broadcast %41 : vector<1x16xf32> to vector<16x16xf32>
    %43 = arith.mulf %35, %42 : vector<16x16xf32>
    %c0_19 = arith.constant 0 : index
    %c0_20 = arith.constant 0 : index
    %44 = vector.load %arg5[%c0_19, %c0_20] : memref<16x1xf32, #tpu.memory_space<vmem>>, vector<16x1xf32>
    %cst_21 = arith.constant 4.000000e+00 : f32
    %45 = vector.broadcast %cst_21 : f32 to vector<16x1xf32>
    %46 = arith.mulf %44, %45 : vector<16x1xf32>
    %47 = vector.broadcast %46 : vector<16x1xf32> to vector<16x16xf32>
    %48 = arith.mulf %43, %47 : vector<16x16xf32>
    %49 = arith.negf %48 : vector<16x16xf32>
    %50 = math.exp %49 : vector<16x16xf32>
    %cst_22 = arith.constant 1.000000e+00 : f32
    %51 = vector.broadcast %cst_22 : f32 to vector<16x16xf32>
    %52 = arith.addf %51, %50 : vector<16x16xf32>
    %53 = arith.divf %51, %52 : vector<16x16xf32>
    %54 = arith.mulf %48, %53 : vector<16x16xf32>
    %c0_23 = arith.constant 0 : index
    %c0_24 = arith.constant 0 : index
    %c0_25 = arith.constant 0 : index
    %55 = vector.load %arg6[%c0_23, %c0_24, %c0_25] : memref<1x16x16xf32, #tpu.memory_space<vmem>>, vector<1x16x16xf32>
    %56 = vector.shape_cast %55 : vector<1x16x16xf32> to vector<16x16xf32>
    %57 = vector.shape_cast %54 : vector<16x16xf32> to vector<1x16x16xf32>
    tpu.vector_store %arg6[%c0_23, %c0_24, %c0_25], %57 {strides = array<i32>} : memref<1x16x16xf32, #tpu.memory_space<vmem>>, vector<1x16x16xf32>,
    return
  }
  func.func @transform_0(%arg0: i32) -> (i32, i32, i32) {
    %c0_i32 = arith.constant 0 : i32
    %c0_i32_0 = arith.constant 0 : i32
    %c0_i32_1 = arith.constant 0 : i32
    return %arg0, %c0_i32, %c0_i32_0 : i32, i32, i32
  }
  func.func @transform_1(%arg0: i32) -> (i32, i32) {
    %c0_i32 = arith.constant 0 : i32
    %c0_i32_0 = arith.constant 0 : i32
    %c0_i32_1 = arith.constant 0 : i32
    return %c0_i32, %c0_i32_0 : i32, i32
  }
  func.func @transform_2(%arg0: i32) -> (i32, i32) {
    %c0_i32 = arith.constant 0 : i32
    %c0_i32_0 = arith.constant 0 : i32
    %c0_i32_1 = arith.constant 0 : i32
    return %c0_i32, %c0_i32_0 : i32, i32
  }
  func.func @transform_3(%arg0: i32) -> (i32, i32) {
    %c0_i32 = arith.constant 0 : i32
    %c0_i32_0 = arith.constant 0 : i32
    %c0_i32_1 = arith.constant 0 : i32
    return %c0_i32, %c0_i32_0 : i32, i32
  }
  func.func @transform_4(%arg0: i32) -> (i32, i32) {
    %c0_i32 = arith.constant 0 : i32
    %c0_i32_0 = arith.constant 0 : i32
    %c0_i32_1 = arith.constant 0 : i32
    return %c0_i32, %c0_i32_0 : i32, i32
  }
  func.func @transform_5(%arg0: i32) -> (i32, i32, i32) {
    %c0_i32 = arith.constant 0 : i32
    %c0_i32_0 = arith.constant 0 : i32
    %c0_i32_1 = arith.constant 0 : i32
    return %arg0, %c0_i32, %c0_i32_0 : i32, i32, i32
  }
}

module attributes {stable_mosaic.version = 11 : i64} {
  func.func @kernel(%arg0: i32, %arg1: memref<1x16x26xf32, #tpu.memory_space<vmem>>, %arg2: memref<16x144xbf16, #tpu.memory_space<vmem>>, %arg3: memref<16x1xf32, #tpu.memory_space<vmem>>, %arg4: memref<3x16xf32, #tpu.memory_space<vmem>>, %arg5: memref<16x1xf32, #tpu.memory_space<vmem>>, %arg6: memref<1x8x16xf32, #tpu.memory_space<vmem>>, %arg7: memref<16x8xbf16, #tpu.memory_space<vmem>>, %arg8: memref<16x1xf32, #tpu.memory_space<vmem>>, %arg9: memref<1x16x16xf32, #tpu.memory_space<vmem>>) attributes {dimension_semantics = [#tpu.dimension_semantics<parallel>], iteration_bounds = array<i64: 2>, scalar_prefetch = 0 : i64, scratch_operands = 0 : i64, tpu.core_type = #tpu.core_type<tc>, window_params = [{transform_indices = @transform_0, window_bounds = array<i64: 1, 16, 26>}, {pipeline_mode = #tpu.pipeline_mode<synchronous>, transform_indices = @transform_1, window_bounds = array<i64: 16, 144>}, {pipeline_mode = #tpu.pipeline_mode<synchronous>, transform_indices = @transform_2, window_bounds = array<i64: 16, 1>}, {pipeline_mode = #tpu.pipeline_mode<synchronous>, transform_indices = @transform_3, window_bounds = array<i64: 3, 16>}, {pipeline_mode = #tpu.pipeline_mode<synchronous>, transform_indices = @transform_4, window_bounds = array<i64: 16, 1>}, {transform_indices = @transform_5, window_bounds = array<i64: 1, 8, 16>}, {pipeline_mode = #tpu.pipeline_mode<synchronous>, transform_indices = @transform_6, window_bounds = array<i64: 16, 8>}, {pipeline_mode = #tpu.pipeline_mode<synchronous>, transform_indices = @transform_7, window_bounds = array<i64: 16, 1>}, {transform_indices = @transform_8, window_bounds = array<i64: 1, 16, 16>}]} {
    %c0 = arith.constant 0 : index
    %c0_0 = arith.constant 0 : index
    %c0_1 = arith.constant 0 : index
    %0 = vector.load %arg1[%c0, %c0_0, %c0_1] : memref<1x16x26xf32, #tpu.memory_space<vmem>>, vector<1x16x26xf32>
    %1 = vector.shape_cast %0 : vector<1x16x26xf32> to vector<16x26xf32>
    %2 = vector.extract_strided_slice %1 {offsets = [0, 0], sizes = [16, 16], strides = [1, 1]} : vector<16x26xf32> to vector<16x16xf32>
    %c0_2 = arith.constant 0 : index
    %c0_3 = arith.constant 0 : index
    %3 = vector.load %arg4[%c0_2, %c0_3] : memref<3x16xf32, #tpu.memory_space<vmem>>, vector<1x16xf32>
    %4 = vector.broadcast %3 : vector<1x16xf32> to vector<16x16xf32>
    %5 = arith.mulf %2, %4 : vector<16x16xf32>
    %6 = vector.extract_strided_slice %1 {offsets = [0, 1], sizes = [16, 16], strides = [1, 1]} : vector<16x26xf32> to vector<16x16xf32>
    %7 = vector.extract_strided_slice %1 {offsets = [0, 2], sizes = [16, 16], strides = [1, 1]} : vector<16x26xf32> to vector<16x16xf32>
    %c2 = arith.constant 2 : index
    %c0_4 = arith.constant 0 : index
    %8 = vector.load %arg4[%c2, %c0_4] : memref<3x16xf32, #tpu.memory_space<vmem>>, vector<1x16xf32>
    %9 = vector.broadcast %8 : vector<1x16xf32> to vector<16x16xf32>
    %10 = arith.mulf %7, %9 : vector<16x16xf32>
    %11 = vector.extract_strided_slice %1 {offsets = [0, 4], sizes = [16, 16], strides = [1, 1]} : vector<16x26xf32> to vector<16x16xf32>
    %c0_5 = arith.constant 0 : index
    %c0_6 = arith.constant 0 : index
    %12 = vector.load %arg4[%c0_5, %c0_6] : memref<3x16xf32, #tpu.memory_space<vmem>>, vector<1x16xf32>
    %13 = vector.broadcast %12 : vector<1x16xf32> to vector<16x16xf32>
    %14 = arith.mulf %11, %13 : vector<16x16xf32>
    %15 = vector.extract_strided_slice %1 {offsets = [0, 5], sizes = [16, 16], strides = [1, 1]} : vector<16x26xf32> to vector<16x16xf32>
    %16 = vector.extract_strided_slice %1 {offsets = [0, 6], sizes = [16, 16], strides = [1, 1]} : vector<16x26xf32> to vector<16x16xf32>
    %c2_7 = arith.constant 2 : index
    %c0_8 = arith.constant 0 : index
    %17 = vector.load %arg4[%c2_7, %c0_8] : memref<3x16xf32, #tpu.memory_space<vmem>>, vector<1x16xf32>
    %18 = vector.broadcast %17 : vector<1x16xf32> to vector<16x16xf32>
    %19 = arith.mulf %16, %18 : vector<16x16xf32>
    %20 = vector.extract_strided_slice %1 {offsets = [0, 8], sizes = [16, 16], strides = [1, 1]} : vector<16x26xf32> to vector<16x16xf32>
    %c0_9 = arith.constant 0 : index
    %c0_10 = arith.constant 0 : index
    %21 = vector.load %arg4[%c0_9, %c0_10] : memref<3x16xf32, #tpu.memory_space<vmem>>, vector<1x16xf32>
    %22 = vector.broadcast %21 : vector<1x16xf32> to vector<16x16xf32>
    %23 = arith.mulf %20, %22 : vector<16x16xf32>
    %24 = vector.extract_strided_slice %1 {offsets = [0, 9], sizes = [16, 16], strides = [1, 1]} : vector<16x26xf32> to vector<16x16xf32>
    %25 = vector.extract_strided_slice %1 {offsets = [0, 10], sizes = [16, 16], strides = [1, 1]} : vector<16x26xf32> to vector<16x16xf32>
    %c2_11 = arith.constant 2 : index
    %c0_12 = arith.constant 0 : index
    %26 = vector.load %arg4[%c2_11, %c0_12] : memref<3x16xf32, #tpu.memory_space<vmem>>, vector<1x16xf32>
    %27 = vector.broadcast %26 : vector<1x16xf32> to vector<16x16xf32>
    %28 = arith.mulf %25, %27 : vector<16x16xf32>
    %29 = tpu.concatenate %5, %6, %10, %14, %15, %19, %23, %24, %28 in 0 : vector<16x16xf32>, vector<16x16xf32>, vector<16x16xf32>, vector<16x16xf32>, vector<16x16xf32>, vector<16x16xf32>, vector<16x16xf32>, vector<16x16xf32>, vector<16x16xf32> -> vector<144x16xf32>
    %c0_13 = arith.constant 0 : index
    %c0_14 = arith.constant 0 : index
    %30 = vector.load %arg2[%c0_13, %c0_14] : memref<16x144xbf16, #tpu.memory_space<vmem>>, vector<16x144xbf16>
    %31 = arith.truncf %29 : vector<144x16xf32> to vector<144x16xbf16>
    %cst = arith.constant dense<0.000000e+00> : vector<16x16xf32>
    %32 = tpu.matmul %30, %31, %cst {dimension_numbers = #tpu.dot_dimension_numbers<[1], [0], [0], [1], [0, 0, 1, 1], [], []>} : vector<16x144xbf16>, vector<144x16xbf16>, vector<16x16xf32> -> vector<16x16xf32>
    %c0_15 = arith.constant 0 : index
    %c0_16 = arith.constant 0 : index
    %33 = vector.load %arg3[%c0_15, %c0_16] : memref<16x1xf32, #tpu.memory_space<vmem>>, vector<16x1xf32>
    %34 = vector.broadcast %33 : vector<16x1xf32> to vector<16x16xf32>
    %35 = arith.addf %32, %34 : vector<16x16xf32>
    %36 = arith.mulf %35, %35 : vector<16x16xf32>
    %cst_17 = arith.constant dense<0.000000e+00> : vector<16xf32>
    %37 = vector.multi_reduction <add>, %36, %cst_17 [0] : vector<16x16xf32> to vector<16xf32>
    %38 = vector.shape_cast %37 : vector<16xf32> to vector<1x16xf32>
    %cst_18 = arith.constant 1.000000e-24 : f32
    %39 = vector.broadcast %cst_18 : f32 to vector<1x16xf32>
    %40 = arith.maximumf %38, %39 : vector<1x16xf32>
    %41 = math.rsqrt %40 : vector<1x16xf32>
    %42 = vector.broadcast %41 : vector<1x16xf32> to vector<16x16xf32>
    %43 = arith.mulf %35, %42 : vector<16x16xf32>
    %c0_19 = arith.constant 0 : index
    %c0_20 = arith.constant 0 : index
    %44 = vector.load %arg5[%c0_19, %c0_20] : memref<16x1xf32, #tpu.memory_space<vmem>>, vector<16x1xf32>
    %cst_21 = arith.constant 4.000000e+00 : f32
    %45 = vector.broadcast %cst_21 : f32 to vector<16x1xf32>
    %46 = arith.mulf %44, %45 : vector<16x1xf32>
    %47 = vector.broadcast %46 : vector<16x1xf32> to vector<16x16xf32>
    %48 = arith.mulf %43, %47 : vector<16x16xf32>
    %49 = arith.negf %48 : vector<16x16xf32>
    %50 = math.exp %49 : vector<16x16xf32>
    %cst_22 = arith.constant 1.000000e+00 : f32
    %51 = vector.broadcast %cst_22 : f32 to vector<16x16xf32>
    %52 = arith.addf %51, %50 : vector<16x16xf32>
    %53 = arith.divf %51, %52 : vector<16x16xf32>
    %54 = arith.mulf %48, %53 : vector<16x16xf32>
    %c0_23 = arith.constant 0 : index
    %c0_24 = arith.constant 0 : index
    %55 = vector.load %arg7[%c0_23, %c0_24] : memref<16x8xbf16, #tpu.memory_space<vmem>>, vector<16x8xbf16>
    %c0_25 = arith.constant 0 : index
    %c0_26 = arith.constant 0 : index
    %c0_27 = arith.constant 0 : index
    %56 = vector.load %arg6[%c0_25, %c0_26, %c0_27] : memref<1x8x16xf32, #tpu.memory_space<vmem>>, vector<1x8x16xf32>
    %57 = vector.shape_cast %56 : vector<1x8x16xf32> to vector<8x16xf32>
    %58 = arith.truncf %57 : vector<8x16xf32> to vector<8x16xbf16>
    %cst_28 = arith.constant dense<0.000000e+00> : vector<16x16xf32>
    %59 = tpu.matmul %55, %58, %cst_28 {dimension_numbers = #tpu.dot_dimension_numbers<[1], [0], [0], [1], [0, 0, 1, 1], [], []>} : vector<16x8xbf16>, vector<8x16xbf16>, vector<16x16xf32> -> vector<16x16xf32>
    %60 = arith.addf %54, %59 : vector<16x16xf32>
    %c0_29 = arith.constant 0 : index
    %c0_30 = arith.constant 0 : index
    %61 = vector.load %arg8[%c0_29, %c0_30] : memref<16x1xf32, #tpu.memory_space<vmem>>, vector<16x1xf32>
    %62 = vector.broadcast %61 : vector<16x1xf32> to vector<16x16xf32>
    %63 = arith.addf %60, %62 : vector<16x16xf32>
    %c0_31 = arith.constant 0 : index
    %c0_32 = arith.constant 0 : index
    %c0_33 = arith.constant 0 : index
    %64 = vector.load %arg9[%c0_31, %c0_32, %c0_33] : memref<1x16x16xf32, #tpu.memory_space<vmem>>, vector<1x16x16xf32>
    %65 = vector.shape_cast %64 : vector<1x16x16xf32> to vector<16x16xf32>
    %66 = vector.shape_cast %63 : vector<16x16xf32> to vector<1x16x16xf32>
    tpu.vector_store %arg9[%c0_31, %c0_32, %c0_33], %66 {strides = array<i32>} : memref<1x16x16xf32, #tpu.memory_space<vmem>>, vector<1x16x16xf32>,
    return
  }
  func.func @transform_0(%arg0: i32) -> (i32, i32, i32) {
    %c0_i32 = arith.constant 0 : i32
    %c0_i32_0 = arith.constant 0 : i32
    %c0_i32_1 = arith.constant 0 : i32
    return %arg0, %c0_i32, %c0_i32_0 : i32, i32, i32
  }
  func.func @transform_1(%arg0: i32) -> (i32, i32) {
    %c0_i32 = arith.constant 0 : i32
    %c0_i32_0 = arith.constant 0 : i32
    %c0_i32_1 = arith.constant 0 : i32
    return %c0_i32, %c0_i32_0 : i32, i32
  }
  func.func @transform_2(%arg0: i32) -> (i32, i32) {
    %c0_i32 = arith.constant 0 : i32
    %c0_i32_0 = arith.constant 0 : i32
    %c0_i32_1 = arith.constant 0 : i32
    return %c0_i32, %c0_i32_0 : i32, i32
  }
  func.func @transform_3(%arg0: i32) -> (i32, i32) {
    %c0_i32 = arith.constant 0 : i32
    %c0_i32_0 = arith.constant 0 : i32
    %c0_i32_1 = arith.constant 0 : i32
    return %c0_i32, %c0_i32_0 : i32, i32
  }
  func.func @transform_4(%arg0: i32) -> (i32, i32) {
    %c0_i32 = arith.constant 0 : i32
    %c0_i32_0 = arith.constant 0 : i32
    %c0_i32_1 = arith.constant 0 : i32
    return %c0_i32, %c0_i32_0 : i32, i32
  }
  func.func @transform_5(%arg0: i32) -> (i32, i32, i32) {
    %c0_i32 = arith.constant 0 : i32
    %c0_i32_0 = arith.constant 0 : i32
    %c0_i32_1 = arith.constant 0 : i32
    return %arg0, %c0_i32, %c0_i32_0 : i32, i32, i32
  }
  func.func @transform_6(%arg0: i32) -> (i32, i32) {
    %c0_i32 = arith.constant 0 : i32
    %c0_i32_0 = arith.constant 0 : i32
    %c0_i32_1 = arith.constant 0 : i32
    return %c0_i32, %c0_i32_0 : i32, i32
  }
  func.func @transform_7(%arg0: i32) -> (i32, i32) {
    %c0_i32 = arith.constant 0 : i32
    %c0_i32_0 = arith.constant 0 : i32
    %c0_i32_1 = arith.constant 0 : i32
    return %c0_i32, %c0_i32_0 : i32, i32
  }
  func.func @transform_8(%arg0: i32) -> (i32, i32, i32) {
    %c0_i32 = arith.constant 0 : i32
    %c0_i32_0 = arith.constant 0 : i32
    %c0_i32_1 = arith.constant 0 : i32
    return %arg0, %c0_i32, %c0_i32_0 : i32, i32, i32
  }
}

module attributes {stable_mosaic.version = 11 : i64} {
  func.func @kernel(%arg0: i32, %arg1: memref<1x16x26xf32, #tpu.memory_space<vmem>>, %arg2: memref<16x144xbf16, #tpu.memory_space<vmem>>, %arg3: memref<16x1xf32, #tpu.memory_space<vmem>>, %arg4: memref<3x16xf32, #tpu.memory_space<vmem>>, %arg5: memref<16x1xf32, #tpu.memory_space<vmem>>, %arg6: memref<1x16x16xf32, #tpu.memory_space<vmem>>, %arg7: memref<1x16x16xf32, #tpu.memory_space<vmem>>) attributes {dimension_semantics = [#tpu.dimension_semantics<parallel>], iteration_bounds = array<i64: 2>, scalar_prefetch = 0 : i64, scratch_operands = 0 : i64, tpu.core_type = #tpu.core_type<tc>, window_params = [{transform_indices = @transform_0, window_bounds = array<i64: 1, 16, 26>}, {pipeline_mode = #tpu.pipeline_mode<synchronous>, transform_indices = @transform_1, window_bounds = array<i64: 16, 144>}, {pipeline_mode = #tpu.pipeline_mode<synchronous>, transform_indices = @transform_2, window_bounds = array<i64: 16, 1>}, {pipeline_mode = #tpu.pipeline_mode<synchronous>, transform_indices = @transform_3, window_bounds = array<i64: 3, 16>}, {pipeline_mode = #tpu.pipeline_mode<synchronous>, transform_indices = @transform_4, window_bounds = array<i64: 16, 1>}, {transform_indices = @transform_5, window_bounds = array<i64: 1, 16, 16>}, {transform_indices = @transform_6, window_bounds = array<i64: 1, 16, 16>}]} {
    %c0 = arith.constant 0 : index
    %c0_0 = arith.constant 0 : index
    %c0_1 = arith.constant 0 : index
    %0 = vector.load %arg1[%c0, %c0_0, %c0_1] : memref<1x16x26xf32, #tpu.memory_space<vmem>>, vector<1x16x26xf32>
    %1 = vector.shape_cast %0 : vector<1x16x26xf32> to vector<16x26xf32>
    %2 = vector.extract_strided_slice %1 {offsets = [0, 0], sizes = [16, 16], strides = [1, 1]} : vector<16x26xf32> to vector<16x16xf32>
    %c0_2 = arith.constant 0 : index
    %c0_3 = arith.constant 0 : index
    %3 = vector.load %arg4[%c0_2, %c0_3] : memref<3x16xf32, #tpu.memory_space<vmem>>, vector<1x16xf32>
    %4 = vector.broadcast %3 : vector<1x16xf32> to vector<16x16xf32>
    %5 = arith.mulf %2, %4 : vector<16x16xf32>
    %6 = vector.extract_strided_slice %1 {offsets = [0, 1], sizes = [16, 16], strides = [1, 1]} : vector<16x26xf32> to vector<16x16xf32>
    %7 = vector.extract_strided_slice %1 {offsets = [0, 2], sizes = [16, 16], strides = [1, 1]} : vector<16x26xf32> to vector<16x16xf32>
    %c2 = arith.constant 2 : index
    %c0_4 = arith.constant 0 : index
    %8 = vector.load %arg4[%c2, %c0_4] : memref<3x16xf32, #tpu.memory_space<vmem>>, vector<1x16xf32>
    %9 = vector.broadcast %8 : vector<1x16xf32> to vector<16x16xf32>
    %10 = arith.mulf %7, %9 : vector<16x16xf32>
    %11 = vector.extract_strided_slice %1 {offsets = [0, 4], sizes = [16, 16], strides = [1, 1]} : vector<16x26xf32> to vector<16x16xf32>
    %c0_5 = arith.constant 0 : index
    %c0_6 = arith.constant 0 : index
    %12 = vector.load %arg4[%c0_5, %c0_6] : memref<3x16xf32, #tpu.memory_space<vmem>>, vector<1x16xf32>
    %13 = vector.broadcast %12 : vector<1x16xf32> to vector<16x16xf32>
    %14 = arith.mulf %11, %13 : vector<16x16xf32>
    %15 = vector.extract_strided_slice %1 {offsets = [0, 5], sizes = [16, 16], strides = [1, 1]} : vector<16x26xf32> to vector<16x16xf32>
    %16 = vector.extract_strided_slice %1 {offsets = [0, 6], sizes = [16, 16], strides = [1, 1]} : vector<16x26xf32> to vector<16x16xf32>
    %c2_7 = arith.constant 2 : index
    %c0_8 = arith.constant 0 : index
    %17 = vector.load %arg4[%c2_7, %c0_8] : memref<3x16xf32, #tpu.memory_space<vmem>>, vector<1x16xf32>
    %18 = vector.broadcast %17 : vector<1x16xf32> to vector<16x16xf32>
    %19 = arith.mulf %16, %18 : vector<16x16xf32>
    %20 = vector.extract_strided_slice %1 {offsets = [0, 8], sizes = [16, 16], strides = [1, 1]} : vector<16x26xf32> to vector<16x16xf32>
    %c0_9 = arith.constant 0 : index
    %c0_10 = arith.constant 0 : index
    %21 = vector.load %arg4[%c0_9, %c0_10] : memref<3x16xf32, #tpu.memory_space<vmem>>, vector<1x16xf32>
    %22 = vector.broadcast %21 : vector<1x16xf32> to vector<16x16xf32>
    %23 = arith.mulf %20, %22 : vector<16x16xf32>
    %24 = vector.extract_strided_slice %1 {offsets = [0, 9], sizes = [16, 16], strides = [1, 1]} : vector<16x26xf32> to vector<16x16xf32>
    %25 = vector.extract_strided_slice %1 {offsets = [0, 10], sizes = [16, 16], strides = [1, 1]} : vector<16x26xf32> to vector<16x16xf32>
    %c2_11 = arith.constant 2 : index
    %c0_12 = arith.constant 0 : index
    %26 = vector.load %arg4[%c2_11, %c0_12] : memref<3x16xf32, #tpu.memory_space<vmem>>, vector<1x16xf32>
    %27 = vector.broadcast %26 : vector<1x16xf32> to vector<16x16xf32>
    %28 = arith.mulf %25, %27 : vector<16x16xf32>
    %29 = tpu.concatenate %5, %6, %10, %14, %15, %19, %23, %24, %28 in 0 : vector<16x16xf32>, vector<16x16xf32>, vector<16x16xf32>, vector<16x16xf32>, vector<16x16xf32>, vector<16x16xf32>, vector<16x16xf32>, vector<16x16xf32>, vector<16x16xf32> -> vector<144x16xf32>
    %c0_13 = arith.constant 0 : index
    %c0_14 = arith.constant 0 : index
    %30 = vector.load %arg2[%c0_13, %c0_14] : memref<16x144xbf16, #tpu.memory_space<vmem>>, vector<16x144xbf16>
    %31 = arith.truncf %29 : vector<144x16xf32> to vector<144x16xbf16>
    %cst = arith.constant dense<0.000000e+00> : vector<16x16xf32>
    %32 = tpu.matmul %30, %31, %cst {dimension_numbers = #tpu.dot_dimension_numbers<[1], [0], [0], [1], [0, 0, 1, 1], [], []>} : vector<16x144xbf16>, vector<144x16xbf16>, vector<16x16xf32> -> vector<16x16xf32>
    %c0_15 = arith.constant 0 : index
    %c0_16 = arith.constant 0 : index
    %33 = vector.load %arg3[%c0_15, %c0_16] : memref<16x1xf32, #tpu.memory_space<vmem>>, vector<16x1xf32>
    %34 = vector.broadcast %33 : vector<16x1xf32> to vector<16x16xf32>
    %35 = arith.addf %32, %34 : vector<16x16xf32>
    %36 = arith.mulf %35, %35 : vector<16x16xf32>
    %cst_17 = arith.constant dense<0.000000e+00> : vector<16xf32>
    %37 = vector.multi_reduction <add>, %36, %cst_17 [0] : vector<16x16xf32> to vector<16xf32>
    %38 = vector.shape_cast %37 : vector<16xf32> to vector<1x16xf32>
    %cst_18 = arith.constant 1.000000e-24 : f32
    %39 = vector.broadcast %cst_18 : f32 to vector<1x16xf32>
    %40 = arith.maximumf %38, %39 : vector<1x16xf32>
    %41 = math.rsqrt %40 : vector<1x16xf32>
    %42 = vector.broadcast %41 : vector<1x16xf32> to vector<16x16xf32>
    %43 = arith.mulf %35, %42 : vector<16x16xf32>
    %c0_19 = arith.constant 0 : index
    %c0_20 = arith.constant 0 : index
    %44 = vector.load %arg5[%c0_19, %c0_20] : memref<16x1xf32, #tpu.memory_space<vmem>>, vector<16x1xf32>
    %cst_21 = arith.constant 4.000000e+00 : f32
    %45 = vector.broadcast %cst_21 : f32 to vector<16x1xf32>
    %46 = arith.mulf %44, %45 : vector<16x1xf32>
    %47 = vector.broadcast %46 : vector<16x1xf32> to vector<16x16xf32>
    %48 = arith.mulf %43, %47 : vector<16x16xf32>
    %49 = arith.negf %48 : vector<16x16xf32>
    %50 = math.exp %49 : vector<16x16xf32>
    %cst_22 = arith.constant 1.000000e+00 : f32
    %51 = vector.broadcast %cst_22 : f32 to vector<16x16xf32>
    %52 = arith.addf %51, %50 : vector<16x16xf32>
    %53 = arith.divf %51, %52 : vector<16x16xf32>
    %54 = arith.mulf %48, %53 : vector<16x16xf32>
    %c0_23 = arith.constant 0 : index
    %c0_24 = arith.constant 0 : index
    %c0_25 = arith.constant 0 : index
    %55 = vector.load %arg6[%c0_23, %c0_24, %c0_25] : memref<1x16x16xf32, #tpu.memory_space<vmem>>, vector<1x16x16xf32>
    %56 = vector.shape_cast %55 : vector<1x16x16xf32> to vector<16x16xf32>
    %57 = arith.addf %54, %56 : vector<16x16xf32>
    %c0_26 = arith.constant 0 : index
    %c0_27 = arith.constant 0 : index
    %c0_28 = arith.constant 0 : index
    %58 = vector.load %arg7[%c0_26, %c0_27, %c0_28] : memref<1x16x16xf32, #tpu.memory_space<vmem>>, vector<1x16x16xf32>
    %59 = vector.shape_cast %58 : vector<1x16x16xf32> to vector<16x16xf32>
    %60 = vector.shape_cast %57 : vector<16x16xf32> to vector<1x16x16xf32>
    tpu.vector_store %arg7[%c0_26, %c0_27, %c0_28], %60 {strides = array<i32>} : memref<1x16x16xf32, #tpu.memory_space<vmem>>, vector<1x16x16xf32>,
    return
  }
  func.func @transform_0(%arg0: i32) -> (i32, i32, i32) {
    %c0_i32 = arith.constant 0 : i32
    %c0_i32_0 = arith.constant 0 : i32
    %c0_i32_1 = arith.constant 0 : i32
    return %arg0, %c0_i32, %c0_i32_0 : i32, i32, i32
  }
  func.func @transform_1(%arg0: i32) -> (i32, i32) {
    %c0_i32 = arith.constant 0 : i32
    %c0_i32_0 = arith.constant 0 : i32
    %c0_i32_1 = arith.constant 0 : i32
    return %c0_i32, %c0_i32_0 : i32, i32
  }
  func.func @transform_2(%arg0: i32) -> (i32, i32) {
    %c0_i32 = arith.constant 0 : i32
    %c0_i32_0 = arith.constant 0 : i32
    %c0_i32_1 = arith.constant 0 : i32
    return %c0_i32, %c0_i32_0 : i32, i32
  }
  func.func @transform_3(%arg0: i32) -> (i32, i32) {
    %c0_i32 = arith.constant 0 : i32
    %c0_i32_0 = arith.constant 0 : i32
    %c0_i32_1 = arith.constant 0 : i32
    return %c0_i32, %c0_i32_0 : i32, i32
  }
  func.func @transform_4(%arg0: i32) -> (i32, i32) {
    %c0_i32 = arith.constant 0 : i32
    %c0_i32_0 = arith.constant 0 : i32
    %c0_i32_1 = arith.constant 0 : i32
    return %c0_i32, %c0_i32_0 : i32, i32
  }
  func.func @transform_5(%arg0: i32) -> (i32, i32, i32) {
    %c0_i32 = arith.constant 0 : i32
    %c0_i32_0 = arith.constant 0 : i32
    %c0_i32_1 = arith.constant 0 : i32
    return %arg0, %c0_i32, %c0_i32_0 : i32, i32, i32
  }
  func.func @transform_6(%arg0: i32) -> (i32, i32, i32) {
    %c0_i32 = arith.constant 0 : i32
    %c0_i32_0 = arith.constant 0 : i32
    %c0_i32_1 = arith.constant 0 : i32
    return %arg0, %c0_i32, %c0_i32_0 : i32, i32, i32
  }
}

module attributes {stable_mosaic.version = 11 : i64} {
  func.func @kernel(%arg0: i32, %arg1: memref<1x16x26xf32, #tpu.memory_space<vmem>>, %arg2: memref<16x144xbf16, #tpu.memory_space<vmem>>, %arg3: memref<16x1xf32, #tpu.memory_space<vmem>>, %arg4: memref<3x16xf32, #tpu.memory_space<vmem>>, %arg5: memref<16x1xf32, #tpu.memory_space<vmem>>, %arg6: memref<1x16x16xf32, #tpu.memory_space<vmem>>) attributes {dimension_semantics = [#tpu.dimension_semantics<parallel>], iteration_bounds = array<i64: 2>, scalar_prefetch = 0 : i64, scratch_operands = 0 : i64, tpu.core_type = #tpu.core_type<tc>, window_params = [{transform_indices = @transform_0, window_bounds = array<i64: 1, 16, 26>}, {pipeline_mode = #tpu.pipeline_mode<synchronous>, transform_indices = @transform_1, window_bounds = array<i64: 16, 144>}, {pipeline_mode = #tpu.pipeline_mode<synchronous>, transform_indices = @transform_2, window_bounds = array<i64: 16, 1>}, {pipeline_mode = #tpu.pipeline_mode<synchronous>, transform_indices = @transform_3, window_bounds = array<i64: 3, 16>}, {pipeline_mode = #tpu.pipeline_mode<synchronous>, transform_indices = @transform_4, window_bounds = array<i64: 16, 1>}, {transform_indices = @transform_5, window_bounds = array<i64: 1, 16, 16>}]} {
    %c0 = arith.constant 0 : index
    %c0_0 = arith.constant 0 : index
    %c0_1 = arith.constant 0 : index
    %0 = vector.load %arg1[%c0, %c0_0, %c0_1] : memref<1x16x26xf32, #tpu.memory_space<vmem>>, vector<1x16x26xf32>
    %1 = vector.shape_cast %0 : vector<1x16x26xf32> to vector<16x26xf32>
    %2 = vector.extract_strided_slice %1 {offsets = [0, 0], sizes = [16, 16], strides = [1, 1]} : vector<16x26xf32> to vector<16x16xf32>
    %c0_2 = arith.constant 0 : index
    %c0_3 = arith.constant 0 : index
    %3 = vector.load %arg4[%c0_2, %c0_3] : memref<3x16xf32, #tpu.memory_space<vmem>>, vector<1x16xf32>
    %4 = vector.broadcast %3 : vector<1x16xf32> to vector<16x16xf32>
    %5 = arith.mulf %2, %4 : vector<16x16xf32>
    %6 = vector.extract_strided_slice %1 {offsets = [0, 1], sizes = [16, 16], strides = [1, 1]} : vector<16x26xf32> to vector<16x16xf32>
    %7 = vector.extract_strided_slice %1 {offsets = [0, 2], sizes = [16, 16], strides = [1, 1]} : vector<16x26xf32> to vector<16x16xf32>
    %c2 = arith.constant 2 : index
    %c0_4 = arith.constant 0 : index
    %8 = vector.load %arg4[%c2, %c0_4] : memref<3x16xf32, #tpu.memory_space<vmem>>, vector<1x16xf32>
    %9 = vector.broadcast %8 : vector<1x16xf32> to vector<16x16xf32>
    %10 = arith.mulf %7, %9 : vector<16x16xf32>
    %11 = vector.extract_strided_slice %1 {offsets = [0, 4], sizes = [16, 16], strides = [1, 1]} : vector<16x26xf32> to vector<16x16xf32>
    %c0_5 = arith.constant 0 : index
    %c0_6 = arith.constant 0 : index
    %12 = vector.load %arg4[%c0_5, %c0_6] : memref<3x16xf32, #tpu.memory_space<vmem>>, vector<1x16xf32>
    %13 = vector.broadcast %12 : vector<1x16xf32> to vector<16x16xf32>
    %14 = arith.mulf %11, %13 : vector<16x16xf32>
    %15 = vector.extract_strided_slice %1 {offsets = [0, 5], sizes = [16, 16], strides = [1, 1]} : vector<16x26xf32> to vector<16x16xf32>
    %16 = vector.extract_strided_slice %1 {offsets = [0, 6], sizes = [16, 16], strides = [1, 1]} : vector<16x26xf32> to vector<16x16xf32>
    %c2_7 = arith.constant 2 : index
    %c0_8 = arith.constant 0 : index
    %17 = vector.load %arg4[%c2_7, %c0_8] : memref<3x16xf32, #tpu.memory_space<vmem>>, vector<1x16xf32>
    %18 = vector.broadcast %17 : vector<1x16xf32> to vector<16x16xf32>
    %19 = arith.mulf %16, %18 : vector<16x16xf32>
    %20 = vector.extract_strided_slice %1 {offsets = [0, 8], sizes = [16, 16], strides = [1, 1]} : vector<16x26xf32> to vector<16x16xf32>
    %c0_9 = arith.constant 0 : index
    %c0_10 = arith.constant 0 : index
    %21 = vector.load %arg4[%c0_9, %c0_10] : memref<3x16xf32, #tpu.memory_space<vmem>>, vector<1x16xf32>
    %22 = vector.broadcast %21 : vector<1x16xf32> to vector<16x16xf32>
    %23 = arith.mulf %20, %22 : vector<16x16xf32>
    %24 = vector.extract_strided_slice %1 {offsets = [0, 9], sizes = [16, 16], strides = [1, 1]} : vector<16x26xf32> to vector<16x16xf32>
    %25 = vector.extract_strided_slice %1 {offsets = [0, 10], sizes = [16, 16], strides = [1, 1]} : vector<16x26xf32> to vector<16x16xf32>
    %c2_11 = arith.constant 2 : index
    %c0_12 = arith.constant 0 : index
    %26 = vector.load %arg4[%c2_11, %c0_12] : memref<3x16xf32, #tpu.memory_space<vmem>>, vector<1x16xf32>
    %27 = vector.broadcast %26 : vector<1x16xf32> to vector<16x16xf32>
    %28 = arith.mulf %25, %27 : vector<16x16xf32>
    %29 = tpu.concatenate %5, %6, %10, %14, %15, %19, %23, %24, %28 in 0 : vector<16x16xf32>, vector<16x16xf32>, vector<16x16xf32>, vector<16x16xf32>, vector<16x16xf32>, vector<16x16xf32>, vector<16x16xf32>, vector<16x16xf32>, vector<16x16xf32> -> vector<144x16xf32>
    %c0_13 = arith.constant 0 : index
    %c0_14 = arith.constant 0 : index
    %30 = vector.load %arg2[%c0_13, %c0_14] : memref<16x144xbf16, #tpu.memory_space<vmem>>, vector<16x144xbf16>
    %31 = arith.truncf %29 : vector<144x16xf32> to vector<144x16xbf16>
    %cst = arith.constant dense<0.000000e+00> : vector<16x16xf32>
    %32 = tpu.matmul %30, %31, %cst {dimension_numbers = #tpu.dot_dimension_numbers<[1], [0], [0], [1], [0, 0, 1, 1], [], []>} : vector<16x144xbf16>, vector<144x16xbf16>, vector<16x16xf32> -> vector<16x16xf32>
    %c0_15 = arith.constant 0 : index
    %c0_16 = arith.constant 0 : index
    %33 = vector.load %arg3[%c0_15, %c0_16] : memref<16x1xf32, #tpu.memory_space<vmem>>, vector<16x1xf32>
    %34 = vector.broadcast %33 : vector<16x1xf32> to vector<16x16xf32>
    %35 = arith.addf %32, %34 : vector<16x16xf32>
    %36 = arith.mulf %35, %35 : vector<16x16xf32>
    %cst_17 = arith.constant dense<0.000000e+00> : vector<16xf32>
    %37 = vector.multi_reduction <add>, %36, %cst_17 [0] : vector<16x16xf32> to vector<16xf32>
    %38 = vector.shape_cast %37 : vector<16xf32> to vector<1x16xf32>
    %cst_18 = arith.constant 1.000000e-24 : f32
    %39 = vector.broadcast %cst_18 : f32 to vector<1x16xf32>
    %40 = arith.maximumf %38, %39 : vector<1x16xf32>
    %41 = math.rsqrt %40 : vector<1x16xf32>
    %42 = vector.broadcast %41 : vector<1x16xf32> to vector<16x16xf32>
    %43 = arith.mulf %35, %42 : vector<16x16xf32>
    %c0_19 = arith.constant 0 : index
    %c0_20 = arith.constant 0 : index
    %44 = vector.load %arg5[%c0_19, %c0_20] : memref<16x1xf32, #tpu.memory_space<vmem>>, vector<16x1xf32>
    %cst_21 = arith.constant 4.000000e+00 : f32
    %45 = vector.broadcast %cst_21 : f32 to vector<16x1xf32>
    %46 = arith.mulf %44, %45 : vector<16x1xf32>
    %47 = vector.broadcast %46 : vector<16x1xf32> to vector<16x16xf32>
    %48 = arith.mulf %43, %47 : vector<16x16xf32>
    %49 = arith.negf %48 : vector<16x16xf32>
    %50 = math.exp %49 : vector<16x16xf32>
    %cst_22 = arith.constant 1.000000e+00 : f32
    %51 = vector.broadcast %cst_22 : f32 to vector<16x16xf32>
    %52 = arith.addf %51, %50 : vector<16x16xf32>
    %53 = arith.divf %51, %52 : vector<16x16xf32>
    %54 = arith.mulf %48, %53 : vector<16x16xf32>
    %c0_23 = arith.constant 0 : index
    %c0_24 = arith.constant 0 : index
    %c0_25 = arith.constant 0 : index
    %55 = vector.load %arg6[%c0_23, %c0_24, %c0_25] : memref<1x16x16xf32, #tpu.memory_space<vmem>>, vector<1x16x16xf32>
    %56 = vector.shape_cast %55 : vector<1x16x16xf32> to vector<16x16xf32>
    %57 = vector.shape_cast %54 : vector<16x16xf32> to vector<1x16x16xf32>
    tpu.vector_store %arg6[%c0_23, %c0_24, %c0_25], %57 {strides = array<i32>} : memref<1x16x16xf32, #tpu.memory_space<vmem>>, vector<1x16x16xf32>,
    return
  }
  func.func @transform_0(%arg0: i32) -> (i32, i32, i32) {
    %c0_i32 = arith.constant 0 : i32
    %c0_i32_0 = arith.constant 0 : i32
    %c0_i32_1 = arith.constant 0 : i32
    return %arg0, %c0_i32, %c0_i32_0 : i32, i32, i32
  }
  func.func @transform_1(%arg0: i32) -> (i32, i32) {
    %c0_i32 = arith.constant 0 : i32
    %c0_i32_0 = arith.constant 0 : i32
    %c0_i32_1 = arith.constant 0 : i32
    return %c0_i32, %c0_i32_0 : i32, i32
  }
  func.func @transform_2(%arg0: i32) -> (i32, i32) {
    %c0_i32 = arith.constant 0 : i32
    %c0_i32_0 = arith.constant 0 : i32
    %c0_i32_1 = arith.constant 0 : i32
    return %c0_i32, %c0_i32_0 : i32, i32
  }
  func.func @transform_3(%arg0: i32) -> (i32, i32) {
    %c0_i32 = arith.constant 0 : i32
    %c0_i32_0 = arith.constant 0 : i32
    %c0_i32_1 = arith.constant 0 : i32
    return %c0_i32, %c0_i32_0 : i32, i32
  }
  func.func @transform_4(%arg0: i32) -> (i32, i32) {
    %c0_i32 = arith.constant 0 : i32
    %c0_i32_0 = arith.constant 0 : i32
    %c0_i32_1 = arith.constant 0 : i32
    return %c0_i32, %c0_i32_0 : i32, i32
  }
  func.func @transform_5(%arg0: i32) -> (i32, i32, i32) {
    %c0_i32 = arith.constant 0 : i32
    %c0_i32_0 = arith.constant 0 : i32
    %c0_i32_1 = arith.constant 0 : i32
    return %arg0, %c0_i32, %c0_i32_0 : i32, i32, i32
  }
}

module attributes {stable_mosaic.version = 11 : i64} {
  func.func @kernel(%arg0: i32, %arg1: memref<1x16x82xf32, #tpu.memory_space<vmem>>, %arg2: memref<8x144xbf16, #tpu.memory_space<vmem>>, %arg3: memref<8x1xf32, #tpu.memory_space<vmem>>, %arg4: memref<3x64xf32, #tpu.memory_space<vmem>>, %arg5: memref<1x8x64xf32, #tpu.memory_space<vmem>>) attributes {dimension_semantics = [#tpu.dimension_semantics<parallel>], iteration_bounds = array<i64: 2>, scalar_prefetch = 0 : i64, scratch_operands = 0 : i64, tpu.core_type = #tpu.core_type<tc>, window_params = [{transform_indices = @transform_0, window_bounds = array<i64: 1, 16, 82>}, {pipeline_mode = #tpu.pipeline_mode<synchronous>, transform_indices = @transform_1, window_bounds = array<i64: 8, 144>}, {pipeline_mode = #tpu.pipeline_mode<synchronous>, transform_indices = @transform_2, window_bounds = array<i64: 8, 1>}, {pipeline_mode = #tpu.pipeline_mode<synchronous>, transform_indices = @transform_3, window_bounds = array<i64: 3, 64>}, {transform_indices = @transform_4, window_bounds = array<i64: 1, 8, 64>}]} {
    %c0 = arith.constant 0 : index
    %c0_0 = arith.constant 0 : index
    %c0_1 = arith.constant 0 : index
    %0 = vector.load %arg1[%c0, %c0_0, %c0_1] : memref<1x16x82xf32, #tpu.memory_space<vmem>>, vector<1x16x82xf32>
    %1 = vector.shape_cast %0 : vector<1x16x82xf32> to vector<16x82xf32>
    %2 = vector.extract_strided_slice %1 {offsets = [0, 0], sizes = [16, 64], strides = [1, 1]} : vector<16x82xf32> to vector<16x64xf32>
    %c0_2 = arith.constant 0 : index
    %c0_3 = arith.constant 0 : index
    %3 = vector.load %arg4[%c0_2, %c0_3] : memref<3x64xf32, #tpu.memory_space<vmem>>, vector<1x64xf32>
    %4 = vector.broadcast %3 : vector<1x64xf32> to vector<16x64xf32>
    %5 = arith.mulf %2, %4 : vector<16x64xf32>
    %6 = vector.extract_strided_slice %1 {offsets = [0, 1], sizes = [16, 64], strides = [1, 1]} : vector<16x82xf32> to vector<16x64xf32>
    %7 = vector.extract_strided_slice %1 {offsets = [0, 2], sizes = [16, 64], strides = [1, 1]} : vector<16x82xf32> to vector<16x64xf32>
    %c2 = arith.constant 2 : index
    %c0_4 = arith.constant 0 : index
    %8 = vector.load %arg4[%c2, %c0_4] : memref<3x64xf32, #tpu.memory_space<vmem>>, vector<1x64xf32>
    %9 = vector.broadcast %8 : vector<1x64xf32> to vector<16x64xf32>
    %10 = arith.mulf %7, %9 : vector<16x64xf32>
    %11 = vector.extract_strided_slice %1 {offsets = [0, 8], sizes = [16, 64], strides = [1, 1]} : vector<16x82xf32> to vector<16x64xf32>
    %c0_5 = arith.constant 0 : index
    %c0_6 = arith.constant 0 : index
    %12 = vector.load %arg4[%c0_5, %c0_6] : memref<3x64xf32, #tpu.memory_space<vmem>>, vector<1x64xf32>
    %13 = vector.broadcast %12 : vector<1x64xf32> to vector<16x64xf32>
    %14 = arith.mulf %11, %13 : vector<16x64xf32>
    %15 = vector.extract_strided_slice %1 {offsets = [0, 9], sizes = [16, 64], strides = [1, 1]} : vector<16x82xf32> to vector<16x64xf32>
    %16 = vector.extract_strided_slice %1 {offsets = [0, 10], sizes = [16, 64], strides = [1, 1]} : vector<16x82xf32> to vector<16x64xf32>
    %c2_7 = arith.constant 2 : index
    %c0_8 = arith.constant 0 : index
    %17 = vector.load %arg4[%c2_7, %c0_8] : memref<3x64xf32, #tpu.memory_space<vmem>>, vector<1x64xf32>
    %18 = vector.broadcast %17 : vector<1x64xf32> to vector<16x64xf32>
    %19 = arith.mulf %16, %18 : vector<16x64xf32>
    %20 = vector.extract_strided_slice %1 {offsets = [0, 16], sizes = [16, 64], strides = [1, 1]} : vector<16x82xf32> to vector<16x64xf32>
    %c0_9 = arith.constant 0 : index
    %c0_10 = arith.constant 0 : index
    %21 = vector.load %arg4[%c0_9, %c0_10] : memref<3x64xf32, #tpu.memory_space<vmem>>, vector<1x64xf32>
    %22 = vector.broadcast %21 : vector<1x64xf32> to vector<16x64xf32>
    %23 = arith.mulf %20, %22 : vector<16x64xf32>
    %24 = vector.extract_strided_slice %1 {offsets = [0, 17], sizes = [16, 64], strides = [1, 1]} : vector<16x82xf32> to vector<16x64xf32>
    %25 = vector.extract_strided_slice %1 {offsets = [0, 18], sizes = [16, 64], strides = [1, 1]} : vector<16x82xf32> to vector<16x64xf32>
    %c2_11 = arith.constant 2 : index
    %c0_12 = arith.constant 0 : index
    %26 = vector.load %arg4[%c2_11, %c0_12] : memref<3x64xf32, #tpu.memory_space<vmem>>, vector<1x64xf32>
    %27 = vector.broadcast %26 : vector<1x64xf32> to vector<16x64xf32>
    %28 = arith.mulf %25, %27 : vector<16x64xf32>
    %29 = tpu.concatenate %5, %6, %10, %14, %15, %19, %23, %24, %28 in 0 : vector<16x64xf32>, vector<16x64xf32>, vector<16x64xf32>, vector<16x64xf32>, vector<16x64xf32>, vector<16x64xf32>, vector<16x64xf32>, vector<16x64xf32>, vector<16x64xf32> -> vector<144x64xf32>
    %c0_13 = arith.constant 0 : index
    %c0_14 = arith.constant 0 : index
    %30 = vector.load %arg2[%c0_13, %c0_14] : memref<8x144xbf16, #tpu.memory_space<vmem>>, vector<8x144xbf16>
    %31 = arith.truncf %29 : vector<144x64xf32> to vector<144x64xbf16>
    %cst = arith.constant dense<0.000000e+00> : vector<8x64xf32>
    %32 = tpu.matmul %30, %31, %cst {dimension_numbers = #tpu.dot_dimension_numbers<[1], [0], [0], [1], [0, 0, 1, 1], [], []>} : vector<8x144xbf16>, vector<144x64xbf16>, vector<8x64xf32> -> vector<8x64xf32>
    %c0_15 = arith.constant 0 : index
    %c0_16 = arith.constant 0 : index
    %33 = vector.load %arg3[%c0_15, %c0_16] : memref<8x1xf32, #tpu.memory_space<vmem>>, vector<8x1xf32>
    %34 = vector.broadcast %33 : vector<8x1xf32> to vector<8x64xf32>
    %35 = arith.addf %32, %34 : vector<8x64xf32>
    %c0_17 = arith.constant 0 : index
    %c0_18 = arith.constant 0 : index
    %c0_19 = arith.constant 0 : index
    %36 = vector.load %arg5[%c0_17, %c0_18, %c0_19] : memref<1x8x64xf32, #tpu.memory_space<vmem>>, vector<1x8x64xf32>
    %37 = vector.shape_cast %36 : vector<1x8x64xf32> to vector<8x64xf32>
    %38 = vector.shape_cast %35 : vector<8x64xf32> to vector<1x8x64xf32>
    tpu.vector_store %arg5[%c0_17, %c0_18, %c0_19], %38 {strides = array<i32>} : memref<1x8x64xf32, #tpu.memory_space<vmem>>, vector<1x8x64xf32>,
    return
  }
  func.func @transform_0(%arg0: i32) -> (i32, i32, i32) {
    %c0_i32 = arith.constant 0 : i32
    %c0_i32_0 = arith.constant 0 : i32
    %c0_i32_1 = arith.constant 0 : i32
    return %arg0, %c0_i32, %c0_i32_0 : i32, i32, i32
  }
  func.func @transform_1(%arg0: i32) -> (i32, i32) {
    %c0_i32 = arith.constant 0 : i32
    %c0_i32_0 = arith.constant 0 : i32
    %c0_i32_1 = arith.constant 0 : i32
    return %c0_i32, %c0_i32_0 : i32, i32
  }
  func.func @transform_2(%arg0: i32) -> (i32, i32) {
    %c0_i32 = arith.constant 0 : i32
    %c0_i32_0 = arith.constant 0 : i32
    %c0_i32_1 = arith.constant 0 : i32
    return %c0_i32, %c0_i32_0 : i32, i32
  }
  func.func @transform_3(%arg0: i32) -> (i32, i32) {
    %c0_i32 = arith.constant 0 : i32
    %c0_i32_0 = arith.constant 0 : i32
    %c0_i32_1 = arith.constant 0 : i32
    return %c0_i32, %c0_i32_0 : i32, i32
  }
  func.func @transform_4(%arg0: i32) -> (i32, i32, i32) {
    %c0_i32 = arith.constant 0 : i32
    %c0_i32_0 = arith.constant 0 : i32
    %c0_i32_1 = arith.constant 0 : i32
    return %arg0, %c0_i32, %c0_i32_0 : i32, i32, i32
  }
}

module attributes {stable_mosaic.version = 11 : i64} {
  func.func @kernel(%arg0: i32, %arg1: memref<1x8x290xf32, #tpu.memory_space<vmem>>, %arg2: memref<8x72xbf16, #tpu.memory_space<vmem>>, %arg3: memref<8x1xf32, #tpu.memory_space<vmem>>, %arg4: memref<3x256xf32, #tpu.memory_space<vmem>>, %arg5: memref<1x8x256xf32, #tpu.memory_space<vmem>>) attributes {dimension_semantics = [#tpu.dimension_semantics<parallel>], iteration_bounds = array<i64: 2>, scalar_prefetch = 0 : i64, scratch_operands = 0 : i64, tpu.core_type = #tpu.core_type<tc>, window_params = [{transform_indices = @transform_0, window_bounds = array<i64: 1, 8, 290>}, {pipeline_mode = #tpu.pipeline_mode<synchronous>, transform_indices = @transform_1, window_bounds = array<i64: 8, 72>}, {pipeline_mode = #tpu.pipeline_mode<synchronous>, transform_indices = @transform_2, window_bounds = array<i64: 8, 1>}, {pipeline_mode = #tpu.pipeline_mode<synchronous>, transform_indices = @transform_3, window_bounds = array<i64: 3, 256>}, {transform_indices = @transform_4, window_bounds = array<i64: 1, 8, 256>}]} {
    %c0 = arith.constant 0 : index
    %c0_0 = arith.constant 0 : index
    %c0_1 = arith.constant 0 : index
    %0 = vector.load %arg1[%c0, %c0_0, %c0_1] : memref<1x8x290xf32, #tpu.memory_space<vmem>>, vector<1x8x290xf32>
    %1 = vector.shape_cast %0 : vector<1x8x290xf32> to vector<8x290xf32>
    %2 = vector.extract_strided_slice %1 {offsets = [0, 0], sizes = [8, 256], strides = [1, 1]} : vector<8x290xf32> to vector<8x256xf32>
    %c0_2 = arith.constant 0 : index
    %c0_3 = arith.constant 0 : index
    %3 = vector.load %arg4[%c0_2, %c0_3] : memref<3x256xf32, #tpu.memory_space<vmem>>, vector<1x256xf32>
    %4 = vector.broadcast %3 : vector<1x256xf32> to vector<8x256xf32>
    %5 = arith.mulf %2, %4 : vector<8x256xf32>
    %6 = vector.extract_strided_slice %1 {offsets = [0, 1], sizes = [8, 256], strides = [1, 1]} : vector<8x290xf32> to vector<8x256xf32>
    %7 = vector.extract_strided_slice %1 {offsets = [0, 2], sizes = [8, 256], strides = [1, 1]} : vector<8x290xf32> to vector<8x256xf32>
    %c2 = arith.constant 2 : index
    %c0_4 = arith.constant 0 : index
    %8 = vector.load %arg4[%c2, %c0_4] : memref<3x256xf32, #tpu.memory_space<vmem>>, vector<1x256xf32>
    %9 = vector.broadcast %8 : vector<1x256xf32> to vector<8x256xf32>
    %10 = arith.mulf %7, %9 : vector<8x256xf32>
    %11 = vector.extract_strided_slice %1 {offsets = [0, 16], sizes = [8, 256], strides = [1, 1]} : vector<8x290xf32> to vector<8x256xf32>
    %c0_5 = arith.constant 0 : index
    %c0_6 = arith.constant 0 : index
    %12 = vector.load %arg4[%c0_5, %c0_6] : memref<3x256xf32, #tpu.memory_space<vmem>>, vector<1x256xf32>
    %13 = vector.broadcast %12 : vector<1x256xf32> to vector<8x256xf32>
    %14 = arith.mulf %11, %13 : vector<8x256xf32>
    %15 = vector.extract_strided_slice %1 {offsets = [0, 17], sizes = [8, 256], strides = [1, 1]} : vector<8x290xf32> to vector<8x256xf32>
    %16 = vector.extract_strided_slice %1 {offsets = [0, 18], sizes = [8, 256], strides = [1, 1]} : vector<8x290xf32> to vector<8x256xf32>
    %c2_7 = arith.constant 2 : index
    %c0_8 = arith.constant 0 : index
    %17 = vector.load %arg4[%c2_7, %c0_8] : memref<3x256xf32, #tpu.memory_space<vmem>>, vector<1x256xf32>
    %18 = vector.broadcast %17 : vector<1x256xf32> to vector<8x256xf32>
    %19 = arith.mulf %16, %18 : vector<8x256xf32>
    %20 = vector.extract_strided_slice %1 {offsets = [0, 32], sizes = [8, 256], strides = [1, 1]} : vector<8x290xf32> to vector<8x256xf32>
    %c0_9 = arith.constant 0 : index
    %c0_10 = arith.constant 0 : index
    %21 = vector.load %arg4[%c0_9, %c0_10] : memref<3x256xf32, #tpu.memory_space<vmem>>, vector<1x256xf32>
    %22 = vector.broadcast %21 : vector<1x256xf32> to vector<8x256xf32>
    %23 = arith.mulf %20, %22 : vector<8x256xf32>
    %24 = vector.extract_strided_slice %1 {offsets = [0, 33], sizes = [8, 256], strides = [1, 1]} : vector<8x290xf32> to vector<8x256xf32>
    %25 = vector.extract_strided_slice %1 {offsets = [0, 34], sizes = [8, 256], strides = [1, 1]} : vector<8x290xf32> to vector<8x256xf32>
    %c2_11 = arith.constant 2 : index
    %c0_12 = arith.constant 0 : index
    %26 = vector.load %arg4[%c2_11, %c0_12] : memref<3x256xf32, #tpu.memory_space<vmem>>, vector<1x256xf32>
    %27 = vector.broadcast %26 : vector<1x256xf32> to vector<8x256xf32>
    %28 = arith.mulf %25, %27 : vector<8x256xf32>
    %29 = tpu.concatenate %5, %6, %10, %14, %15, %19, %23, %24, %28 in 0 : vector<8x256xf32>, vector<8x256xf32>, vector<8x256xf32>, vector<8x256xf32>, vector<8x256xf32>, vector<8x256xf32>, vector<8x256xf32>, vector<8x256xf32>, vector<8x256xf32> -> vector<72x256xf32>
    %c0_13 = arith.constant 0 : index
    %c0_14 = arith.constant 0 : index
    %30 = vector.load %arg2[%c0_13, %c0_14] : memref<8x72xbf16, #tpu.memory_space<vmem>>, vector<8x72xbf16>
    %31 = arith.truncf %29 : vector<72x256xf32> to vector<72x256xbf16>
    %cst = arith.constant dense<0.000000e+00> : vector<8x256xf32>
    %32 = tpu.matmul %30, %31, %cst {dimension_numbers = #tpu.dot_dimension_numbers<[1], [0], [0], [1], [0, 0, 1, 1], [], []>} : vector<8x72xbf16>, vector<72x256xbf16>, vector<8x256xf32> -> vector<8x256xf32>
    %c0_15 = arith.constant 0 : index
    %c0_16 = arith.constant 0 : index
    %33 = vector.load %arg3[%c0_15, %c0_16] : memref<8x1xf32, #tpu.memory_space<vmem>>, vector<8x1xf32>
    %34 = vector.broadcast %33 : vector<8x1xf32> to vector<8x256xf32>
    %35 = arith.addf %32, %34 : vector<8x256xf32>
    %c0_17 = arith.constant 0 : index
    %c0_18 = arith.constant 0 : index
    %c0_19 = arith.constant 0 : index
    %36 = vector.load %arg5[%c0_17, %c0_18, %c0_19] : memref<1x8x256xf32, #tpu.memory_space<vmem>>, vector<1x8x256xf32>
    %37 = vector.shape_cast %36 : vector<1x8x256xf32> to vector<8x256xf32>
    %38 = vector.shape_cast %35 : vector<8x256xf32> to vector<1x8x256xf32>
    tpu.vector_store %arg5[%c0_17, %c0_18, %c0_19], %38 {strides = array<i32>} : memref<1x8x256xf32, #tpu.memory_space<vmem>>, vector<1x8x256xf32>,
    return
  }
  func.func @transform_0(%arg0: i32) -> (i32, i32, i32) {
    %c0_i32 = arith.constant 0 : i32
    %c0_i32_0 = arith.constant 0 : i32
    %c0_i32_1 = arith.constant 0 : i32
    return %arg0, %c0_i32, %c0_i32_0 : i32, i32, i32
  }
  func.func @transform_1(%arg0: i32) -> (i32, i32) {
    %c0_i32 = arith.constant 0 : i32
    %c0_i32_0 = arith.constant 0 : i32
    %c0_i32_1 = arith.constant 0 : i32
    return %c0_i32, %c0_i32_0 : i32, i32
  }
  func.func @transform_2(%arg0: i32) -> (i32, i32) {
    %c0_i32 = arith.constant 0 : i32
    %c0_i32_0 = arith.constant 0 : i32
    %c0_i32_1 = arith.constant 0 : i32
    return %c0_i32, %c0_i32_0 : i32, i32
  }
  func.func @transform_3(%arg0: i32) -> (i32, i32) {
    %c0_i32 = arith.constant 0 : i32
    %c0_i32_0 = arith.constant 0 : i32
    %c0_i32_1 = arith.constant 0 : i32
    return %c0_i32, %c0_i32_0 : i32, i32
  }
  func.func @transform_4(%arg0: i32) -> (i32, i32, i32) {
    %c0_i32 = arith.constant 0 : i32
    %c0_i32_0 = arith.constant 0 : i32
    %c0_i32_1 = arith.constant 0 : i32
    return %arg0, %c0_i32, %c0_i32_0 : i32, i32, i32
  }
}

module attributes {stable_mosaic.version = 11 : i64} {
  func.func @kernel(%arg0: i32, %arg1: memref<1x8x256xf32, #tpu.memory_space<vmem>>, %arg2: memref<3x8xbf16, #tpu.memory_space<vmem>>, %arg3: memref<3x1xf32, #tpu.memory_space<vmem>>, %arg4: memref<1x3x256xf32, #tpu.memory_space<vmem>>) attributes {dimension_semantics = [#tpu.dimension_semantics<parallel>], iteration_bounds = array<i64: 2>, scalar_prefetch = 0 : i64, scratch_operands = 0 : i64, tpu.core_type = #tpu.core_type<tc>, window_params = [{transform_indices = @transform_0, window_bounds = array<i64: 1, 8, 256>}, {pipeline_mode = #tpu.pipeline_mode<synchronous>, transform_indices = @transform_1, window_bounds = array<i64: 3, 8>}, {pipeline_mode = #tpu.pipeline_mode<synchronous>, transform_indices = @transform_2, window_bounds = array<i64: 3, 1>}, {transform_indices = @transform_3, window_bounds = array<i64: 1, 3, 256>}]} {
    %c0 = arith.constant 0 : index
    %c0_0 = arith.constant 0 : index
    %c0_1 = arith.constant 0 : index
    %0 = vector.load %arg1[%c0, %c0_0, %c0_1] : memref<1x8x256xf32, #tpu.memory_space<vmem>>, vector<1x8x256xf32>
    %1 = vector.shape_cast %0 : vector<1x8x256xf32> to vector<8x256xf32>
    %c0_2 = arith.constant 0 : index
    %c0_3 = arith.constant 0 : index
    %2 = vector.load %arg2[%c0_2, %c0_3] : memref<3x8xbf16, #tpu.memory_space<vmem>>, vector<3x8xbf16>
    %3 = arith.truncf %1 : vector<8x256xf32> to vector<8x256xbf16>
    %cst = arith.constant dense<0.000000e+00> : vector<3x256xf32>
    %4 = tpu.matmul %2, %3, %cst {dimension_numbers = #tpu.dot_dimension_numbers<[1], [0], [0], [1], [0, 0, 1, 1], [], []>} : vector<3x8xbf16>, vector<8x256xbf16>, vector<3x256xf32> -> vector<3x256xf32>
    %c0_4 = arith.constant 0 : index
    %c0_5 = arith.constant 0 : index
    %5 = vector.load %arg3[%c0_4, %c0_5] : memref<3x1xf32, #tpu.memory_space<vmem>>, vector<3x1xf32>
    %6 = vector.broadcast %5 : vector<3x1xf32> to vector<3x256xf32>
    %7 = arith.addf %4, %6 : vector<3x256xf32>
    %8 = math.tanh %7 : vector<3x256xf32>
    %c0_6 = arith.constant 0 : index
    %c0_7 = arith.constant 0 : index
    %c0_8 = arith.constant 0 : index
    %9 = vector.load %arg4[%c0_6, %c0_7, %c0_8] : memref<1x3x256xf32, #tpu.memory_space<vmem>>, vector<1x3x256xf32>
    %10 = vector.shape_cast %9 : vector<1x3x256xf32> to vector<3x256xf32>
    %11 = vector.shape_cast %8 : vector<3x256xf32> to vector<1x3x256xf32>
    tpu.vector_store %arg4[%c0_6, %c0_7, %c0_8], %11 {strides = array<i32>} : memref<1x3x256xf32, #tpu.memory_space<vmem>>, vector<1x3x256xf32>,
    return
  }
  func.func @transform_0(%arg0: i32) -> (i32, i32, i32) {
    %c0_i32 = arith.constant 0 : i32
    %c0_i32_0 = arith.constant 0 : i32
    %c0_i32_1 = arith.constant 0 : i32
    return %arg0, %c0_i32, %c0_i32_0 : i32, i32, i32
  }
  func.func @transform_1(%arg0: i32) -> (i32, i32) {
    %c0_i32 = arith.constant 0 : i32
    %c0_i32_0 = arith.constant 0 : i32
    %c0_i32_1 = arith.constant 0 : i32
    return %c0_i32, %c0_i32_0 : i32, i32
  }
  func.func @transform_2(%arg0: i32) -> (i32, i32) {
    %c0_i32 = arith.constant 0 : i32
    %c0_i32_0 = arith.constant 0 : i32
    %c0_i32_1 = arith.constant 0 : i32
    return %c0_i32, %c0_i32_0 : i32, i32
  }
  func.func @transform_3(%arg0: i32) -> (i32, i32, i32) {
    %c0_i32 = arith.constant 0 : i32
    %c0_i32_0 = arith.constant 0 : i32
    %c0_i32_1 = arith.constant 0 : i32
    return %arg0, %c0_i32, %c0_i32_0 : i32, i32, i32
  }
}

</mosaic_0001>

<bundles_post_ra>
// kernel: vae_forward.31
= control target key start
LH: loop header
LB: loop body
LE: loop exit
PB: predicated region body
PF: predicated region fallthrough
CT: control target
= control target key end

     0   :  { %s734_s18 = smov 0   ;;  %s818_s0 = inlined_call_operand.vmem [shape: f32[2,8,290], index: 0, kind: input, shape index: {}]   ;;  %s819_s1 = inlined_call_operand.vmem [shape: bf16[8,72], index: 1, kind: input, shape index: {}]   ;;  %s820_s2 = inlined_call_operand.vmem [shape: f32[8,1], index: 2, kind: input, shape index: {}]   ;;  %s821_s3 = inlined_call_operand.vmem [shape: f32[3,256], index: 3, kind: input, shape index: {}]   ;;  %s822_s4 = inlined_call_operand.vmem [shape: f32[8,1], index: 4, kind: input, shape index: {}]   ;;  %s823_s5 = inlined_call_operand.vmem [shape: f32[2,8,256], index: 5, kind: output, shape index: {}]  }
   0x1 LB: > { %s589_s19 = sadd.s32 4294967295, %s688_s18   ;;  %p593_p0 = scmp.ge.s32.totalorder %s688_s18, 1  ;;  %s688_s18 = sphi %s734_s18, %s15_s18  }
   0x2   : > { %p187_p1 = scmp.lt.s32.totalorder %s688_s18, 3 }
   0x4   : > { %p188_p2 = pnand %p593_p0, %p187_p1 }
   0x5   : > { %v231_v0 = vlaneseq (!%p188_p2)  ;;  %v597_v2 = vld [vmem:[%s821_s3 + $0x2] ss:$4 sm:$0x3] (!%p188_p2)  ;;  %v229_v3 = vld [vmem:[%s821_s3] ss:$4 sm:$0x3] (!%p188_p2) }
   0x6   : > { %191 = sbr.rel (%p188_p2) target bundleno = 553 (0x229), region = 40  ;;  %p215_p3 = scmp.lt.s32.totalorder (!%p188_p2), %s589_s19, 1  ;;  %vm258_vm0 = vcmask (!%p188_p2), 15360   ;;  %vm270_vm1 = vcmask (!%p188_p2), 130048   ;;  %vm282_vm2 = vcmask (!%p188_p2), 146432   ;;  %vm294_vm3 = vcmask (!%p188_p2), 261120  }
   0x7   : > { %v232_v1 = vshrl.u32 (!%p188_p2), %v231_v0, 7  ;;  %s690_s24 = smov (!%p188_p2), 2   ;;  %s691_s25 = smov (!%p188_p2), 16   ;;  %vm306_vm4 = vcmask (!%p188_p2), 277504   ;;  %vm323_vm5 = vcmask (!%p188_p2), 1039360   ;;  %v702_v54 = vmov (!%p188_p2), 0  }
   0x8   : > { %s692_s27 = smov (!%p188_p2), 18   ;;  %s693_s6 = smov (!%p188_p2), 32   ;;  %480 = vmatprep.mubr.bf16.mxu0 (!%p188_p2), %v702_v54  ;;  %668 = vset.pattern.permute.xlu0 (!%p188_p2), %v702_v54  ;;  %v509_v59 = vld [vmem:[%s822_s4] sm:$0xff] (!%p188_p2)  ;;  %vm337_vm6 = vcmask (!%p188_p2), 1031168   ;;  %vm351_vm7 = vcmask (!%p188_p2), 916480   ;;  %vm362_vm8 = vcmask (!%p188_p2), 908288  }
   0x9   : > { %v233_v4 = vsub.s32 (!%p188_p2), 0, %v232_v1  ;;  %v237_v5 = vsub.s32 (!%p188_p2), 1, %v232_v1  ;;  %s694_s7 = smov (!%p188_p2), 34   ;;  %s695_s8 = smov (!%p188_p2), 127   ;;  %669 = vset.pattern.permute.xlu1 (!%p188_p2), %v702_v54  ;;  %v431_v61 = vld [vmem:[%s820_s2] sm:$0xff] (!%p188_p2)  ;;  %vm390_vm9 = vcmask (!%p188_p2), 785408  }
   0xa   : > { %s696_s9 = smov (!%p188_p2), 111   ;;  %s697_s10 = smov (!%p188_p2), 95   ;;  %v510_v62 = vmul.f32 (!%p188_p2), 2.828427, %v509_v59  ;;  %vm376_vm10 = vcmask (!%p188_p2), 900096   ;;  %vm401_vm11 = vcmask (!%p188_p2), 777216  }
   0xb   : > { %v249_v6 = vrot.slane (!%p188_p2), %v597_v2, %v233_v4  ;;  %v748_v7 = vrot.slane (!%p188_p2), %v229_v3, %v233_v4  ;;  %v253_v8 = vrot.slane (!%p188_p2), %v597_v2, %v237_v5  ;;  %v751_v9 = vrot.slane (!%p188_p2), %v229_v3, %v237_v5  ;;  %s698_s11 = smov (!%p188_p2), 126   ;;  %s699_s12 = smov (!%p188_p2), 112  }
   0xc   : > { %s700_s13 = smov (!%p188_p2), 110   ;;  %s701_s14 = smov (!%p188_p2), 96   ;;  %vm415_vm12 = vcmask (!%p188_p2), 769024   ;;  %vm441_vm13 = vcmask (!%p188_p2), 1043456   ;;  %vm437_vm14 = vcmask (!%p188_p2), 588800  }
   0xd   : > { %254 = vrot.lane.b32.xlu0 %v249_v6, %s690_s24  ;;  %266 = vrot.lane.b32.xlu1 %v748_v7, %s691_s25  ;;  %s825_s19 = smov (!%p215_p3, %s589_s19), 1  ;;  %s703_s15 = smov 94  }
   0xe   : > { %s605_s26 = smul.u32 24, %s825_s19 }
  0x10   : > { %s219_s30 = scalar_lea.vmem %s818_s0, %s605_s26 }
  0x11   : > { %256 = vrot.lane.b32.xlu0 %v253_v8, %s690_s24  ;;  %268 = vrot.lane.b32.xlu1 %v751_v9, %s691_s25  ;;  %v762_v10 = vld [vmem:[%s219_s30 + $0x8] sm:$0xff]  ;;  %v764_v11 = vld [vmem:[%s219_s30 + $0x10] sm:$0xff]  ;;  %s604_s24 = sshll.u32 %s825_s19, 4 }
  0x12   : > { %v628_v12 = vpack.i.bf16 %v764_v11, %v762_v10  ;;  %v768_v13 = vld [vmem:[%s219_s30] sm:$0xff]  ;;  %v242_v50 = vmul.f32 %v751_v9, %v762_v10 }
  0x13   : > { %v241_v51 = vmul.f32 %v748_v7, %v768_v13 }
  0x15   : > { %278 = vrot.lane.b32.xlu0 %v249_v6, %s692_s27  ;;  %280 = vrot.lane.b32.xlu1 %v253_v8, %s692_s27  ;;  %s224_s27 = scalar_lea.vmem %s823_s5, %s604_s24 }
  0x19   : > { %290 = vrot.lane.b32.xlu0 %v748_v7, %s693_s6  ;;  %292 = vrot.lane.b32.xlu1 %v751_v9, %s693_s6 }
  0x1d   : > { %302 = vrot.lane.b32.xlu0 %v249_v6, %s694_s7  ;;  %304 = vrot.lane.b32.xlu1 %v253_v8, %s694_s7 }
  0x21   : > { %629 = vrot.lane.b32.xlu0 %v628_v12, %s695_s8  ;;  %317 = vrot.lane.b32.xlu1 %v768_v13, %s695_s8 }
  0x25   : > { %634 = vrot.lane.b32.xlu0 %v628_v12, %s696_s9  ;;  %639 = vrot.lane.b32.xlu1 %v628_v12, %s697_s10 }
  0x29   : > { %356 = vrot.lane.b32.xlu0 %v768_v13, %s696_s9 }
  0x7f   : > { %v255_v14 = vpop.permute.xlu0 %254  ;;  %v267_v15 = vpop.permute.xlu1 %266 }
  0x80   : > { %v263_v16 = vmul.f32 %v255_v14, %v768_v13  ;;  %v275_v17 = vmul.f32 %v267_v15, %v768_v13 }
  0x82   : > { %331 = vrot.lane.b32.xlu0 %v263_v16, %s698_s11  ;;  %345 = vrot.lane.b32.xlu1 %v275_v17, %s699_s12 }
  0x83   : > { %v257_v18 = vpop.permute.xlu0 %256  ;;  %v269_v19 = vpop.permute.xlu1 %268 }
  0x84   : > { %v259_v20 = vsel %vm258_vm0, %v255_v14, %v257_v18  ;;  %v265_v21 = vmul.f32 %v257_v18, %v764_v11  ;;  %v271_v22 = vsel %vm270_vm1, %v267_v15, %v269_v19  ;;  %v277_v26 = vmul.f32 %v269_v19, %v764_v11 }
  0x85   : > { %v264_v23 = vmul.f32 %v259_v20, %v762_v10  ;;  %v276_v25 = vmul.f32 %v271_v22, %v762_v10 }
  0x87   : > { %v643_v24 = vpack.i.bf16 %v265_v21, %v264_v23  ;;  %v279_v27 = vpop.permute.xlu0 %278  ;;  %v281_v28 = vpop.permute.xlu1 %280  ;;  %v648_v31 = vpack.i.bf16 %v277_v26, %v276_v25 }
  0x88   : > { %v287_v29 = vmul.f32 %v279_v27, %v768_v13  ;;  %v283_v30 = vsel %vm282_vm2, %v279_v27, %v281_v28  ;;  %v289_v32 = vmul.f32 %v281_v28, %v764_v11 }
  0x89   : > { %644 = vrot.lane.b32.xlu0 %v643_v24, %s698_s11  ;;  %v288_v35 = vmul.f32 %v283_v30, %v762_v10 }
  0x8a   : > { %370 = vrot.lane.b32.xlu1 %v287_v29, %s700_s13 }
  0x8b   : > { %v291_v33 = vpop.permute.xlu0 %290  ;;  %v293_v34 = vpop.permute.xlu1 %292  ;;  %v653_v43 = vpack.i.bf16 %v289_v32, %v288_v35 }
  0x8c   : > { %v299_v36 = vmul.f32 %v291_v33, %v768_v13  ;;  %v295_v37 = vsel %vm294_vm3, %v291_v33, %v293_v34  ;;  %v301_v38 = vmul.f32 %v293_v34, %v764_v11 }
  0x8d   : > { %v300_v39 = vmul.f32 %v295_v37, %v762_v10 }
  0x8e   : > { %649 = vrot.lane.b32.xlu1 %v648_v31, %s699_s12  ;;  %384 = vrot.lane.b32.xlu0 %v299_v36, %s701_s14 }
  0x8f   : > { %v658_v40 = vpack.i.bf16 %v301_v38, %v300_v39  ;;  %v303_v41 = vpop.permute.xlu0 %302  ;;  %v305_v42 = vpop.permute.xlu1 %304 }
  0x90   : > { %v311_v44 = vmul.f32 %v303_v41, %v768_v13  ;;  %v307_v45 = vsel %vm306_vm4, %v303_v41, %v305_v42  ;;  %v313_v60 = vmul.f32 %v305_v42, %v764_v11 }
  0x91   : > { %v312_v46 = vmul.f32 %v307_v45, %v762_v10 }
  0x92   : > { %654 = vrot.lane.b32.xlu1 %v653_v43, %s700_s13  ;;  %659 = vrot.lane.b32.xlu0 %v658_v40, %s701_s14 }
  0x93   : > { %v663_v47 = vpack.i.bf16 %v312_v46, %v311_v44  ;;  %v630_v48 = vpop.permute.xlu0 %629  ;;  %v318_v49 = vpop.permute.xlu1 %317 }
  0x94   : > { %v632_v52 = vunpack.i.h.bf16 %v630_v48  ;;  %v631_v53 = vunpack.i.l.bf16 %v630_v48 }
  0x96   : > { %395 = vrot.lane.b32.xlu1 %v768_v13, %s697_s10  ;;  %664 = vrot.lane.b32.xlu0 %v663_v47, %s703_s15  ;;  %v324_v55 = vsel %vm323_vm5, %v318_v49, %v631_v53  ;;  %v325_v56 = vsel %vm323_vm5, %v631_v53, %v632_v52 }
  0x97   : > { %v422_v57 = vpack.c.bf16 %v325_v56, %v242_v50  ;;  %v421_v58 = vpack.c.bf16 %v324_v55, %v241_v51  ;;  %v635_v63 = vpop.permute.xlu0 %634  ;;  %v640_v0 = vpop.permute.xlu1 %639  ;;  %v420_v50 = vld [vmem:[%s819_s1] sm:$0xf] }
  0x98   : > { %v637_v12 = vunpack.i.h.bf16 %v635_v63  ;;  %v636_v13 = vunpack.i.l.bf16 %v635_v63  ;;  %v642_v18 = vunpack.i.h.bf16 %v640_v0  ;;  %v641_v19 = vunpack.i.l.bf16 %v640_v0 }
  0x99   : > { %448 = vmatprep.subr.bf16.mxu0 %v422_v57 }
  0x9a   : > { %413 = vrot.lane.b32.xlu1 %v313_v60, %s703_s15  ;;  %449 = vmatpush1.bf16.msra.mxu0 %v421_v58  ;;  %v364_v28 = vsel %vm362_vm8, %v636_v13, %v637_v12  ;;  %v403_v39 = vsel %vm401_vm11, %v641_v19, %v642_v18 }
  0x9b   : > { %434 = vperm.xlu0 %668, %v431_v61   ;;  %v357_v1 = vpop.permute.xlu0 %356 }
  0x9c   : > { %v363_v29 = vsel %vm362_vm8, %v357_v1, %v636_v13 }
  0x9e   : > { %513 = vperm.xlu1 %669, %v510_v62  }
  0xf4   : > { %v346_v2 = vpop.permute.xlu1 %345  ;;  %v332_v3 = vpop.permute.xlu0 %331 }
  0xfb   : > { %v645_v4 = vpop.permute.xlu0 %644 }
  0xfc   : > { %v371_v5 = vpop.permute.xlu1 %370  ;;  %v647_v6 = vunpack.i.h.bf16 %v645_v4  ;;  %v646_v7 = vunpack.i.l.bf16 %v645_v4 }
  0xfe   : > { %v339_v14 = vsel %vm337_vm6, %v646_v7, %v647_v6  ;;  %v338_v16 = vsel %vm337_vm6, %v332_v3, %v646_v7 }
 0x100   : > { %v650_v8 = vpop.permute.xlu1 %649  ;;  %v385_v9 = vpop.permute.xlu0 %384 }
 0x101   : > { %v652_v10 = vunpack.i.h.bf16 %v650_v8  ;;  %v651_v11 = vunpack.i.l.bf16 %v650_v8 }
 0x103   : > { %v353_v15 = vsel %vm351_vm7, %v651_v11, %v652_v10  ;;  %v352_v17 = vsel %vm351_vm7, %v346_v2, %v651_v11 }
 0x104   : > { %v655_v20 = vpop.permute.xlu1 %654  ;;  %v660_v21 = vpop.permute.xlu0 %659  ;;  %v424_v22 = vpack.c.bf16 %v353_v15, %v339_v14  ;;  %v423_v23 = vpack.c.bf16 %v352_v17, %v338_v16 }
 0x105   : > { %v657_v24 = vunpack.i.h.bf16 %v655_v20  ;;  %v656_v25 = vunpack.i.l.bf16 %v655_v20  ;;  %v662_v26 = vunpack.i.h.bf16 %v660_v21  ;;  %v661_v27 = vunpack.i.l.bf16 %v660_v21 }
 0x106   : > { %450 = vmatprep.subr.bf16.mxu0 %v424_v22 }
 0x107   : > { %451 = vmatpush1.bf16.msra.mxu0 %v423_v23  ;;  %v378_v30 = vsel %vm376_vm10, %v656_v25, %v657_v24  ;;  %v377_v31 = vsel %vm376_vm10, %v371_v5, %v656_v25  ;;  %v392_v32 = vsel %vm390_vm9, %v661_v27, %v662_v26  ;;  %v391_v43 = vsel %vm390_vm9, %v385_v9, %v661_v27 }
 0x108   : > { %v396_v33 = vpop.permute.xlu1 %395  ;;  %v665_v34 = vpop.permute.xlu0 %664  ;;  %v426_v35 = vpack.c.bf16 %v378_v30, %v364_v28  ;;  %v425_v36 = vpack.c.bf16 %v377_v31, %v363_v29  ;;  %v428_v41 = vpack.c.bf16 %v403_v39, %v392_v32 }
 0x109   : > { %v667_v37 = vunpack.i.h.bf16 %v665_v34  ;;  %v666_v38 = vunpack.i.l.bf16 %v665_v34  ;;  %v402_v40 = vsel %vm401_vm11, %v396_v33, %v641_v19 }
 0x10a   : > { %452 = vmatprep.subr.bf16.mxu0 %v426_v35  ;;  %v427_v46 = vpack.c.bf16 %v402_v40, %v391_v43 }
 0x10b   : > { %453 = vmatpush1.bf16.msra.mxu0 %v425_v36  ;;  %v416_v42 = vsel %vm415_vm12, %v666_v38, %v667_v37 }
 0x10c   : > { %v414_v44 = vpop.permute.xlu1 %413  ;;  %454 = vmatprep.subr.bf16.mxu0 %v428_v41  ;;  %v429_v45 = vpack.c.bf16 %v416_v42, %v416_v42 }
 0x10d   : > { %v417_v47 = vsel %vm415_vm12, %v667_v37, %v414_v44 }
 0x10e   : > { %v430_v48 = vpack.c.bf16 %v417_v47, %v417_v47  ;;  %v443_v49 = vsel %vm441_vm13, %v429_v45, 0 }
 0x10f   : > { %455 = vmatpush1.bf16.msra.mxu0 %v427_v46 }
 0x110   : > { %598 = vmatprep.subr.msk.bf16.mxu0 %vm441_vm13, %v430_v48 }
 0x113   : > { %457 = vmatpush1.bf16.msra.mxu0 %v443_v49 }
 0x116   : > { %599 = vmatmul.mubr.msk.bf16.vlgmr.msra.gmra.mrb[0].mxu0 %vm437_vm14, %v420_v50 }
 0x11a   : > { %v435_v51 = vpop.permute.xlu0 %434 }
 0x11d   : > { %v514_v11 = vpop.permute.xlu1 %513 }
 0x1e9   : > { %v482_v52 = vpop.f32.mrb[0].mxu0 }
 0x1ea   : > { %v483_v53 = vadd.f32 %v482_v52, %v435_v51  ;;  %v484_v54 = vpop.f32.mrb[1].mxu0 }
 0x1eb   : > { %v485_v55 = vadd.f32 %v484_v54, %v435_v51  ;;  %v486_v56 = vpop.f32.mrb[2].mxu0 }
 0x1ec   : > { %v489_v57 = vmul.f32 %v483_v53, %v483_v53  ;;  %v487_v58 = vpop.f32.mrb[3].mxu0 }
 0x1ed   : > { %v490_v59 = vmul.f32 %v485_v55, %v485_v55 }
 0x1ee   : > { %v491_v60 = vrot.slane %v489_v57, 4 }
 0x1ef   : > { %v497_v61 = vrot.slane %v490_v59, 4 }
 0x1f0   : > { %v492_v62 = vadd.f32 %v491_v60, %v489_v57 }
 0x1f1   : > { %v498_v63 = vadd.f32 %v497_v61, %v490_v59 }
 0x1f2   : > { %v493_v0 = vrot.slane %v492_v62, 2 }
 0x1f3   : > { %v499_v1 = vrot.slane %v498_v63, 2 }
 0x1f4   : > { %v494_v2 = vadd.f32 %v493_v0, %v492_v62 }
 0x1f5   : > { %v500_v3 = vadd.f32 %v499_v1, %v498_v63 }
 0x1f6   : > { %v495_v4 = vrot.slane %v494_v2, 1 }
 0x1f7   : > { %v501_v5 = vrot.slane %v500_v3, 1 }
 0x1f8   : > { %v496_v6 = vadd.f32 %v495_v4, %v494_v2 }
 0x1f9   : > { %v502_v7 = vadd.f32 %v501_v5, %v500_v3 }
 0x1fa   : > { %v503_v8 = vmax.f32 %v496_v6, 1e-24 }
 0x1fb   : > { %v504_v9 = vmax.f32 %v502_v7, 1e-24 }
 0x1fc   : > { %670 = vrsqrt.f32 %v503_v8 }
 0x1fd   : > { %672 = vrsqrt.f32 %v504_v9 }
 0x206   : > { %v671_v10 = vpop.eup %670 }
 0x207   : > { %v673_v12 = vpop.eup %672  ;;  %v507_v13 = vmul.f32 %v671_v10, %v483_v53 }
 0x208   : > { %v508_v14 = vmul.f32 %v673_v12, %v485_v55 }
 0x209   : > { %v516_v15 = vmul.f32 %v514_v11, %v507_v13 }
 0x20a   : > { %v517_v16 = vmul.f32 %v514_v11, %v508_v14 }
 0x20b   : > { %v600_v17 = vmul.f32 -1.442695, %v516_v15 }
 0x20c   : > { %v601_v18 = vmul.f32 -1.442695, %v517_v16 }
 0x20d   : > { %674 = vpow2.f32 %v600_v17 }
 0x20e   : > { %676 = vpow2.f32 %v601_v18 }
 0x217   : > { %v675_v19 = vpop.eup %674 }
 0x218   : > { %v677_v20 = vpop.eup %676  ;;  %v524_v21 = vadd.f32 1.0, %v675_v19 }
 0x219   : > { %v525_v22 = vadd.f32 1.0, %v677_v20 }
 0x21a   : > { %678 = vrcp.f32 %v524_v21 }
 0x21b   : > { %680 = vrcp.f32 %v525_v22 }
 0x224   : > { %v679_v23 = vpop.eup %678 }
 0x225   : > { %v681_v24 = vpop.eup %680  ;;  %v530_v25 = vmul.f32 %v679_v23, %v516_v15 }
 0x226   : > { %v531_v26 = vmul.f32 %v681_v24, %v517_v16 }
 0x227   : > { %532 = vst [vmem:[%s224_s27] sm:$0xff] %v530_v25 }
 0x228   : > { %533 = vst [vmem:[%s224_s27 + $0x8] sm:$0xff] %v531_v26 }
 0x229 PF: > { %s15_s18 = sadd.s32 1, %s688_s18  }
 0x22a   : > { %p12_p4 = scmp.ge.s32.totalorder %s15_s18, 4  }
 0x22c   :  { %14 = sbr.rel (!%p12_p4) target bundleno = 1 (0x1), region = 71 }

// kernel: vae_forward.32
= control target key start
LH: loop header
LB: loop body
LE: loop exit
PB: predicated region body
PF: predicated region fallthrough
CT: control target
= control target key end

     0   :  { %s805_s21 = smov 0   ;;  %s892_s0 = inlined_call_operand.vmem [shape: f32[2,8,290], index: 0, kind: input, shape index: {}]   ;;  %s893_s1 = inlined_call_operand.vmem [shape: bf16[8,72], index: 1, kind: input, shape index: {}]   ;;  %s894_s2 = inlined_call_operand.vmem [shape: f32[8,1], index: 2, kind: input, shape index: {}]   ;;  %s895_s3 = inlined_call_operand.vmem [shape: f32[3,256], index: 3, kind: input, shape index: {}]   ;;  %s896_s4 = inlined_call_operand.vmem [shape: f32[8,1], index: 4, kind: input, shape index: {}]   ;;  %s897_s5 = inlined_call_operand.vmem [shape: f32[2,8,256], index: 5, kind: input, shape index: {}]   ;;  %s898_s6 = inlined_call_operand.vmem [shape: f32[2,8,256], index: 6, kind: output, shape index: {}]  }
   0x1 LB: > { %s652_s22 = sadd.s32 4294967295, %s754_s21   ;;  %p656_p0 = scmp.ge.s32.totalorder %s754_s21, 1  ;;  %s754_s21 = sphi %s805_s21, %s16_s21  }
   0x2   : > { %p222_p1 = scmp.lt.s32.totalorder %s754_s21, 3 }
   0x4   : > { %p223_p2 = pnand %p656_p0, %p222_p1 }
   0x5   : > { %v278_v0 = vlaneseq (!%p223_p2)  ;;  %v662_v2 = vld [vmem:[%s895_s3 + $0x2] ss:$4 sm:$0x3] (!%p223_p2)  ;;  %v276_v3 = vld [vmem:[%s895_s3] ss:$4 sm:$0x3] (!%p223_p2) }
   0x6   : > { %226 = sbr.rel (%p223_p2) target bundleno = 555 (0x22b), region = 44  ;;  %p257_p3 = scmp.lt.s32.totalorder (!%p223_p2), %s652_s22, 1  ;;  %vm305_vm0 = vcmask (!%p223_p2), 15360   ;;  %vm317_vm1 = vcmask (!%p223_p2), 130048   ;;  %vm329_vm2 = vcmask (!%p223_p2), 146432   ;;  %vm341_vm3 = vcmask (!%p223_p2), 261120  }
   0x7   : > { %v279_v1 = vshrl.u32 (!%p223_p2), %v278_v0, 7  ;;  %s756_s27 = smov (!%p223_p2), 2   ;;  %s757_s28 = smov (!%p223_p2), 16   ;;  %vm353_vm4 = vcmask (!%p223_p2), 277504   ;;  %vm370_vm5 = vcmask (!%p223_p2), 1039360   ;;  %v768_v54 = vmov (!%p223_p2), 0  }
   0x8   : > { %s758_s30 = smov (!%p223_p2), 18   ;;  %s759_s10 = smov (!%p223_p2), 32   ;;  %527 = vmatprep.mubr.bf16.mxu0 (!%p223_p2), %v768_v54  ;;  %734 = vset.pattern.permute.xlu0 (!%p223_p2), %v768_v54  ;;  %v556_v59 = vld [vmem:[%s896_s4] sm:$0xff] (!%p223_p2)  ;;  %vm384_vm6 = vcmask (!%p223_p2), 1031168   ;;  %vm398_vm7 = vcmask (!%p223_p2), 916480   ;;  %vm409_vm8 = vcmask (!%p223_p2), 908288  }
   0x9   : > { %v280_v4 = vsub.s32 (!%p223_p2), 0, %v279_v1  ;;  %v284_v5 = vsub.s32 (!%p223_p2), 1, %v279_v1  ;;  %s760_s11 = smov (!%p223_p2), 34   ;;  %s761_s12 = smov (!%p223_p2), 127   ;;  %735 = vset.pattern.permute.xlu1 (!%p223_p2), %v768_v54  ;;  %v478_v61 = vld [vmem:[%s894_s2] sm:$0xff] (!%p223_p2)  ;;  %vm437_vm9 = vcmask (!%p223_p2), 785408  }
   0xa   : > { %s762_s13 = smov (!%p223_p2), 111   ;;  %s763_s14 = smov (!%p223_p2), 95   ;;  %v557_v62 = vmul.f32 (!%p223_p2), 2.828427, %v556_v59  ;;  %vm423_vm10 = vcmask (!%p223_p2), 900096   ;;  %vm448_vm11 = vcmask (!%p223_p2), 777216  }
   0xb   : > { %v296_v6 = vrot.slane (!%p223_p2), %v662_v2, %v280_v4  ;;  %v819_v7 = vrot.slane (!%p223_p2), %v276_v3, %v280_v4  ;;  %v300_v8 = vrot.slane (!%p223_p2), %v662_v2, %v284_v5  ;;  %v822_v9 = vrot.slane (!%p223_p2), %v276_v3, %v284_v5  ;;  %s764_s15 = smov (!%p223_p2), 126   ;;  %s765_s16 = smov (!%p223_p2), 112  }
   0xc   : > { %s766_s17 = smov (!%p223_p2), 110   ;;  %s767_s18 = smov (!%p223_p2), 96   ;;  %vm462_vm12 = vcmask (!%p223_p2), 769024   ;;  %vm488_vm13 = vcmask (!%p223_p2), 1043456   ;;  %vm484_vm14 = vcmask (!%p223_p2), 588800  }
   0xd   : > { %301 = vrot.lane.b32.xlu0 %v296_v6, %s756_s27  ;;  %313 = vrot.lane.b32.xlu1 %v819_v7, %s757_s28  ;;  %s900_s22 = smov (!%p257_p3, %s652_s22), 1  ;;  %s769_s19 = smov 94  }
   0xe   : > { %s671_s29 = smul.u32 24, %s900_s22 }
  0x10   : > { %s261_s9 = scalar_lea.vmem %s892_s0, %s671_s29 }
  0x11   : > { %303 = vrot.lane.b32.xlu0 %v300_v8, %s756_s27  ;;  %315 = vrot.lane.b32.xlu1 %v822_v9, %s757_s28  ;;  %v833_v10 = vld [vmem:[%s261_s9 + $0x8] sm:$0xff]  ;;  %v835_v11 = vld [vmem:[%s261_s9 + $0x10] sm:$0xff]  ;;  %s669_s28 = sshll.u32 %s900_s22, 4 }
  0x12   : > { %v694_v12 = vpack.i.bf16 %v835_v11, %v833_v10  ;;  %v839_v13 = vld [vmem:[%s261_s9] sm:$0xff]  ;;  %v289_v50 = vmul.f32 %v822_v9, %v833_v10  ;;  %s266_s7 = scalar_lea.vmem %s897_s5, %s669_s28 }
  0x13   : > { %v288_v51 = vmul.f32 %v819_v7, %v839_v13 }
  0x15   : > { %325 = vrot.lane.b32.xlu0 %v296_v6, %s758_s30  ;;  %327 = vrot.lane.b32.xlu1 %v300_v8, %s758_s30 }
  0x19   : > { %337 = vrot.lane.b32.xlu0 %v819_v7, %s759_s10  ;;  %339 = vrot.lane.b32.xlu1 %v822_v9, %s759_s10  ;;  %s271_s10 = scalar_lea.vmem %s898_s6, %s669_s28 }
  0x1d   : > { %349 = vrot.lane.b32.xlu0 %v296_v6, %s760_s11  ;;  %351 = vrot.lane.b32.xlu1 %v300_v8, %s760_s11 }
  0x21   : > { %695 = vrot.lane.b32.xlu0 %v694_v12, %s761_s12  ;;  %364 = vrot.lane.b32.xlu1 %v839_v13, %s761_s12 }
  0x25   : > { %700 = vrot.lane.b32.xlu0 %v694_v12, %s762_s13  ;;  %705 = vrot.lane.b32.xlu1 %v694_v12, %s763_s14 }
  0x29   : > { %403 = vrot.lane.b32.xlu0 %v839_v13, %s762_s13 }
  0x7f   : > { %v302_v14 = vpop.permute.xlu0 %301  ;;  %v314_v15 = vpop.permute.xlu1 %313 }
  0x80   : > { %v310_v16 = vmul.f32 %v302_v14, %v839_v13  ;;  %v322_v17 = vmul.f32 %v314_v15, %v839_v13 }
  0x82   : > { %378 = vrot.lane.b32.xlu0 %v310_v16, %s764_s15  ;;  %392 = vrot.lane.b32.xlu1 %v322_v17, %s765_s16 }
  0x83   : > { %v304_v18 = vpop.permute.xlu0 %303  ;;  %v316_v19 = vpop.permute.xlu1 %315 }
  0x84   : > { %v306_v20 = vsel %vm305_vm0, %v302_v14, %v304_v18  ;;  %v312_v21 = vmul.f32 %v304_v18, %v835_v11  ;;  %v318_v22 = vsel %vm317_vm1, %v314_v15, %v316_v19  ;;  %v324_v26 = vmul.f32 %v316_v19, %v835_v11 }
  0x85   : > { %v311_v23 = vmul.f32 %v306_v20, %v833_v10  ;;  %v323_v25 = vmul.f32 %v318_v22, %v833_v10 }
  0x87   : > { %v709_v24 = vpack.i.bf16 %v312_v21, %v311_v23  ;;  %v326_v27 = vpop.permute.xlu0 %325  ;;  %v328_v28 = vpop.permute.xlu1 %327  ;;  %v714_v31 = vpack.i.bf16 %v324_v26, %v323_v25 }
  0x88   : > { %v334_v29 = vmul.f32 %v326_v27, %v839_v13  ;;  %v330_v30 = vsel %vm329_vm2, %v326_v27, %v328_v28  ;;  %v336_v32 = vmul.f32 %v328_v28, %v835_v11 }
  0x89   : > { %710 = vrot.lane.b32.xlu0 %v709_v24, %s764_s15  ;;  %v335_v35 = vmul.f32 %v330_v30, %v833_v10 }
  0x8a   : > { %417 = vrot.lane.b32.xlu1 %v334_v29, %s766_s17 }
  0x8b   : > { %v338_v33 = vpop.permute.xlu0 %337  ;;  %v340_v34 = vpop.permute.xlu1 %339  ;;  %v719_v43 = vpack.i.bf16 %v336_v32, %v335_v35 }
  0x8c   : > { %v346_v36 = vmul.f32 %v338_v33, %v839_v13  ;;  %v342_v37 = vsel %vm341_vm3, %v338_v33, %v340_v34  ;;  %v348_v38 = vmul.f32 %v340_v34, %v835_v11 }
  0x8d   : > { %v347_v39 = vmul.f32 %v342_v37, %v833_v10 }
  0x8e   : > { %715 = vrot.lane.b32.xlu1 %v714_v31, %s765_s16  ;;  %431 = vrot.lane.b32.xlu0 %v346_v36, %s767_s18 }
  0x8f   : > { %v724_v40 = vpack.i.bf16 %v348_v38, %v347_v39  ;;  %v350_v41 = vpop.permute.xlu0 %349  ;;  %v352_v42 = vpop.permute.xlu1 %351 }
  0x90   : > { %v358_v44 = vmul.f32 %v350_v41, %v839_v13  ;;  %v354_v45 = vsel %vm353_vm4, %v350_v41, %v352_v42  ;;  %v360_v60 = vmul.f32 %v352_v42, %v835_v11 }
  0x91   : > { %v359_v46 = vmul.f32 %v354_v45, %v833_v10 }
  0x92   : > { %720 = vrot.lane.b32.xlu1 %v719_v43, %s766_s17  ;;  %725 = vrot.lane.b32.xlu0 %v724_v40, %s767_s18 }
  0x93   : > { %v729_v47 = vpack.i.bf16 %v359_v46, %v358_v44  ;;  %v696_v48 = vpop.permute.xlu0 %695  ;;  %v365_v49 = vpop.permute.xlu1 %364 }
  0x94   : > { %v698_v52 = vunpack.i.h.bf16 %v696_v48  ;;  %v697_v53 = vunpack.i.l.bf16 %v696_v48 }
  0x96   : > { %442 = vrot.lane.b32.xlu1 %v839_v13, %s763_s14  ;;  %730 = vrot.lane.b32.xlu0 %v729_v47, %s769_s19  ;;  %v371_v55 = vsel %vm370_vm5, %v365_v49, %v697_v53  ;;  %v372_v56 = vsel %vm370_vm5, %v697_v53, %v698_v52 }
  0x97   : > { %v469_v57 = vpack.c.bf16 %v372_v56, %v289_v50  ;;  %v468_v58 = vpack.c.bf16 %v371_v55, %v288_v51  ;;  %v701_v63 = vpop.permute.xlu0 %700  ;;  %v706_v0 = vpop.permute.xlu1 %705  ;;  %v467_v50 = vld [vmem:[%s893_s1] sm:$0xf] }
  0x98   : > { %v703_v12 = vunpack.i.h.bf16 %v701_v63  ;;  %v702_v13 = vunpack.i.l.bf16 %v701_v63  ;;  %v708_v18 = vunpack.i.h.bf16 %v706_v0  ;;  %v707_v19 = vunpack.i.l.bf16 %v706_v0 }
  0x99   : > { %495 = vmatprep.subr.bf16.mxu0 %v469_v57 }
  0x9a   : > { %460 = vrot.lane.b32.xlu1 %v360_v60, %s769_s19  ;;  %496 = vmatpush1.bf16.msra.mxu0 %v468_v58  ;;  %v411_v28 = vsel %vm409_vm8, %v702_v13, %v703_v12  ;;  %v450_v39 = vsel %vm448_vm11, %v707_v19, %v708_v18 }
  0x9b   : > { %481 = vperm.xlu0 %734, %v478_v61   ;;  %v404_v1 = vpop.permute.xlu0 %403 }
  0x9c   : > { %v410_v29 = vsel %vm409_vm8, %v404_v1, %v702_v13 }
  0x9e   : > { %560 = vperm.xlu1 %735, %v557_v62  }
  0xf4   : > { %v393_v2 = vpop.permute.xlu1 %392  ;;  %v379_v3 = vpop.permute.xlu0 %378 }
  0xfb   : > { %v711_v4 = vpop.permute.xlu0 %710 }
  0xfc   : > { %v418_v5 = vpop.permute.xlu1 %417  ;;  %v713_v6 = vunpack.i.h.bf16 %v711_v4  ;;  %v712_v7 = vunpack.i.l.bf16 %v711_v4 }
  0xfe   : > { %v386_v14 = vsel %vm384_vm6, %v712_v7, %v713_v6  ;;  %v385_v16 = vsel %vm384_vm6, %v379_v3, %v712_v7 }
 0x100   : > { %v716_v8 = vpop.permute.xlu1 %715  ;;  %v432_v9 = vpop.permute.xlu0 %431 }
 0x101   : > { %v718_v10 = vunpack.i.h.bf16 %v716_v8  ;;  %v717_v11 = vunpack.i.l.bf16 %v716_v8 }
 0x103   : > { %v400_v15 = vsel %vm398_vm7, %v717_v11, %v718_v10  ;;  %v399_v17 = vsel %vm398_vm7, %v393_v2, %v717_v11 }
 0x104   : > { %v721_v20 = vpop.permute.xlu1 %720  ;;  %v726_v21 = vpop.permute.xlu0 %725  ;;  %v471_v22 = vpack.c.bf16 %v400_v15, %v386_v14  ;;  %v470_v23 = vpack.c.bf16 %v399_v17, %v385_v16 }
 0x105   : > { %v723_v24 = vunpack.i.h.bf16 %v721_v20  ;;  %v722_v25 = vunpack.i.l.bf16 %v721_v20  ;;  %v728_v26 = vunpack.i.h.bf16 %v726_v21  ;;  %v727_v27 = vunpack.i.l.bf16 %v726_v21 }
 0x106   : > { %497 = vmatprep.subr.bf16.mxu0 %v471_v22 }
 0x107   : > { %498 = vmatpush1.bf16.msra.mxu0 %v470_v23  ;;  %v425_v30 = vsel %vm423_vm10, %v722_v25, %v723_v24  ;;  %v424_v31 = vsel %vm423_vm10, %v418_v5, %v722_v25  ;;  %v439_v32 = vsel %vm437_vm9, %v727_v27, %v728_v26  ;;  %v438_v43 = vsel %vm437_vm9, %v432_v9, %v727_v27  ;;  %v579_v24 = vld [vmem:[%s266_s7] sm:$0xff]  ;;  %v580_v26 = vld [vmem:[%s266_s7 + $0x8] sm:$0xff] }
 0x108   : > { %v443_v33 = vpop.permute.xlu1 %442  ;;  %v731_v34 = vpop.permute.xlu0 %730  ;;  %v473_v35 = vpack.c.bf16 %v425_v30, %v411_v28  ;;  %v472_v36 = vpack.c.bf16 %v424_v31, %v410_v29  ;;  %v475_v41 = vpack.c.bf16 %v450_v39, %v439_v32 }
 0x109   : > { %v733_v37 = vunpack.i.h.bf16 %v731_v34  ;;  %v732_v38 = vunpack.i.l.bf16 %v731_v34  ;;  %v449_v40 = vsel %vm448_vm11, %v443_v33, %v707_v19 }
 0x10a   : > { %499 = vmatprep.subr.bf16.mxu0 %v473_v35  ;;  %v474_v46 = vpack.c.bf16 %v449_v40, %v438_v43 }
 0x10b   : > { %500 = vmatpush1.bf16.msra.mxu0 %v472_v36  ;;  %v463_v42 = vsel %vm462_vm12, %v732_v38, %v733_v37 }
 0x10c   : > { %v461_v44 = vpop.permute.xlu1 %460  ;;  %501 = vmatprep.subr.bf16.mxu0 %v475_v41  ;;  %v476_v45 = vpack.c.bf16 %v463_v42, %v463_v42 }
 0x10d   : > { %v464_v47 = vsel %vm462_vm12, %v733_v37, %v461_v44 }
 0x10e   : > { %v477_v48 = vpack.c.bf16 %v464_v47, %v464_v47  ;;  %v490_v49 = vsel %vm488_vm13, %v476_v45, 0 }
 0x10f   : > { %502 = vmatpush1.bf16.msra.mxu0 %v474_v46 }
 0x110   : > { %663 = vmatprep.subr.msk.bf16.mxu0 %vm488_vm13, %v477_v48 }
 0x113   : > { %504 = vmatpush1.bf16.msra.mxu0 %v490_v49 }
 0x116   : > { %664 = vmatmul.mubr.msk.bf16.vlgmr.msra.gmra.mrb[0].mxu0 %vm484_vm14, %v467_v50 }
 0x11a   : > { %v482_v51 = vpop.permute.xlu0 %481 }
 0x11d   : > { %v561_v11 = vpop.permute.xlu1 %560 }
 0x1e9   : > { %v529_v52 = vpop.f32.mrb[0].mxu0 }
 0x1ea   : > { %v530_v53 = vadd.f32 %v529_v52, %v482_v51  ;;  %v531_v54 = vpop.f32.mrb[1].mxu0 }
 0x1eb   : > { %v532_v55 = vadd.f32 %v531_v54, %v482_v51  ;;  %v533_v56 = vpop.f32.mrb[2].mxu0 }
 0x1ec   : > { %v536_v57 = vmul.f32 %v530_v53, %v530_v53  ;;  %v534_v58 = vpop.f32.mrb[3].mxu0 }
 0x1ed   : > { %v537_v59 = vmul.f32 %v532_v55, %v532_v55 }
 0x1ee   : > { %v538_v60 = vrot.slane %v536_v57, 4 }
 0x1ef   : > { %v544_v61 = vrot.slane %v537_v59, 4 }
 0x1f0   : > { %v539_v62 = vadd.f32 %v538_v60, %v536_v57 }
 0x1f1   : > { %v545_v63 = vadd.f32 %v544_v61, %v537_v59 }
 0x1f2   : > { %v540_v0 = vrot.slane %v539_v62, 2 }
 0x1f3   : > { %v546_v1 = vrot.slane %v545_v63, 2 }
 0x1f4   : > { %v541_v2 = vadd.f32 %v540_v0, %v539_v62 }
 0x1f5   : > { %v547_v3 = vadd.f32 %v546_v1, %v545_v63 }
 0x1f6   : > { %v542_v4 = vrot.slane %v541_v2, 1 }
 0x1f7   : > { %v548_v5 = vrot.slane %v547_v3, 1 }
 0x1f8   : > { %v543_v6 = vadd.f32 %v542_v4, %v541_v2 }
 0x1f9   : > { %v549_v7 = vadd.f32 %v548_v5, %v547_v3 }
 0x1fa   : > { %v550_v8 = vmax.f32 %v543_v6, 1e-24 }
 0x1fb   : > { %v551_v9 = vmax.f32 %v549_v7, 1e-24 }
 0x1fc   : > { %736 = vrsqrt.f32 %v550_v8 }
 0x1fd   : > { %738 = vrsqrt.f32 %v551_v9 }
 0x206   : > { %v737_v10 = vpop.eup %736 }
 0x207   : > { %v739_v12 = vpop.eup %738  ;;  %v554_v13 = vmul.f32 %v737_v10, %v530_v53 }
 0x208   : > { %v555_v14 = vmul.f32 %v739_v12, %v532_v55 }
 0x209   : > { %v563_v15 = vmul.f32 %v561_v11, %v554_v13 }
 0x20a   : > { %v564_v16 = vmul.f32 %v561_v11, %v555_v14 }
 0x20b   : > { %v665_v17 = vmul.f32 -1.442695, %v563_v15 }
 0x20c   : > { %v666_v18 = vmul.f32 -1.442695, %v564_v16 }
 0x20d   : > { %740 = vpow2.f32 %v665_v17 }
 0x20e   : > { %742 = vpow2.f32 %v666_v18 }
 0x217   : > { %v741_v19 = vpop.eup %740 }
 0x218   : > { %v743_v20 = vpop.eup %742  ;;  %v571_v21 = vadd.f32 1.0, %v741_v19 }
 0x219   : > { %v572_v22 = vadd.f32 1.0, %v743_v20 }
 0x21a   : > { %744 = vrcp.f32 %v571_v21 }
 0x21b   : > { %746 = vrcp.f32 %v572_v22 }
 0x224   : > { %v745_v23 = vpop.eup %744 }
 0x225   : > { %v747_v25 = vpop.eup %746  ;;  %v577_v27 = vmul.f32 %v745_v23, %v563_v15 }
 0x226   : > { %v578_v28 = vmul.f32 %v747_v25, %v564_v16 }
 0x227   : > { %v581_v29 = vadd.f32 %v579_v24, %v577_v27 }
 0x228   : > { %v582_v30 = vadd.f32 %v580_v26, %v578_v28 }
 0x229   : > { %583 = vst [vmem:[%s271_s10] sm:$0xff] %v581_v29 }
 0x22a   : > { %584 = vst [vmem:[%s271_s10 + $0x8] sm:$0xff] %v582_v30 }
 0x22b PF: > { %s16_s21 = sadd.s32 1, %s754_s21  }
 0x22c   : > { %p13_p4 = scmp.ge.s32.totalorder %s16_s21, 4  }
 0x22e   :  { %15 = sbr.rel (!%p13_p4) target bundleno = 1 (0x1), region = 78 }

// kernel: vae_forward.30
= control target key start
LH: loop header
LB: loop body
LE: loop exit
PB: predicated region body
PF: predicated region fallthrough
CT: control target
= control target key end

     0   :  { %s2602_s15 = smov 0   ;;  %s3670_s0 = inlined_call_operand.vmem [shape: f32[2,8,358], index: 0, kind: input, shape index: {}]   ;;  %s3671_s1 = inlined_call_operand.vmem [shape: bf16[8,392], index: 1, kind: input, shape index: {}]   ;;  %s3672_s2 = inlined_call_operand.vmem [shape: f32[8,1], index: 2, kind: input, shape index: {}]   ;;  %s3673_s3 = inlined_call_operand.vmem [shape: f32[7,256], index: 3, kind: input, shape index: {}]   ;;  %s3674_s4 = inlined_call_operand.vmem [shape: f32[2,8,256], index: 4, kind: output, shape index: {}]  }
   0x1 LB: > { %s1852_s16 = sadd.s32 4294967295, %s2511_s15   ;;  %p1856_p0 = scmp.ge.s32.totalorder %s2511_s15, 1  ;;  %s2511_s15 = sphi %s2602_s15, %s14_s15  }
   0x2   : > { %p162_p1 = scmp.lt.s32.totalorder %s2511_s15, 3 }
   0x4   : > { %p163_p2 = pnand %p1856_p0, %p162_p1 }
   0x5   : > { %v204_v0 = vlaneseq (!%p163_p2)  ;;  %v1861_v2 = vld [vmem:[%s3673_s3 + $0x2] ss:$8 sm:$0x3] (!%p163_p2)  ;;  %v1860_v3 = vld [vmem:[%s3673_s3 + $0x1] ss:$8 sm:$0x3] (!%p163_p2) }
   0x6   : > { %166 = sbr.rel (%p163_p2) target bundleno = 851 (0x353), region = 36  ;;  %s2513_s21 = smov (!%p163_p2), 2   ;;  %v1862_v10 = vld [vmem:[%s3673_s3 + $0x4] ss:$8 sm:$0x3] (!%p163_p2)  ;;  %vm231_vm0 = vcmask (!%p163_p2), 7168  }
   0x7   : > { %v205_v1 = vshrl.u32 (!%p163_p2), %v204_v0, 7  ;;  %s2514_s22 = smov (!%p163_p2), 1   ;;  %v1863_v13 = vld [vmem:[%s3673_s3 + $0x5] ss:$8 sm:$0x3] (!%p163_p2)  ;;  %s2515_s27 = smov (!%p163_p2), 4  }
   0x8   : > { %v1864_v16 = vld [vmem:[%s3673_s3 + $0x6] ss:$8 sm:$0x3] (!%p163_p2)  ;;  %s2516_s30 = smov (!%p163_p2), 5   ;;  %s2517_s7 = smov (!%p163_p2), 6   ;;  %vm254_vm1 = vcmask (!%p163_p2), 15360  }
   0x9   : > { %v206_v4 = vsub.s32 (!%p163_p2), 0, %v205_v1  ;;  %v210_v5 = vsub.s32 (!%p163_p2), 1, %v205_v1  ;;  %v202_v19 = vld [vmem:[%s3673_s3] ss:$8 sm:$0x3] (!%p163_p2)  ;;  %s2518_s8 = smov (!%p163_p2), 16  }
   0xa   : > { %s2519_s9 = smov (!%p163_p2), 17   ;;  %s2520_s10 = smov (!%p163_p2), 18   ;;  %vm277_vm2 = vcmask (!%p163_p2), 31744   ;;  %vm300_vm3 = vcmask (!%p163_p2), 39936   ;;  %vm323_vm4 = vcmask (!%p163_p2), 48128   ;;  %vm455_vm5 = vcmask (!%p163_p2), 302080  }
   0xb   : > { %v2616_v6 = vrot.slane (!%p163_p2), %v1861_v2, %v206_v4  ;;  %v2618_v7 = vrot.slane (!%p163_p2), %v1860_v3, %v206_v4  ;;  %v2622_v8 = vrot.slane (!%p163_p2), %v1861_v2, %v210_v5  ;;  %v2624_v9 = vrot.slane (!%p163_p2), %v1860_v3, %v210_v5  ;;  %s2521_s11 = smov (!%p163_p2), 20   ;;  %s2522_s12 = smov (!%p163_p2), 21  }
   0xc   : > { %v2631_v11 = vrot.slane (!%p163_p2), %v1862_v10, %v210_v5  ;;  %v2633_v12 = vrot.slane (!%p163_p2), %v1862_v10, %v206_v4  ;;  %v2640_v14 = vrot.slane (!%p163_p2), %v1863_v13, %v210_v5  ;;  %v2642_v15 = vrot.slane (!%p163_p2), %v1863_v13, %v206_v4  ;;  %s2523_s13 = smov (!%p163_p2), 22   ;;  %s2524_s14 = smov (!%p163_p2), 32  }
   0xd   : > { %250 = vrot.lane.b32.xlu1 %v2616_v6, %s2513_s21  ;;  %227 = vrot.lane.b32.xlu0 %v2618_v7, %s2514_s22  ;;  %v2649_v17 = vrot.slane %v1864_v16, %v210_v5  ;;  %v2651_v18 = vrot.slane %v1864_v16, %v206_v4  ;;  %v2658_v20 = vrot.slane %v202_v19, %v210_v5  ;;  %s2525_s17 = smov 33   ;;  %s2526_s18 = smov 34   ;;  %vm335_vm6 = vcmask 130048  }
   0xe   : > { %v2660_v21 = vrot.slane %v202_v19, %v206_v4  ;;  %s2527_s19 = smov 36   ;;  %s2528_s20 = smov 37   ;;  %vm467_vm7 = vcmask 310272   ;;  %vm347_vm8 = vcmask 138240   ;;  %vm359_vm9 = vcmask 146432  }
   0xf   : > { %s2531_s23 = smov 49   ;;  %s2532_s24 = smov 50   ;;  %vm371_vm10 = vcmask 162816   ;;  %vm383_vm11 = vcmask 171008   ;;  %vm395_vm12 = vcmask 179200   ;;  %vm407_vm13 = vcmask 261120  }
  0x10   : > { %s2533_s25 = smov 52   ;;  %s2534_s26 = smov 53   ;;  %vm419_vm14 = vcmask 269312   ;;  %vm599_vm15 = vcmask 564224  }
  0x11   : > { %252 = vrot.lane.b32.xlu1 %v2622_v8, %s2513_s21  ;;  %229 = vrot.lane.b32.xlu0 %v2624_v9, %s2514_s22  ;;  %s2529_s21 = smov 38   ;;  %s2530_s22 = smov 48  }
  0x12   : > { %s2536_s28 = smov 64   ;;  %s2537_s29 = smov 65  }
  0x13   : > { %s2539_s5 = smov 68   ;;  %s2540_s6 = smov 69  }
  0x14   : > { %p188_p3 = scmp.lt.s32.totalorder %s1852_s16, 1 }
  0x15   : > { %275 = vrot.lane.b32.xlu1 %v2631_v11, %s2515_s27  ;;  %273 = vrot.lane.b32.xlu0 %v2633_v12, %s2515_s27  ;;  %s2535_s27 = smov 54  }
  0x16   : > { %s3676_s16 = smov (!%p188_p3, %s1852_s16), 1 }
  0x19   : > { %298 = vrot.lane.b32.xlu1 %v2640_v14, %s2516_s30  ;;  %296 = vrot.lane.b32.xlu0 %v2642_v15, %s2516_s30  ;;  %s2538_s30 = smov 66  }
  0x1d   : > { %321 = vrot.lane.b32.xlu1 %v2649_v17, %s2517_s7  ;;  %319 = vrot.lane.b32.xlu0 %v2651_v18, %s2517_s7  ;;  %s2541_s7 = smov 70  }
  0x21   : > { %333 = vrot.lane.b32.xlu1 %v2658_v20, %s2518_s8  ;;  %331 = vrot.lane.b32.xlu0 %v2660_v21, %s2518_s8  ;;  %s2542_s8 = smov 80  }
  0x25   : > { %345 = vrot.lane.b32.xlu1 %v2624_v9, %s2519_s9  ;;  %343 = vrot.lane.b32.xlu0 %v2618_v7, %s2519_s9  ;;  %s2543_s9 = smov 81  }
  0x29   : > { %357 = vrot.lane.b32.xlu1 %v2622_v8, %s2520_s10  ;;  %355 = vrot.lane.b32.xlu0 %v2616_v6, %s2520_s10  ;;  %s2544_s10 = smov 82  }
  0x2d   : > { %369 = vrot.lane.b32.xlu1 %v2631_v11, %s2521_s11  ;;  %367 = vrot.lane.b32.xlu0 %v2633_v12, %s2521_s11  ;;  %s2545_s11 = smov 84  }
  0x31   : > { %381 = vrot.lane.b32.xlu1 %v2640_v14, %s2522_s12  ;;  %379 = vrot.lane.b32.xlu0 %v2642_v15, %s2522_s12  ;;  %s2546_s12 = smov 85  }
  0x35   : > { %393 = vrot.lane.b32.xlu1 %v2649_v17, %s2523_s13  ;;  %391 = vrot.lane.b32.xlu0 %v2651_v18, %s2523_s13  ;;  %s2547_s13 = smov 86  }
  0x39   : > { %405 = vrot.lane.b32.xlu1 %v2658_v20, %s2524_s14  ;;  %403 = vrot.lane.b32.xlu0 %v2660_v21, %s2524_s14  ;;  %s2548_s14 = smov 96  }
  0x3d   : > { %417 = vrot.lane.b32.xlu1 %v2624_v9, %s2525_s17  ;;  %415 = vrot.lane.b32.xlu0 %v2618_v7, %s2525_s17  ;;  %s2549_s17 = smov 97  }
  0x41   : > { %429 = vrot.lane.b32.xlu1 %v2622_v8, %s2526_s18  ;;  %427 = vrot.lane.b32.xlu0 %v2616_v6, %s2526_s18  ;;  %s2550_s18 = smov 98  }
  0x45   : > { %441 = vrot.lane.b32.xlu1 %v2631_v11, %s2527_s19  ;;  %439 = vrot.lane.b32.xlu0 %v2633_v12, %s2527_s19  ;;  %s1878_s19 = smul.u32 24, %s3676_s16 }
  0x49   : > { %453 = vrot.lane.b32.xlu1 %v2640_v14, %s2528_s20  ;;  %451 = vrot.lane.b32.xlu0 %v2642_v15, %s2528_s20  ;;  %s2551_s20 = smov 100  }
  0x4d   : > { %465 = vrot.lane.b32.xlu1 %v2649_v17, %s2529_s21  ;;  %463 = vrot.lane.b32.xlu0 %v2651_v18, %s2529_s21  ;;  %s2569_s21 = smov 113  }
  0x51   : > { %477 = vrot.lane.b32.xlu1 %v2658_v20, %s2530_s22  ;;  %475 = vrot.lane.b32.xlu0 %v2660_v21, %s2530_s22  ;;  %s2570_s22 = smov 99  }
  0x55   : > { %489 = vrot.lane.b32.xlu1 %v2624_v9, %s2531_s23  ;;  %487 = vrot.lane.b32.xlu0 %v2618_v7, %s2531_s23  ;;  %s2786_s23 = scalar_lea.vmem %s3670_s0, %s1878_s19  ;;  %s2568_s19 = smov 114  }
  0x56   : > { %v2793_v44 = vld [vmem:[%s2786_s23 + $0x8] sm:$0xff]  ;;  %v2796_v45 = vld [vmem:[%s2786_s23 + $0x10] sm:$0xff]  ;;  %v2802_v47 = vld [vmem:[%s2786_s23] sm:$0xff] }
  0x57   : > { %v2835_v0 = vpack.i.bf16 %v2793_v44, %v2802_v47 }
  0x59   : > { %501 = vrot.lane.b32.xlu1 %v2622_v8, %s2532_s24  ;;  %499 = vrot.lane.b32.xlu0 %v2616_v6, %s2532_s24  ;;  %s2552_s24 = smov 101  }
  0x5d   : > { %513 = vrot.lane.b32.xlu1 %v2631_v11, %s2533_s25  ;;  %511 = vrot.lane.b32.xlu0 %v2633_v12, %s2533_s25  ;;  %s2553_s25 = smov 102  }
  0x61   : > { %525 = vrot.lane.b32.xlu1 %v2640_v14, %s2534_s26  ;;  %523 = vrot.lane.b32.xlu0 %v2642_v15, %s2534_s26  ;;  %s2554_s26 = smov 127  }
  0x65   : > { %537 = vrot.lane.b32.xlu1 %v2649_v17, %s2535_s27  ;;  %535 = vrot.lane.b32.xlu0 %v2651_v18, %s2535_s27  ;;  %s2555_s27 = smov 126  }
  0x69   : > { %549 = vrot.lane.b32.xlu1 %v2658_v20, %s2536_s28  ;;  %547 = vrot.lane.b32.xlu0 %v2660_v21, %s2536_s28  ;;  %s2556_s28 = smov 125  }
  0x6d   : > { %561 = vrot.lane.b32.xlu1 %v2624_v9, %s2537_s29  ;;  %559 = vrot.lane.b32.xlu0 %v2618_v7, %s2537_s29  ;;  %s2557_s29 = smov 124  }
  0x71   : > { %573 = vrot.lane.b32.xlu1 %v2622_v8, %s2538_s30  ;;  %571 = vrot.lane.b32.xlu0 %v2616_v6, %s2538_s30  ;;  %s2558_s30 = smov 123  }
  0x75   : > { %585 = vrot.lane.b32.xlu1 %v2631_v11, %s2539_s5  ;;  %583 = vrot.lane.b32.xlu0 %v2633_v12, %s2539_s5  ;;  %s2559_s5 = smov 122  }
  0x79   : > { %597 = vrot.lane.b32.xlu1 %v2640_v14, %s2540_s6  ;;  %595 = vrot.lane.b32.xlu0 %v2642_v15, %s2540_s6  ;;  %s2560_s6 = smov 112  }
  0x7d   : > { %609 = vrot.lane.b32.xlu1 %v2649_v17, %s2541_s7  ;;  %607 = vrot.lane.b32.xlu0 %v2651_v18, %s2541_s7  ;;  %s2561_s7 = smov 111  }
  0x7f   : > { %v2710_v22 = vpop.permute.xlu1 %250  ;;  %v2712_v23 = vpop.permute.xlu0 %227 }
  0x80   : > { %v236_v53 = vmul.f32 %v2712_v23, %v2802_v47  ;;  %v259_v59 = vmul.f32 %v2710_v22, %v2802_v47 }
  0x81   : > { %621 = vrot.lane.b32.xlu1 %v2658_v20, %s2542_s8  ;;  %619 = vrot.lane.b32.xlu0 %v2660_v21, %s2542_s8  ;;  %s2562_s8 = smov 110  }
  0x83   : > { %v2716_v24 = vpop.permute.xlu1 %252  ;;  %v230_v25 = vpop.permute.xlu0 %229 }
  0x84   : > { %v232_v46 = vsel %vm231_vm0, %v2712_v23, %v230_v25  ;;  %v238_v49 = vmul.f32 %v230_v25, %v2796_v45  ;;  %v255_v52 = vsel %vm254_vm1, %v2710_v22, %v2716_v24  ;;  %v261_v5 = vmul.f32 %v2716_v24, %v2796_v45 }
  0x85   : > { %633 = vrot.lane.b32.xlu1 %v2624_v9, %s2543_s9  ;;  %631 = vrot.lane.b32.xlu0 %v2618_v7, %s2543_s9  ;;  %v237_v48 = vmul.f32 %v232_v46, %v2793_v44  ;;  %v260_v54 = vmul.f32 %v255_v52, %v2793_v44  ;;  %s2563_s9 = smov 109   ;;  %vm611_vm0 = vcmask 572416   ;;  %vm647_vm1 = vcmask 670720  }
  0x86   : > { %v1956_v57 = vpack.i.bf16 %v2802_v47, %v238_v49 }
  0x87   : > { %v2720_v26 = vpop.permute.xlu1 %275  ;;  %v2722_v27 = vpop.permute.xlu0 %273  ;;  %v1951_v58 = vpack.i.bf16 %v237_v48, %v236_v53  ;;  %v1961_v62 = vpack.i.bf16 %v260_v54, %v259_v59 }
  0x88   : > { %v278_v63 = vsel %vm277_vm2, %v2722_v27, %v2720_v26  ;;  %v282_v1 = vmul.f32 %v2722_v27, %v2802_v47  ;;  %vm479_vm2 = vcmask 392192  }
  0x89   : > { %645 = vrot.lane.b32.xlu1 %v2622_v8, %s2544_s10  ;;  %643 = vrot.lane.b32.xlu0 %v2616_v6, %s2544_s10  ;;  %v283_v2 = vmul.f32 %v278_v63, %v2793_v44  ;;  %s2564_s10 = smov 108  }
  0x8b   : > { %v2726_v28 = vpop.permute.xlu1 %298  ;;  %v2728_v29 = vpop.permute.xlu0 %296  ;;  %v1981_v13 = vpack.i.bf16 %v283_v2, %v282_v1 }
  0x8d   : > { %657 = vrot.lane.b32.xlu1 %v2631_v11, %s2545_s11  ;;  %655 = vrot.lane.b32.xlu0 %v2633_v12, %s2545_s11  ;;  %s2565_s11 = smov 107  }
  0x8f   : > { %v2732_v30 = vpop.permute.xlu1 %321  ;;  %v2734_v31 = vpop.permute.xlu0 %319 }
  0x91   : > { %669 = vrot.lane.b32.xlu1 %v2640_v14, %s2546_s12  ;;  %667 = vrot.lane.b32.xlu0 %v2642_v15, %s2546_s12  ;;  %s2566_s12 = smov 106  }
  0x93   : > { %v2738_v32 = vpop.permute.xlu1 %333  ;;  %v2740_v33 = vpop.permute.xlu0 %331 }
  0x94   : > { %v336_v25 = vsel %vm335_vm6, %v2740_v33, %v2738_v32  ;;  %v340_v46 = vmul.f32 %v2740_v33, %v2802_v47  ;;  %vm683_vm6 = vcmask 703488  }
  0x95   : > { %681 = vrot.lane.b32.xlu1 %v2649_v17, %s2547_s13  ;;  %679 = vrot.lane.b32.xlu0 %v2651_v18, %s2547_s13  ;;  %v341_v48 = vmul.f32 %v336_v25, %v2793_v44  ;;  %s2567_s13 = smov 95  }
  0x97   : > { %v2744_v34 = vpop.permute.xlu1 %345  ;;  %v2746_v35 = vpop.permute.xlu0 %343  ;;  %v2001_v63 = vpack.i.bf16 %v341_v48, %v340_v46 }
  0x98   : > { %v352_v33 = vmul.f32 %v2746_v35, %v2802_v47 }
  0x99   : > { %693 = vrot.lane.b32.xlu1 %v2658_v20, %s2548_s14  ;;  %691 = vrot.lane.b32.xlu0 %v2660_v21, %s2548_s14 }
  0x9b   : > { %v2754_v36 = vpop.permute.xlu1 %357  ;;  %v2756_v37 = vpop.permute.xlu0 %355 }
  0x9c   : > { %v360_v1 = vsel %vm359_vm9, %v2756_v37, %v2754_v36  ;;  %vm731_vm9 = vcmask 818176  }
  0x9d   : > { %705 = vrot.lane.b32.xlu1 %v2624_v9, %s2549_s17  ;;  %703 = vrot.lane.b32.xlu0 %v2618_v7, %s2549_s17  ;;  %v305_v9 = vmul.f32 %v2728_v29, %v2802_v47  ;;  %v365_v2 = vmul.f32 %v360_v1, %v2793_v44 }
  0x9f   : > { %v2766_v38 = vpop.permute.xlu1 %369  ;;  %v2768_v39 = vpop.permute.xlu0 %367 }
  0xa1   : > { %717 = vrot.lane.b32.xlu1 %v2622_v8, %s2550_s18  ;;  %715 = vrot.lane.b32.xlu0 %v2616_v6, %s2550_s18  ;;  %v301_v6 = vsel %vm300_vm3, %v2728_v29, %v2726_v28  ;;  %v284_v29 = vmul.f32 %v2720_v26, %v2796_v45  ;;  %v348_v26 = vsel %vm347_vm8, %v2746_v35, %v2744_v34  ;;  %vm659_vm3 = vcmask 687104  }
  0xa2   : > { %v306_v10 = vmul.f32 %v301_v6, %v2793_v44  ;;  %v364_v35 = vmul.f32 %v2756_v37, %v2802_v47  ;;  %v376_v37 = vmul.f32 %v2768_v39, %v2802_v47  ;;  %vm515_vm8 = vcmask 424960  }
  0xa3   : > { %v2775_v40 = vpop.permute.xlu1 %381  ;;  %v2777_v41 = vpop.permute.xlu0 %379 }
  0xa4   : > { %v1991_v24 = vpack.i.bf16 %v306_v10, %v305_v9 }
  0xa5   : > { %729 = vrot.lane.b32.xlu1 %v2631_v11, %s2551_s20  ;;  %727 = vrot.lane.b32.xlu0 %v2633_v12, %s2551_s20 }
  0xa7   : > { %v2788_v42 = vpop.permute.xlu1 %393  ;;  %v2790_v43 = vpop.permute.xlu0 %391 }
  0xa8   : > { %v396_v25 = vsel %vm395_vm12, %v2790_v43, %v2788_v42  ;;  %vm443_vm12 = vcmask 293888  }
  0xa9   : > { %741 = vrot.lane.b32.xlu1 %v2640_v14, %s2552_s24  ;;  %739 = vrot.lane.b32.xlu0 %v2642_v15, %s2552_s24  ;;  %v324_v14 = vsel %vm323_vm4, %v2734_v31, %v2732_v30  ;;  %vm671_vm4 = vcmask 695296   ;;  %s2571_s24 = smov 116  }
  0xab   : > { %v2806_v50 = vpop.permute.xlu1 %405  ;;  %v2808_v51 = vpop.permute.xlu0 %403 }
  0xac   : > { %v408_v46 = vsel %vm407_vm13, %v2808_v51, %v2806_v50  ;;  %vm772_vm13 = vcmask 1039360  }
  0xad   : > { %753 = vrot.lane.b32.xlu1 %v2649_v17, %s2553_s25  ;;  %751 = vrot.lane.b32.xlu0 %v2651_v18, %s2553_s25  ;;  %v328_v17 = vmul.f32 %v2734_v31, %v2802_v47  ;;  %v329_v18 = vmul.f32 %v324_v14, %v2793_v44  ;;  %s2572_s25 = smov 115  }
  0xaf   : > { %v2817_v55 = vpop.permute.xlu1 %417  ;;  %v2819_v56 = vpop.permute.xlu0 %415  ;;  %v1996_v54 = vpack.i.bf16 %v329_v18, %v328_v17  ;;  %v388_v18 = vmul.f32 %v2777_v41, %v2802_v47 }
  0xb1   : > { %1957 = vrot.lane.b32.xlu1 %v1956_v57, %s2554_s26  ;;  %1952 = vrot.lane.b32.xlu0 %v1951_v58, %s2554_s26  ;;  %v307_v57 = vmul.f32 %v2726_v28, %v2796_v45  ;;  %v353_v58 = vmul.f32 %v348_v26, %v2793_v44  ;;  %v330_v28 = vmul.f32 %v2732_v30, %v2796_v45 }
  0xb2   : > { %v372_v30 = vsel %vm371_vm10, %v2768_v39, %v2766_v38  ;;  %vm707_vm10 = vcmask 793600  }
  0xb3   : > { %v2826_v60 = vpop.permute.xlu1 %429  ;;  %v2828_v61 = vpop.permute.xlu0 %427 }
  0xb5   : > { %1962 = vrot.lane.b32.xlu0 %v1961_v62, %s2555_s27 }
  0xb7   : > { %v2840_v3 = vpop.permute.xlu1 %441  ;;  %v2842_v4 = vpop.permute.xlu0 %439 }
  0xb8   : > { %v448_v7 = vmul.f32 %v2842_v4, %v2802_v47 }
  0xb9   : > { %1972 = vrot.lane.b32.xlu0 %v2835_v0, %s2556_s28 }
  0xba   : > { %v1966_v8 = vpack.i.bf16 %v448_v7, %v261_v5  ;;  %v2011_v7 = vpack.i.bf16 %v353_v58, %v352_v33  ;;  %v424_v58 = vmul.f32 %v2819_v56, %v2802_v47 }
  0xbb   : > { %v2855_v11 = vpop.permute.xlu1 %453  ;;  %v2857_v12 = vpop.permute.xlu0 %451 }
  0xbc   : > { %v456_v15 = vsel %vm455_vm5, %v2857_v12, %v2855_v11  ;;  %1967 = vrot.lane.b32.xlu1 %v1966_v8, %s2555_s27  ;;  %v2021_v8 = vpack.i.bf16 %v365_v2, %v364_v35  ;;  %vm527_vm5 = vcmask 433152  }
  0xbd   : > { %v461_v16 = vmul.f32 %v456_v15, %v2793_v44  ;;  %1982 = vrot.lane.b32.xlu0 %v1981_v13, %s2557_s29  ;;  %v377_v13 = vmul.f32 %v372_v30, %v2793_v44 }
  0xbf   : > { %v2869_v19 = vpop.permute.xlu1 %465  ;;  %v2871_v22 = vpop.permute.xlu0 %463  ;;  %v1976_v23 = vpack.i.bf16 %v461_v16, %v2796_v45  ;;  %v384_v16 = vsel %vm383_vm11, %v2777_v41, %v2775_v40  ;;  %v2041_v17 = vpack.i.bf16 %v377_v13, %v376_v37  ;;  %vm743_vm11 = vcmask 826368  }
  0xc0   : > { %v468_v27 = vsel %vm467_vm7, %v2871_v22, %v2869_v19  ;;  %v389_v39 = vmul.f32 %v384_v16, %v2793_v44  ;;  %vm539_vm7 = vcmask 441344  }
  0xc1   : > { %v473_v31 = vmul.f32 %v468_v27, %v2793_v44  ;;  %1977 = vrot.lane.b32.xlu1 %v1976_v23, %s2556_s28  ;;  %1992 = vrot.lane.b32.xlu0 %v1991_v24, %s2558_s30 }
  0xc2   : > { %v2051_v27 = vpack.i.bf16 %v389_v39, %v388_v18 }
  0xc3   : > { %v2885_v49 = vpop.permute.xlu1 %477  ;;  %v2887_v52 = vpop.permute.xlu0 %475  ;;  %v1986_v53 = vpack.i.bf16 %v473_v31, %v284_v29  ;;  %v401_v29 = vmul.f32 %v396_v25, %v2793_v44 }
  0xc5   : > { %1987 = vrot.lane.b32.xlu1 %v1986_v53, %s2557_s29  ;;  %1997 = vrot.lane.b32.xlu0 %v1996_v54, %s2559_s5  ;;  %v412_v53 = vmul.f32 %v2808_v51, %v2802_v47  ;;  %v413_v54 = vmul.f32 %v408_v46, %v2793_v44 }
  0xc7   : > { %v2897_v59 = vpop.permute.xlu1 %489  ;;  %v2899_v62 = vpop.permute.xlu0 %487  ;;  %v2061_v33 = vpack.i.bf16 %v413_v54, %v412_v53  ;;  %v460_v53 = vmul.f32 %v2857_v12, %v2802_v47  ;;  %v480_v12 = vsel %vm479_vm2, %v2887_v52, %v2885_v49  ;;  %vm786_vm2 = vcmask 1031168  }
  0xc9   : > { %826 = vrot.lane.b32.xlu1 %v307_v57, %s2558_s30  ;;  %2002 = vrot.lane.b32.xlu0 %v2001_v63, %s2560_s6  ;;  %v420_v57 = vsel %vm419_vm14, %v2819_v56, %v2817_v55  ;;  %v2977_v56 = vpack.i.bf16 %v2796_v45, %v2793_v44  ;;  %vm623_vm14 = vcmask 654336  }
  0xca   : > { %v425_v63 = vmul.f32 %v420_v57, %v2793_v44 }
  0xcb   : > { %v2909_v5 = vpop.permute.xlu1 %501  ;;  %v2911_v6 = vpop.permute.xlu0 %499 }
  0xcd   : > { %840 = vrot.lane.b32.xlu1 %v330_v28, %s2559_s5  ;;  %2012 = vrot.lane.b32.xlu0 %v2011_v7, %s2561_s7  ;;  %v2071_v28 = vpack.i.bf16 %v425_v63, %v424_v58 }
  0xcf   : > { %v2914_v9 = vpop.permute.xlu1 %513  ;;  %v2916_v10 = vpop.permute.xlu0 %511 }
  0xd1   : > { %2022 = vrot.lane.b32.xlu0 %v2021_v8, %s2562_s8 }
  0xd3   : > { %v2924_v14 = vpop.permute.xlu1 %525  ;;  %v2926_v15 = vpop.permute.xlu0 %523 }
  0xd5   : > { %2032 = vrot.lane.b32.xlu0 %v2835_v0, %s2563_s9  ;;  %v400_v0 = vmul.f32 %v2790_v43, %v2802_v47 }
  0xd7   : > { %v2935_v23 = vpop.permute.xlu1 %537  ;;  %v2937_v24 = vpop.permute.xlu0 %535  ;;  %v2056_v48 = vpack.i.bf16 %v401_v29, %v400_v0 }
  0xd9   : > { %2042 = vrot.lane.b32.xlu0 %v2041_v17, %s2564_s10 }
  0xdb   : > { %v2945_v41 = vpop.permute.xlu1 %549  ;;  %v2947_v31 = vpop.permute.xlu0 %547 }
  0xdd   : > { %2052 = vrot.lane.b32.xlu0 %v2051_v27, %s2565_s11 }
  0xdf   : > { %v2955_v43 = vpop.permute.xlu1 %561  ;;  %v2957_v26 = vpop.permute.xlu0 %559 }
  0xe1   : > { %2057 = vrot.lane.b32.xlu0 %v2056_v48, %s2566_s12  ;;  %v462_v48 = vmul.f32 %v2855_v11, %v2796_v45 }
  0xe3   : > { %v2965_v1 = vpop.permute.xlu1 %573  ;;  %v2967_v51 = vpop.permute.xlu0 %571  ;;  %v2106_v58 = vpack.i.bf16 %v460_v53, %v462_v48  ;;  %v484_v48 = vmul.f32 %v2887_v52, %v2802_v47 }
  0xe5   : > { %2062 = vrot.lane.b32.xlu0 %v2061_v33, %s2548_s14 }
  0xe7   : > { %v2970_v35 = vpop.permute.xlu1 %585  ;;  %v2972_v2 = vpop.permute.xlu0 %583 }
  0xe9   : > { %2072 = vrot.lane.b32.xlu0 %v2071_v28, %s2567_s13 }
  0xeb   : > { %v598_v7 = vpop.permute.xlu1 %597  ;;  %v2979_v8 = vpop.permute.xlu0 %595 }
  0xec   : > { %v606_v30 = vmul.f32 %v598_v7, %v2796_v45  ;;  %v600_v37 = vsel %vm599_vm15, %v2979_v8, %v598_v7  ;;  %vm563_vm15 = vcmask 531456  }
  0xed   : > { %v605_v13 = vmul.f32 %v600_v37, %v2793_v44  ;;  %2082 = vrot.lane.b32.xlu0 %v2977_v56, %s2554_s26 }
  0xef   : > { %v2091_v16 = vpack.i.bf16 %v606_v30, %v605_v13  ;;  %v610_v17 = vpop.permute.xlu1 %609  ;;  %v608_v18 = vpop.permute.xlu0 %607 }
  0xf0   : > { %v618_v39 = vmul.f32 %v610_v17, %v2796_v45  ;;  %v612_v25 = vsel %vm611_vm0, %v608_v18, %v610_v17  ;;  %v616_v54 = vmul.f32 %v608_v18, %v2802_v47  ;;  %vm635_vm0 = vcmask 662528  }
  0xf1   : > { %v617_v27 = vmul.f32 %v612_v25, %v2793_v44  ;;  %2092 = vrot.lane.b32.xlu0 %v2091_v16, %s2554_s26  ;;  %v485_v25 = vmul.f32 %v480_v12, %v2793_v44 }
  0xf3   : > { %v2096_v0 = vpack.i.bf16 %v618_v39, %v617_v27  ;;  %v2989_v29 = vpop.permute.xlu1 %621  ;;  %v2991_v46 = vpop.permute.xlu0 %619  ;;  %v342_v39 = vmul.f32 %v2738_v32, %v2796_v45 }
  0xf5   : > { %2097 = vrot.lane.b32.xlu0 %v2096_v0, %s2555_s27  ;;  %v486_v0 = vmul.f32 %v2885_v49, %v2796_v45 }
  0xf7   : > { %v2999_v57 = vpop.permute.xlu1 %633  ;;  %v3001_v33 = vpop.permute.xlu0 %631  ;;  %v2131_v49 = vpack.i.bf16 %v484_v48, %v486_v0 }
  0xf9   : > { %1141 = vrot.lane.b32.xlu0 %v616_v54, %s2555_s27 }
  0xfb   : > { %v646_v63 = vpop.permute.xlu1 %645  ;;  %v644_v28 = vpop.permute.xlu0 %643 }
  0xfc   : > { %v654_v7 = vmul.f32 %v646_v63, %v2796_v45  ;;  %v648_v30 = vsel %vm647_vm1, %v644_v28, %v646_v63  ;;  %v652_v13 = vmul.f32 %v644_v28, %v2802_v47  ;;  %v354_v28 = vmul.f32 %v2744_v34, %v2796_v45 }
  0xfd   : > { %v653_v11 = vmul.f32 %v648_v30, %v2793_v44  ;;  %2107 = vrot.lane.b32.xlu0 %v2106_v58, %s2556_s28  ;;  %v366_v34 = vmul.f32 %v2754_v36, %v2796_v45  ;;  %v540_v36 = vsel %vm539_vm7, %v2937_v24, %v2935_v23  ;;  %vm800_vm1 = vcmask 1022976   ;;  %s2576_s28 = smov 26  }
  0xfe   : > { %v2121_v53 = vpack.i.bf16 %v485_v25, %v652_v13  ;;  %v528_v13 = vsel %vm527_vm5, %v2926_v15, %v2924_v14  ;;  %vm491_vm5 = vcmask 400384   ;;  %vm695_vm7 = vcmask 785408  }
  0xff   : > { %v2116_v37 = vpack.i.bf16 %v654_v7, %v653_v11  ;;  %v658_v16 = vpop.permute.xlu1 %657  ;;  %v656_v17 = vpop.permute.xlu0 %655  ;;  %v533_v25 = vmul.f32 %v528_v13, %v2793_v44 }
 0x100   : > { %v660_v18 = vsel %vm659_vm3, %v656_v17, %v658_v16  ;;  %v666_v52 = vmul.f32 %v658_v16, %v2796_v45  ;;  %v664_v30 = vmul.f32 %v656_v17, %v2802_v47  ;;  %v498_v16 = vmul.f32 %v2897_v59, %v2796_v45 }
 0x101   : > { %v665_v27 = vmul.f32 %v660_v18, %v2793_v44  ;;  %2117 = vrot.lane.b32.xlu0 %v2116_v37, %s2568_s19  ;;  %v496_v17 = vmul.f32 %v2899_v62, %v2802_v47  ;;  %vm828_vm3 = vcmask 1006592  }
 0x103   : > { %v3018_v54 = vpop.permute.xlu1 %669  ;;  %v3020_v58 = vpop.permute.xlu0 %667  ;;  %v2006_v63 = vpack.i.bf16 %v665_v27, %v342_v39  ;;  %v2141_v27 = vpack.i.bf16 %v664_v30, %v666_v52  ;;  %v378_v52 = vmul.f32 %v2766_v38, %v2796_v45  ;;  %v508_v30 = vmul.f32 %v2911_v6, %v2802_v47 }
 0x104   : > { %v672_v32 = vsel %vm671_vm4, %v3020_v58, %v3018_v54  ;;  %v516_v38 = vsel %vm515_vm8, %v2916_v10, %v2914_v9  ;;  %vm814_vm4 = vcmask 1014784   ;;  %vm719_vm8 = vcmask 801792  }
 0x105   : > { %v677_v7 = vmul.f32 %v672_v32, %v2793_v44  ;;  %2007 = vrot.lane.b32.xlu1 %v2006_v63, %s2560_s6  ;;  %2122 = vrot.lane.b32.xlu0 %v2121_v53, %s2568_s19  ;;  %v2151_v63 = vpack.i.bf16 %v496_v17, %v498_v16  ;;  %v2036_v32 = vpack.i.bf16 %v533_v25, %v2796_v45 }
 0x106   : > { %v390_v16 = vmul.f32 %v2775_v40, %v2796_v45  ;;  %v402_v40 = vmul.f32 %v2788_v42, %v2796_v45  ;;  %v444_v42 = vsel %vm443_vm12, %v2842_v4, %v2840_v3  ;;  %v450_v4 = vmul.f32 %v2840_v3, %v2796_v45 }
 0x107   : > { %v682_v11 = vpop.permute.xlu1 %681  ;;  %v680_v12 = vpop.permute.xlu0 %679  ;;  %v2016_v37 = vpack.i.bf16 %v677_v7, %v354_v28  ;;  %v545_v28 = vmul.f32 %v540_v36, %v2793_v44  ;;  %vm551_vm12 = vcmask 523264  }
 0x108   : > { %v684_v18 = vsel %vm683_vm6, %v680_v12, %v682_v11  ;;  %v690_v13 = vmul.f32 %v682_v11, %v2796_v45  ;;  %v522_v11 = vmul.f32 %v2914_v9, %v2796_v45  ;;  %vm503_vm6 = vcmask 408576  }
 0x109   : > { %v689_v39 = vmul.f32 %v684_v18, %v2793_v44  ;;  %2017 = vrot.lane.b32.xlu1 %v2016_v37, %s2561_s7  ;;  %2132 = vrot.lane.b32.xlu0 %v2131_v49, %s2568_s19  ;;  %v2046_v37 = vpack.i.bf16 %v545_v28, %v378_v52  ;;  %v688_v18 = vmul.f32 %v680_v12, %v2802_v47 }
 0x10a   : > { %v521_v12 = vmul.f32 %v516_v38, %v2793_v44 }
 0x10b   : > { %v2026_v0 = vpack.i.bf16 %v689_v39, %v366_v34  ;;  %v3041_v48 = vpop.permute.xlu1 %693  ;;  %v3043_v53 = vpop.permute.xlu0 %691  ;;  %v2166_v17 = vpack.i.bf16 %v688_v18, %v690_v13 }
 0x10c   : > { %v2176_v9 = vpack.i.bf16 %v522_v11, %v521_v12  ;;  %v426_v12 = vmul.f32 %v2817_v55, %v2796_v45  ;;  %v214_v55 = vmul.f32 %v2660_v21, %v2802_v47  ;;  %v544_v21 = vmul.f32 %v2937_v24, %v2802_v47 }
 0x10d   : > { %2027 = vrot.lane.b32.xlu1 %v2026_v0, %s2562_s8  ;;  %2142 = vrot.lane.b32.xlu0 %v2141_v27, %s2560_s6  ;;  %v630_v24 = vmul.f32 %v2989_v29, %v2796_v45 }
 0x10f   : > { %v706_v7 = vpop.permute.xlu1 %705  ;;  %v3051_v49 = vpop.permute.xlu0 %703 }
 0x110   : > { %v708_v28 = vsel %vm707_vm10, %v3051_v49, %v706_v7  ;;  %v714_v13 = vmul.f32 %v706_v7, %v2796_v45  ;;  %v215_v7 = vmul.f32 %v2658_v20, %v2793_v44  ;;  %v546_v20 = vmul.f32 %v2935_v23, %v2796_v45 }
 0x111   : > { %2037 = vrot.lane.b32.xlu1 %v2036_v32, %s2563_s9  ;;  %2152 = vrot.lane.b32.xlu0 %v2151_v63, %s2569_s21  ;;  %v713_v18 = vmul.f32 %v708_v28, %v2793_v44 }
 0x112   : > { %v2196_v23 = vpack.i.bf16 %v544_v21, %v546_v20 }
 0x113   : > { %v3061_v34 = vpop.permute.xlu1 %717  ;;  %v3063_v39 = vpop.permute.xlu0 %715 }
 0x115   : > { %2047 = vrot.lane.b32.xlu1 %v2046_v37, %s2564_s10  ;;  %1037 = vrot.lane.b32.xlu0 %v508_v30, %s2560_s6  ;;  %v414_v30 = vmul.f32 %v2806_v50, %v2796_v45  ;;  %v520_v37 = vmul.f32 %v2916_v10, %v2802_v47  ;;  %v449_v10 = vmul.f32 %v444_v42, %v2793_v44 }
 0x117   : > { %v3074_v25 = vpop.permute.xlu1 %729  ;;  %v3076_v27 = vpop.permute.xlu0 %727  ;;  %v2086_v3 = vpack.i.bf16 %v450_v4, %v449_v10  ;;  %v564_v10 = vsel %vm563_vm15, %v2957_v26, %v2955_v43  ;;  %vm587_vm15 = vcmask 556032  }
 0x118   : > { %v732_v0 = vsel %vm731_vm9, %v3076_v27, %v3074_v25 }
 0x119   : > { %921 = vrot.lane.b32.xlu1 %v390_v16, %s2565_s11  ;;  %2167 = vrot.lane.b32.xlu0 %v2166_v17, %s2562_s8  ;;  %v737_v36 = vmul.f32 %v732_v0, %v2793_v44  ;;  %v2186_v17 = vpack.i.bf16 %v714_v13, %v713_v18 }
 0x11b   : > { %v3086_v63 = vpop.permute.xlu1 %741  ;;  %v3088_v32 = vpop.permute.xlu0 %739  ;;  %v2066_v38 = vpack.i.bf16 %v737_v36, %v414_v30 }
 0x11c   : > { %v744_v52 = vsel %vm743_vm11, %v3088_v32, %v3086_v63  ;;  %vm431_vm11 = vcmask 277504  }
 0x11d   : > { %935 = vrot.lane.b32.xlu1 %v402_v40, %s2566_s12  ;;  %2177 = vrot.lane.b32.xlu0 %v2176_v9, %s2562_s8  ;;  %v749_v16 = vmul.f32 %v744_v52, %v2793_v44 }
 0x11f   : > { %v3105_v11 = vpop.permute.xlu1 %753  ;;  %v3107_v50 = vpop.permute.xlu0 %751  ;;  %v2076_v0 = vpack.i.bf16 %v749_v16, %v426_v12  ;;  %v624_v16 = vsel %vm623_vm14, %v2991_v46, %v2989_v29  ;;  %v604_v12 = vmul.f32 %v2979_v8, %v2802_v47  ;;  %v569_v8 = vmul.f32 %v564_v10, %v2793_v44 }
 0x120   : > { %vm575_vm14 = vcmask 539648  }
 0x121   : > { %2067 = vrot.lane.b32.xlu1 %v2066_v38, %s2548_s14  ;;  %1056 = vrot.lane.b32.xlu0 %v520_v37, %s2562_s8  ;;  %v712_v37 = vmul.f32 %v3051_v49, %v2802_v47  ;;  %v629_v49 = vmul.f32 %v624_v16, %v2793_v44  ;;  %v750_v16 = vmul.f32 %v3086_v63, %v2796_v45 }
 0x123   : > { %v3118_v40 = vpop.permute.xlu1 %1957  ;;  %v1953_v9 = vpop.permute.xlu0 %1952 }
 0x124   : > { %v1959_v36 = vunpack.i.l.bf16 %v3118_v40  ;;  %v1955_v28 = vunpack.i.h.bf16 %v1953_v9  ;;  %v1954_v52 = vunpack.i.l.bf16 %v1953_v9  ;;  %v570_v9 = vmul.f32 %v2955_v43, %v2796_v45 }
 0x125   : > { %2077 = vrot.lane.b32.xlu1 %v2076_v0, %s2567_s13  ;;  %2187 = vrot.lane.b32.xlu0 %v2186_v17, %s2570_s22  ;;  %v2101_v0 = vpack.i.bf16 %v630_v24, %v629_v49  ;;  %v628_v43 = vmul.f32 %v2991_v46, %v2802_v47 }
 0x126   : > { %v774_v30 = vsel %vm772_vm13, %v1955_v28, %v1959_v36  ;;  %v773_v42 = vsel %vm772_vm13, %v1954_v52, %v1955_v28  ;;  %v642_v36 = vmul.f32 %v2999_v57, %v2796_v45 }
 0x127   : > { %v1963_v13 = vpop.permute.xlu0 %1962  ;;  %v1634_v18 = vpack.c.bf16 %v774_v30, %v215_v7  ;;  %v1633_v38 = vpack.c.bf16 %v773_v42, %v214_v55  ;;  %v636_v7 = vsel %vm635_vm0, %v3001_v33, %v2999_v57  ;;  %v568_v55 = vmul.f32 %v2957_v26, %v2802_v47 }
 0x128   : > { %v641_v28 = vmul.f32 %v636_v7, %v2793_v44  ;;  %v2216_v30 = vpack.i.bf16 %v569_v8, %v2802_v47  ;;  %v1965_v57 = vunpack.i.h.bf16 %v1963_v13  ;;  %v1964_v21 = vunpack.i.l.bf16 %v1963_v13 }
 0x129   : > { %2087 = vrot.lane.b32.xlu1 %v2086_v3, %s2555_s27  ;;  %1239 = vrot.lane.b32.xlu0 %v712_v37, %s2570_s22  ;;  %v748_v13 = vmul.f32 %v3088_v32, %v2802_v47  ;;  %v474_v32 = vmul.f32 %v2869_v19, %v2796_v45  ;;  %vm856_vm0 = vcmask 916480  }
 0x12a   : > { %1713 = vmatprep.subr.bf16.mxu1 %v1634_v18  ;;  %v2226_v18 = vpack.i.bf16 %v568_v55, %v570_v9  ;;  %v787_v63 = vsel %vm786_vm2, %v1964_v21, %v1965_v57  ;;  %v492_v21 = vsel %vm491_vm5, %v2899_v62, %v2897_v59  ;;  %v510_v62 = vmul.f32 %v2909_v5, %v2796_v45 }
 0x12b   : > { %1714 = vmatpush1.bf16.msra.mxu1 %v1633_v38  ;;  %v1973_v4 = vpop.permute.xlu0 %1972  ;;  %v2111_v38 = vpack.i.bf16 %v642_v36, %v641_v28  ;;  %v472_v36 = vmul.f32 %v2871_v22, %v2802_v47  ;;  %v640_v28 = vmul.f32 %v3001_v33, %v2802_v47  ;;  %vm884_vm5 = vcmask 900096  }
 0x12c   : > { %v1975_v52 = vunpack.i.h.bf16 %v1973_v4  ;;  %v1974_v3 = vunpack.i.l.bf16 %v1973_v4 }
 0x12d   : > { %1130 = vrot.lane.b32.xlu1 %v604_v12, %s2554_s26  ;;  %2197 = vrot.lane.b32.xlu0 %v2196_v23, %s2564_s10  ;;  %v2126_v33 = vpack.i.bf16 %v472_v36, %v474_v32  ;;  %v720_v32 = vsel %vm719_vm8, %v3063_v39, %v3061_v34 }
 0x12e   : > { %v3146_v17 = vpop.permute.xlu1 %1967  ;;  %v801_v12 = vsel %vm800_vm1, %v1974_v3, %v1975_v52 }
 0x12f   : > { %v1983_v29 = vpop.permute.xlu0 %1982  ;;  %v1969_v20 = vunpack.i.l.bf16 %v3146_v17  ;;  %v1635_v55 = vpack.c.bf16 %v801_v12, %v787_v63  ;;  %v676_v12 = vmul.f32 %v3020_v58, %v2802_v47 }
 0x130   : > { %v1984_v9 = vunpack.i.l.bf16 %v1983_v29 }
 0x131   : > { %2102 = vrot.lane.b32.xlu1 %v2101_v0, %s2571_s24  ;;  %2207 = vrot.lane.b32.xlu0 %v2977_v56, %s2549_s17  ;;  %v788_v23 = vsel %vm786_vm2, %v1965_v57, %v1969_v20  ;;  %v1985_v0 = vunpack.i.h.bf16 %v1983_v29 }
 0x133   : > { %v3162_v26 = vpop.permute.xlu1 %1977  ;;  %v1993_v42 = vpop.permute.xlu0 %1992  ;;  %v815_v22 = vsel %vm814_vm4, %v1984_v9, %v1985_v0  ;;  %v534_v9 = vmul.f32 %v2924_v14, %v2796_v45  ;;  %v726_v14 = vmul.f32 %v3061_v34, %v2796_v45 }
 0x134   : > { %v1979_v37 = vunpack.i.l.bf16 %v3162_v26  ;;  %v1995_v24 = vunpack.i.h.bf16 %v1993_v42  ;;  %v1994_v49 = vunpack.i.l.bf16 %v1993_v42 }
 0x135   : > { %1152 = vrot.lane.b32.xlu1 %v628_v43, %s2571_s24  ;;  %2217 = vrot.lane.b32.xlu0 %v2216_v30, %s2549_s17 }
 0x136   : > { %v802_v46 = vsel %vm800_vm1, %v1975_v52, %v1979_v37  ;;  %v2236_v52 = vpack.i.bf16 %v748_v13, %v750_v16  ;;  %v829_v20 = vsel %vm828_vm3, %v1994_v49, %v1995_v24  ;;  %v497_v37 = vmul.f32 %v492_v21, %v2793_v44 }
 0x137   : > { %v3173_v4 = vpop.permute.xlu1 %1987  ;;  %v3175_v10 = vpop.permute.xlu0 %1997  ;;  %v1636_v7 = vpack.c.bf16 %v802_v46, %v788_v23  ;;  %v1637_v42 = vpack.c.bf16 %v829_v20, %v815_v22  ;;  %v438_v20 = vmul.f32 %v2826_v60, %v2796_v45  ;;  %v724_v22 = vmul.f32 %v3063_v39, %v2802_v47 }
 0x138   : > { %v1989_v8 = vunpack.i.l.bf16 %v3173_v4  ;;  %v2146_v59 = vpack.i.bf16 %v497_v37, %v2802_v47 }
 0x139   : > { %2112 = vrot.lane.b32.xlu1 %v2111_v38, %s2572_s25  ;;  %2227 = vrot.lane.b32.xlu0 %v2226_v18, %s2549_s17  ;;  %v504_v38 = vsel %vm503_vm6, %v2911_v6, %v2909_v5  ;;  %v678_v6 = vmul.f32 %v3018_v54, %v2796_v45  ;;  %v702_v54 = vmul.f32 %v3041_v48, %v2796_v45  ;;  %s2573_s17 = smov 60   ;;  %vm870_vm6 = vcmask 908288  }
 0x13a   : > { %1715 = vmatprep.subr.bf16.mxu1 %v1636_v7  ;;  %v816_v30 = vsel %vm814_vm4, %v1985_v0, %v1989_v8  ;;  %v509_v16 = vmul.f32 %v504_v38, %v2793_v44  ;;  %v696_v7 = vsel %vm695_vm7, %v3043_v53, %v3041_v48  ;;  %v700_v48 = vmul.f32 %v3043_v53, %v2802_v47 }
 0x13b   : > { %1716 = vmatpush1.bf16.msra.mxu1 %v1635_v55  ;;  %v827_v3 = vpop.permute.xlu1 %826  ;;  %v3186_v29 = vpop.permute.xlu0 %2002  ;;  %v701_v58 = vmul.f32 %v696_v7, %v2793_v44  ;;  %v432_v53 = vsel %vm431_vm11, %v2828_v61, %v2826_v60  ;;  %v1960_v60 = vunpack.i.h.bf16 %v3118_v40  ;;  %v558_v38 = vmul.f32 %v2945_v41, %v2796_v45 }
 0x13c   : > { %v830_v43 = vsel %vm828_vm3, %v1995_v24, %v827_v3  ;;  %v2156_v46 = vpack.i.bf16 %v510_v62, %v509_v16  ;;  %v2161_v24 = vpack.i.bf16 %v676_v12, %v678_v6  ;;  %v436_v16 = vmul.f32 %v2828_v61, %v2802_v47 }
 0x13d   : > { %v1638_v19 = vpack.c.bf16 %v830_v43, %v816_v30  ;;  %1164 = vrot.lane.b32.xlu1 %v640_v28, %s2572_s25  ;;  %2237 = vrot.lane.b32.xlu0 %v2236_v52, %s2567_s13  ;;  %v2181_v63 = vpack.i.bf16 %v702_v54, %v701_v58  ;;  %v725_v28 = vmul.f32 %v720_v32, %v2793_v44  ;;  %vm842_vm3 = vcmask 998400  }
 0x13e   : > { %v552_v30 = vsel %vm551_vm12, %v2947_v31, %v2945_v41  ;;  %v437_v43 = vmul.f32 %v432_v53, %v2793_v44  ;;  %v738_v41 = vmul.f32 %v3074_v25, %v2796_v45  ;;  %v576_v6 = vsel %vm575_vm14, %v2967_v51, %v2965_v1 }
 0x13f   : > { %v3193_v57 = vpop.permute.xlu0 %2012  ;;  %1717 = vmatprep.subr.bf16.mxu1 %v1638_v19  ;;  %v2201_v19 = vpack.i.bf16 %v726_v14, %v725_v28  ;;  %v557_v21 = vmul.f32 %v552_v30, %v2793_v44  ;;  %v582_v61 = vmul.f32 %v2965_v1, %v2796_v45  ;;  %v581_v12 = vmul.f32 %v576_v6, %v2793_v44  ;;  %v841_v7 = vpop.permute.xlu1 %840 }
 0x140   : > { %1718 = vmatpush1.bf16.msra.mxu1 %v1637_v42  ;;  %v2266_v37 = vpack.i.bf16 %v438_v20, %v437_v43  ;;  %v2005_v25 = vunpack.i.h.bf16 %v3186_v29  ;;  %v594_v28 = vmul.f32 %v2970_v35, %v2796_v45  ;;  %v2015_v45 = vunpack.i.h.bf16 %v3193_v57 }
 0x141   : > { %2127 = vrot.lane.b32.xlu1 %v2126_v33, %s2557_s29  ;;  %2247 = vrot.lane.b32.xlu0 %v2977_v56, %s2567_s13  ;;  %v2211_v39 = vpack.i.bf16 %v557_v21, %v724_v22  ;;  %v2241_v58 = vpack.i.bf16 %v582_v61, %v581_v12  ;;  %vm895_vm11 = vcmask 891904   ;;  %vm909_vm12 = vcmask 883712  }
 0x142   : > { %vm937_vm14 = vcmask 867328  }
 0x143   : > { %v3201_v18 = vpop.permute.xlu0 %2022 }
 0x144   : > { %v2025_v43 = vunpack.i.h.bf16 %v3201_v18 }
 0x145   : > { %2137 = vrot.lane.b32.xlu1 %v2977_v56, %s2569_s21  ;;  %1119 = vrot.lane.b32.xlu0 %v2802_v47, %s2567_s13 }
 0x147   : > { %v3213_v23 = vpop.permute.xlu0 %2032 }
 0x149   : > { %2147 = vrot.lane.b32.xlu1 %v2146_v59, %s2569_s21  ;;  %v556_v59 = vmul.f32 %v2947_v31, %v2802_v47  ;;  %v736_v31 = vmul.f32 %v3076_v27, %v2802_v47  ;;  %v2004_v27 = vunpack.i.l.bf16 %v3186_v29 }
 0x14b   : > { %v3220_v13 = vpop.permute.xlu0 %2042  ;;  %v2221_v40 = vpack.i.bf16 %v556_v59, %v558_v38  ;;  %v857_v29 = vsel %vm856_vm0, %v2004_v27, %v2005_v25 }
 0x14d   : > { %2157 = vrot.lane.b32.xlu1 %v2156_v46, %s2560_s6 }
 0x14f   : > { %v3223_v49 = vpop.permute.xlu0 %2052 }
 0x151   : > { %2162 = vrot.lane.b32.xlu1 %v2161_v24, %s2561_s7  ;;  %v2231_v24 = vpack.i.bf16 %v736_v31, %v738_v41 }
 0x153   : > { %v3226_v5 = vpop.permute.xlu0 %2057 }
 0x155   : > { %2172 = vrot.lane.b32.xlu1 %v2977_v56, %s2561_s7  ;;  %v532_v56 = vmul.f32 %v2926_v15, %v2802_v47 }
 0x157   : > { %v3236_v8 = vpop.permute.xlu0 %2062  ;;  %v2191_v36 = vpack.i.bf16 %v532_v56, %v534_v9  ;;  %v1999_v9 = vunpack.i.l.bf16 %v3175_v10  ;;  %v588_v56 = vsel %vm587_vm15, %v2972_v2, %v2970_v35  ;;  %vm923_vm15 = vcmask 875520  }
 0x158   : > { %v593_v53 = vmul.f32 %v588_v56, %v2793_v44  ;;  %v2014_v44 = vunpack.i.l.bf16 %v3193_v57  ;;  %v2054_v56 = vunpack.i.l.bf16 %v3223_v49 }
 0x159   : > { %1045 = vrot.lane.b32.xlu1 %v2802_v47, %s2561_s7 }
 0x15a   : > { %v871_v57 = vsel %vm870_vm6, %v2014_v44, %v2015_v45 }
 0x15b   : > { %v3240_v0 = vpop.permute.xlu0 %2072 }
 0x15d   : > { %2182 = vrot.lane.b32.xlu1 %v2181_v63, %s2551_s20  ;;  %v2000_v63 = vunpack.i.h.bf16 %v3175_v10 }
 0x15f   : > { %v3249_v55 = vpop.permute.xlu0 %2082  ;;  %v844_v14 = vsel %vm842_vm3, %v2000_v63, %v841_v7  ;;  %v843_v30 = vsel %vm842_vm3, %v1999_v9, %v2000_v63  ;;  %v2059_v7 = vunpack.i.l.bf16 %v3226_v5  ;;  %v2055_v9 = vunpack.i.h.bf16 %v3223_v49 }
 0x160   : > { %v2084_v33 = vunpack.i.l.bf16 %v3249_v55  ;;  %v2074_v49 = vunpack.i.l.bf16 %v3240_v0  ;;  %vm964_vm3 = vcmask 777216  }
 0x161   : > { %1228 = vrot.lane.b32.xlu1 %v700_v48, %s2551_s20  ;;  %s2574_s20 = smov 94  }
 0x162   : > { %v975_v62 = vsel %vm772_vm13, %v1960_v60, %v2084_v33 }
 0x163   : > { %v3258_v15 = vpop.permute.xlu0 %2092  ;;  %v2276_v46 = vpack.i.bf16 %v975_v62, %v436_v16  ;;  %v2034_v62 = vunpack.i.l.bf16 %v3213_v23  ;;  %v2045_v16 = vunpack.i.h.bf16 %v3220_v13 }
 0x164   : > { %v2095_v52 = vunpack.i.h.bf16 %v3258_v15  ;;  %v2094_v3 = vunpack.i.l.bf16 %v3258_v15 }
 0x165   : > { %2192 = vrot.lane.b32.xlu1 %v2191_v36, %s2563_s9  ;;  %v580_v36 = vmul.f32 %v2967_v51, %v2802_v47  ;;  %v2251_v51 = vpack.i.bf16 %v594_v28, %v593_v53  ;;  %v924_v28 = vsel %vm923_vm15, %v2054_v56, %v2055_v9 }
 0x166   : > { %v1137_v34 = vsel %vm772_vm13, %v2094_v3, %v2095_v52 }
 0x167   : > { %v2256_v42 = vpack.i.bf16 %v2095_v52, %v1137_v34  ;;  %v3302_v54 = vpop.permute.xlu0 %2097  ;;  %v1639_v34 = vpack.c.bf16 %v857_v29, %v843_v30  ;;  %v2075_v30 = vunpack.i.h.bf16 %v3240_v0 }
 0x169   : > { %2202 = vrot.lane.b32.xlu1 %v2201_v19, %s2550_s18  ;;  %2257 = vrot.lane.b32.xlu0 %v2256_v42, %s2573_s17  ;;  %v2024_v19 = vunpack.i.l.bf16 %v3201_v18  ;;  %v965_v44 = vsel %vm964_vm3, %v2074_v49, %v2075_v30 }
 0x16b   : > { %v3314_v32 = vpop.permute.xlu0 %1141  ;;  %v885_v18 = vsel %vm884_vm5, %v2024_v19, %v2025_v43  ;;  %v2064_v19 = vunpack.i.l.bf16 %v3236_v8 }
 0x16c   : > { %v1641_v59 = vpack.c.bf16 %v885_v18, %v871_v57 }
 0x16d   : > { %2212 = vrot.lane.b32.xlu1 %v2211_v39, %s2550_s18  ;;  %2267 = vrot.lane.b32.xlu0 %v2266_v37, %s2574_s20  ;;  %v2035_v39 = vunpack.i.h.bf16 %v3213_v23 }
 0x16f   : > { %v3332_v35 = vpop.permute.xlu0 %2107  ;;  %v896_v61 = vsel %vm895_vm11, %v2034_v62, %v2035_v39 }
 0x170   : > { %v2110_v56 = vunpack.i.h.bf16 %v3332_v35 }
 0x171   : > { %2222 = vrot.lane.b32.xlu1 %v2221_v40, %s2550_s18  ;;  %2277 = vrot.lane.b32.xlu0 %v2276_v46, %s2574_s20  ;;  %v2044_v40 = vunpack.i.l.bf16 %v3220_v13 }
 0x173   : > { %v3348_v41 = vpop.permute.xlu0 %2117  ;;  %v910_v23 = vsel %vm909_vm12, %v2044_v40, %v2045_v16 }
 0x174   : > { %v1643_v63 = vpack.c.bf16 %v910_v23, %v896_v61  ;;  %v2099_v61 = vunpack.i.l.bf16 %v3302_v54 }
 0x175   : > { %2232 = vrot.lane.b32.xlu1 %v2231_v24, %s2548_s14  ;;  %v2060_v24 = vunpack.i.h.bf16 %v3226_v5 }
 0x177   : > { %v3309_v1 = vpop.permute.xlu1 %2007  ;;  %v938_v29 = vsel %vm937_vm14, %v2059_v7, %v2060_v24 }
 0x178   : > { %v2009_v48 = vunpack.i.l.bf16 %v3309_v1  ;;  %v1645_v53 = vpack.c.bf16 %v938_v29, %v924_v28  ;;  %v1147_v28 = vsel %vm786_vm2, %v3314_v32, %v2099_v61 }
 0x179   : > { %2242 = vrot.lane.b32.xlu1 %v2241_v58, %s2548_s14 }
 0x17a   : > { %v858_v10 = vsel %vm856_vm0, %v2005_v25, %v2009_v48  ;;  %v3360_v25 = vpop.permute.xlu0 %2122 }
 0x17b   : > { %v3324_v52 = vpop.permute.xlu1 %2017  ;;  %v1640_v20 = vpack.c.bf16 %v858_v10, %v844_v14 }
 0x17c   : > { %v2019_v47 = vunpack.i.l.bf16 %v3324_v52 }
 0x17d   : > { %1111 = vrot.lane.b32.xlu1 %v580_v36, %s2548_s14  ;;  %1719 = vmatprep.subr.bf16.mxu1 %v1640_v20 }
 0x17e   : > { %1720 = vmatpush1.bf16.msra.mxu1 %v1639_v34  ;;  %v872_v21 = vsel %vm870_vm6, %v2015_v45, %v2019_v47  ;;  %v3364_v10 = vpop.permute.xlu0 %2132 }
 0x17f   : > { %v3334_v22 = vpop.permute.xlu1 %2027 }
 0x180   : > { %v2029_v42 = vunpack.i.l.bf16 %v3334_v22 }
 0x181   : > { %2252 = vrot.lane.b32.xlu1 %v2251_v51, %s2573_s17 }
 0x182   : > { %v886_v60 = vsel %vm884_vm5, %v2025_v43, %v2029_v42  ;;  %v2065_v43 = vunpack.i.h.bf16 %v3236_v8  ;;  %v3373_v47 = vpop.permute.xlu0 %2142  ;;  %v2085_v8 = vunpack.i.h.bf16 %v3249_v55 }
 0x183   : > { %v3341_v37 = vpop.permute.xlu1 %2037  ;;  %v1642_v38 = vpack.c.bf16 %v886_v60, %v872_v21 }
 0x184   : > { %v2039_v31 = vunpack.i.l.bf16 %v3341_v37  ;;  %v951_v60 = vsel %vm695_vm7, %v2064_v19, %v2065_v43 }
 0x185   : > { %1721 = vmatprep.subr.bf16.mxu1 %v1642_v38  ;;  %v1647_v38 = vpack.c.bf16 %v965_v44, %v951_v60  ;;  %v2124_v60 = vunpack.i.l.bf16 %v3360_v25 }
 0x186   : > { %1722 = vmatpush1.bf16.msra.mxu1 %v1641_v59  ;;  %v897_v12 = vsel %vm895_vm11, %v2035_v39, %v2039_v31  ;;  %v3382_v57 = vpop.permute.xlu0 %2152  ;;  %v3386_v59 = vld [vmem:[%s2786_s23] sm:$0xff]  ;;  %v976_v31 = vsel %vm772_vm13, %v2084_v33, %v2085_v8 }
 0x187   : > { %v3351_v46 = vpop.permute.xlu1 %2047  ;;  %v592_v39 = vmul.f32 %v3386_v59, %v2972_v2 }
 0x188   : > { %v2049_v6 = vunpack.i.l.bf16 %v3351_v46 }
 0x18a   : > { %v911_v13 = vsel %vm909_vm12, %v2045_v16, %v2049_v6  ;;  %v2100_v6 = vunpack.i.h.bf16 %v3302_v54  ;;  %v3398_v23 = vpop.permute.xlu0 %1037 }
 0x18b   : > { %v922_v27 = vpop.permute.xlu1 %921  ;;  %v1644_v58 = vpack.c.bf16 %v911_v13, %v897_v12 }
 0x18c   : > { %v925_v36 = vsel %vm923_vm15, %v2055_v9, %v922_v27  ;;  %v1148_v7 = vsel %vm786_vm2, %v2099_v61, %v2100_v6  ;;  %v1970_v9 = vunpack.i.h.bf16 %v3146_v17  ;;  %vm1170_vm15 = vcmask 941056  }
 0x18d   : > { %1723 = vmatprep.subr.bf16.mxu1 %v1644_v58  ;;  %v2281_v58 = vpack.i.bf16 %v2100_v6, %v1148_v7 }
 0x18e   : > { %1724 = vmatpush1.bf16.msra.mxu1 %v1643_v63  ;;  %v3405_v63 = vpop.permute.xlu0 %2167 }
 0x18f   : > { %v936_v48 = vpop.permute.xlu1 %935 }
 0x190   : > { %v939_v14 = vsel %vm937_vm14, %v2060_v24, %v936_v48  ;;  %vm1158_vm14 = vcmask 949248   ;;  %v2109_v48 = vunpack.i.l.bf16 %v3332_v35 }
 0x191   : > { %v1646_v5 = vpack.c.bf16 %v939_v14, %v925_v36  ;;  %v1980_v36 = vunpack.i.h.bf16 %v3162_v26 }
 0x192   : > { %v3422_v19 = vpop.permute.xlu0 %2177 }
 0x193   : > { %v3366_v20 = vpop.permute.xlu1 %2067  ;;  %1725 = vmatprep.subr.bf16.mxu1 %v1646_v5  ;;  %v997_v35 = vsel %vm800_vm1, %v2110_v56, %v1980_v36  ;;  %v998_v26 = vsel %vm800_vm1, %v1980_v36, %v2109_v48  ;;  %vm1031_vm1 = vcmask 924672   ;;  %v2154_v56 = vunpack.i.l.bf16 %v3382_v57 }
 0x194   : > { %1726 = vmatpush1.bf16.msra.mxu1 %v1645_v53  ;;  %v2069_v34 = vunpack.i.l.bf16 %v3366_v20  ;;  %v2120_v53 = vunpack.i.h.bf16 %v3348_v41  ;;  %v2301_v44 = vpack.i.bf16 %v2109_v48, %v998_v26 }
 0x196   : > { %v952_v42 = vsel %vm695_vm7, %v2065_v43, %v2069_v34 }
 0x197   : > { %v3375_v51 = vpop.permute.xlu1 %2077 }
 0x198   : > { %v2079_v45 = vunpack.i.l.bf16 %v3375_v51 }
 0x19a   : > { %v966_v0 = vsel %vm964_vm3, %v2075_v30, %v2079_v45  ;;  %v2119_v30 = vunpack.i.l.bf16 %v3348_v41 }
 0x19b   : > { %v2088_v18 = vpop.permute.xlu1 %2087  ;;  %v1648_v21 = vpack.c.bf16 %v966_v0, %v952_v42 }
 0x19c   : > { %v2090_v2 = vunpack.i.h.bf16 %v2088_v18  ;;  %v2089_v13 = vunpack.i.l.bf16 %v2088_v18 }
 0x19d   : > { %1727 = vmatprep.subr.bf16.mxu1 %v1648_v21  ;;  %v1990_v21 = vunpack.i.h.bf16 %v3173_v4  ;;  %v2125_v4 = vunpack.i.h.bf16 %v3360_v25 }
 0x19e   : > { %1728 = vmatpush1.bf16.msra.mxu1 %v1647_v38  ;;  %v987_v54 = vsel %vm786_vm2, %v2089_v13, %v2090_v2  ;;  %v986_v17 = vsel %vm786_vm2, %v1970_v9, %v2089_v13  ;;  %vm1245_vm2 = vcmask 809984  }
 0x19f   : > { %v1131_v62 = vpop.permute.xlu1 %1130  ;;  %v2296_v14 = vpack.i.bf16 %v2090_v2, %v987_v54  ;;  %v2306_v45 = vpack.i.bf16 %v997_v35, %v986_v17  ;;  %v2144_v2 = vunpack.i.l.bf16 %v3373_v47 }
 0x1a0   : > { %v1136_v16 = vsel %vm772_vm13, %v1131_v62, %v2094_v3  ;;  %v2271_v3 = vpack.i.bf16 %v2085_v8, %v976_v31  ;;  %vm1019_vm13 = vcmask 932864  }
 0x1a1   : > { %v2261_v40 = vpack.i.bf16 %v1136_v16, %v592_v39  ;;  %v1183_v41 = vsel %vm1019_vm13, %v2119_v30, %v2120_v53  ;;  %v3431_v39 = vpop.permute.xlu0 %1056  ;;  %v2135_v16 = vunpack.i.h.bf16 %v3364_v10  ;;  %v1182_v13 = vsel %vm1019_vm13, %v2124_v60, %v2119_v30 }
 0x1a2   : > { %v2316_v0 = vpack.i.bf16 %v2120_v53, %v1183_v41 }
 0x1a3   : > { %v2103_v12 = vpop.permute.xlu1 %2102  ;;  %2262 = vrot.lane.b32.xlu1 %v2261_v40, %s2573_s17  ;;  %v2134_v40 = vunpack.i.l.bf16 %v3364_v10  ;;  %v1020_v7 = vsel %vm1019_vm13, %v2135_v16, %v2125_v4 }
 0x1a4   : > { %v2105_v15 = vunpack.i.h.bf16 %v2103_v12  ;;  %v2104_v24 = vunpack.i.l.bf16 %v2103_v12 }
 0x1a5   : > { %v1021_v10 = vsel %vm1019_vm13, %v2125_v4, %v2134_v40 }
 0x1a6   : > { %v1160_v55 = vsel %vm1158_vm14, %v2104_v24, %v2105_v15 }
 0x1a7   : > { %v2286_v33 = vpack.i.bf16 %v2105_v15, %v1160_v55  ;;  %v1153_v27 = vpop.permute.xlu1 %1152  ;;  %2272 = vrot.lane.b32.xlu1 %v2271_v3, %s2574_s20 }
 0x1a8   : > { %v1159_v29 = vsel %vm1158_vm14, %v1153_v27, %v2104_v24  ;;  %v2010_v24 = vunpack.i.h.bf16 %v3309_v1  ;;  %v3447_v27 = vpop.permute.xlu0 %2187  ;;  %v2331_v1 = vpack.i.bf16 %v2134_v40, %v1021_v10 }
 0x1a9   : > { %2287 = vrot.lane.b32.xlu0 %v2286_v33, %s2573_s17  ;;  %v2291_v49 = vpack.i.bf16 %v1159_v29, %v1147_v28 }
 0x1ab   : > { %v2113_v5 = vpop.permute.xlu1 %2112  ;;  %2282 = vrot.lane.b32.xlu1 %v2281_v58, %s2573_s17  ;;  %v1202_v58 = vsel %vm856_vm0, %v2010_v24, %v2144_v2 }
 0x1ac   : > { %v2115_v34 = vunpack.i.h.bf16 %v2113_v5  ;;  %v2114_v43 = vunpack.i.l.bf16 %v2113_v5  ;;  %v2346_v36 = vpack.i.bf16 %v2144_v2, %v1202_v58  ;;  %v2145_v5 = vunpack.i.h.bf16 %v3373_v47  ;;  %v3457_v30 = vpop.permute.xlu0 %1239 }
 0x1ad   : > { %2297 = vrot.lane.b32.xlu0 %v2296_v14, %s2574_s20  ;;  %v2169_v47 = vunpack.i.l.bf16 %v3405_v63 }
 0x1ae   : > { %v1172_v42 = vsel %vm1170_vm15, %v2114_v43, %v2115_v34 }
 0x1af   : > { %v1165_v32 = vpop.permute.xlu1 %1164  ;;  %2292 = vrot.lane.b32.xlu1 %v2291_v49, %s2573_s17  ;;  %v2311_v62 = vpack.i.bf16 %v2115_v34, %v1172_v42 }
 0x1b0   : > { %v1171_v31 = vsel %vm1170_vm15, %v1165_v32, %v2114_v43  ;;  %v1201_v43 = vsel %vm856_vm0, %v2145_v5, %v2010_v24 }
 0x1b1   : > { %2307 = vrot.lane.b32.xlu0 %v2306_v45, %s2574_s20  ;;  %v2321_v3 = vpack.i.bf16 %v1182_v13, %v1171_v31  ;;  %v2155_v45 = vunpack.i.h.bf16 %v3382_v57  ;;  %v2020_v57 = vunpack.i.h.bf16 %v3324_v52  ;;  %v2180_v13 = vunpack.i.h.bf16 %v3422_v19 }
 0x1b3   : > { %v2128_v18 = vpop.permute.xlu1 %2127  ;;  %2302 = vrot.lane.b32.xlu1 %v2301_v44, %s2574_s20  ;;  %v2030_v44 = vunpack.i.h.bf16 %v3334_v22 }
 0x1b4   : > { %v2130_v38 = vunpack.i.h.bf16 %v2128_v18  ;;  %v2129_v8 = vunpack.i.l.bf16 %v2128_v18 }
 0x1b5   : > { %2317 = vrot.lane.b32.xlu0 %v2316_v0, %s2573_s17 }
 0x1b6   : > { %v1009_v6 = vsel %vm814_vm4, %v1990_v21, %v2129_v8  ;;  %v1008_v15 = vsel %vm814_vm4, %v2130_v38, %v1990_v21  ;;  %v3471_v21 = vpop.permute.xlu0 %2197  ;;  %vm1702_vm4 = vcmask 64512  }
 0x1b7   : > { %v2326_v61 = vpack.i.bf16 %v2129_v8, %v1009_v6  ;;  %v2138_v12 = vpop.permute.xlu1 %2137  ;;  %2312 = vrot.lane.b32.xlu1 %v2311_v62, %s2573_s17  ;;  %v2336_v25 = vpack.i.bf16 %v1020_v7, %v1008_v15  ;;  %v2179_v15 = vunpack.i.l.bf16 %v3422_v19  ;;  %v2190_v7 = vunpack.i.h.bf16 %v3447_v27 }
 0x1b8   : > { %v2140_v55 = vunpack.i.h.bf16 %v2138_v12  ;;  %v2139_v33 = vunpack.i.l.bf16 %v2138_v12  ;;  %v2170_v12 = vunpack.i.h.bf16 %v3405_v63  ;;  %v2189_v63 = vunpack.i.l.bf16 %v3447_v27 }
 0x1b9   : > { %2327 = vrot.lane.b32.xlu0 %v2326_v61, %s2574_s20  ;;  %v1062_v19 = vsel %vm884_vm5, %v3431_v39, %v2179_v15  ;;  %v2040_v39 = vunpack.i.h.bf16 %v3341_v37 }
 0x1ba   : > { %v1191_v48 = vsel %vm1031_vm1, %v2139_v33, %v2140_v55  ;;  %v3481_v4 = vpop.permute.xlu0 %2207  ;;  %v1223_v10 = vsel %vm884_vm5, %v2170_v12, %v2030_v44  ;;  %v1247_v27 = vsel %vm1245_vm2, %v2189_v63, %v2190_v7 }
 0x1bb   : > { %v2148_v54 = vpop.permute.xlu1 %2147  ;;  %2322 = vrot.lane.b32.xlu1 %v2321_v3, %s2573_s17  ;;  %v2341_v17 = vpack.i.bf16 %v2140_v55, %v1191_v48 }
 0x1bc   : > { %v2150_v9 = vunpack.i.h.bf16 %v2148_v54  ;;  %v2149_v29 = vunpack.i.l.bf16 %v2148_v54 }
 0x1bd   : > { %2337 = vrot.lane.b32.xlu0 %v2336_v25, %s2574_s20  ;;  %v1063_v25 = vsel %vm884_vm5, %v2179_v15, %v2180_v13 }
 0x1be   : > { %v1033_v28 = vsel %vm1031_vm1, %v2150_v9, %v2154_v56  ;;  %v1190_v49 = vsel %vm1031_vm1, %v2149_v29, %v2139_v33  ;;  %v1032_v42 = vsel %vm1031_vm1, %v2155_v45, %v2150_v9  ;;  %v3496_v9 = vpop.permute.xlu0 %2217  ;;  %v2391_v48 = vpack.i.bf16 %v2180_v13, %v1063_v25 }
 0x1bf   : > { %v2158_v14 = vpop.permute.xlu1 %2157  ;;  %2332 = vrot.lane.b32.xlu1 %v2331_v1, %s2574_s20  ;;  %v2356_v26 = vpack.i.bf16 %v2154_v56, %v1033_v28  ;;  %v2351_v41 = vpack.i.bf16 %v1201_v43, %v1190_v49  ;;  %v2050_v45 = vunpack.i.h.bf16 %v3351_v46 }
 0x1c0   : > { %v2159_v53 = vunpack.i.l.bf16 %v2158_v14  ;;  %v2160_v35 = vunpack.i.h.bf16 %v2158_v14 }
 0x1c1   : > { %2347 = vrot.lane.b32.xlu0 %v2346_v36, %s2573_s17  ;;  %v2406_v36 = vpack.i.bf16 %v2190_v7, %v1247_v27 }
 0x1c2   : > { %v1043_v32 = vsel %vm856_vm0, %v3398_v23, %v2159_v53  ;;  %v1044_v0 = vsel %vm856_vm0, %v2159_v53, %v2160_v35  ;;  %v1224_v23 = vsel %vm884_vm5, %v2030_v44, %v2169_v47  ;;  %v2200_v53 = vunpack.i.h.bf16 %v3471_v21 }
 0x1c3   : > { %v2163_v34 = vpop.permute.xlu1 %2162  ;;  %2342 = vrot.lane.b32.xlu1 %v2341_v17, %s2573_s17  ;;  %v2366_v60 = vpack.i.bf16 %v1043_v32, %v1032_v42  ;;  %v2361_v16 = vpack.i.bf16 %v2160_v35, %v1044_v0  ;;  %v2376_v6 = vpack.i.bf16 %v2169_v47, %v1224_v23  ;;  %v3505_v17 = vpop.permute.xlu0 %2227  ;;  %v2199_v35 = vunpack.i.l.bf16 %v3471_v21 }
 0x1c4   : > { %v2164_v18 = vunpack.i.l.bf16 %v2163_v34  ;;  %v2165_v22 = vunpack.i.h.bf16 %v2163_v34  ;;  %v1246_v32 = vsel %vm1245_vm2, %v3457_v30, %v2189_v63  ;;  %v1084_v42 = vsel %vm909_vm12, %v2200_v53, %v2050_v45 }
 0x1c5   : > { %2357 = vrot.lane.b32.xlu0 %v2356_v26, %s2574_s20  ;;  %v2210_v26 = vunpack.i.h.bf16 %v3481_v4  ;;  %vm1706_vm0 = vcmask 1043456  }
 0x1c6   : > { %v1213_v40 = vsel %vm870_vm6, %v2020_v57, %v2164_v18  ;;  %v1212_v24 = vsel %vm870_vm6, %v2165_v22, %v2020_v57 }
 0x1c7   : > { %v2173_v38 = vpop.permute.xlu1 %2172  ;;  %2352 = vrot.lane.b32.xlu1 %v2351_v41, %s2573_s17  ;;  %v2371_v52 = vpack.i.bf16 %v2164_v18, %v1213_v40  ;;  %v2381_v33 = vpack.i.bf16 %v1223_v10, %v1212_v24  ;;  %v2209_v41 = vunpack.i.l.bf16 %v3481_v4  ;;  %v1085_v18 = vsel %vm909_vm12, %v2050_v45, %v2199_v35 }
 0x1c8   : > { %v2175_v8 = vunpack.i.h.bf16 %v2173_v38  ;;  %v2174_v62 = vunpack.i.l.bf16 %v2173_v38  ;;  %v3522_v38 = vpop.permute.xlu0 %2237  ;;  %v2421_v30 = vpack.i.bf16 %v2199_v35, %v1085_v18  ;;  %v2220_v10 = vunpack.i.h.bf16 %v3496_v9 }
 0x1c9   : > { %2367 = vrot.lane.b32.xlu0 %v2366_v60, %s2574_s20  ;;  %v1266_v46 = vsel %vm707_vm10, %v2209_v41, %v2210_v26  ;;  %v2239_v63 = vunpack.i.l.bf16 %v3522_v38 }
 0x1ca   : > { %v1052_v31 = vsel %vm870_vm6, %v2174_v62, %v2175_v8 }
 0x1cb   : > { %v1046_v61 = vpop.permute.xlu1 %1045  ;;  %2362 = vrot.lane.b32.xlu1 %v2361_v16, %s2574_s20  ;;  %v2386_v2 = vpack.i.bf16 %v2175_v8, %v1052_v31  ;;  %v2436_v8 = vpack.i.bf16 %v2210_v26, %v1266_v46  ;;  %v2219_v31 = vunpack.i.l.bf16 %v3496_v9  ;;  %v2070_v9 = vunpack.i.h.bf16 %v3366_v20  ;;  %v3569_v46 = vld [vmem:[%s3671_s1] sm:$0xff] }
 0x1cc   : > { %v1051_v55 = vsel %vm870_vm6, %v1046_v61, %v2174_v62  ;;  %v3527_v22 = vpop.permute.xlu0 %2247 }
 0x1cd   : > { %2377 = vrot.lane.b32.xlu0 %v2376_v6, %s2573_s17  ;;  %v2396_v1 = vpack.i.bf16 %v1062_v19, %v1051_v55  ;;  %v1265_v7 = vsel %vm707_vm10, %v2219_v31, %v2209_v41  ;;  %v2080_v19 = vunpack.i.h.bf16 %v3375_v51  ;;  %v2250_v53 = vunpack.i.h.bf16 %v3527_v22 }
 0x1ce   : > { %v2249_v20 = vunpack.i.l.bf16 %v3527_v22  ;;  %v760_v22 = vmul.f32 %v3386_v59, %v3107_v50 }
 0x1cf   : > { %v2183_v3 = vpop.permute.xlu1 %2182  ;;  %2372 = vrot.lane.b32.xlu1 %v2371_v52, %s2573_s17  ;;  %v2230_v52 = vunpack.i.h.bf16 %v3505_v17 }
 0x1d0   : > { %v2185_v54 = vunpack.i.h.bf16 %v2183_v3  ;;  %v2184_v58 = vunpack.i.l.bf16 %v2183_v3 }
 0x1d1   : > { %2387 = vrot.lane.b32.xlu0 %v2386_v2, %s2574_s20  ;;  %v2229_v2 = vunpack.i.l.bf16 %v3505_v17 }
 0x1d2   : > { %v1235_v29 = vsel %vm731_vm9, %v2184_v58, %v2185_v54 }
 0x1d3   : > { %v1229_v56 = vpop.permute.xlu1 %1228  ;;  %2382 = vrot.lane.b32.xlu1 %v2381_v33, %s2573_s17  ;;  %v2401_v49 = vpack.i.bf16 %v2185_v54, %v1235_v29  ;;  %v1120_v33 = vpop.permute.xlu0 %1119  ;;  %v1107_v54 = vsel %vm707_vm10, %v2220_v10, %v2229_v2 }
 0x1d4   : > { %v1234_v34 = vsel %vm731_vm9, %v1229_v56, %v2184_v58  ;;  %v1106_v58 = vsel %vm707_vm10, %v2230_v52, %v2220_v10  ;;  %vm755_vm9 = vcmask 834560   ;;  %vm1552_vm10 = vcmask 490496  }
 0x1d5   : > { %2397 = vrot.lane.b32.xlu0 %v2396_v1, %s2574_s20  ;;  %v2411_v0 = vpack.i.bf16 %v1246_v32, %v1234_v34 }
 0x1d7   : > { %v2193_v14 = vpop.permute.xlu1 %2192  ;;  %2392 = vrot.lane.b32.xlu1 %v2391_v48, %s2574_s20  ;;  %v1288_v48 = vsel %vm964_vm3, %v2080_v19, %v2239_v63 }
 0x1d8   : > { %v2195_v5 = vunpack.i.h.bf16 %v2193_v14  ;;  %v2194_v28 = vunpack.i.l.bf16 %v2193_v14  ;;  %v2451_v14 = vpack.i.bf16 %v2229_v2, %v1107_v54 }
 0x1d9   : > { %2407 = vrot.lane.b32.xlu0 %v2406_v36, %s2573_s17 }
 0x1da   : > { %v1074_v43 = vsel %vm895_vm11, %v2040_v39, %v2194_v28  ;;  %v1073_v44 = vsel %vm895_vm11, %v2195_v5, %v2040_v39  ;;  %v2240_v5 = vunpack.i.h.bf16 %v3522_v38  ;;  %v756_v38 = vsel %vm755_vm9, %v3107_v50, %v3105_v11  ;;  %v1683_v50 = vld [vmem:[%s3672_s2] sm:$0xff] }
 0x1db   : > { %v2416_v37 = vpack.i.bf16 %v2194_v28, %v1074_v43  ;;  %v2203_v47 = vpop.permute.xlu1 %2202  ;;  %2402 = vrot.lane.b32.xlu1 %v2401_v49, %s2573_s17  ;;  %v2426_v57 = vpack.i.bf16 %v1084_v42, %v1073_v44  ;;  %v2466_v28 = vpack.i.bf16 %v2239_v63, %v1288_v48  ;;  %v3552_v17 = vpop.permute.xlu0 %2257  ;;  %v1125_v44 = vsel %vm964_vm3, %v1120_v33, %v2249_v20 }
 0x1dc   : > { %v2205_v21 = vunpack.i.h.bf16 %v2203_v47  ;;  %v2204_v60 = vunpack.i.l.bf16 %v2203_v47  ;;  %v2260_v34 = vunpack.i.h.bf16 %v3552_v17  ;;  %v2259_v43 = vunpack.i.l.bf16 %v3552_v17 }
 0x1dd   : > { %2417 = vrot.lane.b32.xlu0 %v2416_v37, %s2574_s20  ;;  %v1287_v37 = vsel %vm964_vm3, %v2240_v5, %v2080_v19  ;;  %v1126_v47 = vsel %vm964_vm3, %v2249_v20, %v2250_v53 }
 0x1de   : > { %v1258_v62 = vsel %vm719_vm8, %v2204_v60, %v2205_v21 }
 0x1df   : > { %v2213_v23 = vpop.permute.xlu1 %2212  ;;  %2412 = vrot.lane.b32.xlu1 %v2411_v0, %s2573_s17  ;;  %v2431_v4 = vpack.i.bf16 %v2205_v21, %v1258_v62  ;;  %v2268_v59 = vpop.permute.xlu0 %2267 }
 0x1e0   : > { %v2214_v16 = vunpack.i.l.bf16 %v2213_v23  ;;  %v2215_v6 = vunpack.i.h.bf16 %v2213_v23  ;;  %v1556_v23 = vsel %vm1552_vm10, %v2259_v43, %v2260_v34 }
 0x1e1   : > { %2427 = vrot.lane.b32.xlu0 %v2426_v57, %s2574_s20 }
 0x1e2   : > { %v1257_v13 = vsel %vm719_vm8, %v2214_v16, %v2204_v60  ;;  %v1866_v60 = vcombine.high %v3569_v46, %v3569_v46  ;;  %v3583_v16 = vld [vmem:[%s3671_s1 + $0x8] sm:$0xff] }
 0x1e3   : > { %v2223_v40 = vpop.permute.xlu1 %2222  ;;  %2422 = vrot.lane.b32.xlu1 %v2421_v30, %s2574_s20  ;;  %v2441_v25 = vpack.i.bf16 %v1265_v7, %v1257_v13  ;;  %v2481_v30 = vpack.i.bf16 %v2250_v53, %v1126_v47  ;;  %v2278_v2 = vpop.permute.xlu0 %2277 }
 0x1e4   : > { %v2225_v61 = vunpack.i.h.bf16 %v2223_v40  ;;  %v2224_v12 = vunpack.i.l.bf16 %v2223_v40  ;;  %1745 = vmatprep.mubr.bf16.mxu1 %v1866_v60  ;;  %v2503_v40 = vld [vmem:[%s2786_s23 + $0x8] sm:$0xff]  ;;  %v2279_v10 = vunpack.i.l.bf16 %v2278_v2 }
 0x1e5   : > { %2437 = vrot.lane.b32.xlu0 %v2436_v8, %s2573_s17  ;;  %v761_v31 = vmul.f32 %v2503_v40, %v756_v38 }
 0x1e6   : > { %v1096_v15 = vsel %vm719_vm8, %v2215_v6, %v2224_v12  ;;  %v1095_v55 = vsel %vm719_vm8, %v2225_v61, %v2215_v6  ;;  %v1868_v6 = vcombine.high %v3583_v16, %v3583_v16  ;;  %v2504_v61 = vld [vmem:[%s2786_s23 + $0x10] sm:$0xff]  ;;  %vm1626_vm8 = vcmask 211968   ;;  %s1873_s23 = sshll.u32 %s3676_s16, 4 }
 0x1e7   : > { %v2446_v24 = vpack.i.bf16 %v2224_v12, %v1096_v15  ;;  %v2233_v3 = vpop.permute.xlu1 %2232  ;;  %2432 = vrot.lane.b32.xlu1 %v2431_v4, %s2573_s17  ;;  %v2456_v56 = vpack.i.bf16 %v1106_v58, %v1095_v55  ;;  %v762_v12 = vmul.f32 %v2504_v61, %v3105_v11  ;;  %v2575_v4 = vmov 0   ;;  %s197_s7 = scalar_lea.vmem %s3674_s4, %s1873_s23 }
 0x1e8   : > { %v2234_v1 = vunpack.i.l.bf16 %v2233_v3  ;;  %v2235_v39 = vunpack.i.h.bf16 %v2233_v3  ;;  %1870 = vmatprep.mubr.msk.bf16.mxu0 %vm1702_vm4, %v1868_v6  ;;  %2496 = vset.pattern.permute.xlu1 %v2575_v4  ;;  %v2491_v52 = vpack.i.bf16 %v761_v31, %v760_v22  ;;  %v2269_v3 = vunpack.i.l.bf16 %v2268_v59 }
 0x1e9   : > { %2447 = vrot.lane.b32.xlu0 %v2446_v24, %s2574_s20  ;;  %v2270_v24 = vunpack.i.h.bf16 %v2268_v59 }
 0x1ea   : > { %v1277_v51 = vsel %vm695_vm7, %v2070_v9, %v2234_v1  ;;  %v1276_v45 = vsel %vm695_vm7, %v2235_v39, %v2070_v9  ;;  %2497 = vset.pattern.permute.xlu0 %v2575_v4 }
 0x1eb   : > { %v2243_v27 = vpop.permute.xlu1 %2242  ;;  %2442 = vrot.lane.b32.xlu1 %v2441_v25, %s2573_s17  ;;  %v2461_v26 = vpack.i.bf16 %v2234_v1, %v1277_v51  ;;  %v2471_v21 = vpack.i.bf16 %v1287_v37, %v1276_v45  ;;  %v2280_v25 = vunpack.i.h.bf16 %v2278_v2 }
 0x1ec   : > { %v2245_v29 = vunpack.i.h.bf16 %v2243_v27  ;;  %v2244_v36 = vunpack.i.l.bf16 %v2243_v27 }
 0x1ed   : > { %2457 = vrot.lane.b32.xlu0 %v2456_v56, %s2574_s20 }
 0x1ee   : > { %v1118_v35 = vsel %vm695_vm7, %v2244_v36, %v2245_v29 }
 0x1ef   : > { %v1112_v49 = vpop.permute.xlu1 %1111  ;;  %2452 = vrot.lane.b32.xlu1 %v2451_v14, %s2574_s20  ;;  %v2476_v32 = vpack.i.bf16 %v2245_v29, %v1118_v35 }
 0x1f0   : > { %v1117_v42 = vsel %vm695_vm7, %v1112_v49, %v2244_v36  ;;  %vm1388_vm7 = vcmask 769024  }
 0x1f1   : > { %2467 = vrot.lane.b32.xlu0 %v2466_v28, %s2573_s17  ;;  %v2486_v8 = vpack.i.bf16 %v1125_v44, %v1117_v42  ;;  %v1390_v1 = vsel %vm1388_vm7, %v2269_v3, %v2270_v24  ;;  %v1389_v56 = vsel %vm1388_vm7, %v2279_v10, %v2269_v3 }
 0x1f3   : > { %v2253_v41 = vpop.permute.xlu1 %2252  ;;  %2462 = vrot.lane.b32.xlu1 %v2461_v26, %s2573_s17 }
 0x1f4   : > { %v2255_v0 = vunpack.i.h.bf16 %v2253_v41  ;;  %v2254_v18 = vunpack.i.l.bf16 %v2253_v41 }
 0x1f5   : > { %2477 = vrot.lane.b32.xlu0 %v2476_v32, %s2574_s20 }
 0x1f6   : > { %v1554_v57 = vsel %vm1552_vm10, %v2254_v18, %v2255_v0 }
 0x1f7   : > { %2472 = vrot.lane.b32.xlu1 %v2471_v21, %s2573_s17  ;;  %v1666_v62 = vpack.c.bf16 %v1556_v23, %v1554_v57 }
 0x1f9   : > { %1754 = vmatprep.subr.bf16.mxu0 %v1666_v62  ;;  %2487 = vrot.lane.b32.xlu0 %v2486_v8, %s2574_s20 }
 0x1fb   : > { %2482 = vrot.lane.b32.xlu1 %v2481_v30, %s2574_s20 }
 0x1fd   : > { %1624 = vrot.lane.b32.xlu0 %v762_v12, %s2576_s28 }
 0x1ff   : > { %2492 = vrot.lane.b32.xlu1 %v2491_v52, %s2576_s28 }
 0x203   : > { %1686 = vperm.xlu1 %2496, %v1683_v50  }
 0x215   : > { %v2263_v13 = vpop.permute.xlu1 %2262 }
 0x216   : > { %v2265_v15 = vunpack.i.h.bf16 %v2263_v13  ;;  %v2264_v11 = vunpack.i.l.bf16 %v2263_v13 }
 0x218   : > { %v1553_v7 = vsel %vm1552_vm10, %v2264_v11, %v2254_v18  ;;  %v1555_v63 = vsel %vm1552_vm10, %v2265_v15, %v2259_v43 }
 0x219   : > { %v2273_v55 = vpop.permute.xlu1 %2272  ;;  %v1665_v33 = vpack.c.bf16 %v1555_v63, %v1553_v7 }
 0x21a   : > { %v2275_v19 = vunpack.i.h.bf16 %v2273_v55  ;;  %v2274_v54 = vunpack.i.l.bf16 %v2273_v55 }
 0x21b   : > { %1755 = vmatpush1.bf16.msra.mxu0 %v1665_v33  ;;  %v2288_v58 = vpop.permute.xlu0 %2287 }
 0x21c   : > { %v2290_v27 = vunpack.i.h.bf16 %v2288_v58  ;;  %v2289_v9 = vunpack.i.l.bf16 %v2288_v58  ;;  %v1392_v48 = vsel %vm1388_vm7, %v2274_v54, %v2275_v19  ;;  %v1391_v29 = vsel %vm1388_vm7, %v2280_v25, %v2274_v54 }
 0x21d   : > { %v2283_v36 = vpop.permute.xlu1 %2282  ;;  %v1650_v14 = vpack.c.bf16 %v1392_v48, %v1390_v1  ;;  %v1649_v39 = vpack.c.bf16 %v1391_v29, %v1389_v56 }
 0x21e   : > { %v2285_v51 = vunpack.i.h.bf16 %v2283_v36  ;;  %v2284_v5 = vunpack.i.l.bf16 %v2283_v36  ;;  %v1560_v17 = vsel %vm1552_vm10, %v2289_v9, %v2290_v27 }
 0x21f   : > { %v2298_v28 = vpop.permute.xlu0 %2297  ;;  %1729 = vmatprep.subr.bf16.mxu1 %v1650_v14 }
 0x220   : > { %1730 = vmatpush1.bf16.msra.mxu1 %v1649_v39  ;;  %v1558_v53 = vsel %vm1552_vm10, %v2284_v5, %v2285_v51  ;;  %v2300_v34 = vunpack.i.h.bf16 %v2298_v28  ;;  %v2299_v43 = vunpack.i.l.bf16 %v2298_v28 }
 0x221   : > { %v2293_v49 = vpop.permute.xlu1 %2292  ;;  %v1668_v20 = vpack.c.bf16 %v1560_v17, %v1558_v53 }
 0x222   : > { %v2295_v35 = vunpack.i.h.bf16 %v2293_v49  ;;  %v2294_v26 = vunpack.i.l.bf16 %v2293_v49  ;;  %v1394_v60 = vsel %vm1388_vm7, %v2299_v43, %v2300_v34 }
 0x223   : > { %v2308_v45 = vpop.permute.xlu0 %2307  ;;  %1756 = vmatprep.subr.bf16.mxu0 %v1668_v20 }
 0x224   : > { %v2309_v37 = vunpack.i.l.bf16 %v2308_v45  ;;  %v1557_v47 = vsel %vm1552_vm10, %v2294_v26, %v2284_v5  ;;  %v1559_v32 = vsel %vm1552_vm10, %v2295_v35, %v2289_v9  ;;  %v2310_v42 = vunpack.i.h.bf16 %v2308_v45 }
 0x225   : > { %v2303_v41 = vpop.permute.xlu1 %2302  ;;  %v1667_v44 = vpack.c.bf16 %v1559_v32, %v1557_v47 }
 0x226   : > { %v2305_v0 = vunpack.i.h.bf16 %v2303_v41  ;;  %v2304_v18 = vunpack.i.l.bf16 %v2303_v41  ;;  %v1393_v38 = vsel %vm1388_vm7, %v2309_v37, %v2299_v43 }
 0x227   : > { %v2318_v21 = vpop.permute.xlu0 %2317  ;;  %1757 = vmatpush1.bf16.msra.mxu0 %v1667_v44 }
 0x228   : > { %v2320_v57 = vunpack.i.h.bf16 %v2318_v21  ;;  %v2319_v23 = vunpack.i.l.bf16 %v2318_v21  ;;  %v1396_v30 = vsel %vm1388_vm7, %v2304_v18, %v2305_v0  ;;  %v1395_v8 = vsel %vm1388_vm7, %v2310_v42, %v2304_v18 }
 0x229   : > { %v2313_v62 = vpop.permute.xlu1 %2312  ;;  %v1652_v22 = vpack.c.bf16 %v1396_v30, %v1394_v60  ;;  %v1651_v40 = vpack.c.bf16 %v1395_v8, %v1393_v38 }
 0x22a   : > { %v2315_v31 = vunpack.i.h.bf16 %v2313_v62  ;;  %v2314_v6 = vunpack.i.l.bf16 %v2313_v62  ;;  %v1564_v4 = vsel %vm1552_vm10, %v2319_v23, %v2320_v57 }
 0x22b   : > { %v2328_v61 = vpop.permute.xlu0 %2327  ;;  %1731 = vmatprep.subr.bf16.mxu1 %v1652_v22 }
 0x22c   : > { %1732 = vmatpush1.bf16.msra.mxu1 %v1651_v40  ;;  %v1562_v12 = vsel %vm1552_vm10, %v2314_v6, %v2315_v31  ;;  %v2330_v13 = vunpack.i.h.bf16 %v2328_v61  ;;  %v2329_v15 = vunpack.i.l.bf16 %v2328_v61 }
 0x22d   : > { %v2323_v52 = vpop.permute.xlu1 %2322  ;;  %v1670_v50 = vpack.c.bf16 %v1564_v4, %v1562_v12 }
 0x22e   : > { %v2325_v59 = vunpack.i.h.bf16 %v2323_v52  ;;  %v2324_v2 = vunpack.i.l.bf16 %v2323_v52  ;;  %v1398_v54 = vsel %vm1388_vm7, %v2329_v15, %v2330_v13 }
 0x22f   : > { %v2338_v11 = vpop.permute.xlu0 %2337  ;;  %1758 = vmatprep.subr.bf16.mxu0 %v1670_v50 }
 0x230   : > { %v2339_v24 = vunpack.i.l.bf16 %v2338_v11  ;;  %v1561_v3 = vsel %vm1552_vm10, %v2324_v2, %v2314_v6  ;;  %v1563_v10 = vsel %vm1552_vm10, %v2325_v59, %v2319_v23  ;;  %v2340_v55 = vunpack.i.h.bf16 %v2338_v11 }
 0x231   : > { %v2333_v7 = vpop.permute.xlu1 %2332  ;;  %v1669_v63 = vpack.c.bf16 %v1563_v10, %v1561_v3 }
 0x232   : > { %v2335_v33 = vunpack.i.h.bf16 %v2333_v7  ;;  %v2334_v25 = vunpack.i.l.bf16 %v2333_v7  ;;  %v1397_v58 = vsel %vm1388_vm7, %v2339_v24, %v2329_v15 }
 0x233   : > { %v2348_v19 = vpop.permute.xlu0 %2347  ;;  %1759 = vmatpush1.bf16.msra.mxu0 %v1669_v63 }
 0x234   : > { %v2350_v1 = vunpack.i.h.bf16 %v2348_v19  ;;  %v2349_v56 = vunpack.i.l.bf16 %v2348_v19  ;;  %v1400_v27 = vsel %vm1388_vm7, %v2334_v25, %v2335_v33  ;;  %v1399_v9 = vsel %vm1388_vm7, %v2340_v55, %v2334_v25 }
 0x235   : > { %v2343_v48 = vpop.permute.xlu1 %2342  ;;  %v1654_v29 = vpack.c.bf16 %v1400_v27, %v1398_v54  ;;  %v1653_v36 = vpack.c.bf16 %v1399_v9, %v1397_v58 }
 0x236   : > { %v2345_v14 = vunpack.i.h.bf16 %v2343_v48  ;;  %v2344_v39 = vunpack.i.l.bf16 %v2343_v48  ;;  %v1568_v28 = vsel %vm1552_vm10, %v2349_v56, %v2350_v1 }
 0x237   : > { %v2358_v51 = vpop.permute.xlu0 %2357  ;;  %1733 = vmatprep.subr.bf16.mxu1 %v1654_v29 }
 0x238   : > { %1734 = vmatpush1.bf16.msra.mxu1 %v1653_v36  ;;  %v1566_v5 = vsel %vm1552_vm10, %v2344_v39, %v2345_v14  ;;  %v2360_v35 = vunpack.i.h.bf16 %v2358_v51  ;;  %v2359_v26 = vunpack.i.l.bf16 %v2358_v51 }
 0x239   : > { %v2353_v53 = vpop.permute.xlu1 %2352  ;;  %v1672_v17 = vpack.c.bf16 %v1568_v28, %v1566_v5 }
 0x23a   : > { %v2355_v49 = vunpack.i.h.bf16 %v2353_v53  ;;  %v2354_v20 = vunpack.i.l.bf16 %v2353_v53  ;;  %v1402_v18 = vsel %vm1388_vm7, %v2359_v26, %v2360_v35 }
 0x23b   : > { %v2368_v34 = vpop.permute.xlu0 %2367  ;;  %1760 = vmatprep.subr.bf16.mxu0 %v1672_v17 }
 0x23c   : > { %v2369_v43 = vunpack.i.l.bf16 %v2368_v34  ;;  %v1565_v45 = vsel %vm1552_vm10, %v2354_v20, %v2344_v39  ;;  %v1567_v37 = vsel %vm1552_vm10, %v2355_v49, %v2349_v56  ;;  %v2370_v41 = vunpack.i.h.bf16 %v2368_v34 }
 0x23d   : > { %v2363_v47 = vpop.permute.xlu1 %2362  ;;  %v1671_v32 = vpack.c.bf16 %v1567_v37, %v1565_v45 }
 0x23e   : > { %v2365_v44 = vunpack.i.h.bf16 %v2363_v47  ;;  %v2364_v42 = vunpack.i.l.bf16 %v2363_v47  ;;  %v1401_v21 = vsel %vm1388_vm7, %v2369_v43, %v2359_v26 }
 0x23f   : > { %v2378_v0 = vpop.permute.xlu0 %2377  ;;  %1761 = vmatpush1.bf16.msra.mxu0 %v1671_v32 }
 0x240   : > { %v2380_v60 = vunpack.i.h.bf16 %v2378_v0  ;;  %v2379_v38 = vunpack.i.l.bf16 %v2378_v0  ;;  %v1404_v57 = vsel %vm1388_vm7, %v2364_v42, %v2365_v44  ;;  %v1403_v23 = vsel %vm1388_vm7, %v2370_v41, %v2364_v42 }
 0x241   : > { %v2373_v30 = vpop.permute.xlu1 %2372  ;;  %v1656_v8 = vpack.c.bf16 %v1404_v57, %v1402_v18  ;;  %v1655_v62 = vpack.c.bf16 %v1403_v23, %v1401_v21 }
 0x242   : > { %v2375_v22 = vunpack.i.h.bf16 %v2373_v30  ;;  %v2374_v40 = vunpack.i.l.bf16 %v2373_v30  ;;  %v1572_v61 = vsel %vm1552_vm10, %v2379_v38, %v2380_v60 }
 0x243   : > { %v2388_v31 = vpop.permute.xlu0 %2387  ;;  %1735 = vmatprep.subr.bf16.mxu1 %v1656_v8 }
 0x244   : > { %1736 = vmatpush1.bf16.msra.mxu1 %v1655_v62  ;;  %v1570_v6 = vsel %vm1552_vm10, %v2374_v40, %v2375_v22  ;;  %v2390_v59 = vunpack.i.h.bf16 %v2388_v31  ;;  %v2389_v2 = vunpack.i.l.bf16 %v2388_v31 }
 0x245   : > { %v2383_v12 = vpop.permute.xlu1 %2382  ;;  %v1674_v4 = vpack.c.bf16 %v1572_v61, %v1570_v6 }
 0x246   : > { %v2385_v52 = vunpack.i.h.bf16 %v2383_v12  ;;  %v2384_v50 = vunpack.i.l.bf16 %v2383_v12  ;;  %v1406_v25 = vsel %vm1388_vm7, %v2389_v2, %v2390_v59 }
 0x247   : > { %v2398_v13 = vpop.permute.xlu0 %2397  ;;  %1762 = vmatprep.subr.bf16.mxu0 %v1674_v4 }
 0x248   : > { %v2399_v15 = vunpack.i.l.bf16 %v2398_v13  ;;  %v1569_v11 = vsel %vm1552_vm10, %v2384_v50, %v2374_v40  ;;  %v1571_v24 = vsel %vm1552_vm10, %v2385_v52, %v2379_v38  ;;  %v2400_v7 = vunpack.i.h.bf16 %v2398_v13 }
 0x249   : > { %v2393_v3 = vpop.permute.xlu1 %2392  ;;  %v1673_v10 = vpack.c.bf16 %v1571_v24, %v1569_v11 }
 0x24a   : > { %v2395_v63 = vunpack.i.h.bf16 %v2393_v3  ;;  %v2394_v55 = vunpack.i.l.bf16 %v2393_v3  ;;  %v1405_v19 = vsel %vm1388_vm7, %v2399_v15, %v2389_v2 }
 0x24b   : > { %v2408_v33 = vpop.permute.xlu0 %2407  ;;  %1763 = vmatpush1.bf16.msra.mxu0 %v1673_v10 }
 0x24c   : > { %v2410_v54 = vunpack.i.h.bf16 %v2408_v33  ;;  %v2409_v58 = vunpack.i.l.bf16 %v2408_v33  ;;  %v1408_v1 = vsel %vm1388_vm7, %v2394_v55, %v2395_v63  ;;  %v1407_v56 = vsel %vm1388_vm7, %v2400_v7, %v2394_v55 }
 0x24d   : > { %v2403_v27 = vpop.permute.xlu1 %2402  ;;  %v1658_v9 = vpack.c.bf16 %v1408_v1, %v1406_v25  ;;  %v1657_v48 = vpack.c.bf16 %v1407_v56, %v1405_v19 }
 0x24e   : > { %v2405_v29 = vunpack.i.h.bf16 %v2403_v27  ;;  %v2404_v36 = vunpack.i.l.bf16 %v2403_v27  ;;  %v1576_v51 = vsel %vm1552_vm10, %v2409_v58, %v2410_v54 }
 0x24f   : > { %v2418_v14 = vpop.permute.xlu0 %2417  ;;  %1737 = vmatprep.subr.bf16.mxu1 %v1658_v9 }
 0x250   : > { %1738 = vmatpush1.bf16.msra.mxu1 %v1657_v48  ;;  %v1574_v39 = vsel %vm1552_vm10, %v2404_v36, %v2405_v29  ;;  %v2420_v49 = vunpack.i.h.bf16 %v2418_v14  ;;  %v2419_v20 = vunpack.i.l.bf16 %v2418_v14 }
 0x251   : > { %v2413_v5 = vpop.permute.xlu1 %2412  ;;  %v1676_v28 = vpack.c.bf16 %v1576_v51, %v1574_v39 }
 0x252   : > { %v2415_v53 = vunpack.i.h.bf16 %v2413_v5  ;;  %v2414_v17 = vunpack.i.l.bf16 %v2413_v5  ;;  %v1410_v42 = vsel %vm1388_vm7, %v2419_v20, %v2420_v49 }
 0x253   : > { %v2428_v35 = vpop.permute.xlu0 %2427  ;;  %1764 = vmatprep.subr.bf16.mxu0 %v1676_v28 }
 0x254   : > { %v2429_v26 = vunpack.i.l.bf16 %v2428_v35  ;;  %v1573_v34 = vsel %vm1552_vm10, %v2414_v17, %v2404_v36  ;;  %v1575_v43 = vsel %vm1552_vm10, %v2415_v53, %v2409_v58  ;;  %v2430_v47 = vunpack.i.h.bf16 %v2428_v35 }
 0x255   : > { %v2423_v45 = vpop.permute.xlu1 %2422  ;;  %v1675_v37 = vpack.c.bf16 %v1575_v43, %v1573_v34 }
 0x256   : > { %v2425_v32 = vunpack.i.h.bf16 %v2423_v45  ;;  %v2424_v41 = vunpack.i.l.bf16 %v2423_v45  ;;  %v1409_v0 = vsel %vm1388_vm7, %v2429_v26, %v2419_v20 }
 0x257   : > { %v2438_v44 = vpop.permute.xlu0 %2437  ;;  %1765 = vmatpush1.bf16.msra.mxu0 %v1675_v37 }
 0x258   : > { %v2440_v18 = vunpack.i.h.bf16 %v2438_v44  ;;  %v2439_v21 = vunpack.i.l.bf16 %v2438_v44  ;;  %v1412_v60 = vsel %vm1388_vm7, %v2424_v41, %v2425_v32  ;;  %v1411_v38 = vsel %vm1388_vm7, %v2430_v47, %v2424_v41 }
 0x259   : > { %v2433_v57 = vpop.permute.xlu1 %2432  ;;  %v1660_v23 = vpack.c.bf16 %v1412_v60, %v1410_v42  ;;  %v1659_v30 = vpack.c.bf16 %v1411_v38, %v1409_v0 }
 0x25a   : > { %v2435_v8 = vunpack.i.h.bf16 %v2433_v57  ;;  %v2434_v62 = vunpack.i.l.bf16 %v2433_v57  ;;  %v1580_v22 = vsel %vm1552_vm10, %v2439_v21, %v2440_v18 }
 0x25b   : > { %v2448_v40 = vpop.permute.xlu0 %2447  ;;  %1739 = vmatprep.subr.bf16.mxu1 %v1660_v23  ;;  %v1865_v23 = vcombine.low %v3569_v46, %v3569_v46 }
 0x25c   : > { %1740 = vmatpush1.bf16.msra.mxu1 %v1659_v30  ;;  %v1578_v31 = vsel %vm1552_vm10, %v2434_v62, %v2435_v8  ;;  %v2450_v52 = vunpack.i.h.bf16 %v2448_v40  ;;  %v2449_v50 = vunpack.i.l.bf16 %v2448_v40 }
 0x25d   : > { %v2443_v6 = vpop.permute.xlu1 %2442  ;;  %v1678_v61 = vpack.c.bf16 %v1580_v22, %v1578_v31  ;;  %v1867_v31 = vcombine.low %v3583_v16, %v3583_v16 }
 0x25e   : > { %v2445_v12 = vunpack.i.h.bf16 %v2443_v6  ;;  %v2444_v4 = vunpack.i.l.bf16 %v2443_v6  ;;  %v1414_v55 = vsel %vm1388_vm7, %v2449_v50, %v2450_v52 }
 0x25f   : > { %v2458_v59 = vpop.permute.xlu0 %2457  ;;  %1766 = vmatprep.subr.bf16.mxu0 %v1678_v61 }
 0x260   : > { %v2459_v2 = vunpack.i.l.bf16 %v2458_v59  ;;  %v1577_v13 = vsel %vm1552_vm10, %v2444_v4, %v2434_v62  ;;  %v1579_v15 = vsel %vm1552_vm10, %v2445_v12, %v2439_v21  ;;  %v2460_v3 = vunpack.i.h.bf16 %v2458_v59 }
 0x261   : > { %v2453_v11 = vpop.permute.xlu1 %2452  ;;  %v1677_v24 = vpack.c.bf16 %v1579_v15, %v1577_v13 }
 0x262   : > { %v2455_v10 = vunpack.i.h.bf16 %v2453_v11  ;;  %v2454_v7 = vunpack.i.l.bf16 %v2453_v11  ;;  %v1413_v33 = vsel %vm1388_vm7, %v2459_v2, %v2449_v50 }
 0x263   : > { %v2468_v63 = vpop.permute.xlu0 %2467  ;;  %1767 = vmatpush1.bf16.msra.mxu0 %v1677_v24 }
 0x264   : > { %v2470_v25 = vunpack.i.h.bf16 %v2468_v63  ;;  %v2469_v19 = vunpack.i.l.bf16 %v2468_v63  ;;  %v1416_v54 = vsel %vm1388_vm7, %v2454_v7, %v2455_v10  ;;  %v1415_v58 = vsel %vm1388_vm7, %v2460_v3, %v2454_v7 }
 0x265   : > { %v2463_v1 = vpop.permute.xlu1 %2462  ;;  %v1662_v56 = vpack.c.bf16 %v1416_v54, %v1414_v55  ;;  %v1661_v27 = vpack.c.bf16 %v1415_v58, %v1413_v33 }
 0x266   : > { %v2465_v9 = vunpack.i.h.bf16 %v2463_v1  ;;  %v2464_v48 = vunpack.i.l.bf16 %v2463_v1  ;;  %v1584_v14 = vsel %vm1552_vm10, %v2469_v19, %v2470_v25 }
 0x267   : > { %v2478_v29 = vpop.permute.xlu0 %2477  ;;  %1741 = vmatprep.subr.bf16.mxu1 %v1662_v56 }
 0x268   : > { %1742 = vmatpush1.bf16.msra.mxu1 %v1661_v27  ;;  %v1582_v36 = vsel %vm1552_vm10, %v2464_v48, %v2465_v9  ;;  %v2480_v53 = vunpack.i.h.bf16 %v2478_v29  ;;  %v2479_v49 = vunpack.i.l.bf16 %v2478_v29 }
 0x269   : > { %v2473_v39 = vpop.permute.xlu1 %2472  ;;  %v1680_v51 = vpack.c.bf16 %v1584_v14, %v1582_v36 }
 0x26a   : > { %v2475_v5 = vunpack.i.h.bf16 %v2473_v39  ;;  %v2474_v28 = vunpack.i.l.bf16 %v2473_v39  ;;  %v1418_v32 = vsel %vm1388_vm7, %v2479_v49, %v2480_v53 }
 0x26b   : > { %v2488_v17 = vpop.permute.xlu0 %2487  ;;  %1768 = vmatprep.subr.bf16.mxu0 %v1680_v51 }
 0x26c   : > { %v2489_v20 = vunpack.i.l.bf16 %v2488_v17  ;;  %v1581_v35 = vsel %vm1552_vm10, %v2474_v28, %v2464_v48  ;;  %v1583_v26 = vsel %vm1552_vm10, %v2475_v5, %v2469_v19  ;;  %v2490_v45 = vunpack.i.h.bf16 %v2488_v17 }
 0x26d   : > { %v2483_v34 = vpop.permute.xlu1 %2482  ;;  %v1679_v43 = vpack.c.bf16 %v1583_v26, %v1581_v35 }
 0x26e   : > { %v2485_v37 = vunpack.i.h.bf16 %v2483_v34  ;;  %v2484_v47 = vunpack.i.l.bf16 %v2483_v34  ;;  %v1417_v44 = vsel %vm1388_vm7, %v2489_v20, %v2479_v49 }
 0x26f   : > { %1769 = vmatpush1.bf16.msra.mxu0 %v1679_v43  ;;  %v1625_v57 = vpop.permute.xlu0 %1624 }
 0x270   : > { %v1420_v41 = vsel %vm1388_vm7, %v2484_v47, %v2485_v37  ;;  %v1419_v42 = vsel %vm1388_vm7, %v2490_v45, %v2484_v47 }
 0x271   : > { %v2493_v0 = vpop.permute.xlu1 %2492  ;;  %v1664_v18 = vpack.c.bf16 %v1420_v41, %v1418_v32  ;;  %v1663_v21 = vpack.c.bf16 %v1419_v42, %v1417_v44 }
 0x272   : > { %v2495_v60 = vunpack.i.h.bf16 %v2493_v0  ;;  %v2494_v38 = vunpack.i.l.bf16 %v2493_v0 }
 0x273   : > { %1743 = vmatprep.subr.bf16.mxu1 %v1664_v18 }
 0x274   : > { %v1628_v30 = vsel %vm1626_vm8, %v2495_v60, %v1625_v57  ;;  %1744 = vmatpush1.bf16.msra.mxu1 %v1663_v21  ;;  %v1627_v8 = vsel %vm1626_vm8, %v2494_v38, %v2495_v60 }
 0x275   : > { %v1682_v62 = vpack.c.bf16 %v1628_v30, %v1628_v30  ;;  %v1681_v22 = vpack.c.bf16 %v1627_v8, %v1627_v8 }
 0x277   : > { %1746 = vmatmul.mubr.bf16.vlgmr.msra.gmra.mrb[0].mxu1 %v1865_v23  ;;  %1869 = vmatprep.subr.msk.bf16.mxu0 %vm1706_vm0, %v1682_v62  ;;  %v1708_v40 = vsel %vm1706_vm0, %v1681_v22, 0 }
 0x278   : > { %1771 = vmatpush1.bf16.msra.mxu0 %v1708_v40 }
 0x27b   : > { %1787 = vmatmul.mubr.bf16.vlgmr.msra.gmra.mrb[0].mxu0 %v1867_v31 }
 0x282   : > { %v1687_v6 = vpop.permute.xlu1 %1686 }
 0x34a   : > { %v1747_v61 = vpop.f32.mrb[0].mxu1 }
 0x34b   : > { %v1749_v12 = vpop.f32.mrb[1].mxu1  ;;  %v1748_v4 = vadd.f32 %v1747_v61, %v1687_v6 }
 0x34c   : > { %v1750_v46 = vadd.f32 %v1749_v12, %v1687_v6  ;;  %v1751_v52 = vpop.f32.mrb[2].mxu1 }
 0x34d   : > { %v1752_v50 = vpop.f32.mrb[3].mxu1 }
 0x34e   : > { %v1788_v59 = vpop.f32.mrb[0].mxu0 }
 0x34f   : > { %v1789_v2 = vadd.f32 %v1788_v59, %v1748_v4  ;;  %v1790_v13 = vpop.f32.mrb[1].mxu0 }
 0x350   : > { %v1791_v15 = vadd.f32 %v1790_v13, %v1750_v46  ;;  %v1792_v11 = vpop.f32.mrb[2].mxu0 }
 0x351   : > { %1795 = vst [vmem:[%s197_s7] sm:$0xff] %v1789_v2  ;;  %v1793_v16 = vpop.f32.mrb[3].mxu0 }
 0x352   : > { %1796 = vst [vmem:[%s197_s7 + $0x8] sm:$0xff] %v1791_v15 }
 0x353 PF: > { %s14_s15 = sadd.s32 1, %s2511_s15  }
 0x354   : > { %p11_p4 = scmp.ge.s32.totalorder %s14_s15, 4  }
 0x356   :  { %13 = sbr.rel (!%p11_p4) target bundleno = 1 (0x1), region = 71 }

// kernel: vae_forward.35
= control target key start
LH: loop header
LB: loop body
LE: loop exit
PB: predicated region body
PF: predicated region fallthrough
CT: control target
= control target key end

     0   :  { %s348_s12 = smov 0   ;;  %s371_s0 = inlined_call_operand.vmem [shape: f32[2,32,64], index: 0, kind: input, shape index: {}]   ;;  %s372_s1 = inlined_call_operand.vmem [shape: bf16[8,32], index: 1, kind: input, shape index: {}]   ;;  %s373_s2 = inlined_call_operand.vmem [shape: f32[8,1], index: 2, kind: input, shape index: {}]   ;;  %s374_s3 = inlined_call_operand.vmem [shape: f32[2,8,64], index: 3, kind: output, shape index: {}]  }
   0x1 LB: > { %s282_s13 = sadd.s32 4294967295, %s323_s12   ;;  %p286_p0 = scmp.ge.s32.totalorder %s323_s12, 1  ;;  %s323_s12 = sphi %s348_s12, %s13_s12  }
   0x2   : > { %p137_p1 = scmp.lt.s32.totalorder %s323_s12, 3 }
   0x4   : > { %p138_p2 = pnand %p286_p0, %p137_p1 }
   0x5   : > { %p160_p3 = scmp.lt.s32.totalorder (!%p138_p2), %s282_s13, 1  ;;  %v325_v0 = vmov (!%p138_p2), 0.0   ;;  %vm326_vm0 = vmmov (!%p138_p2), 0   ;;  %v177_v1 = vld [vmem:[%s373_s2] sm:$0xff] (!%p138_p2)  ;;  %v327_v2 = vmov (!%p138_p2), 0   ;;  %vm183_vm1 = vcmask (!%p138_p2), 261120  }
   0x6   : > { %141 = sbr.rel (%p138_p2) target bundleno = 241 (0xf1), region = 32  ;;  %297 = vmatprep.subr.bf16.mxu0 (!%p138_p2), %v325_v0  ;;  %301 = vmatprep.mubr.msk.bf16.mxu0 (!%p138_p2), %vm326_vm0, %v325_v0  ;;  %v174_v9 = vld [vmem:[%s372_s1] sm:$0xf] (!%p138_p2)  ;;  %vm227_vm2 = vcmask (!%p138_p2), 523264  }
   0x7   : > { %316 = vset.pattern.permute.xlu0 (!%p138_p2), %v327_v2 }
   0x8   : > { %180 = vperm.xlu0 (!%p138_p2), %316, %v177_v1  }
   0xd   : > { %s376_s13 = smov (!%p160_p3, %s282_s13), 1 }
   0xe   : > { %s293_s16 = sshll.u32 %s376_s13, 5  ;;  %s289_s22 = sshll.u32 %s376_s13, 3 }
   0xf   : > { %s164_s19 = scalar_lea.vmem %s371_s0, %s293_s16  ;;  %s168_s25 = scalar_lea.vmem %s374_s3, %s289_s22 }
  0x10   : > { %v170_v3 = vld [vmem:[%s164_s19] sm:$0xff]  ;;  %v171_v4 = vld [vmem:[%s164_s19 + $0x8] sm:$0xff]  ;;  %v172_v5 = vld [vmem:[%s164_s19 + $0x10] sm:$0xff] }
  0x11   : > { %v175_v6 = vpack.c.bf16 %v171_v4, %v170_v3  ;;  %v173_v7 = vld [vmem:[%s164_s19 + $0x18] sm:$0xff] }
  0x12   : > { %v176_v8 = vpack.c.bf16 %v173_v7, %v172_v5 }
  0x13   : > { %298 = vmatpush3.bf16.msra.mxu0 %v175_v6 }
  0x14   : > { %299 = vmatprep.subr.bf16.mxu0 %v325_v0 }
  0x17   : > { %300 = vmatpush3.bf16.msra.mxu0 %v176_v8 }
  0x1a   : > { %302 = vmatmul.mubr.msk.bf16.vlgmr.msra.gmra.mrb[0].mxu0 %vm183_vm1, %v174_v9 }
  0x87   : > { %v181_v10 = vpop.permute.xlu0 %180 }
  0xed   : > { %v221_v11 = vpop.f32.mrb[0].mxu0 }
  0xee   : > { %v222_v12 = vadd.f32 %v221_v11, %v181_v10  ;;  %v303_v13 = vpop.f32.mrb[1].mxu0 }
  0xef   : > { %v224_v14 = vpop.f32.mrb[2].mxu0 }
  0xf0   : > { %228 = vst.msk [vmem:[%s168_s25] sm:$0xff] %vm227_vm2, %v222_v12  ;;  %v304_v15 = vpop.f32.mrb[3].mxu0 }
  0xf1 PF: > { %s13_s12 = sadd.s32 1, %s323_s12  }
  0xf2   : > { %p10_p4 = scmp.ge.s32.totalorder %s13_s12, 4  }
  0xf4   :  { %12 = sbr.rel (!%p10_p4) target bundleno = 1 (0x1), region = 62 }

// kernel: vae_forward.36
= control target key start
LH: loop header
LB: loop body
LE: loop exit
PB: predicated region body
PF: predicated region fallthrough
CT: control target
= control target key end

     0   :  { %s545_s18 = smov 0   ;;  %s586_s0 = inlined_call_operand.vmem [shape: f32[2,8,82], index: 0, kind: input, shape index: {}]   ;;  %s587_s1 = inlined_call_operand.vmem [shape: bf16[8,72], index: 1, kind: input, shape index: {}]   ;;  %s588_s2 = inlined_call_operand.vmem [shape: f32[8,1], index: 2, kind: input, shape index: {}]   ;;  %s589_s3 = inlined_call_operand.vmem [shape: f32[3,64], index: 3, kind: input, shape index: {}]   ;;  %s590_s4 = inlined_call_operand.vmem [shape: f32[8,1], index: 4, kind: input, shape index: {}]   ;;  %s591_s5 = inlined_call_operand.vmem [shape: f32[2,8,64], index: 5, kind: output, shape index: {}]  }
   0x1 LB: > { %s426_s19 = sadd.s32 4294967295, %s497_s18   ;;  %p430_p0 = scmp.ge.s32.totalorder %s497_s18, 1  ;;  %s497_s18 = sphi %s545_s18, %s15_s18  }
   0x2   : > { %p186_p1 = scmp.lt.s32.totalorder %s497_s18, 3 }
   0x4   : > { %p187_p2 = pnand %p430_p0, %p186_p1 }
   0x5   : > { %v434_v0 = vld [vmem:[%s589_s3 + $0x2] ss:$0 sm:$0xff] (!%p187_p2)  ;;  %s499_s22 = smov (!%p187_p2), 2   ;;  %v433_v1 = vld [vmem:[%s589_s3] ss:$0 sm:$0xff] (!%p187_p2)  ;;  %s500_s25 = smov (!%p187_p2), 10  }
   0x6   : > { %190 = sbr.rel (%p187_p2) target bundleno = 534 (0x216), region = 40  ;;  %234 = vrot.lane.b32.xlu0 (!%p187_p2), %v434_v0, %s499_s22  ;;  %243 = vrot.lane.b32.xlu1 (!%p187_p2), %v434_v0, %s500_s25  ;;  %p212_p3 = scmp.lt.s32.totalorder (!%p187_p2), %s426_s19, 1  ;;  %v505_v3 = vmov (!%p187_p2), 0.0   ;;  %vm509_vm0 = vmmov (!%p187_p2), 0   ;;  %v512_v17 = vmov (!%p187_p2), 0   ;;  %v357_v18 = vld [vmem:[%s590_s4] sm:$0xff] (!%p187_p2) }
   0x7   : > { %s501_s26 = smov (!%p187_p2), 8   ;;  %s502_s27 = smov (!%p187_p2), 16   ;;  %445 = vmatprep.subr.bf16.mxu0 (!%p187_p2), %v505_v3  ;;  %455 = vmatprep.mubr.msk.bf16.mxu0 (!%p187_p2), %vm509_vm0, %v505_v3  ;;  %v358_v19 = vmul.f32 (!%p187_p2), 2.828427, %v357_v18  ;;  %v291_v20 = vld [vmem:[%s588_s2] sm:$0xff] (!%p187_p2)  ;;  %vm301_vm1 = vcmask (!%p187_p2), 1043456  }
   0x8   : > { %s503_s7 = smov (!%p187_p2), 18   ;;  %s504_s8 = smov (!%p187_p2), 127   ;;  %483 = vset.pattern.permute.xlu1 (!%p187_p2), %v512_v17  ;;  %484 = vset.pattern.permute.xlu0 (!%p187_p2), %v512_v17  ;;  %v285_v33 = vld [vmem:[%s587_s1] sm:$0xf] (!%p187_p2)  ;;  %vm297_vm2 = vcmask (!%p187_p2), 588800   ;;  %vm346_vm3 = vcmask (!%p187_p2), 523264  }
   0x9   : > { %s506_s9 = smov (!%p187_p2), 126   ;;  %s507_s10 = smov (!%p187_p2), 120  }
   0xa   : > { %239 = vrot.lane.b32.xlu0 (!%p187_p2), %v433_v1, %s501_s26  ;;  %247 = vrot.lane.b32.xlu1 (!%p187_p2), %v433_v1, %s502_s27  ;;  %s508_s11 = smov (!%p187_p2), 119   ;;  %s510_s12 = smov (!%p187_p2), 118  }
   0xb   : > { %s511_s13 = smov (!%p187_p2), 112   ;;  %s513_s16 = smov (!%p187_p2), 111  }
   0xc   : > { %s514_s17 = smov (!%p187_p2), 110  }
   0xd   : > { %s593_s19 = smov (!%p212_p3, %s426_s19), 1 }
   0xe   : > { %s431_s28 = sshll.u32 %s593_s19, 3  ;;  %251 = vrot.lane.b32.xlu0 %v434_v0, %s503_s7 }
   0xf   : > { %s215_s6 = scalar_lea.vmem %s586_s0, %s431_s28  ;;  %s219_s26 = scalar_lea.vmem %s591_s5, %s431_s28 }
  0x10   : > { %v221_v2 = vld [vmem:[%s215_s6] sm:$0xff] }
  0x11   : > { %256 = vrot.lane.b32.xlu1 %v221_v2, %s504_s8  ;;  %v227_v10 = vmul.f32 %v433_v1, %v221_v2 }
  0x78   : > { %v235_v4 = vpop.permute.xlu0 %234  ;;  %v244_v6 = vpop.permute.xlu1 %243 }
  0x79   : > { %v237_v5 = vmul.f32 %v235_v4, %v221_v2  ;;  %v246_v11 = vmul.f32 %v244_v6, %v221_v2 }
  0x7b   : > { %260 = vrot.lane.b32.xlu0 %v237_v5, %s506_s9 }
  0x7c   : > { %v240_v7 = vpop.permute.xlu0 %239  ;;  %v248_v9 = vpop.permute.xlu1 %247 }
  0x7d   : > { %v242_v8 = vmul.f32 %v240_v7, %v221_v2  ;;  %v250_v12 = vmul.f32 %v248_v9, %v221_v2 }
  0x7f   : > { %264 = vrot.lane.b32.xlu1 %v242_v8, %s507_s10  ;;  %267 = vrot.lane.b32.xlu0 %v221_v2, %s508_s11 }
  0x80   : > { %v252_v13 = vpop.permute.xlu0 %251 }
  0x81   : > { %v254_v16 = vmul.f32 %v252_v13, %v221_v2 }
  0x83   : > { %v257_v14 = vpop.permute.xlu1 %256  ;;  %271 = vrot.lane.b32.xlu1 %v246_v11, %s510_s12  ;;  %275 = vrot.lane.b32.xlu0 %v250_v12, %s511_s13 }
  0x84   : > { %v286_v15 = vpack.c.bf16 %v257_v14, %v227_v10 }
  0x86   : > { %446 = vmatpush3.bf16.msra.mxu0 %v286_v15 }
  0x87   : > { %447 = vmatprep.subr.bf16.mxu0 %v505_v3  ;;  %278 = vrot.lane.b32.xlu1 %v221_v2, %s513_s16 }
  0x88   : > { %282 = vrot.lane.b32.xlu0 %v254_v16, %s514_s17 }
  0x8b   : > { %294 = vperm.xlu1 %483, %v291_v20  }
  0x8c   : > { %361 = vperm.xlu0 %484, %v358_v19  }
  0xed   : > { %v261_v21 = vpop.permute.xlu0 %260 }
  0xf1   : > { %v265_v22 = vpop.permute.xlu1 %264  ;;  %v268_v23 = vpop.permute.xlu0 %267 }
  0xf2   : > { %v287_v24 = vpack.c.bf16 %v265_v22, %v261_v21 }
  0xf4   : > { %448 = vmatpush3.bf16.msra.mxu0 %v287_v24 }
  0xf5   : > { %v272_v25 = vpop.permute.xlu1 %271  ;;  %449 = vmatprep.subr.bf16.mxu0 %v505_v3  ;;  %v276_v26 = vpop.permute.xlu0 %275 }
  0xf6   : > { %v288_v27 = vpack.c.bf16 %v272_v25, %v268_v23 }
  0xf8   : > { %450 = vmatpush3.bf16.msra.mxu0 %v288_v27 }
  0xf9   : > { %v279_v28 = vpop.permute.xlu1 %278  ;;  %451 = vmatprep.subr.bf16.mxu0 %v505_v3 }
  0xfa   : > { %v283_v29 = vpop.permute.xlu0 %282  ;;  %v289_v30 = vpack.c.bf16 %v279_v28, %v276_v26 }
  0xfb   : > { %v290_v31 = vpack.c.bf16 %v283_v29, %v283_v29 }
  0xfc   : > { %452 = vmatpush3.bf16.msra.mxu0 %v289_v30 }
  0xfd   : > { %453 = vmatprep.subr.bf16.mxu0 %v505_v3  ;;  %v303_v32 = vsel %vm301_vm1, %v290_v31, 0 }
 0x100   : > { %454 = vmatpush3.bf16.msra.mxu0 %v303_v32 }
 0x103   : > { %456 = vmatmul.mubr.msk.bf16.vlgmr.msra.gmra.mrb[0].mxu0 %vm297_vm2, %v285_v33 }
 0x10a   : > { %v295_v34 = vpop.permute.xlu1 %294 }
 0x10b   : > { %v362_v50 = vpop.permute.xlu0 %361 }
 0x1d6   : > { %v339_v35 = vpop.f32.mrb[0].mxu0 }
 0x1d7   : > { %v340_v36 = vadd.f32 %v339_v35, %v295_v34  ;;  %v457_v37 = vpop.f32.mrb[1].mxu0 }
 0x1d8   : > { %v342_v38 = vpop.f32.mrb[2].mxu0 }
 0x1d9   : > { %v345_v39 = vmul.f32 %v340_v36, %v340_v36  ;;  %v458_v40 = vpop.f32.mrb[3].mxu0 }
 0x1db   : > { %v347_v41 = vsel %vm346_vm3, %v345_v39, 0.0 }
 0x1dc   : > { %v348_v42 = vrot.slane %v347_v41, 4 }
 0x1de   : > { %v349_v43 = vadd.f32 %v348_v42, %v347_v41 }
 0x1e0   : > { %v350_v44 = vrot.slane %v349_v43, 2 }
 0x1e2   : > { %v351_v45 = vadd.f32 %v350_v44, %v349_v43 }
 0x1e4   : > { %v352_v46 = vrot.slane %v351_v45, 1 }
 0x1e6   : > { %v353_v47 = vadd.f32 %v352_v46, %v351_v45 }
 0x1e8   : > { %v354_v48 = vmax.f32 %v353_v47, 1e-24 }
 0x1ea   : > { %485 = vrsqrt.f32 %v354_v48 }
 0x1f4   : > { %v486_v49 = vpop.eup %485 }
 0x1f5   : > { %v356_v51 = vmul.f32 %v486_v49, %v340_v36 }
 0x1f7   : > { %v364_v52 = vmul.f32 %v362_v50, %v356_v51 }
 0x1f9   : > { %v436_v53 = vmul.f32 -1.442695, %v364_v52 }
 0x1fb   : > { %487 = vpow2.f32 %v436_v53 }
 0x205   : > { %v488_v54 = vpop.eup %487 }
 0x206   : > { %v368_v55 = vadd.f32 1.0, %v488_v54 }
 0x208   : > { %489 = vrcp.f32 %v368_v55 }
 0x212   : > { %v490_v56 = vpop.eup %489 }
 0x213   : > { %v371_v57 = vmul.f32 %v490_v56, %v364_v52 }
 0x215   : > { %372 = vst.msk [vmem:[%s219_s26] sm:$0xff] %vm346_vm3, %v371_v57 }
 0x216 PF: > { %s15_s18 = sadd.s32 1, %s497_s18  }
 0x217   : > { %p12_p4 = scmp.ge.s32.totalorder %s15_s18, 4  }
 0x219   :  { %14 = sbr.rel (!%p12_p4) target bundleno = 1 (0x1), region = 70 }

// kernel: vae_forward.37
= control target key start
LH: loop header
LB: loop body
LE: loop exit
PB: predicated region body
PF: predicated region fallthrough
CT: control target
= control target key end

     0   :  { %s609_s21 = smov 0   ;;  %s651_s0 = inlined_call_operand.vmem [shape: f32[2,8,82], index: 0, kind: input, shape index: {}]   ;;  %s652_s1 = inlined_call_operand.vmem [shape: bf16[8,72], index: 1, kind: input, shape index: {}]   ;;  %s653_s2 = inlined_call_operand.vmem [shape: f32[8,1], index: 2, kind: input, shape index: {}]   ;;  %s654_s3 = inlined_call_operand.vmem [shape: f32[3,64], index: 3, kind: input, shape index: {}]   ;;  %s655_s4 = inlined_call_operand.vmem [shape: f32[8,1], index: 4, kind: input, shape index: {}]   ;;  %s656_s5 = inlined_call_operand.vmem [shape: f32[2,8,64], index: 5, kind: input, shape index: {}]   ;;  %s657_s6 = inlined_call_operand.vmem [shape: f32[2,8,64], index: 6, kind: output, shape index: {}]  }
   0x1 LB: > { %s484_s22 = sadd.s32 4294967295, %s556_s21   ;;  %p488_p0 = scmp.ge.s32.totalorder %s556_s21, 1  ;;  %s556_s21 = sphi %s609_s21, %s16_s21  }
   0x2   : > { %p220_p1 = scmp.lt.s32.totalorder %s556_s21, 3 }
   0x4   : > { %p221_p2 = pnand %p488_p0, %p220_p1 }
   0x5   : > { %v493_v0 = vld [vmem:[%s654_s3 + $0x2] ss:$0 sm:$0xff] (!%p221_p2)  ;;  %s558_s25 = smov (!%p221_p2), 2   ;;  %v492_v1 = vld [vmem:[%s654_s3] ss:$0 sm:$0xff] (!%p221_p2)  ;;  %s559_s28 = smov (!%p221_p2), 10  }
   0x6   : > { %224 = sbr.rel (%p221_p2) target bundleno = 536 (0x218), region = 44  ;;  %278 = vrot.lane.b32.xlu0 (!%p221_p2), %v493_v0, %s558_s25  ;;  %287 = vrot.lane.b32.xlu1 (!%p221_p2), %v493_v0, %s559_s28  ;;  %p252_p3 = scmp.lt.s32.totalorder (!%p221_p2), %s484_s22, 1  ;;  %v564_v3 = vmov (!%p221_p2), 0.0   ;;  %vm568_vm0 = vmmov (!%p221_p2), 0   ;;  %v571_v17 = vmov (!%p221_p2), 0   ;;  %v401_v18 = vld [vmem:[%s655_s4] sm:$0xff] (!%p221_p2) }
   0x7   : > { %s560_s29 = smov (!%p221_p2), 8   ;;  %s561_s30 = smov (!%p221_p2), 16   ;;  %504 = vmatprep.subr.bf16.mxu0 (!%p221_p2), %v564_v3  ;;  %514 = vmatprep.mubr.msk.bf16.mxu0 (!%p221_p2), %vm568_vm0, %v564_v3  ;;  %v402_v19 = vmul.f32 (!%p221_p2), 2.828427, %v401_v18  ;;  %v335_v20 = vld [vmem:[%s653_s2] sm:$0xff] (!%p221_p2)  ;;  %vm345_vm1 = vcmask (!%p221_p2), 1043456  }
   0x8   : > { %s562_s11 = smov (!%p221_p2), 18   ;;  %s563_s12 = smov (!%p221_p2), 127   ;;  %542 = vset.pattern.permute.xlu1 (!%p221_p2), %v571_v17  ;;  %543 = vset.pattern.permute.xlu0 (!%p221_p2), %v571_v17  ;;  %v329_v33 = vld [vmem:[%s652_s1] sm:$0xf] (!%p221_p2)  ;;  %vm341_vm2 = vcmask (!%p221_p2), 588800   ;;  %vm390_vm3 = vcmask (!%p221_p2), 523264  }
   0x9   : > { %s565_s13 = smov (!%p221_p2), 126   ;;  %s566_s14 = smov (!%p221_p2), 120  }
   0xa   : > { %283 = vrot.lane.b32.xlu0 (!%p221_p2), %v492_v1, %s560_s29  ;;  %291 = vrot.lane.b32.xlu1 (!%p221_p2), %v492_v1, %s561_s30  ;;  %s567_s15 = smov (!%p221_p2), 119   ;;  %s569_s16 = smov (!%p221_p2), 118  }
   0xb   : > { %s570_s17 = smov (!%p221_p2), 112   ;;  %s572_s20 = smov (!%p221_p2), 111  }
   0xd   : > { %s659_s22 = smov (!%p252_p3, %s484_s22), 1 }
   0xe   : > { %s623_s7 = sshll.u32 %s659_s22, 3  ;;  %295 = vrot.lane.b32.xlu0 %v493_v0, %s562_s11  ;;  %s573_s22 = smov 110  }
   0xf   : > { %s255_s10 = scalar_lea.vmem %s651_s0, %s623_s7  ;;  %s259_s29 = scalar_lea.vmem %s656_s5, %s623_s7 }
  0x10   : > { %v265_v2 = vld [vmem:[%s255_s10] sm:$0xff]  ;;  %s263_s9 = scalar_lea.vmem %s657_s6, %s623_s7 }
  0x11   : > { %300 = vrot.lane.b32.xlu1 %v265_v2, %s563_s12  ;;  %v271_v10 = vmul.f32 %v492_v1, %v265_v2  ;;  %v416_v57 = vld [vmem:[%s259_s29] sm:$0xff] }
  0x78   : > { %v279_v4 = vpop.permute.xlu0 %278  ;;  %v288_v6 = vpop.permute.xlu1 %287 }
  0x79   : > { %v281_v5 = vmul.f32 %v279_v4, %v265_v2  ;;  %v290_v11 = vmul.f32 %v288_v6, %v265_v2 }
  0x7b   : > { %304 = vrot.lane.b32.xlu0 %v281_v5, %s565_s13 }
  0x7c   : > { %v284_v7 = vpop.permute.xlu0 %283  ;;  %v292_v9 = vpop.permute.xlu1 %291 }
  0x7d   : > { %v286_v8 = vmul.f32 %v284_v7, %v265_v2  ;;  %v294_v12 = vmul.f32 %v292_v9, %v265_v2 }
  0x7f   : > { %308 = vrot.lane.b32.xlu1 %v286_v8, %s566_s14  ;;  %311 = vrot.lane.b32.xlu0 %v265_v2, %s567_s15 }
  0x80   : > { %v296_v13 = vpop.permute.xlu0 %295 }
  0x81   : > { %v298_v16 = vmul.f32 %v296_v13, %v265_v2 }
  0x83   : > { %v301_v14 = vpop.permute.xlu1 %300  ;;  %315 = vrot.lane.b32.xlu1 %v290_v11, %s569_s16  ;;  %319 = vrot.lane.b32.xlu0 %v294_v12, %s570_s17 }
  0x84   : > { %v330_v15 = vpack.c.bf16 %v301_v14, %v271_v10 }
  0x86   : > { %505 = vmatpush3.bf16.msra.mxu0 %v330_v15 }
  0x87   : > { %506 = vmatprep.subr.bf16.mxu0 %v564_v3  ;;  %322 = vrot.lane.b32.xlu1 %v265_v2, %s572_s20 }
  0x88   : > { %326 = vrot.lane.b32.xlu0 %v298_v16, %s573_s22 }
  0x8b   : > { %338 = vperm.xlu1 %542, %v335_v20  }
  0x8c   : > { %405 = vperm.xlu0 %543, %v402_v19  }
  0xed   : > { %v305_v21 = vpop.permute.xlu0 %304 }
  0xf1   : > { %v309_v22 = vpop.permute.xlu1 %308  ;;  %v312_v23 = vpop.permute.xlu0 %311 }
  0xf2   : > { %v331_v24 = vpack.c.bf16 %v309_v22, %v305_v21 }
  0xf4   : > { %507 = vmatpush3.bf16.msra.mxu0 %v331_v24 }
  0xf5   : > { %v316_v25 = vpop.permute.xlu1 %315  ;;  %508 = vmatprep.subr.bf16.mxu0 %v564_v3  ;;  %v320_v26 = vpop.permute.xlu0 %319 }
  0xf6   : > { %v332_v27 = vpack.c.bf16 %v316_v25, %v312_v23 }
  0xf8   : > { %509 = vmatpush3.bf16.msra.mxu0 %v332_v27 }
  0xf9   : > { %v323_v28 = vpop.permute.xlu1 %322  ;;  %510 = vmatprep.subr.bf16.mxu0 %v564_v3 }
  0xfa   : > { %v327_v29 = vpop.permute.xlu0 %326  ;;  %v333_v30 = vpack.c.bf16 %v323_v28, %v320_v26 }
  0xfb   : > { %v334_v31 = vpack.c.bf16 %v327_v29, %v327_v29 }
  0xfc   : > { %511 = vmatpush3.bf16.msra.mxu0 %v333_v30 }
  0xfd   : > { %512 = vmatprep.subr.bf16.mxu0 %v564_v3  ;;  %v347_v32 = vsel %vm345_vm1, %v334_v31, 0 }
 0x100   : > { %513 = vmatpush3.bf16.msra.mxu0 %v347_v32 }
 0x103   : > { %515 = vmatmul.mubr.msk.bf16.vlgmr.msra.gmra.mrb[0].mxu0 %vm341_vm2, %v329_v33 }
 0x10a   : > { %v339_v34 = vpop.permute.xlu1 %338 }
 0x10b   : > { %v406_v50 = vpop.permute.xlu0 %405 }
 0x1d6   : > { %v383_v35 = vpop.f32.mrb[0].mxu0 }
 0x1d7   : > { %v384_v36 = vadd.f32 %v383_v35, %v339_v34  ;;  %v516_v37 = vpop.f32.mrb[1].mxu0 }
 0x1d8   : > { %v386_v38 = vpop.f32.mrb[2].mxu0 }
 0x1d9   : > { %v389_v39 = vmul.f32 %v384_v36, %v384_v36  ;;  %v517_v40 = vpop.f32.mrb[3].mxu0 }
 0x1db   : > { %v391_v41 = vsel %vm390_vm3, %v389_v39, 0.0 }
 0x1dc   : > { %v392_v42 = vrot.slane %v391_v41, 4 }
 0x1de   : > { %v393_v43 = vadd.f32 %v392_v42, %v391_v41 }
 0x1e0   : > { %v394_v44 = vrot.slane %v393_v43, 2 }
 0x1e2   : > { %v395_v45 = vadd.f32 %v394_v44, %v393_v43 }
 0x1e4   : > { %v396_v46 = vrot.slane %v395_v45, 1 }
 0x1e6   : > { %v397_v47 = vadd.f32 %v396_v46, %v395_v45 }
 0x1e8   : > { %v398_v48 = vmax.f32 %v397_v47, 1e-24 }
 0x1ea   : > { %544 = vrsqrt.f32 %v398_v48 }
 0x1f4   : > { %v545_v49 = vpop.eup %544 }
 0x1f5   : > { %v400_v51 = vmul.f32 %v545_v49, %v384_v36 }
 0x1f7   : > { %v408_v52 = vmul.f32 %v406_v50, %v400_v51 }
 0x1f9   : > { %v495_v53 = vmul.f32 -1.442695, %v408_v52 }
 0x1fb   : > { %546 = vpow2.f32 %v495_v53 }
 0x205   : > { %v547_v54 = vpop.eup %546 }
 0x206   : > { %v412_v55 = vadd.f32 1.0, %v547_v54 }
 0x208   : > { %548 = vrcp.f32 %v412_v55 }
 0x212   : > { %v549_v56 = vpop.eup %548 }
 0x213   : > { %v415_v58 = vmul.f32 %v549_v56, %v408_v52 }
 0x215   : > { %v417_v59 = vadd.f32 %v416_v57, %v415_v58 }
 0x217   : > { %418 = vst.msk [vmem:[%s263_s9] sm:$0xff] %vm390_vm3, %v417_v59 }
 0x218 PF: > { %s16_s21 = sadd.s32 1, %s556_s21  }
 0x219   : > { %p13_p4 = scmp.ge.s32.totalorder %s16_s21, 4  }
 0x21b   :  { %15 = sbr.rel (!%p13_p4) target bundleno = 1 (0x1), region = 77 }

// kernel: vae_forward.40
= control target key start
LH: loop header
LB: loop body
LE: loop exit
PB: predicated region body
PF: predicated region fallthrough
CT: control target
= control target key end

     0   :  { %s370_s12 = smov 0   ;;  %s396_s0 = inlined_call_operand.vmem [shape: f32[2,32,16], index: 0, kind: input, shape index: {}]   ;;  %s397_s1 = inlined_call_operand.vmem [shape: bf16[16,32], index: 1, kind: input, shape index: {}]   ;;  %s398_s2 = inlined_call_operand.vmem [shape: f32[16,1], index: 2, kind: input, shape index: {}]   ;;  %s399_s3 = inlined_call_operand.vmem [shape: f32[2,16,16], index: 3, kind: output, shape index: {}]  }
   0x1 LB: > { %s300_s13 = sadd.s32 4294967295, %s345_s12   ;;  %p304_p0 = scmp.ge.s32.totalorder %s345_s12, 1  ;;  %s345_s12 = sphi %s370_s12, %s13_s12  }
   0x2   : > { %p137_p1 = scmp.lt.s32.totalorder %s345_s12, 3 }
   0x4   : > { %p138_p2 = pnand %p304_p0, %p137_p1 }
   0x5   : > { %p161_p3 = scmp.lt.s32.totalorder (!%p138_p2), %s300_s13, 1  ;;  %v347_v0 = vmov (!%p138_p2), 0.0   ;;  %vm348_vm0 = vmmov (!%p138_p2), 0   ;;  %v180_v1 = vld [vmem:[%s398_s2] sm:$0xff] (!%p138_p2)  ;;  %v349_v2 = vmov (!%p138_p2), 0   ;;  %v181_v3 = vld [vmem:[%s398_s2 + $0x8] sm:$0xff] (!%p138_p2) }
   0x6   : > { %141 = sbr.rel (%p138_p2) target bundleno = 243 (0xf3), region = 32  ;;  %318 = vmatprep.subr.bf16.mxu0 (!%p138_p2), %v347_v0  ;;  %322 = vmatprep.mubr.msk.bf16.mxu0 (!%p138_p2), %vm348_vm0, %v347_v0  ;;  %v338_v10 = vld [vmem:[%s397_s1] sm:$0xff] (!%p138_p2)   ;;  %vm197_vm1 = vcmask (!%p138_p2), 261120   ;;  %vm242_vm2 = vcmask (!%p138_p2), 130048  }
   0x7   : > { %337 = vset.pattern.permute.xlu0 (!%p138_p2), %v349_v2 }
   0x8   : > { %184 = vperm.xlu0 (!%p138_p2), %337, %v180_v1  }
   0xc   : > { %189 = vperm.xlu0 (!%p138_p2), %337, %v181_v3  }
   0xd   : > { %s401_s13 = smov (!%p161_p3, %s300_s13), 1 }
   0xe   : > { %s313_s16 = sshll.u32 %s401_s13, 5  ;;  %s314_s24 = sshll.u32 %s401_s13, 4 }
   0xf   : > { %s165_s21 = scalar_lea.vmem %s396_s0, %s313_s16  ;;  %s170_s27 = scalar_lea.vmem %s399_s3, %s314_s24 }
  0x10   : > { %v172_v4 = vld [vmem:[%s165_s21] sm:$0xff]  ;;  %v173_v5 = vld [vmem:[%s165_s21 + $0x8] sm:$0xff]  ;;  %v174_v6 = vld [vmem:[%s165_s21 + $0x10] sm:$0xff] }
  0x11   : > { %v178_v7 = vpack.c.bf16 %v173_v5, %v172_v4  ;;  %v175_v8 = vld [vmem:[%s165_s21 + $0x18] sm:$0xff] }
  0x12   : > { %v179_v9 = vpack.c.bf16 %v175_v8, %v174_v6 }
  0x13   : > { %319 = vmatpush3.bf16.msra.mxu0 %v178_v7 }
  0x14   : > { %320 = vmatprep.subr.bf16.mxu0 %v347_v0 }
  0x17   : > { %321 = vmatpush3.bf16.msra.mxu0 %v179_v9 }
  0x1a   : > { %323 = vmatmul.mubr.msk.bf16.vlgmr.msra.gmra.mrb[0].mxu0 %vm197_vm1, %v338_v10 }
  0x87   : > { %v185_v11 = vpop.permute.xlu0 %184 }
  0x8b   : > { %v190_v15 = vpop.permute.xlu0 %189 }
  0xed   : > { %v235_v12 = vpop.f32.mrb[0].mxu0 }
  0xee   : > { %v236_v13 = vadd.f32 %v235_v12, %v185_v11  ;;  %v324_v14 = vpop.f32.mrb[1].mxu0 }
  0xef   : > { %v238_v16 = vpop.f32.mrb[2].mxu0 }
  0xf0   : > { %243 = vst.msk [vmem:[%s170_s27] sm:$0xff] %vm242_vm2, %v236_v13  ;;  %v239_v17 = vadd.f32 %v238_v16, %v190_v15  ;;  %v325_v18 = vpop.f32.mrb[3].mxu0 }
  0xf2   : > { %244 = vst.msk [vmem:[%s170_s27 + $0x8] sm:$0xff] %vm242_vm2, %v239_v17 }
  0xf3 PF: > { %s13_s12 = sadd.s32 1, %s345_s12  }
  0xf4   : > { %p10_p4 = scmp.ge.s32.totalorder %s13_s12, 4  }
  0xf6   :  { %12 = sbr.rel (!%p10_p4) target bundleno = 1 (0x1), region = 62 }

// kernel: vae_forward.42
= control target key start
LH: loop header
LB: loop body
LE: loop exit
PB: predicated region body
PF: predicated region fallthrough
CT: control target
= control target key end

     0   :  { %s740_s27 = smov 0   ;;  %s800_s0 = inlined_call_operand.vmem [shape: f32[2,8,26], index: 0, kind: input, shape index: {}]   ;;  %s801_s1 = inlined_call_operand.vmem [shape: bf16[8,72], index: 1, kind: input, shape index: {}]   ;;  %s802_s2 = inlined_call_operand.vmem [shape: f32[8,1], index: 2, kind: input, shape index: {}]   ;;  %s803_s3 = inlined_call_operand.vmem [shape: f32[3,16], index: 3, kind: input, shape index: {}]   ;;  %s804_s4 = inlined_call_operand.vmem [shape: f32[8,1], index: 4, kind: input, shape index: {}]   ;;  %s805_s5 = inlined_call_operand.vmem [shape: f32[2,16,16], index: 5, kind: input, shape index: {}]   ;;  %s806_s6 = inlined_call_operand.vmem [shape: bf16[8,16], index: 6, kind: input, shape index: {}]   ;;  %s807_s7 = inlined_call_operand.vmem [shape: f32[8,1], index: 7, kind: input, shape index: {}]   ;;  %s808_s8 = inlined_call_operand.vmem [shape: f32[2,8,16], index: 8, kind: output, shape index: {}]  }
   0x1 LB: > { %s594_s28 = sadd.s32 4294967295, %s677_s27   ;;  %p598_p0 = scmp.ge.s32.totalorder %s677_s27, 1  ;;  %s677_s27 = sphi %s740_s27, %s18_s27  }
   0x2   : > { %p271_p1 = scmp.lt.s32.totalorder %s677_s27, 3 }
   0x4   : > { %p272_p2 = pnand %p598_p0, %p271_p1 }
   0x5   : > { %v604_v0 = vld [vmem:[%s803_s3 + $0x2] ss:$0 sm:$0xff] (!%p272_p2)  ;;  %s679_s9 = smov (!%p272_p2), 2   ;;  %v603_v1 = vld [vmem:[%s803_s3] ss:$0 sm:$0xff] (!%p272_p2)  ;;  %s680_s12 = smov (!%p272_p2), 6  }
   0x6   : > { %275 = sbr.rel (%p272_p2) target bundleno = 538 (0x21a), region = 52  ;;  %335 = vrot.lane.b32.xlu0 (!%p272_p2), %v604_v0, %s679_s9  ;;  %344 = vrot.lane.b32.xlu1 (!%p272_p2), %v604_v0, %s680_s12  ;;  %p308_p3 = scmp.lt.s32.totalorder (!%p272_p2), %s594_s28, 1  ;;  %v685_v3 = vmov (!%p272_p2), 0.0   ;;  %vm689_vm0 = vmmov (!%p272_p2), 0   ;;  %v692_v17 = vmov (!%p272_p2), 0   ;;  %v458_v20 = vld [vmem:[%s804_s4] sm:$0xff] (!%p272_p2) }
   0x7   : > { %s681_s13 = smov (!%p272_p2), 4   ;;  %s682_s14 = smov (!%p272_p2), 8   ;;  %619 = vmatprep.subr.bf16.mxu0 (!%p272_p2), %v685_v3  ;;  %633 = vmatprep.subr.bf16.mxu1 (!%p272_p2), %v685_v3  ;;  %vm447_vm1 = vcmask (!%p272_p2), 130048   ;;  %v473_v22 = vld [vmem:[%s806_s6] sm:$0xf] (!%p272_p2)  ;;  %vm402_vm2 = vcmask (!%p272_p2), 1043456  }
   0x8   : > { %s683_s19 = smov (!%p272_p2), 10   ;;  %s684_s20 = smov (!%p272_p2), 127   ;;  %629 = vmatprep.mubr.msk.bf16.mxu0 (!%p272_p2), %vm689_vm0, %v685_v3  ;;  %635 = vmatprep.mubr.msk.bf16.mxu1 (!%p272_p2), %vm689_vm0, %v685_v3  ;;  %v392_v23 = vld [vmem:[%s802_s2] sm:$0xff] (!%p272_p2)  ;;  %v459_v24 = vmul.f32 (!%p272_p2), 2.828427, %v458_v20  ;;  %vm398_vm3 = vcmask (!%p272_p2), 588800  }
   0x9   : > { %s686_s21 = smov (!%p272_p2), 126   ;;  %s687_s22 = smov (!%p272_p2), 124   ;;  %663 = vset.pattern.permute.xlu1 (!%p272_p2), %v692_v17  ;;  %664 = vset.pattern.permute.xlu0 (!%p272_p2), %v692_v17  ;;  %v521_v25 = vld [vmem:[%s807_s7] sm:$0xff] (!%p272_p2) }
   0xa   : > { %340 = vrot.lane.b32.xlu0 (!%p272_p2), %v603_v1, %s681_s13  ;;  %348 = vrot.lane.b32.xlu1 (!%p272_p2), %v603_v1, %s682_s14  ;;  %s688_s23 = smov (!%p272_p2), 123   ;;  %s690_s24 = smov (!%p272_p2), 122   ;;  %v386_v38 = vld [vmem:[%s801_s1] sm:$0xf] (!%p272_p2) }
   0xb   : > { %s691_s25 = smov (!%p272_p2), 120   ;;  %s693_s12 = smov (!%p272_p2), 119  }
   0xc   : > { %s694_s13 = smov (!%p272_p2), 118  }
   0xd   : > { %s810_s28 = smov (!%p308_p3, %s594_s28), 1 }
   0xe   : > { %s599_s15 = sshll.u32 %s810_s28, 3  ;;  %352 = vrot.lane.b32.xlu0 %v604_v0, %s683_s19  ;;  %s610_s26 = sshll.u32 %s810_s28, 4 }
   0xf   : > { %s311_s18 = scalar_lea.vmem %s800_s0, %s599_s15  ;;  %s316_s9 = scalar_lea.vmem %s805_s5, %s610_s26 }
  0x10   : > { %v322_v2 = vld [vmem:[%s311_s18] sm:$0xff]  ;;  %v475_v19 = vld [vmem:[%s316_s9 + $0x8] sm:$0xff] }
  0x11   : > { %357 = vrot.lane.b32.xlu1 %v322_v2, %s684_s20  ;;  %v328_v10 = vmul.f32 %v603_v1, %v322_v2  ;;  %v474_v18 = vld [vmem:[%s316_s9] sm:$0xff] }
  0x12   : > { %v476_v21 = vpack.c.bf16 %v475_v19, %v474_v18 }
  0x14   : > { %634 = vmatpush3.bf16.msra.mxu1 %v476_v21 }
  0x17   : > { %636 = vmatmul.mubr.msk.bf16.vlgmr.msra.gmra.mrb[0].mxu1 %vm447_vm1, %v473_v22 }
  0x78   : > { %v336_v4 = vpop.permute.xlu0 %335  ;;  %v345_v6 = vpop.permute.xlu1 %344 }
  0x79   : > { %v338_v5 = vmul.f32 %v336_v4, %v322_v2  ;;  %v347_v11 = vmul.f32 %v345_v6, %v322_v2 }
  0x7b   : > { %361 = vrot.lane.b32.xlu0 %v338_v5, %s686_s21 }
  0x7c   : > { %v341_v7 = vpop.permute.xlu0 %340  ;;  %v349_v9 = vpop.permute.xlu1 %348 }
  0x7d   : > { %v343_v8 = vmul.f32 %v341_v7, %v322_v2  ;;  %v351_v12 = vmul.f32 %v349_v9, %v322_v2 }
  0x7f   : > { %365 = vrot.lane.b32.xlu1 %v343_v8, %s687_s22  ;;  %368 = vrot.lane.b32.xlu0 %v322_v2, %s688_s23 }
  0x80   : > { %v353_v13 = vpop.permute.xlu0 %352 }
  0x81   : > { %v355_v16 = vmul.f32 %v353_v13, %v322_v2 }
  0x83   : > { %v358_v14 = vpop.permute.xlu1 %357  ;;  %372 = vrot.lane.b32.xlu1 %v347_v11, %s690_s24  ;;  %376 = vrot.lane.b32.xlu0 %v351_v12, %s691_s25  ;;  %s320_s25 = scalar_lea.vmem %s808_s8, %s599_s15 }
  0x84   : > { %v387_v15 = vpack.c.bf16 %v358_v14, %v328_v10 }
  0x86   : > { %620 = vmatpush3.bf16.msra.mxu0 %v387_v15 }
  0x87   : > { %621 = vmatprep.subr.bf16.mxu0 %v685_v3  ;;  %379 = vrot.lane.b32.xlu1 %v322_v2, %s693_s12 }
  0x88   : > { %383 = vrot.lane.b32.xlu0 %v355_v16, %s694_s13 }
  0x8b   : > { %395 = vperm.xlu1 %663, %v392_v23  }
  0x8c   : > { %462 = vperm.xlu0 %664, %v459_v24  }
  0x8f   : > { %524 = vperm.xlu1 %663, %v521_v25  }
  0xea   : > { %v514_v39 = vpop.f32.mrb[0].mxu1 }
  0xeb   : > { %v637_v40 = vpop.f32.mrb[1].mxu1 }
  0xec   : > { %v517_v41 = vpop.f32.mrb[2].mxu1 }
  0xed   : > { %v362_v26 = vpop.permute.xlu0 %361  ;;  %v638_v42 = vpop.f32.mrb[3].mxu1 }
  0xf1   : > { %v366_v27 = vpop.permute.xlu1 %365  ;;  %v369_v28 = vpop.permute.xlu0 %368 }
  0xf2   : > { %v388_v29 = vpack.c.bf16 %v366_v27, %v362_v26 }
  0xf4   : > { %622 = vmatpush3.bf16.msra.mxu0 %v388_v29 }
  0xf5   : > { %v373_v30 = vpop.permute.xlu1 %372  ;;  %623 = vmatprep.subr.bf16.mxu0 %v685_v3  ;;  %v377_v31 = vpop.permute.xlu0 %376 }
  0xf6   : > { %v389_v32 = vpack.c.bf16 %v373_v30, %v369_v28 }
  0xf8   : > { %624 = vmatpush3.bf16.msra.mxu0 %v389_v32 }
  0xf9   : > { %v380_v33 = vpop.permute.xlu1 %379  ;;  %625 = vmatprep.subr.bf16.mxu0 %v685_v3 }
  0xfa   : > { %v384_v34 = vpop.permute.xlu0 %383  ;;  %v390_v35 = vpack.c.bf16 %v380_v33, %v377_v31 }
  0xfb   : > { %v391_v36 = vpack.c.bf16 %v384_v34, %v384_v34 }
  0xfc   : > { %626 = vmatpush3.bf16.msra.mxu0 %v390_v35 }
  0xfd   : > { %627 = vmatprep.subr.bf16.mxu0 %v685_v3  ;;  %v404_v37 = vsel %vm402_vm2, %v391_v36, 0 }
 0x100   : > { %628 = vmatpush3.bf16.msra.mxu0 %v404_v37 }
 0x103   : > { %630 = vmatmul.mubr.msk.bf16.vlgmr.msra.gmra.mrb[0].mxu0 %vm398_vm3, %v386_v38 }
 0x10a   : > { %v396_v43 = vpop.permute.xlu1 %395 }
 0x10b   : > { %v463_v59 = vpop.permute.xlu0 %462 }
 0x10e   : > { %v525_v4 = vpop.permute.xlu1 %524 }
 0x1d6   : > { %v440_v44 = vpop.f32.mrb[0].mxu0 }
 0x1d7   : > { %v441_v45 = vadd.f32 %v440_v44, %v396_v43  ;;  %v631_v46 = vpop.f32.mrb[1].mxu0 }
 0x1d8   : > { %v443_v47 = vpop.f32.mrb[2].mxu0 }
 0x1d9   : > { %v446_v48 = vmul.f32 %v441_v45, %v441_v45  ;;  %v632_v49 = vpop.f32.mrb[3].mxu0 }
 0x1db   : > { %v448_v50 = vsel %vm447_vm1, %v446_v48, 0.0 }
 0x1dc   : > { %v449_v51 = vrot.slane %v448_v50, 4 }
 0x1de   : > { %v450_v52 = vadd.f32 %v449_v51, %v448_v50 }
 0x1e0   : > { %v451_v53 = vrot.slane %v450_v52, 2 }
 0x1e2   : > { %v452_v54 = vadd.f32 %v451_v53, %v450_v52 }
 0x1e4   : > { %v453_v55 = vrot.slane %v452_v54, 1 }
 0x1e6   : > { %v454_v56 = vadd.f32 %v453_v55, %v452_v54 }
 0x1e8   : > { %v455_v57 = vmax.f32 %v454_v56, 1e-24 }
 0x1ea   : > { %665 = vrsqrt.f32 %v455_v57 }
 0x1f4   : > { %v666_v58 = vpop.eup %665 }
 0x1f5   : > { %v457_v60 = vmul.f32 %v666_v58, %v441_v45 }
 0x1f7   : > { %v465_v61 = vmul.f32 %v463_v59, %v457_v60 }
 0x1f9   : > { %v606_v62 = vmul.f32 -1.442695, %v465_v61 }
 0x1fb   : > { %667 = vpow2.f32 %v606_v62 }
 0x205   : > { %v668_v63 = vpop.eup %667 }
 0x206   : > { %v469_v0 = vadd.f32 1.0, %v668_v63 }
 0x208   : > { %669 = vrcp.f32 %v469_v0 }
 0x212   : > { %v670_v1 = vpop.eup %669 }
 0x213   : > { %v472_v2 = vmul.f32 %v670_v1, %v465_v61 }
 0x215   : > { %v520_v3 = vadd.f32 %v514_v39, %v472_v2 }
 0x217   : > { %v527_v5 = vadd.f32 %v525_v4, %v520_v3 }
 0x219   : > { %528 = vst.msk [vmem:[%s320_s25] sm:$0xff] %vm447_vm1, %v527_v5 }
 0x21a PF: > { %s18_s27 = sadd.s32 1, %s677_s27  }
 0x21b   : > { %p15_p4 = scmp.ge.s32.totalorder %s18_s27, 4  }
 0x21d   :  { %17 = sbr.rel (!%p15_p4) target bundleno = 1 (0x1), region = 85 }

// kernel: vae_forward.41
= control target key start
LH: loop header
LB: loop body
LE: loop exit
PB: predicated region body
PF: predicated region fallthrough
CT: control target
= control target key end

     0   :  { %s612_s18 = smov 0   ;;  %s662_s0 = inlined_call_operand.vmem [shape: f32[2,16,26], index: 0, kind: input, shape index: {}]   ;;  %s663_s1 = inlined_call_operand.vmem [shape: bf16[8,144], index: 1, kind: input, shape index: {}]   ;;  %s664_s2 = inlined_call_operand.vmem [shape: f32[8,1], index: 2, kind: input, shape index: {}]   ;;  %s665_s3 = inlined_call_operand.vmem [shape: f32[3,16], index: 3, kind: input, shape index: {}]   ;;  %s666_s4 = inlined_call_operand.vmem [shape: f32[8,1], index: 4, kind: input, shape index: {}]   ;;  %s667_s5 = inlined_call_operand.vmem [shape: f32[2,8,16], index: 5, kind: output, shape index: {}]  }
   0x1 LB: > { %s471_s19 = sadd.s32 4294967295, %s566_s18   ;;  %p475_p0 = scmp.ge.s32.totalorder %s566_s18, 1  ;;  %s566_s18 = sphi %s612_s18, %s15_s18  }
   0x2   : > { %p187_p1 = scmp.lt.s32.totalorder %s566_s18, 3 }
   0x4   : > { %p188_p2 = pnand %p475_p0, %p187_p1 }
   0x5   : > { %v480_v0 = vld [vmem:[%s665_s3 + $0x2] ss:$0 sm:$0xff] (!%p188_p2)  ;;  %s568_s22 = smov (!%p188_p2), 2   ;;  %v479_v1 = vld [vmem:[%s665_s3] ss:$0 sm:$0xff] (!%p188_p2)  ;;  %s569_s25 = smov (!%p188_p2), 6  }
   0x6   : > { %191 = sbr.rel (%p188_p2) target bundleno = 546 (0x222), region = 40  ;;  %239 = vrot.lane.b32.xlu0 (!%p188_p2), %v480_v0, %s568_s22  ;;  %250 = vrot.lane.b32.xlu1 (!%p188_p2), %v480_v0, %s569_s25  ;;  %p214_p3 = scmp.lt.s32.totalorder (!%p188_p2), %s471_s19, 1  ;;  %v571_v2 = vmov (!%p188_p2), 0   ;;  %v325_v33 = vld [vmem:[%s663_s1] sm:$0xff] (!%p188_p2)  ;;  %vm347_vm0 = vcmask (!%p188_p2), 130048  }
   0x7   : > { %s570_s26 = smov (!%p188_p2), 4   ;;  %351 = vmatprep.subr.bf16.mxu0 (!%p188_p2), %v571_v2  ;;  %s572_s27 = smov (!%p188_p2), 8   ;;  %551 = vset.pattern.permute.xlu0 (!%p188_p2), %v571_v2  ;;  %v482_v34 = vcombine.high (!%p188_p2), %v325_v33, %v325_v33  ;;  %v335_v35 = vld [vmem:[%s664_s2] sm:$0xff] (!%p188_p2) }
   0x8   : > { %550 = vset.pattern.permute.xlu1 (!%p188_p2), %v571_v2  ;;  %s573_s7 = smov (!%p188_p2), 10   ;;  %s574_s8 = smov (!%p188_p2), 127   ;;  %v402_v36 = vld [vmem:[%s666_s4] sm:$0xff] (!%p188_p2) }
   0x9   : > { %s575_s9 = smov (!%p188_p2), 126   ;;  %s576_s10 = smov (!%p188_p2), 124   ;;  %483 = vmatprep.mubr.msk.bf16.mxu0 (!%p188_p2), %vm347_vm0, %v482_v34  ;;  %v403_v37 = vmul.f32 (!%p188_p2), 2.828427, %v402_v36 }
   0xa   : > { %245 = vrot.lane.b32.xlu0 (!%p188_p2), %v479_v1, %s570_s26  ;;  %255 = vrot.lane.b32.xlu1 (!%p188_p2), %v479_v1, %s572_s27  ;;  %s577_s11 = smov (!%p188_p2), 123   ;;  %s578_s12 = smov (!%p188_p2), 122  }
   0xb   : > { %s579_s13 = smov (!%p188_p2), 120   ;;  %s580_s14 = smov (!%p188_p2), 119  }
   0xc   : > { %s581_s15 = smov (!%p188_p2), 118  }
   0xd   : > { %s669_s19 = smov (!%p214_p3, %s471_s19), 1 }
   0xe   : > { %s487_s28 = sshll.u32 %s669_s19, 4  ;;  %260 = vrot.lane.b32.xlu0 %v480_v0, %s573_s7  ;;  %s478_s24 = sshll.u32 %s669_s19, 3 }
   0xf   : > { %s218_s6 = scalar_lea.vmem %s662_s0, %s487_s28  ;;  %s222_s27 = scalar_lea.vmem %s667_s5, %s478_s24 }
  0x10   : > { %v224_v3 = vld [vmem:[%s218_s6] sm:$0xff]  ;;  %v225_v4 = vld [vmem:[%s218_s6 + $0x8] sm:$0xff] }
  0x11   : > { %v510_v5 = vpack.i.bf16 %v225_v4, %v224_v3  ;;  %v231_v6 = vmul.f32 %v479_v1, %v224_v3  ;;  %v232_v7 = vmul.f32 %v479_v1, %v225_v4 }
  0x13   : > { %511 = vrot.lane.b32.xlu1 %v510_v5, %s574_s8  ;;  %v326_v8 = vpack.c.bf16 %v232_v7, %v231_v6 }
  0x15   : > { %352 = vmatpush1.bf16.msra.mxu0 %v326_v8 }
  0x16   : > { %353 = vmatprep.subr.bf16.mxu0 %v571_v2 }
  0x78   : > { %v240_v9 = vpop.permute.xlu0 %239  ;;  %v251_v12 = vpop.permute.xlu1 %250 }
  0x79   : > { %v242_v10 = vmul.f32 %v240_v9, %v224_v3  ;;  %v243_v11 = vmul.f32 %v240_v9, %v225_v4  ;;  %v253_v15 = vmul.f32 %v251_v12, %v224_v3  ;;  %v254_v16 = vmul.f32 %v251_v12, %v225_v4 }
  0x7b   : > { %v515_v13 = vpack.i.bf16 %v243_v11, %v242_v10  ;;  %v530_v23 = vpack.i.bf16 %v254_v16, %v253_v15 }
  0x7c   : > { %v246_v14 = vpop.permute.xlu0 %245  ;;  %v256_v19 = vpop.permute.xlu1 %255 }
  0x7d   : > { %v248_v17 = vmul.f32 %v246_v14, %v224_v3  ;;  %v249_v18 = vmul.f32 %v246_v14, %v225_v4  ;;  %516 = vrot.lane.b32.xlu0 %v515_v13, %s575_s9  ;;  %v258_v20 = vmul.f32 %v256_v19, %v224_v3  ;;  %v259_v21 = vmul.f32 %v256_v19, %v225_v4 }
  0x7f   : > { %v520_v22 = vpack.i.bf16 %v249_v18, %v248_v17  ;;  %v535_v25 = vpack.i.bf16 %v259_v21, %v258_v20 }
  0x80   : > { %v261_v24 = vpop.permute.xlu0 %260 }
  0x81   : > { %521 = vrot.lane.b32.xlu1 %v520_v22, %s576_s10  ;;  %526 = vrot.lane.b32.xlu0 %v510_v5, %s577_s11  ;;  %v263_v26 = vmul.f32 %v261_v24, %v224_v3  ;;  %v264_v27 = vmul.f32 %v261_v24, %v225_v4  ;;  %v481_v3 = vcombine.low %v325_v33, %v325_v33 }
  0x83   : > { %v545_v31 = vpack.i.bf16 %v264_v27, %v263_v26 }
  0x85   : > { %v512_v28 = vpop.permute.xlu1 %511  ;;  %531 = vrot.lane.b32.xlu1 %v530_v23, %s578_s12  ;;  %536 = vrot.lane.b32.xlu0 %v535_v25, %s579_s13 }
  0x86   : > { %v514_v29 = vunpack.i.h.bf16 %v512_v28  ;;  %v513_v30 = vunpack.i.l.bf16 %v512_v28 }
  0x88   : > { %v327_v32 = vpack.c.bf16 %v514_v29, %v513_v30 }
  0x89   : > { %541 = vrot.lane.b32.xlu1 %v510_v5, %s580_s14  ;;  %546 = vrot.lane.b32.xlu0 %v545_v31, %s581_s15 }
  0x8a   : > { %354 = vmatpush1.bf16.msra.mxu0 %v327_v32 }
  0x8b   : > { %355 = vmatprep.subr.bf16.mxu0 %v571_v2 }
  0x8d   : > { %338 = vperm.xlu1 %550, %v335_v35   ;;  %406 = vperm.xlu0 %551, %v403_v37  }
  0xef   : > { %v517_v38 = vpop.permute.xlu0 %516 }
  0xf0   : > { %v519_v39 = vunpack.i.h.bf16 %v517_v38  ;;  %v518_v40 = vunpack.i.l.bf16 %v517_v38 }
  0xf2   : > { %v328_v41 = vpack.c.bf16 %v519_v39, %v518_v40 }
  0xf3   : > { %v522_v42 = vpop.permute.xlu1 %521  ;;  %v527_v43 = vpop.permute.xlu0 %526 }
  0xf4   : > { %v524_v44 = vunpack.i.h.bf16 %v522_v42  ;;  %v523_v45 = vunpack.i.l.bf16 %v522_v42  ;;  %356 = vmatpush1.bf16.msra.mxu0 %v328_v41  ;;  %v529_v46 = vunpack.i.h.bf16 %v527_v43  ;;  %v528_v47 = vunpack.i.l.bf16 %v527_v43 }
  0xf5   : > { %357 = vmatprep.subr.bf16.mxu0 %v571_v2 }
  0xf6   : > { %v329_v48 = vpack.c.bf16 %v524_v44, %v523_v45  ;;  %v330_v50 = vpack.c.bf16 %v529_v46, %v528_v47 }
  0xf7   : > { %v532_v49 = vpop.permute.xlu1 %531  ;;  %v537_v53 = vpop.permute.xlu0 %536 }
  0xf8   : > { %358 = vmatpush1.bf16.msra.mxu0 %v329_v48  ;;  %v534_v51 = vunpack.i.h.bf16 %v532_v49  ;;  %v533_v52 = vunpack.i.l.bf16 %v532_v49  ;;  %v539_v55 = vunpack.i.h.bf16 %v537_v53  ;;  %v538_v56 = vunpack.i.l.bf16 %v537_v53 }
  0xf9   : > { %359 = vmatprep.subr.bf16.mxu0 %v571_v2 }
  0xfa   : > { %v331_v54 = vpack.c.bf16 %v534_v51, %v533_v52  ;;  %v332_v58 = vpack.c.bf16 %v539_v55, %v538_v56 }
  0xfb   : > { %v542_v57 = vpop.permute.xlu1 %541  ;;  %v547_v61 = vpop.permute.xlu0 %546 }
  0xfc   : > { %360 = vmatpush1.bf16.msra.mxu0 %v330_v50  ;;  %v544_v59 = vunpack.i.h.bf16 %v542_v57  ;;  %v543_v60 = vunpack.i.l.bf16 %v542_v57  ;;  %v549_v63 = vunpack.i.h.bf16 %v547_v61  ;;  %v548_v0 = vunpack.i.l.bf16 %v547_v61 }
  0xfd   : > { %361 = vmatprep.subr.bf16.mxu0 %v571_v2 }
  0xfe   : > { %v333_v62 = vpack.c.bf16 %v544_v59, %v543_v60  ;;  %v334_v1 = vpack.c.bf16 %v549_v63, %v548_v0 }
 0x100   : > { %362 = vmatpush1.bf16.msra.mxu0 %v331_v54 }
 0x101   : > { %363 = vmatprep.subr.bf16.mxu0 %v571_v2 }
 0x104   : > { %364 = vmatpush1.bf16.msra.mxu0 %v332_v58 }
 0x105   : > { %365 = vmatprep.subr.bf16.mxu0 %v571_v2 }
 0x108   : > { %366 = vmatpush1.bf16.msra.mxu0 %v333_v62 }
 0x109   : > { %367 = vmatprep.subr.bf16.mxu0 %v571_v2 }
 0x10c   : > { %368 = vmatpush1.bf16.msra.mxu0 %v334_v1  ;;  %v339_v4 = vpop.permute.xlu1 %338  ;;  %v407_v19 = vpop.permute.xlu0 %406 }
 0x10f   : > { %384 = vmatmul.mubr.bf16.vlgmr.msra.gmra.mrb[0].mxu0 %v481_v3 }
 0x1e2   : > { %v385_v5 = vpop.f32.mrb[0].mxu0 }
 0x1e3   : > { %v386_v6 = vadd.f32 %v385_v5, %v339_v4  ;;  %v387_v7 = vpop.f32.mrb[1].mxu0 }
 0x1e4   : > { %v388_v8 = vpop.f32.mrb[2].mxu0 }
 0x1e5   : > { %v391_v9 = vmul.f32 %v386_v6, %v386_v6  ;;  %v389_v10 = vpop.f32.mrb[3].mxu0 }
 0x1e7   : > { %v392_v11 = vsel %vm347_vm0, %v391_v9, 0.0 }
 0x1e8   : > { %v393_v12 = vrot.slane %v392_v11, 4 }
 0x1ea   : > { %v394_v13 = vadd.f32 %v393_v12, %v392_v11 }
 0x1ec   : > { %v395_v14 = vrot.slane %v394_v13, 2 }
 0x1ee   : > { %v396_v15 = vadd.f32 %v395_v14, %v394_v13 }
 0x1f0   : > { %v397_v16 = vrot.slane %v396_v15, 1 }
 0x1f2   : > { %v398_v17 = vadd.f32 %v397_v16, %v396_v15 }
 0x1f4   : > { %v399_v2 = vmax.f32 %v398_v17, 1e-24 }
 0x1f6   : > { %554 = vrsqrt.f32 %v399_v2 }
 0x200   : > { %v555_v18 = vpop.eup %554 }
 0x201   : > { %v401_v20 = vmul.f32 %v555_v18, %v386_v6 }
 0x203   : > { %v409_v21 = vmul.f32 %v407_v19, %v401_v20 }
 0x205   : > { %v484_v22 = vmul.f32 -1.442695, %v409_v21 }
 0x207   : > { %556 = vpow2.f32 %v484_v22 }
 0x211   : > { %v557_v23 = vpop.eup %556 }
 0x212   : > { %v413_v24 = vadd.f32 1.0, %v557_v23 }
 0x214   : > { %558 = vrcp.f32 %v413_v24 }
 0x21e   : > { %v559_v25 = vpop.eup %558 }
 0x21f   : > { %v416_v26 = vmul.f32 %v559_v25, %v409_v21 }
 0x221   : > { %417 = vst.msk [vmem:[%s222_s27] sm:$0xff] %vm347_vm0, %v416_v26 }
 0x222 PF: > { %s15_s18 = sadd.s32 1, %s566_s18  }
 0x223   : > { %p12_p4 = scmp.ge.s32.totalorder %s15_s18, 4  }
 0x225   :  { %14 = sbr.rel (!%p12_p4) target bundleno = 1 (0x1), region = 70 }

// kernel: vae_forward.43
= control target key start
LH: loop header
LB: loop body
LE: loop exit
PB: predicated region body
PF: predicated region fallthrough
CT: control target
= control target key end

     0   :  { %s687_s27 = smov 0   ;;  %s735_s0 = inlined_call_operand.vmem [shape: f32[2,8,16], index: 0, kind: input, shape index: {}]   ;;  %s736_s1 = inlined_call_operand.vmem [shape: bf16[8,8], index: 1, kind: input, shape index: {}]   ;;  %s737_s2 = inlined_call_operand.vmem [shape: f32[8,1], index: 2, kind: input, shape index: {}]   ;;  %s738_s3 = inlined_call_operand.vmem [shape: bf16[8,8], index: 3, kind: input, shape index: {}]   ;;  %s739_s4 = inlined_call_operand.vmem [shape: f32[8,1], index: 4, kind: input, shape index: {}]   ;;  %s740_s5 = inlined_call_operand.vmem [shape: f32[2,8,16], index: 5, kind: input, shape index: {}]   ;;  %s741_s6 = inlined_call_operand.vmem [shape: f32[2,8,16], index: 6, kind: output, shape index: {0}]   ;;  %s742_s7 = inlined_call_operand.vmem [shape: f32[2,8,16], index: 7, kind: output, shape index: {1}]   ;;  %s743_s8 = inlined_call_operand.vmem [shape: f32[2,8,16], index: 8, kind: output, shape index: {2}]  }
   0x1 LB: > { %s586_s28 = sadd.s32 4294967295, %s637_s27   ;;  %p590_p0 = scmp.ge.s32.totalorder %s637_s27, 1  ;;  %s637_s27 = sphi %s687_s27, %s19_s27  }
   0x2   : > { %p275_p1 = scmp.lt.s32.totalorder %s637_s27, 3 }
   0x4   : > { %p276_p2 = pnand %p590_p0, %p275_p1 }
   0x5   : > { %p319_p3 = scmp.lt.s32.totalorder (!%p276_p2), %s586_s28, 1  ;;  %v639_v0 = vmov (!%p276_p2), 0.0   ;;  %v398_v1 = vld [vmem:[%s739_s4] sm:$0xff] (!%p276_p2)  ;;  %vm640_vm0 = vmmov (!%p276_p2), 0   ;;  %v641_v2 = vmov (!%p276_p2), 0   ;;  %vm353_vm1 = vcmask (!%p276_p2), 1043456  }
   0x6   : > { %279 = sbr.rel (%p276_p2) target bundleno = 259 (0x103), region = 44  ;;  %605 = vmatprep.subr.bf16.mxu0 (!%p276_p2), %v639_v0  ;;  %611 = vmatprep.subr.bf16.mxu1 (!%p276_p2), %v639_v0  ;;  %v343_v3 = vld [vmem:[%s737_s2] sm:$0xff] (!%p276_p2)  ;;  %vm349_vm2 = vcmask (!%p276_p2), 64512   ;;  %vm455_vm3 = vcmask (!%p276_p2), 130048  }
   0x7   : > { %607 = vmatprep.mubr.msk.bf16.mxu0 (!%p276_p2), %vm640_vm0, %v639_v0  ;;  %613 = vmatprep.mubr.msk.bf16.mxu1 (!%p276_p2), %vm640_vm0, %v639_v0  ;;  %v342_v7 = vld [vmem:[%s736_s1] sm:$0xf] (!%p276_p2) }
   0x8   : > { %628 = vset.pattern.permute.xlu0 (!%p276_p2), %v641_v2  ;;  %v397_v8 = vld [vmem:[%s738_s3] sm:$0xf] (!%p276_p2) }
   0x9   : > { %401 = vperm.xlu0 (!%p276_p2), %628, %v398_v1  }
   0xd   : > { %s745_s28 = smov (!%p319_p3, %s586_s28), 1  ;;  %346 = vperm.xlu0 %628, %v343_v3  }
   0xe   : > { %s698_s9 = sshll.u32 %s745_s28, 3 }
   0xf   : > { %s322_s12 = scalar_lea.vmem %s735_s0, %s698_s9  ;;  %s330_s21 = scalar_lea.vmem %s741_s6, %s698_s9 }
  0x10   : > { %v340_v4 = vld [vmem:[%s322_s12] sm:$0xff]  ;;  %s334_s24 = scalar_lea.vmem %s742_s7, %s698_s9  ;;  %s326_s28 = scalar_lea.vmem %s740_s5, %s698_s9 }
  0x11   : > { %v341_v5 = vpack.c.bf16 %v340_v4, %v340_v4  ;;  %v449_v24 = vld [vmem:[%s326_s28] sm:$0xff]  ;;  %s338_s10 = scalar_lea.vmem %s743_s8, %s698_s9 }
  0x13   : > { %v355_v6 = vsel %vm353_vm1, %v341_v5, 0 }
  0x14   : > { %606 = vmatpush3.bf16.msra.mxu0 %v355_v6  ;;  %612 = vmatpush3.bf16.msra.mxu1 %v355_v6 }
  0x17   : > { %608 = vmatmul.mubr.msk.bf16.vlgmr.msra.gmra.mrb[0].mxu0 %vm349_vm2, %v342_v7  ;;  %614 = vmatmul.mubr.msk.bf16.vlgmr.msra.gmra.mrb[0].mxu1 %vm349_vm2, %v397_v8 }
  0x88   : > { %v402_v9 = vpop.permute.xlu0 %401 }
  0x8c   : > { %v347_v10 = vpop.permute.xlu0 %346 }
  0xea   : > { %v391_v11 = vpop.f32.mrb[0].mxu0  ;;  %v441_v12 = vpop.f32.mrb[0].mxu1 }
  0xeb   : > { %v392_v13 = vadd.f32 %v391_v11, %v347_v10  ;;  %v442_v14 = vadd.f32 %v441_v12, %v402_v9  ;;  %v615_v15 = vpop.f32.mrb[1].mxu1  ;;  %v609_v16 = vpop.f32.mrb[1].mxu0 }
  0xec   : > { %v444_v17 = vpop.f32.mrb[2].mxu1  ;;  %v394_v18 = vpop.f32.mrb[2].mxu0 }
  0xed   : > { %456 = vst.msk [vmem:[%s330_s21] sm:$0xff] %vm455_vm3, %v392_v13  ;;  %v598_v19 = vclamps-f32 %v442_v14, 10.0  ;;  %v616_v20 = vpop.f32.mrb[3].mxu1  ;;  %v610_v21 = vpop.f32.mrb[3].mxu0 }
  0xef   : > { %v450_v22 = vmul.f32 0.5, %v598_v19  ;;  %457 = vst.msk [vmem:[%s334_s24] sm:$0xff] %vm455_vm3, %v598_v19 }
  0xf1   : > { %v451_v23 = vmul.f32 1.442695, %v450_v22 }
  0xf3   : > { %629 = vpow2.f32 %v451_v23 }
  0xfd   : > { %v630_v25 = vpop.eup %629 }
  0xfe   : > { %v453_v26 = vmul.f32 %v630_v25, %v449_v24 }
 0x100   : > { %v454_v27 = vadd.f32 %v453_v26, %v392_v13 }
 0x102   : > { %458 = vst.msk [vmem:[%s338_s10] sm:$0xff] %vm455_vm3, %v454_v27 }
 0x103 PF: > { %s19_s27 = sadd.s32 1, %s637_s27  }
 0x104   : > { %p16_p4 = scmp.ge.s32.totalorder %s19_s27, 4  }
 0x106   :  { %18 = sbr.rel (!%p16_p4) target bundleno = 1 (0x1), region = 101 }

// kernel: vae_forward.44
= control target key start
LH: loop header
LB: loop body
LE: loop exit
PB: predicated region body
PF: predicated region fallthrough
CT: control target
= control target key end

     0   :  { %s340_s12 = smov 0   ;;  %s363_s0 = inlined_call_operand.vmem [shape: f32[2,8,16], index: 0, kind: input, shape index: {}]   ;;  %s364_s1 = inlined_call_operand.vmem [shape: bf16[8,8], index: 1, kind: input, shape index: {}]   ;;  %s365_s2 = inlined_call_operand.vmem [shape: f32[8,1], index: 2, kind: input, shape index: {}]   ;;  %s366_s3 = inlined_call_operand.vmem [shape: f32[2,8,16], index: 3, kind: output, shape index: {}]  }
   0x1 LB: > { %s279_s13 = sadd.s32 4294967295, %s315_s12   ;;  %p283_p0 = scmp.ge.s32.totalorder %s315_s12, 1  ;;  %s315_s12 = sphi %s340_s12, %s13_s12  }
   0x2   : > { %p136_p1 = scmp.lt.s32.totalorder %s315_s12, 3 }
   0x4   : > { %p137_p2 = pnand %p283_p0, %p136_p1 }
   0x5   : > { %p158_p3 = scmp.lt.s32.totalorder (!%p137_p2), %s279_s13, 1  ;;  %v317_v0 = vmov (!%p137_p2), 0.0   ;;  %vm318_vm0 = vmmov (!%p137_p2), 0   ;;  %v170_v1 = vld [vmem:[%s365_s2] sm:$0xff] (!%p137_p2)  ;;  %v319_v2 = vmov (!%p137_p2), 0   ;;  %vm180_vm1 = vcmask (!%p137_p2), 1043456  }
   0x6   : > { %140 = sbr.rel (%p137_p2) target bundleno = 238 (0xee), region = 32  ;;  %291 = vmatprep.subr.bf16.mxu0 (!%p137_p2), %v317_v0  ;;  %293 = vmatprep.mubr.msk.bf16.mxu0 (!%p137_p2), %vm318_vm0, %v317_v0  ;;  %v168_v6 = vld [vmem:[%s364_s1] sm:$0xf] (!%p137_p2)  ;;  %vm176_vm2 = vcmask (!%p137_p2), 64512   ;;  %vm224_vm3 = vcmask (!%p137_p2), 130048  }
   0x7   : > { %308 = vset.pattern.permute.xlu0 (!%p137_p2), %v319_v2 }
   0x8   : > { %173 = vperm.xlu0 (!%p137_p2), %308, %v170_v1  }
   0xd   : > { %s368_s13 = smov (!%p158_p3, %s279_s13), 1 }
   0xe   : > { %s284_s16 = sshll.u32 %s368_s13, 3 }
   0xf   : > { %s161_s19 = scalar_lea.vmem %s363_s0, %s284_s16  ;;  %s165_s24 = scalar_lea.vmem %s366_s3, %s284_s16 }
  0x10   : > { %v167_v3 = vld [vmem:[%s161_s19] sm:$0xff] }
  0x11   : > { %v169_v4 = vpack.c.bf16 %v167_v3, %v167_v3 }
  0x13   : > { %v182_v5 = vsel %vm180_vm1, %v169_v4, 0 }
  0x14   : > { %292 = vmatpush3.bf16.msra.mxu0 %v182_v5 }
  0x17   : > { %294 = vmatmul.mubr.msk.bf16.vlgmr.msra.gmra.mrb[0].mxu0 %vm176_vm2, %v168_v6 }
  0x87   : > { %v174_v7 = vpop.permute.xlu0 %173 }
  0xea   : > { %v218_v8 = vpop.f32.mrb[0].mxu0 }
  0xeb   : > { %v219_v9 = vadd.f32 %v218_v8, %v174_v7  ;;  %v295_v10 = vpop.f32.mrb[1].mxu0 }
  0xec   : > { %v221_v11 = vpop.f32.mrb[2].mxu0 }
  0xed   : > { %225 = vst.msk [vmem:[%s165_s24] sm:$0xff] %vm224_vm3, %v219_v9  ;;  %v296_v12 = vpop.f32.mrb[3].mxu0 }
  0xee PF: > { %s13_s12 = sadd.s32 1, %s315_s12  }
  0xef   : > { %p10_p4 = scmp.ge.s32.totalorder %s13_s12, 4  }
  0xf1   :  { %12 = sbr.rel (!%p10_p4) target bundleno = 1 (0x1), region = 62 }

// kernel: vae_forward.45
= control target key start
LH: loop header
LB: loop body
LE: loop exit
PB: predicated region body
PF: predicated region fallthrough
CT: control target
= control target key end

     0   :  { %s591_s18 = smov 0   ;;  %s637_s0 = inlined_call_operand.vmem [shape: f32[2,8,26], index: 0, kind: input, shape index: {}]   ;;  %s638_s1 = inlined_call_operand.vmem [shape: bf16[16,72], index: 1, kind: input, shape index: {}]   ;;  %s639_s2 = inlined_call_operand.vmem [shape: f32[16,1], index: 2, kind: input, shape index: {}]   ;;  %s640_s3 = inlined_call_operand.vmem [shape: f32[3,16], index: 3, kind: input, shape index: {}]   ;;  %s641_s4 = inlined_call_operand.vmem [shape: f32[16,1], index: 4, kind: input, shape index: {}]   ;;  %s642_s5 = inlined_call_operand.vmem [shape: f32[2,16,16], index: 5, kind: output, shape index: {}]  }
   0x1 LB: > { %s463_s19 = sadd.s32 4294967295, %s543_s18   ;;  %p467_p0 = scmp.ge.s32.totalorder %s543_s18, 1  ;;  %s543_s18 = sphi %s591_s18, %s15_s18  }
   0x2   : > { %p186_p1 = scmp.lt.s32.totalorder %s543_s18, 3 }
   0x4   : > { %p187_p2 = pnand %p467_p0, %p186_p1 }
   0x5   : > { %v472_v0 = vld [vmem:[%s640_s3 + $0x2] ss:$0 sm:$0xff] (!%p187_p2)  ;;  %s545_s22 = smov (!%p187_p2), 2   ;;  %v471_v1 = vld [vmem:[%s640_s3] ss:$0 sm:$0xff] (!%p187_p2)  ;;  %s546_s25 = smov (!%p187_p2), 6  }
   0x6   : > { %190 = sbr.rel (%p187_p2) target bundleno = 539 (0x21b), region = 40  ;;  %236 = vrot.lane.b32.xlu0 (!%p187_p2), %v472_v0, %s545_s22  ;;  %245 = vrot.lane.b32.xlu1 (!%p187_p2), %v472_v0, %s546_s25  ;;  %p213_p3 = scmp.lt.s32.totalorder (!%p187_p2), %s463_s19, 1  ;;  %v551_v3 = vmov (!%p187_p2), 0.0   ;;  %vm555_vm0 = vmmov (!%p187_p2), 0   ;;  %v558_v17 = vmov (!%p187_p2), 0   ;;  %v294_v18 = vld [vmem:[%s639_s2] sm:$0xff] (!%p187_p2) }
   0x7   : > { %s547_s26 = smov (!%p187_p2), 4   ;;  %s548_s27 = smov (!%p187_p2), 8   ;;  %486 = vmatprep.subr.bf16.mxu0 (!%p187_p2), %v551_v3  ;;  %496 = vmatprep.mubr.msk.bf16.mxu0 (!%p187_p2), %vm555_vm0, %v551_v3  ;;  %v376_v19 = vld [vmem:[%s641_s4] sm:$0xff] (!%p187_p2)  ;;  %v295_v20 = vld [vmem:[%s639_s2 + $0x8] sm:$0xff] (!%p187_p2)  ;;  %vm315_vm1 = vcmask (!%p187_p2), 1043456   ;;  %vm311_vm2 = vcmask (!%p187_p2), 588800  }
   0x8   : > { %s549_s7 = smov (!%p187_p2), 10   ;;  %s550_s8 = smov (!%p187_p2), 127   ;;  %524 = vset.pattern.permute.xlu1 (!%p187_p2), %v558_v17  ;;  %525 = vset.pattern.permute.xlu0 (!%p187_p2), %v558_v17  ;;  %v378_v21 = vmul.f32 (!%p187_p2), 4.0, %v376_v19  ;;  %v377_v22 = vld [vmem:[%s641_s4 + $0x8] sm:$0xff] (!%p187_p2)  ;;  %v526_v36 = vld [vmem:[%s638_s1] sm:$0xff] (!%p187_p2)   ;;  %vm362_vm3 = vcmask (!%p187_p2), 130048  }
   0x9   : > { %s552_s9 = smov (!%p187_p2), 126   ;;  %s553_s10 = smov (!%p187_p2), 124   ;;  %v379_v23 = vmul.f32 (!%p187_p2), 4.0, %v377_v22 }
   0xa   : > { %241 = vrot.lane.b32.xlu0 (!%p187_p2), %v471_v1, %s547_s26  ;;  %249 = vrot.lane.b32.xlu1 (!%p187_p2), %v471_v1, %s548_s27  ;;  %s554_s11 = smov (!%p187_p2), 123   ;;  %s556_s12 = smov (!%p187_p2), 122  }
   0xb   : > { %s557_s13 = smov (!%p187_p2), 120   ;;  %s559_s14 = smov (!%p187_p2), 119  }
   0xc   : > { %s560_s15 = smov (!%p187_p2), 118  }
   0xd   : > { %s644_s19 = smov (!%p213_p3, %s463_s19), 1 }
   0xe   : > { %s468_s28 = sshll.u32 %s644_s19, 3  ;;  %253 = vrot.lane.b32.xlu0 %v472_v0, %s549_s7 }
   0xf   : > { %s216_s6 = scalar_lea.vmem %s637_s0, %s468_s28  ;;  %s479_s28 = sshll.u32 %s644_s19, 4 }
  0x10   : > { %v223_v2 = vld [vmem:[%s216_s6] sm:$0xff]  ;;  %s221_s6 = scalar_lea.vmem %s642_s5, %s479_s28 }
  0x11   : > { %258 = vrot.lane.b32.xlu1 %v223_v2, %s550_s8  ;;  %v229_v10 = vmul.f32 %v471_v1, %v223_v2 }
  0x78   : > { %v237_v4 = vpop.permute.xlu0 %236  ;;  %v246_v6 = vpop.permute.xlu1 %245 }
  0x79   : > { %v239_v5 = vmul.f32 %v237_v4, %v223_v2  ;;  %v248_v11 = vmul.f32 %v246_v6, %v223_v2 }
  0x7b   : > { %262 = vrot.lane.b32.xlu0 %v239_v5, %s552_s9 }
  0x7c   : > { %v242_v7 = vpop.permute.xlu0 %241  ;;  %v250_v9 = vpop.permute.xlu1 %249 }
  0x7d   : > { %v244_v8 = vmul.f32 %v242_v7, %v223_v2  ;;  %v252_v12 = vmul.f32 %v250_v9, %v223_v2 }
  0x7f   : > { %266 = vrot.lane.b32.xlu1 %v244_v8, %s553_s10  ;;  %269 = vrot.lane.b32.xlu0 %v223_v2, %s554_s11 }
  0x80   : > { %v254_v13 = vpop.permute.xlu0 %253 }
  0x81   : > { %v256_v16 = vmul.f32 %v254_v13, %v223_v2 }
  0x83   : > { %v259_v14 = vpop.permute.xlu1 %258  ;;  %273 = vrot.lane.b32.xlu1 %v248_v11, %s556_s12  ;;  %277 = vrot.lane.b32.xlu0 %v252_v12, %s557_s13 }
  0x84   : > { %v289_v15 = vpack.c.bf16 %v259_v14, %v229_v10 }
  0x86   : > { %487 = vmatpush3.bf16.msra.mxu0 %v289_v15 }
  0x87   : > { %488 = vmatprep.subr.bf16.mxu0 %v551_v3  ;;  %280 = vrot.lane.b32.xlu1 %v223_v2, %s559_s14 }
  0x88   : > { %284 = vrot.lane.b32.xlu0 %v256_v16, %s560_s15 }
  0x8b   : > { %298 = vperm.xlu1 %524, %v294_v18  }
  0x8c   : > { %303 = vperm.xlu0 %525, %v295_v20  }
  0x8f   : > { %382 = vperm.xlu1 %524, %v378_v21  }
  0x93   : > { %387 = vperm.xlu1 %524, %v379_v23  }
  0xed   : > { %v263_v24 = vpop.permute.xlu0 %262 }
  0xf1   : > { %v267_v25 = vpop.permute.xlu1 %266  ;;  %v270_v26 = vpop.permute.xlu0 %269 }
  0xf2   : > { %v290_v27 = vpack.c.bf16 %v267_v25, %v263_v24 }
  0xf4   : > { %489 = vmatpush3.bf16.msra.mxu0 %v290_v27 }
  0xf5   : > { %v274_v28 = vpop.permute.xlu1 %273  ;;  %490 = vmatprep.subr.bf16.mxu0 %v551_v3  ;;  %v278_v29 = vpop.permute.xlu0 %277 }
  0xf6   : > { %v291_v30 = vpack.c.bf16 %v274_v28, %v270_v26 }
  0xf8   : > { %491 = vmatpush3.bf16.msra.mxu0 %v291_v30 }
  0xf9   : > { %v281_v31 = vpop.permute.xlu1 %280  ;;  %492 = vmatprep.subr.bf16.mxu0 %v551_v3 }
  0xfa   : > { %v285_v32 = vpop.permute.xlu0 %284  ;;  %v292_v33 = vpack.c.bf16 %v281_v31, %v278_v29 }
  0xfb   : > { %v293_v34 = vpack.c.bf16 %v285_v32, %v285_v32 }
  0xfc   : > { %493 = vmatpush3.bf16.msra.mxu0 %v292_v33 }
  0xfd   : > { %494 = vmatprep.subr.bf16.mxu0 %v551_v3  ;;  %v317_v35 = vsel %vm315_vm1, %v293_v34, 0 }
 0x100   : > { %495 = vmatpush3.bf16.msra.mxu0 %v317_v35 }
 0x103   : > { %497 = vmatmul.mubr.msk.bf16.vlgmr.msra.gmra.mrb[0].mxu0 %vm311_vm2, %v526_v36 }
 0x10a   : > { %v299_v37 = vpop.permute.xlu1 %298 }
 0x10b   : > { %v304_v39 = vpop.permute.xlu0 %303 }
 0x10e   : > { %v383_v57 = vpop.permute.xlu1 %382 }
 0x112   : > { %v388_v61 = vpop.permute.xlu1 %387 }
 0x1d6   : > { %v353_v38 = vpop.f32.mrb[0].mxu0 }
 0x1d7   : > { %v354_v40 = vadd.f32 %v353_v38, %v299_v37  ;;  %v498_v41 = vpop.f32.mrb[1].mxu0 }
 0x1d8   : > { %v356_v42 = vpop.f32.mrb[2].mxu0 }
 0x1d9   : > { %v360_v43 = vmul.f32 %v354_v40, %v354_v40  ;;  %v357_v44 = vadd.f32 %v356_v42, %v304_v39  ;;  %v499_v45 = vpop.f32.mrb[3].mxu0 }
 0x1db   : > { %v361_v46 = vmul.f32 %v357_v44, %v357_v44  ;;  %v363_v47 = vsel %vm362_vm3, %v360_v43, 0.0 }
 0x1dd   : > { %v364_v48 = vsel %vm362_vm3, %v361_v46, 0.0 }
 0x1de   : > { %v365_v49 = vadd.f32 %v364_v48, %v363_v47 }
 0x1e0   : > { %v366_v50 = vrot.slane %v365_v49, 4 }
 0x1e2   : > { %v367_v51 = vadd.f32 %v366_v50, %v365_v49 }
 0x1e4   : > { %v368_v52 = vrot.slane %v367_v51, 2 }
 0x1e6   : > { %v369_v53 = vadd.f32 %v368_v52, %v367_v51 }
 0x1e8   : > { %v370_v54 = vrot.slane %v369_v53, 1 }
 0x1ea   : > { %v371_v55 = vadd.f32 %v370_v54, %v369_v53 }
 0x1ec   : > { %v372_v56 = vmax.f32 %v371_v55, 1e-24 }
 0x1ee   : > { %527 = vrsqrt.f32 %v372_v56 }
 0x1f8   : > { %v528_v58 = vpop.eup %527 }
 0x1f9   : > { %v374_v59 = vmul.f32 %v528_v58, %v354_v40  ;;  %v375_v60 = vmul.f32 %v528_v58, %v357_v44 }
 0x1fb   : > { %v390_v62 = vmul.f32 %v383_v57, %v374_v59  ;;  %v391_v63 = vmul.f32 %v388_v61, %v375_v60 }
 0x1fd   : > { %v475_v0 = vmul.f32 -1.442695, %v390_v62  ;;  %v476_v1 = vmul.f32 -1.442695, %v391_v63 }
 0x1ff   : > { %529 = vpow2.f32 %v475_v0 }
 0x200   : > { %531 = vpow2.f32 %v476_v1 }
 0x209   : > { %v530_v2 = vpop.eup %529 }
 0x20a   : > { %v532_v3 = vpop.eup %531  ;;  %v398_v4 = vadd.f32 1.0, %v530_v2 }
 0x20b   : > { %v399_v5 = vadd.f32 1.0, %v532_v3 }
 0x20c   : > { %533 = vrcp.f32 %v398_v4 }
 0x20d   : > { %535 = vrcp.f32 %v399_v5 }
 0x216   : > { %v534_v6 = vpop.eup %533 }
 0x217   : > { %v536_v7 = vpop.eup %535  ;;  %v404_v8 = vmul.f32 %v534_v6, %v390_v62 }
 0x218   : > { %v405_v9 = vmul.f32 %v536_v7, %v391_v63 }
 0x219   : > { %406 = vst.msk [vmem:[%s221_s6] sm:$0xff] %vm362_vm3, %v404_v8 }
 0x21a   : > { %407 = vst.msk [vmem:[%s221_s6 + $0x8] sm:$0xff] %vm362_vm3, %v405_v9 }
 0x21b PF: > { %s15_s18 = sadd.s32 1, %s543_s18  }
 0x21c   : > { %p12_p4 = scmp.ge.s32.totalorder %s15_s18, 4  }
 0x21e   :  { %14 = sbr.rel (!%p12_p4) target bundleno = 1 (0x1), region = 70 }

// kernel: vae_forward.47
= control target key start
LH: loop header
LB: loop body
LE: loop exit
PB: predicated region body
PF: predicated region fallthrough
CT: control target
= control target key end

     0   :  { %s655_s18 = smov 0   ;;  %s719_s0 = inlined_call_operand.vmem [shape: f32[2,16,26], index: 0, kind: input, shape index: {}]   ;;  %s720_s1 = inlined_call_operand.vmem [shape: bf16[16,144], index: 1, kind: input, shape index: {}]   ;;  %s721_s2 = inlined_call_operand.vmem [shape: f32[16,1], index: 2, kind: input, shape index: {}]   ;;  %s722_s3 = inlined_call_operand.vmem [shape: f32[3,16], index: 3, kind: input, shape index: {}]   ;;  %s723_s4 = inlined_call_operand.vmem [shape: f32[16,1], index: 4, kind: input, shape index: {}]   ;;  %s724_s5 = inlined_call_operand.vmem [shape: f32[2,16,16], index: 5, kind: output, shape index: {}]  }
   0x1 LB: > { %s506_s19 = sadd.s32 4294967295, %s609_s18   ;;  %p510_p0 = scmp.ge.s32.totalorder %s609_s18, 1  ;;  %s609_s18 = sphi %s655_s18, %s15_s18  }
   0x2   : > { %p187_p1 = scmp.lt.s32.totalorder %s609_s18, 3 }
   0x4   : > { %p188_p2 = pnand %p510_p0, %p187_p1 }
   0x5   : > { %v516_v0 = vld [vmem:[%s722_s3 + $0x2] ss:$0 sm:$0xff] (!%p188_p2)  ;;  %s611_s22 = smov (!%p188_p2), 2   ;;  %v515_v1 = vld [vmem:[%s722_s3] ss:$0 sm:$0xff] (!%p188_p2)  ;;  %s612_s25 = smov (!%p188_p2), 6  }
   0x6   : > { %191 = sbr.rel (%p188_p2) target bundleno = 551 (0x227), region = 40  ;;  %241 = vrot.lane.b32.xlu0 (!%p188_p2), %v516_v0, %s611_s22  ;;  %252 = vrot.lane.b32.xlu1 (!%p188_p2), %v516_v0, %s612_s25  ;;  %p215_p3 = scmp.lt.s32.totalorder (!%p188_p2), %s506_s19, 1  ;;  %v614_v2 = vmov (!%p188_p2), 0   ;;  %v592_v33 = vld [vmem:[%s720_s1 + $0x4] ss:$8 sps:$4 sm:$0xff] (!%p188_p2)   ;;  %vm359_vm0 = vcmask (!%p188_p2), 130048  }
   0x7   : > { %s613_s26 = smov (!%p188_p2), 4   ;;  %363 = vmatprep.subr.bf16.mxu0 (!%p188_p2), %v614_v2  ;;  %s615_s27 = smov (!%p188_p2), 8   ;;  %589 = vset.pattern.permute.xlu0 (!%p188_p2), %v614_v2  ;;  %v338_v34 = vld [vmem:[%s721_s2] sm:$0xff] (!%p188_p2)  ;;  %v339_v37 = vld [vmem:[%s721_s2 + $0x8] sm:$0xff] (!%p188_p2) }
   0x8   : > { %588 = vset.pattern.permute.xlu1 (!%p188_p2), %v614_v2  ;;  %s616_s7 = smov (!%p188_p2), 10   ;;  %s617_s8 = smov (!%p188_p2), 127   ;;  %519 = vmatprep.mubr.msk.bf16.mxu0 (!%p188_p2), %vm359_vm0, %v592_v33  ;;  %v419_v35 = vld [vmem:[%s723_s4] sm:$0xff] (!%p188_p2)  ;;  %v420_v38 = vld [vmem:[%s723_s4 + $0x8] sm:$0xff] (!%p188_p2) }
   0x9   : > { %s618_s9 = smov (!%p188_p2), 126   ;;  %s619_s10 = smov (!%p188_p2), 124   ;;  %v421_v36 = vmul.f32 (!%p188_p2), 4.0, %v419_v35  ;;  %v422_v39 = vmul.f32 (!%p188_p2), 4.0, %v420_v38 }
   0xa   : > { %247 = vrot.lane.b32.xlu0 (!%p188_p2), %v515_v1, %s613_s26  ;;  %257 = vrot.lane.b32.xlu1 (!%p188_p2), %v515_v1, %s615_s27  ;;  %s620_s11 = smov (!%p188_p2), 123   ;;  %s621_s12 = smov (!%p188_p2), 122  }
   0xb   : > { %s622_s13 = smov (!%p188_p2), 120   ;;  %s623_s14 = smov (!%p188_p2), 119  }
   0xc   : > { %s624_s15 = smov (!%p188_p2), 118  }
   0xd   : > { %s726_s19 = smov (!%p215_p3, %s506_s19), 1 }
   0xe   : > { %s524_s28 = sshll.u32 %s726_s19, 4  ;;  %262 = vrot.lane.b32.xlu0 %v516_v0, %s616_s7 }
   0xf   : > { %s219_s6 = scalar_lea.vmem %s719_s0, %s524_s28 }
  0x10   : > { %v226_v3 = vld [vmem:[%s219_s6] sm:$0xff]  ;;  %v227_v4 = vld [vmem:[%s219_s6 + $0x8] sm:$0xff] }
  0x11   : > { %v548_v5 = vpack.i.bf16 %v227_v4, %v226_v3  ;;  %v233_v6 = vmul.f32 %v515_v1, %v226_v3  ;;  %v234_v7 = vmul.f32 %v515_v1, %v227_v4 }
  0x13   : > { %549 = vrot.lane.b32.xlu1 %v548_v5, %s617_s8  ;;  %v329_v8 = vpack.c.bf16 %v234_v7, %v233_v6  ;;  %s224_s8 = scalar_lea.vmem %s724_s5, %s524_s28 }
  0x15   : > { %364 = vmatpush1.bf16.msra.mxu0 %v329_v8 }
  0x16   : > { %365 = vmatprep.subr.bf16.mxu0 %v614_v2 }
  0x78   : > { %v242_v9 = vpop.permute.xlu0 %241  ;;  %v253_v12 = vpop.permute.xlu1 %252 }
  0x79   : > { %v244_v10 = vmul.f32 %v242_v9, %v226_v3  ;;  %v245_v11 = vmul.f32 %v242_v9, %v227_v4  ;;  %v255_v15 = vmul.f32 %v253_v12, %v226_v3  ;;  %v256_v16 = vmul.f32 %v253_v12, %v227_v4 }
  0x7b   : > { %v553_v13 = vpack.i.bf16 %v245_v11, %v244_v10  ;;  %v568_v23 = vpack.i.bf16 %v256_v16, %v255_v15 }
  0x7c   : > { %v248_v14 = vpop.permute.xlu0 %247  ;;  %v258_v19 = vpop.permute.xlu1 %257 }
  0x7d   : > { %v250_v17 = vmul.f32 %v248_v14, %v226_v3  ;;  %v251_v18 = vmul.f32 %v248_v14, %v227_v4  ;;  %554 = vrot.lane.b32.xlu0 %v553_v13, %s618_s9  ;;  %v260_v20 = vmul.f32 %v258_v19, %v226_v3  ;;  %v261_v21 = vmul.f32 %v258_v19, %v227_v4 }
  0x7f   : > { %v558_v22 = vpack.i.bf16 %v251_v18, %v250_v17  ;;  %v573_v25 = vpack.i.bf16 %v261_v21, %v260_v20 }
  0x80   : > { %v263_v24 = vpop.permute.xlu0 %262 }
  0x81   : > { %559 = vrot.lane.b32.xlu1 %v558_v22, %s619_s10  ;;  %564 = vrot.lane.b32.xlu0 %v548_v5, %s620_s11  ;;  %v265_v26 = vmul.f32 %v263_v24, %v226_v3  ;;  %v266_v27 = vmul.f32 %v263_v24, %v227_v4 }
  0x83   : > { %v583_v31 = vpack.i.bf16 %v266_v27, %v265_v26 }
  0x85   : > { %v550_v28 = vpop.permute.xlu1 %549  ;;  %569 = vrot.lane.b32.xlu1 %v568_v23, %s621_s12  ;;  %574 = vrot.lane.b32.xlu0 %v573_v25, %s622_s13 }
  0x86   : > { %v552_v29 = vunpack.i.h.bf16 %v550_v28  ;;  %v551_v30 = vunpack.i.l.bf16 %v550_v28 }
  0x88   : > { %v330_v32 = vpack.c.bf16 %v552_v29, %v551_v30 }
  0x89   : > { %579 = vrot.lane.b32.xlu1 %v548_v5, %s623_s14  ;;  %584 = vrot.lane.b32.xlu0 %v583_v31, %s624_s15  ;;  %v590_v5 = vld [vmem:[%s720_s1] ss:$8 sps:$4 sm:$0xff]  }
  0x8a   : > { %366 = vmatpush1.bf16.msra.mxu0 %v330_v32 }
  0x8b   : > { %367 = vmatprep.subr.bf16.mxu0 %v614_v2 }
  0x8d   : > { %342 = vperm.xlu1 %588, %v338_v34   ;;  %347 = vperm.xlu0 %589, %v339_v37  }
  0x91   : > { %425 = vperm.xlu1 %588, %v421_v36  }
  0x95   : > { %430 = vperm.xlu1 %588, %v422_v39  }
  0xef   : > { %v555_v40 = vpop.permute.xlu0 %554 }
  0xf0   : > { %v557_v41 = vunpack.i.h.bf16 %v555_v40  ;;  %v556_v42 = vunpack.i.l.bf16 %v555_v40 }
  0xf2   : > { %v331_v43 = vpack.c.bf16 %v557_v41, %v556_v42 }
  0xf3   : > { %v560_v44 = vpop.permute.xlu1 %559  ;;  %v565_v45 = vpop.permute.xlu0 %564 }
  0xf4   : > { %v562_v46 = vunpack.i.h.bf16 %v560_v44  ;;  %v561_v47 = vunpack.i.l.bf16 %v560_v44  ;;  %368 = vmatpush1.bf16.msra.mxu0 %v331_v43  ;;  %v567_v48 = vunpack.i.h.bf16 %v565_v45  ;;  %v566_v49 = vunpack.i.l.bf16 %v565_v45 }
  0xf5   : > { %369 = vmatprep.subr.bf16.mxu0 %v614_v2 }
  0xf6   : > { %v332_v50 = vpack.c.bf16 %v562_v46, %v561_v47  ;;  %v333_v52 = vpack.c.bf16 %v567_v48, %v566_v49 }
  0xf7   : > { %v570_v51 = vpop.permute.xlu1 %569  ;;  %v575_v55 = vpop.permute.xlu0 %574 }
  0xf8   : > { %370 = vmatpush1.bf16.msra.mxu0 %v332_v50  ;;  %v572_v53 = vunpack.i.h.bf16 %v570_v51  ;;  %v571_v54 = vunpack.i.l.bf16 %v570_v51  ;;  %v577_v57 = vunpack.i.h.bf16 %v575_v55  ;;  %v576_v58 = vunpack.i.l.bf16 %v575_v55 }
  0xf9   : > { %371 = vmatprep.subr.bf16.mxu0 %v614_v2 }
  0xfa   : > { %v334_v56 = vpack.c.bf16 %v572_v53, %v571_v54  ;;  %v335_v60 = vpack.c.bf16 %v577_v57, %v576_v58 }
  0xfb   : > { %v580_v59 = vpop.permute.xlu1 %579  ;;  %v585_v63 = vpop.permute.xlu0 %584 }
  0xfc   : > { %372 = vmatpush1.bf16.msra.mxu0 %v333_v52  ;;  %v582_v61 = vunpack.i.h.bf16 %v580_v59  ;;  %v581_v62 = vunpack.i.l.bf16 %v580_v59  ;;  %v587_v1 = vunpack.i.h.bf16 %v585_v63  ;;  %v586_v3 = vunpack.i.l.bf16 %v585_v63 }
  0xfd   : > { %373 = vmatprep.subr.bf16.mxu0 %v614_v2 }
  0xfe   : > { %v336_v0 = vpack.c.bf16 %v582_v61, %v581_v62  ;;  %v337_v4 = vpack.c.bf16 %v587_v1, %v586_v3 }
 0x100   : > { %374 = vmatpush1.bf16.msra.mxu0 %v334_v56 }
 0x101   : > { %375 = vmatprep.subr.bf16.mxu0 %v614_v2 }
 0x104   : > { %376 = vmatpush1.bf16.msra.mxu0 %v335_v60 }
 0x105   : > { %377 = vmatprep.subr.bf16.mxu0 %v614_v2 }
 0x108   : > { %378 = vmatpush1.bf16.msra.mxu0 %v336_v0 }
 0x109   : > { %379 = vmatprep.subr.bf16.mxu0 %v614_v2 }
 0x10c   : > { %380 = vmatpush1.bf16.msra.mxu0 %v337_v4  ;;  %v343_v6 = vpop.permute.xlu1 %342  ;;  %v348_v8 = vpop.permute.xlu0 %347 }
 0x10f   : > { %396 = vmatmul.mubr.bf16.vlgmr.msra.gmra.mrb[0].mxu0 %v590_v5 }
 0x110   : > { %v426_v25 = vpop.permute.xlu1 %425 }
 0x114   : > { %v431_v29 = vpop.permute.xlu1 %430 }
 0x1e2   : > { %v397_v7 = vpop.f32.mrb[0].mxu0 }
 0x1e3   : > { %v398_v9 = vadd.f32 %v397_v7, %v343_v6  ;;  %v399_v10 = vpop.f32.mrb[1].mxu0 }
 0x1e4   : > { %v400_v11 = vpop.f32.mrb[2].mxu0 }
 0x1e5   : > { %v404_v12 = vmul.f32 %v398_v9, %v398_v9  ;;  %v401_v13 = vadd.f32 %v400_v11, %v348_v8  ;;  %v402_v14 = vpop.f32.mrb[3].mxu0 }
 0x1e7   : > { %v405_v15 = vmul.f32 %v401_v13, %v401_v13  ;;  %v406_v16 = vsel %vm359_vm0, %v404_v12, 0.0 }
 0x1e9   : > { %v407_v2 = vsel %vm359_vm0, %v405_v15, 0.0 }
 0x1ea   : > { %v408_v17 = vadd.f32 %v407_v2, %v406_v16 }
 0x1ec   : > { %v409_v18 = vrot.slane %v408_v17, 4 }
 0x1ee   : > { %v410_v19 = vadd.f32 %v409_v18, %v408_v17 }
 0x1f0   : > { %v411_v20 = vrot.slane %v410_v19, 2 }
 0x1f2   : > { %v412_v21 = vadd.f32 %v411_v20, %v410_v19 }
 0x1f4   : > { %v413_v22 = vrot.slane %v412_v21, 1 }
 0x1f6   : > { %v414_v23 = vadd.f32 %v413_v22, %v412_v21 }
 0x1f8   : > { %v415_v24 = vmax.f32 %v414_v23, 1e-24 }
 0x1fa   : > { %593 = vrsqrt.f32 %v415_v24 }
 0x204   : > { %v594_v26 = vpop.eup %593 }
 0x205   : > { %v417_v27 = vmul.f32 %v594_v26, %v398_v9  ;;  %v418_v28 = vmul.f32 %v594_v26, %v401_v13 }
 0x207   : > { %v433_v30 = vmul.f32 %v426_v25, %v417_v27  ;;  %v434_v31 = vmul.f32 %v431_v29, %v418_v28 }
 0x209   : > { %v520_v32 = vmul.f32 -1.442695, %v433_v30  ;;  %v521_v33 = vmul.f32 -1.442695, %v434_v31 }
 0x20b   : > { %595 = vpow2.f32 %v520_v32 }
 0x20c   : > { %597 = vpow2.f32 %v521_v33 }
 0x215   : > { %v596_v34 = vpop.eup %595 }
 0x216   : > { %v598_v35 = vpop.eup %597  ;;  %v441_v36 = vadd.f32 1.0, %v596_v34 }
 0x217   : > { %v442_v37 = vadd.f32 1.0, %v598_v35 }
 0x218   : > { %599 = vrcp.f32 %v441_v36 }
 0x219   : > { %601 = vrcp.f32 %v442_v37 }
 0x222   : > { %v600_v38 = vpop.eup %599 }
 0x223   : > { %v602_v39 = vpop.eup %601  ;;  %v447_v40 = vmul.f32 %v600_v38, %v433_v30 }
 0x224   : > { %v448_v41 = vmul.f32 %v602_v39, %v434_v31 }
 0x225   : > { %449 = vst.msk [vmem:[%s224_s8] sm:$0xff] %vm359_vm0, %v447_v40 }
 0x226   : > { %450 = vst.msk [vmem:[%s224_s8 + $0x8] sm:$0xff] %vm359_vm0, %v448_v41 }
 0x227 PF: > { %s15_s18 = sadd.s32 1, %s609_s18  }
 0x228   : > { %p12_p4 = scmp.ge.s32.totalorder %s15_s18, 4  }
 0x22a   :  { %14 = sbr.rel (!%p12_p4) target bundleno = 1 (0x1), region = 70 }

// kernel: vae_forward.48
= control target key start
LH: loop header
LB: loop body
LE: loop exit
PB: predicated region body
PF: predicated region fallthrough
CT: control target
= control target key end

     0   :  { %s726_s21 = smov 0   ;;  %s791_s0 = inlined_call_operand.vmem [shape: f32[2,16,26], index: 0, kind: input, shape index: {}]   ;;  %s792_s1 = inlined_call_operand.vmem [shape: bf16[16,144], index: 1, kind: input, shape index: {}]   ;;  %s793_s2 = inlined_call_operand.vmem [shape: f32[16,1], index: 2, kind: input, shape index: {}]   ;;  %s794_s3 = inlined_call_operand.vmem [shape: f32[3,16], index: 3, kind: input, shape index: {}]   ;;  %s795_s4 = inlined_call_operand.vmem [shape: f32[16,1], index: 4, kind: input, shape index: {}]   ;;  %s796_s5 = inlined_call_operand.vmem [shape: f32[2,16,16], index: 5, kind: input, shape index: {}]   ;;  %s797_s6 = inlined_call_operand.vmem [shape: f32[2,16,16], index: 6, kind: output, shape index: {}]  }
   0x1 LB: > { %s569_s22 = sadd.s32 4294967295, %s675_s21   ;;  %p573_p0 = scmp.ge.s32.totalorder %s675_s21, 1  ;;  %s675_s21 = sphi %s726_s21, %s16_s21  }
   0x2   : > { %p222_p1 = scmp.lt.s32.totalorder %s675_s21, 3 }
   0x4   : > { %p223_p2 = pnand %p573_p0, %p222_p1 }
   0x5   : > { %v581_v0 = vld [vmem:[%s794_s3 + $0x2] ss:$0 sm:$0xff] (!%p223_p2)  ;;  %s677_s25 = smov (!%p223_p2), 2   ;;  %v580_v1 = vld [vmem:[%s794_s3] ss:$0 sm:$0xff] (!%p223_p2)  ;;  %s678_s28 = smov (!%p223_p2), 6  }
   0x6   : > { %226 = sbr.rel (%p223_p2) target bundleno = 553 (0x229), region = 44  ;;  %288 = vrot.lane.b32.xlu0 (!%p223_p2), %v581_v0, %s677_s25  ;;  %299 = vrot.lane.b32.xlu1 (!%p223_p2), %v581_v0, %s678_s28  ;;  %p257_p3 = scmp.lt.s32.totalorder (!%p223_p2), %s569_s22, 1  ;;  %v680_v2 = vmov (!%p223_p2), 0   ;;  %v658_v33 = vld [vmem:[%s792_s1 + $0x4] ss:$8 sps:$4 sm:$0xff] (!%p223_p2)   ;;  %vm406_vm0 = vcmask (!%p223_p2), 130048  }
   0x7   : > { %s679_s29 = smov (!%p223_p2), 4   ;;  %410 = vmatprep.subr.bf16.mxu0 (!%p223_p2), %v680_v2  ;;  %s681_s30 = smov (!%p223_p2), 8   ;;  %655 = vset.pattern.permute.xlu0 (!%p223_p2), %v680_v2  ;;  %v385_v34 = vld [vmem:[%s793_s2] sm:$0xff] (!%p223_p2)  ;;  %v386_v37 = vld [vmem:[%s793_s2 + $0x8] sm:$0xff] (!%p223_p2) }
   0x8   : > { %654 = vset.pattern.permute.xlu1 (!%p223_p2), %v680_v2  ;;  %s682_s11 = smov (!%p223_p2), 10   ;;  %s683_s12 = smov (!%p223_p2), 127   ;;  %584 = vmatprep.mubr.msk.bf16.mxu0 (!%p223_p2), %vm406_vm0, %v658_v33  ;;  %v466_v35 = vld [vmem:[%s795_s4] sm:$0xff] (!%p223_p2)  ;;  %v467_v38 = vld [vmem:[%s795_s4 + $0x8] sm:$0xff] (!%p223_p2) }
   0x9   : > { %s684_s13 = smov (!%p223_p2), 126   ;;  %s685_s14 = smov (!%p223_p2), 124   ;;  %v468_v36 = vmul.f32 (!%p223_p2), 4.0, %v466_v35  ;;  %v469_v39 = vmul.f32 (!%p223_p2), 4.0, %v467_v38 }
   0xa   : > { %294 = vrot.lane.b32.xlu0 (!%p223_p2), %v580_v1, %s679_s29  ;;  %304 = vrot.lane.b32.xlu1 (!%p223_p2), %v580_v1, %s681_s30  ;;  %s686_s15 = smov (!%p223_p2), 123   ;;  %s687_s16 = smov (!%p223_p2), 122  }
   0xb   : > { %s688_s17 = smov (!%p223_p2), 120   ;;  %s689_s18 = smov (!%p223_p2), 119  }
   0xc   : > { %s690_s19 = smov (!%p223_p2), 118  }
   0xd   : > { %s799_s22 = smov (!%p257_p3, %s569_s22), 1 }
   0xe   : > { %s741_s7 = sshll.u32 %s799_s22, 4  ;;  %309 = vrot.lane.b32.xlu0 %v581_v0, %s682_s11 }
   0xf   : > { %s261_s10 = scalar_lea.vmem %s791_s0, %s741_s7 }
  0x10   : > { %v273_v3 = vld [vmem:[%s261_s10] sm:$0xff]  ;;  %v274_v4 = vld [vmem:[%s261_s10 + $0x8] sm:$0xff] }
  0x11   : > { %v614_v5 = vpack.i.bf16 %v274_v4, %v273_v3  ;;  %v280_v6 = vmul.f32 %v580_v1, %v273_v3  ;;  %v281_v7 = vmul.f32 %v580_v1, %v274_v4 }
  0x13   : > { %615 = vrot.lane.b32.xlu1 %v614_v5, %s683_s12  ;;  %v376_v8 = vpack.c.bf16 %v281_v7, %v280_v6  ;;  %s266_s12 = scalar_lea.vmem %s796_s5, %s741_s7 }
  0x15   : > { %411 = vmatpush1.bf16.msra.mxu0 %v376_v8 }
  0x16   : > { %412 = vmatprep.subr.bf16.mxu0 %v680_v2 }
  0x78   : > { %v289_v9 = vpop.permute.xlu0 %288  ;;  %v300_v12 = vpop.permute.xlu1 %299 }
  0x79   : > { %v291_v10 = vmul.f32 %v289_v9, %v273_v3  ;;  %v292_v11 = vmul.f32 %v289_v9, %v274_v4  ;;  %v302_v15 = vmul.f32 %v300_v12, %v273_v3  ;;  %v303_v16 = vmul.f32 %v300_v12, %v274_v4 }
  0x7b   : > { %v619_v13 = vpack.i.bf16 %v292_v11, %v291_v10  ;;  %v634_v23 = vpack.i.bf16 %v303_v16, %v302_v15 }
  0x7c   : > { %v295_v14 = vpop.permute.xlu0 %294  ;;  %v305_v19 = vpop.permute.xlu1 %304 }
  0x7d   : > { %v297_v17 = vmul.f32 %v295_v14, %v273_v3  ;;  %v298_v18 = vmul.f32 %v295_v14, %v274_v4  ;;  %620 = vrot.lane.b32.xlu0 %v619_v13, %s684_s13  ;;  %v307_v20 = vmul.f32 %v305_v19, %v273_v3  ;;  %v308_v21 = vmul.f32 %v305_v19, %v274_v4 }
  0x7f   : > { %v624_v22 = vpack.i.bf16 %v298_v18, %v297_v17  ;;  %v639_v25 = vpack.i.bf16 %v308_v21, %v307_v20 }
  0x80   : > { %v310_v24 = vpop.permute.xlu0 %309 }
  0x81   : > { %625 = vrot.lane.b32.xlu1 %v624_v22, %s685_s14  ;;  %630 = vrot.lane.b32.xlu0 %v614_v5, %s686_s15  ;;  %v312_v26 = vmul.f32 %v310_v24, %v273_v3  ;;  %v313_v27 = vmul.f32 %v310_v24, %v274_v4  ;;  %s271_s15 = scalar_lea.vmem %s797_s6, %s741_s7 }
  0x83   : > { %v649_v31 = vpack.i.bf16 %v313_v27, %v312_v26 }
  0x85   : > { %v616_v28 = vpop.permute.xlu1 %615  ;;  %635 = vrot.lane.b32.xlu1 %v634_v23, %s687_s16  ;;  %640 = vrot.lane.b32.xlu0 %v639_v25, %s688_s17 }
  0x86   : > { %v618_v29 = vunpack.i.h.bf16 %v616_v28  ;;  %v617_v30 = vunpack.i.l.bf16 %v616_v28 }
  0x88   : > { %v377_v32 = vpack.c.bf16 %v618_v29, %v617_v30 }
  0x89   : > { %645 = vrot.lane.b32.xlu1 %v614_v5, %s689_s18  ;;  %650 = vrot.lane.b32.xlu0 %v649_v31, %s690_s19  ;;  %v656_v5 = vld [vmem:[%s792_s1] ss:$8 sps:$4 sm:$0xff]  }
  0x8a   : > { %413 = vmatpush1.bf16.msra.mxu0 %v377_v32 }
  0x8b   : > { %414 = vmatprep.subr.bf16.mxu0 %v680_v2 }
  0x8d   : > { %389 = vperm.xlu1 %654, %v385_v34   ;;  %394 = vperm.xlu0 %655, %v386_v37  }
  0x91   : > { %472 = vperm.xlu1 %654, %v468_v36  }
  0x95   : > { %477 = vperm.xlu1 %654, %v469_v39   ;;  %v496_v39 = vld [vmem:[%s266_s12] sm:$0xff] }
  0xef   : > { %v621_v40 = vpop.permute.xlu0 %620 }
  0xf0   : > { %v623_v41 = vunpack.i.h.bf16 %v621_v40  ;;  %v622_v42 = vunpack.i.l.bf16 %v621_v40 }
  0xf2   : > { %v378_v43 = vpack.c.bf16 %v623_v41, %v622_v42  ;;  %v497_v42 = vld [vmem:[%s266_s12 + $0x8] sm:$0xff] }
  0xf3   : > { %v626_v44 = vpop.permute.xlu1 %625  ;;  %v631_v45 = vpop.permute.xlu0 %630 }
  0xf4   : > { %v628_v46 = vunpack.i.h.bf16 %v626_v44  ;;  %v627_v47 = vunpack.i.l.bf16 %v626_v44  ;;  %415 = vmatpush1.bf16.msra.mxu0 %v378_v43  ;;  %v633_v48 = vunpack.i.h.bf16 %v631_v45  ;;  %v632_v49 = vunpack.i.l.bf16 %v631_v45 }
  0xf5   : > { %416 = vmatprep.subr.bf16.mxu0 %v680_v2 }
  0xf6   : > { %v379_v50 = vpack.c.bf16 %v628_v46, %v627_v47  ;;  %v380_v52 = vpack.c.bf16 %v633_v48, %v632_v49 }
  0xf7   : > { %v636_v51 = vpop.permute.xlu1 %635  ;;  %v641_v55 = vpop.permute.xlu0 %640 }
  0xf8   : > { %417 = vmatpush1.bf16.msra.mxu0 %v379_v50  ;;  %v638_v53 = vunpack.i.h.bf16 %v636_v51  ;;  %v637_v54 = vunpack.i.l.bf16 %v636_v51  ;;  %v643_v57 = vunpack.i.h.bf16 %v641_v55  ;;  %v642_v58 = vunpack.i.l.bf16 %v641_v55 }
  0xf9   : > { %418 = vmatprep.subr.bf16.mxu0 %v680_v2 }
  0xfa   : > { %v381_v56 = vpack.c.bf16 %v638_v53, %v637_v54  ;;  %v382_v60 = vpack.c.bf16 %v643_v57, %v642_v58 }
  0xfb   : > { %v646_v59 = vpop.permute.xlu1 %645  ;;  %v651_v63 = vpop.permute.xlu0 %650 }
  0xfc   : > { %419 = vmatpush1.bf16.msra.mxu0 %v380_v52  ;;  %v648_v61 = vunpack.i.h.bf16 %v646_v59  ;;  %v647_v62 = vunpack.i.l.bf16 %v646_v59  ;;  %v653_v1 = vunpack.i.h.bf16 %v651_v63  ;;  %v652_v3 = vunpack.i.l.bf16 %v651_v63 }
  0xfd   : > { %420 = vmatprep.subr.bf16.mxu0 %v680_v2 }
  0xfe   : > { %v383_v0 = vpack.c.bf16 %v648_v61, %v647_v62  ;;  %v384_v4 = vpack.c.bf16 %v653_v1, %v652_v3 }
 0x100   : > { %421 = vmatpush1.bf16.msra.mxu0 %v381_v56 }
 0x101   : > { %422 = vmatprep.subr.bf16.mxu0 %v680_v2 }
 0x104   : > { %423 = vmatpush1.bf16.msra.mxu0 %v382_v60 }
 0x105   : > { %424 = vmatprep.subr.bf16.mxu0 %v680_v2 }
 0x108   : > { %425 = vmatpush1.bf16.msra.mxu0 %v383_v0 }
 0x109   : > { %426 = vmatprep.subr.bf16.mxu0 %v680_v2 }
 0x10c   : > { %427 = vmatpush1.bf16.msra.mxu0 %v384_v4  ;;  %v390_v6 = vpop.permute.xlu1 %389  ;;  %v395_v8 = vpop.permute.xlu0 %394 }
 0x10f   : > { %443 = vmatmul.mubr.bf16.vlgmr.msra.gmra.mrb[0].mxu0 %v656_v5 }
 0x110   : > { %v473_v25 = vpop.permute.xlu1 %472 }
 0x114   : > { %v478_v29 = vpop.permute.xlu1 %477 }
 0x1e2   : > { %v444_v7 = vpop.f32.mrb[0].mxu0 }
 0x1e3   : > { %v445_v9 = vadd.f32 %v444_v7, %v390_v6  ;;  %v446_v10 = vpop.f32.mrb[1].mxu0 }
 0x1e4   : > { %v447_v11 = vpop.f32.mrb[2].mxu0 }
 0x1e5   : > { %v451_v12 = vmul.f32 %v445_v9, %v445_v9  ;;  %v448_v13 = vadd.f32 %v447_v11, %v395_v8  ;;  %v449_v14 = vpop.f32.mrb[3].mxu0 }
 0x1e7   : > { %v452_v15 = vmul.f32 %v448_v13, %v448_v13  ;;  %v453_v16 = vsel %vm406_vm0, %v451_v12, 0.0 }
 0x1e9   : > { %v454_v2 = vsel %vm406_vm0, %v452_v15, 0.0 }
 0x1ea   : > { %v455_v17 = vadd.f32 %v454_v2, %v453_v16 }
 0x1ec   : > { %v456_v18 = vrot.slane %v455_v17, 4 }
 0x1ee   : > { %v457_v19 = vadd.f32 %v456_v18, %v455_v17 }
 0x1f0   : > { %v458_v20 = vrot.slane %v457_v19, 2 }
 0x1f2   : > { %v459_v21 = vadd.f32 %v458_v20, %v457_v19 }
 0x1f4   : > { %v460_v22 = vrot.slane %v459_v21, 1 }
 0x1f6   : > { %v461_v23 = vadd.f32 %v460_v22, %v459_v21 }
 0x1f8   : > { %v462_v24 = vmax.f32 %v461_v23, 1e-24 }
 0x1fa   : > { %659 = vrsqrt.f32 %v462_v24 }
 0x204   : > { %v660_v26 = vpop.eup %659 }
 0x205   : > { %v464_v27 = vmul.f32 %v660_v26, %v445_v9  ;;  %v465_v28 = vmul.f32 %v660_v26, %v448_v13 }
 0x207   : > { %v480_v30 = vmul.f32 %v473_v25, %v464_v27  ;;  %v481_v31 = vmul.f32 %v478_v29, %v465_v28 }
 0x209   : > { %v585_v32 = vmul.f32 -1.442695, %v480_v30  ;;  %v586_v33 = vmul.f32 -1.442695, %v481_v31 }
 0x20b   : > { %661 = vpow2.f32 %v585_v32 }
 0x20c   : > { %663 = vpow2.f32 %v586_v33 }
 0x215   : > { %v662_v34 = vpop.eup %661 }
 0x216   : > { %v664_v35 = vpop.eup %663  ;;  %v488_v36 = vadd.f32 1.0, %v662_v34 }
 0x217   : > { %v489_v37 = vadd.f32 1.0, %v664_v35 }
 0x218   : > { %665 = vrcp.f32 %v488_v36 }
 0x219   : > { %667 = vrcp.f32 %v489_v37 }
 0x222   : > { %v666_v38 = vpop.eup %665 }
 0x223   : > { %v668_v40 = vpop.eup %667  ;;  %v494_v41 = vmul.f32 %v666_v38, %v480_v30 }
 0x224   : > { %v495_v43 = vmul.f32 %v668_v40, %v481_v31 }
 0x225   : > { %v498_v44 = vadd.f32 %v496_v39, %v494_v41 }
 0x226   : > { %v499_v45 = vadd.f32 %v497_v42, %v495_v43 }
 0x227   : > { %500 = vst.msk [vmem:[%s271_s15] sm:$0xff] %vm406_vm0, %v498_v44 }
 0x228   : > { %501 = vst.msk [vmem:[%s271_s15 + $0x8] sm:$0xff] %vm406_vm0, %v499_v45 }
 0x229 PF: > { %s16_s21 = sadd.s32 1, %s675_s21  }
 0x22a   : > { %p13_p4 = scmp.ge.s32.totalorder %s16_s21, 4  }
 0x22c   :  { %15 = sbr.rel (!%p13_p4) target bundleno = 1 (0x1), region = 77 }

// kernel: vae_forward.46
= control target key start
LH: loop header
LB: loop body
LE: loop exit
PB: predicated region body
PF: predicated region fallthrough
CT: control target
= control target key end

     0   :  { %s870_s27 = smov 0   ;;  %s947_s0 = inlined_call_operand.vmem [shape: f32[2,16,26], index: 0, kind: input, shape index: {}]   ;;  %s948_s1 = inlined_call_operand.vmem [shape: bf16[16,144], index: 1, kind: input, shape index: {}]   ;;  %s949_s2 = inlined_call_operand.vmem [shape: f32[16,1], index: 2, kind: input, shape index: {}]   ;;  %s950_s3 = inlined_call_operand.vmem [shape: f32[3,16], index: 3, kind: input, shape index: {}]   ;;  %s951_s4 = inlined_call_operand.vmem [shape: f32[16,1], index: 4, kind: input, shape index: {}]   ;;  %s952_s5 = inlined_call_operand.vmem [shape: f32[2,8,16], index: 5, kind: input, shape index: {}]   ;;  %s953_s6 = inlined_call_operand.vmem [shape: bf16[16,8], index: 6, kind: input, shape index: {}]   ;;  %s954_s7 = inlined_call_operand.vmem [shape: f32[16,1], index: 7, kind: input, shape index: {}]   ;;  %s955_s8 = inlined_call_operand.vmem [shape: f32[2,16,16], index: 8, kind: output, shape index: {}]  }
   0x1 LB: > { %s690_s28 = sadd.s32 4294967295, %s807_s27   ;;  %p694_p0 = scmp.ge.s32.totalorder %s807_s27, 1  ;;  %s807_s27 = sphi %s870_s27, %s18_s27  }
   0x2   : > { %p271_p1 = scmp.lt.s32.totalorder %s807_s27, 3 }
   0x4   : > { %p272_p2 = pnand %p694_p0, %p271_p1 }
   0x5   : > { %v701_v0 = vld [vmem:[%s950_s3 + $0x2] ss:$0 sm:$0xff] (!%p272_p2)  ;;  %s809_s9 = smov (!%p272_p2), 2   ;;  %v700_v1 = vld [vmem:[%s950_s3] ss:$0 sm:$0xff] (!%p272_p2)  ;;  %s810_s12 = smov (!%p272_p2), 6  }
   0x6   : > { %275 = sbr.rel (%p272_p2) target bundleno = 555 (0x22b), region = 52  ;;  %339 = vrot.lane.b32.xlu0 (!%p272_p2), %v701_v0, %s809_s9  ;;  %350 = vrot.lane.b32.xlu1 (!%p272_p2), %v701_v0, %s810_s12  ;;  %p309_p3 = scmp.lt.s32.totalorder (!%p272_p2), %s690_s28, 1  ;;  %v812_v2 = vmov (!%p272_p2), 0   ;;  %v789_v33 = vld [vmem:[%s948_s1 + $0x4] ss:$8 sps:$4 sm:$0xff] (!%p272_p2)   ;;  %vm457_vm0 = vcmask (!%p272_p2), 130048  }
   0x7   : > { %s811_s13 = smov (!%p272_p2), 4   ;;  %461 = vmatprep.subr.bf16.mxu0 (!%p272_p2), %v812_v2  ;;  %s813_s14 = smov (!%p272_p2), 8   ;;  %786 = vset.pattern.permute.xlu0 (!%p272_p2), %v812_v2  ;;  %v823_v34 = vmov (!%p272_p2), 0.0   ;;  %vm824_vm1 = vmmov (!%p272_p2), 0   ;;  %v436_v35 = vld [vmem:[%s949_s2] sm:$0xff] (!%p272_p2)  ;;  %vm560_vm2 = vcmask (!%p272_p2), 1043456  }
   0x8   : > { %785 = vset.pattern.permute.xlu1 (!%p272_p2), %v812_v2  ;;  %s814_s19 = smov (!%p272_p2), 10   ;;  %s815_s20 = smov (!%p272_p2), 127   ;;  %704 = vmatprep.mubr.msk.bf16.mxu0 (!%p272_p2), %vm457_vm0, %v789_v33  ;;  %v517_v36 = vld [vmem:[%s951_s4] sm:$0xff] (!%p272_p2)  ;;  %v437_v39 = vld [vmem:[%s949_s2 + $0x8] sm:$0xff] (!%p272_p2)  ;;  %vm556_vm3 = vcmask (!%p272_p2), 64512  }
   0x9   : > { %s816_s21 = smov (!%p272_p2), 126   ;;  %s817_s22 = smov (!%p272_p2), 124   ;;  %715 = vmatprep.subr.bf16.mxu1 (!%p272_p2), %v823_v34  ;;  %717 = vmatprep.mubr.msk.bf16.mxu1 (!%p272_p2), %vm824_vm1, %v823_v34  ;;  %v519_v38 = vmul.f32 (!%p272_p2), 4.0, %v517_v36  ;;  %v518_v41 = vld [vmem:[%s951_s4 + $0x8] sm:$0xff] (!%p272_p2)  ;;  %v607_v42 = vld [vmem:[%s954_s7] sm:$0xff] (!%p272_p2) }
   0xa   : > { %345 = vrot.lane.b32.xlu0 (!%p272_p2), %v700_v1, %s811_s13  ;;  %355 = vrot.lane.b32.xlu1 (!%p272_p2), %v700_v1, %s813_s14  ;;  %s818_s23 = smov (!%p272_p2), 123   ;;  %s819_s24 = smov (!%p272_p2), 122   ;;  %v790_v44 = vld [vmem:[%s953_s6] sm:$0xff] (!%p272_p2)   ;;  %v520_v45 = vmul.f32 (!%p272_p2), 4.0, %v518_v41  ;;  %v608_v46 = vld [vmem:[%s954_s7 + $0x8] sm:$0xff] (!%p272_p2) }
   0xb   : > { %s820_s25 = smov (!%p272_p2), 120   ;;  %s821_s26 = smov (!%p272_p2), 119  }
   0xc   : > { %s822_s29 = smov (!%p272_p2), 118  }
   0xd   : > { %s957_s28 = smov (!%p309_p3, %s690_s28), 1 }
   0xe   : > { %s711_s15 = sshll.u32 %s957_s28, 4  ;;  %360 = vrot.lane.b32.xlu0 %v701_v0, %s814_s19  ;;  %s697_s10 = sshll.u32 %s957_s28, 3 }
   0xf   : > { %s313_s18 = scalar_lea.vmem %s947_s0, %s711_s15  ;;  %s317_s13 = scalar_lea.vmem %s952_s5, %s697_s10 }
  0x10   : > { %v324_v3 = vld [vmem:[%s313_s18] sm:$0xff]  ;;  %v325_v4 = vld [vmem:[%s313_s18 + $0x8] sm:$0xff] }
  0x11   : > { %v745_v5 = vpack.i.bf16 %v325_v4, %v324_v3  ;;  %v331_v6 = vmul.f32 %v700_v1, %v324_v3  ;;  %v332_v7 = vmul.f32 %v700_v1, %v325_v4  ;;  %v549_v37 = vld [vmem:[%s317_s13] sm:$0xff]  ;;  %s322_s13 = scalar_lea.vmem %s955_s8, %s711_s15 }
  0x12   : > { %v550_v40 = vpack.c.bf16 %v549_v37, %v549_v37 }
  0x13   : > { %746 = vrot.lane.b32.xlu1 %v745_v5, %s815_s20  ;;  %v427_v8 = vpack.c.bf16 %v332_v7, %v331_v6 }
  0x14   : > { %v562_v43 = vsel %vm560_vm2, %v550_v40, 0 }
  0x15   : > { %462 = vmatpush1.bf16.msra.mxu0 %v427_v8  ;;  %716 = vmatpush3.bf16.msra.mxu1 %v562_v43 }
  0x16   : > { %463 = vmatprep.subr.bf16.mxu0 %v812_v2 }
  0x18   : > { %718 = vmatmul.mubr.msk.bf16.vlgmr.msra.gmra.mrb[0].mxu1 %vm556_vm3, %v790_v44 }
  0x78   : > { %v340_v9 = vpop.permute.xlu0 %339  ;;  %v351_v12 = vpop.permute.xlu1 %350 }
  0x79   : > { %v342_v10 = vmul.f32 %v340_v9, %v324_v3  ;;  %v343_v11 = vmul.f32 %v340_v9, %v325_v4  ;;  %v353_v15 = vmul.f32 %v351_v12, %v324_v3  ;;  %v354_v16 = vmul.f32 %v351_v12, %v325_v4  ;;  %v787_v12 = vld [vmem:[%s948_s1] ss:$8 sps:$4 sm:$0xff]  }
  0x7b   : > { %v750_v13 = vpack.i.bf16 %v343_v11, %v342_v10  ;;  %v765_v23 = vpack.i.bf16 %v354_v16, %v353_v15 }
  0x7c   : > { %v346_v14 = vpop.permute.xlu0 %345  ;;  %v356_v19 = vpop.permute.xlu1 %355 }
  0x7d   : > { %v348_v17 = vmul.f32 %v346_v14, %v324_v3  ;;  %v349_v18 = vmul.f32 %v346_v14, %v325_v4  ;;  %751 = vrot.lane.b32.xlu0 %v750_v13, %s816_s21  ;;  %v358_v20 = vmul.f32 %v356_v19, %v324_v3  ;;  %v359_v21 = vmul.f32 %v356_v19, %v325_v4 }
  0x7f   : > { %v755_v22 = vpack.i.bf16 %v349_v18, %v348_v17  ;;  %v770_v25 = vpack.i.bf16 %v359_v21, %v358_v20 }
  0x80   : > { %v361_v24 = vpop.permute.xlu0 %360 }
  0x81   : > { %756 = vrot.lane.b32.xlu1 %v755_v22, %s817_s22  ;;  %761 = vrot.lane.b32.xlu0 %v745_v5, %s818_s23  ;;  %v363_v26 = vmul.f32 %v361_v24, %v324_v3  ;;  %v364_v27 = vmul.f32 %v361_v24, %v325_v4 }
  0x83   : > { %v780_v31 = vpack.i.bf16 %v364_v27, %v363_v26 }
  0x85   : > { %v747_v28 = vpop.permute.xlu1 %746  ;;  %766 = vrot.lane.b32.xlu1 %v765_v23, %s819_s24  ;;  %771 = vrot.lane.b32.xlu0 %v770_v25, %s820_s25 }
  0x86   : > { %v749_v29 = vunpack.i.h.bf16 %v747_v28  ;;  %v748_v30 = vunpack.i.l.bf16 %v747_v28 }
  0x88   : > { %v428_v32 = vpack.c.bf16 %v749_v29, %v748_v30 }
  0x89   : > { %776 = vrot.lane.b32.xlu1 %v745_v5, %s821_s26  ;;  %781 = vrot.lane.b32.xlu0 %v780_v31, %s822_s29 }
  0x8a   : > { %464 = vmatpush1.bf16.msra.mxu0 %v428_v32 }
  0x8b   : > { %465 = vmatprep.subr.bf16.mxu0 %v812_v2 }
  0x8d   : > { %440 = vperm.xlu1 %785, %v436_v35   ;;  %445 = vperm.xlu0 %786, %v437_v39  }
  0x91   : > { %523 = vperm.xlu1 %785, %v519_v38   ;;  %611 = vperm.xlu0 %786, %v607_v42  }
  0x95   : > { %528 = vperm.xlu1 %785, %v520_v45  }
  0x99   : > { %616 = vperm.xlu1 %785, %v608_v46  }
  0xeb   : > { %v598_v13 = vpop.f32.mrb[0].mxu1 }
  0xec   : > { %v719_v14 = vpop.f32.mrb[1].mxu1 }
  0xed   : > { %v601_v15 = vpop.f32.mrb[2].mxu1 }
  0xee   : > { %v720_v16 = vpop.f32.mrb[3].mxu1 }
  0xef   : > { %v752_v47 = vpop.permute.xlu0 %751 }
  0xf0   : > { %v754_v48 = vunpack.i.h.bf16 %v752_v47  ;;  %v753_v49 = vunpack.i.l.bf16 %v752_v47 }
  0xf2   : > { %v429_v50 = vpack.c.bf16 %v754_v48, %v753_v49 }
  0xf3   : > { %v757_v51 = vpop.permute.xlu1 %756  ;;  %v762_v52 = vpop.permute.xlu0 %761 }
  0xf4   : > { %v759_v53 = vunpack.i.h.bf16 %v757_v51  ;;  %v758_v54 = vunpack.i.l.bf16 %v757_v51  ;;  %466 = vmatpush1.bf16.msra.mxu0 %v429_v50  ;;  %v764_v55 = vunpack.i.h.bf16 %v762_v52  ;;  %v763_v56 = vunpack.i.l.bf16 %v762_v52 }
  0xf5   : > { %467 = vmatprep.subr.bf16.mxu0 %v812_v2 }
  0xf6   : > { %v430_v57 = vpack.c.bf16 %v759_v53, %v758_v54  ;;  %v431_v59 = vpack.c.bf16 %v764_v55, %v763_v56 }
  0xf7   : > { %v767_v58 = vpop.permute.xlu1 %766  ;;  %v772_v62 = vpop.permute.xlu0 %771 }
  0xf8   : > { %468 = vmatpush1.bf16.msra.mxu0 %v430_v57  ;;  %v769_v60 = vunpack.i.h.bf16 %v767_v58  ;;  %v768_v61 = vunpack.i.l.bf16 %v767_v58  ;;  %v774_v0 = vunpack.i.h.bf16 %v772_v62  ;;  %v773_v1 = vunpack.i.l.bf16 %v772_v62 }
  0xf9   : > { %469 = vmatprep.subr.bf16.mxu0 %v812_v2 }
  0xfa   : > { %v432_v63 = vpack.c.bf16 %v769_v60, %v768_v61  ;;  %v433_v4 = vpack.c.bf16 %v774_v0, %v773_v1 }
  0xfb   : > { %v777_v3 = vpop.permute.xlu1 %776  ;;  %v782_v7 = vpop.permute.xlu0 %781 }
  0xfc   : > { %470 = vmatpush1.bf16.msra.mxu0 %v431_v59  ;;  %v779_v5 = vunpack.i.h.bf16 %v777_v3  ;;  %v778_v6 = vunpack.i.l.bf16 %v777_v3  ;;  %v784_v9 = vunpack.i.h.bf16 %v782_v7  ;;  %v783_v10 = vunpack.i.l.bf16 %v782_v7 }
  0xfd   : > { %471 = vmatprep.subr.bf16.mxu0 %v812_v2 }
  0xfe   : > { %v434_v8 = vpack.c.bf16 %v779_v5, %v778_v6  ;;  %v435_v11 = vpack.c.bf16 %v784_v9, %v783_v10 }
 0x100   : > { %472 = vmatpush1.bf16.msra.mxu0 %v432_v63 }
 0x101   : > { %473 = vmatprep.subr.bf16.mxu0 %v812_v2 }
 0x104   : > { %474 = vmatpush1.bf16.msra.mxu0 %v433_v4 }
 0x105   : > { %475 = vmatprep.subr.bf16.mxu0 %v812_v2 }
 0x108   : > { %476 = vmatpush1.bf16.msra.mxu0 %v434_v8 }
 0x109   : > { %477 = vmatprep.subr.bf16.mxu0 %v812_v2 }
 0x10c   : > { %478 = vmatpush1.bf16.msra.mxu0 %v435_v11  ;;  %v441_v17 = vpop.permute.xlu1 %440  ;;  %v446_v21 = vpop.permute.xlu0 %445 }
 0x10f   : > { %494 = vmatmul.mubr.bf16.vlgmr.msra.gmra.mrb[0].mxu0 %v787_v12 }
 0x110   : > { %v524_v36 = vpop.permute.xlu1 %523  ;;  %v612_v54 = vpop.permute.xlu0 %611 }
 0x114   : > { %v529_v40 = vpop.permute.xlu1 %528 }
 0x118   : > { %v617_v56 = vpop.permute.xlu1 %616 }
 0x1e2   : > { %v495_v18 = vpop.f32.mrb[0].mxu0 }
 0x1e3   : > { %v496_v19 = vadd.f32 %v495_v18, %v441_v17  ;;  %v497_v20 = vpop.f32.mrb[1].mxu0 }
 0x1e4   : > { %v498_v22 = vpop.f32.mrb[2].mxu0 }
 0x1e5   : > { %v502_v23 = vmul.f32 %v496_v19, %v496_v19  ;;  %v499_v24 = vadd.f32 %v498_v22, %v446_v21  ;;  %v500_v25 = vpop.f32.mrb[3].mxu0 }
 0x1e7   : > { %v503_v2 = vmul.f32 %v499_v24, %v499_v24  ;;  %v504_v26 = vsel %vm457_vm0, %v502_v23, 0.0 }
 0x1e9   : > { %v505_v27 = vsel %vm457_vm0, %v503_v2, 0.0 }
 0x1ea   : > { %v506_v28 = vadd.f32 %v505_v27, %v504_v26 }
 0x1ec   : > { %v507_v29 = vrot.slane %v506_v28, 4 }
 0x1ee   : > { %v508_v30 = vadd.f32 %v507_v29, %v506_v28 }
 0x1f0   : > { %v509_v31 = vrot.slane %v508_v30, 2 }
 0x1f2   : > { %v510_v32 = vadd.f32 %v509_v31, %v508_v30 }
 0x1f4   : > { %v511_v33 = vrot.slane %v510_v32, 1 }
 0x1f6   : > { %v512_v34 = vadd.f32 %v511_v33, %v510_v32 }
 0x1f8   : > { %v513_v35 = vmax.f32 %v512_v34, 1e-24 }
 0x1fa   : > { %791 = vrsqrt.f32 %v513_v35 }
 0x204   : > { %v792_v37 = vpop.eup %791 }
 0x205   : > { %v516_v38 = vmul.f32 %v792_v37, %v499_v24  ;;  %v515_v39 = vmul.f32 %v792_v37, %v496_v19 }
 0x207   : > { %v531_v41 = vmul.f32 %v524_v36, %v515_v39  ;;  %v532_v42 = vmul.f32 %v529_v40, %v516_v38 }
 0x209   : > { %v705_v43 = vmul.f32 -1.442695, %v531_v41  ;;  %v706_v44 = vmul.f32 -1.442695, %v532_v42 }
 0x20b   : > { %793 = vpow2.f32 %v705_v43 }
 0x20c   : > { %795 = vpow2.f32 %v706_v44 }
 0x215   : > { %v794_v45 = vpop.eup %793 }
 0x216   : > { %v796_v46 = vpop.eup %795  ;;  %v539_v47 = vadd.f32 1.0, %v794_v45 }
 0x217   : > { %v540_v48 = vadd.f32 1.0, %v796_v46 }
 0x218   : > { %797 = vrcp.f32 %v539_v47 }
 0x219   : > { %799 = vrcp.f32 %v540_v48 }
 0x222   : > { %v798_v49 = vpop.eup %797 }
 0x223   : > { %v800_v50 = vpop.eup %799  ;;  %v545_v51 = vmul.f32 %v798_v49, %v531_v41 }
 0x224   : > { %v546_v52 = vmul.f32 %v800_v50, %v532_v42 }
 0x225   : > { %v605_v53 = vadd.f32 %v598_v13, %v545_v51 }
 0x226   : > { %v606_v55 = vadd.f32 %v601_v15, %v546_v52 }
 0x227   : > { %v619_v57 = vadd.f32 %v612_v54, %v605_v53 }
 0x228   : > { %v620_v58 = vadd.f32 %v617_v56, %v606_v55 }
 0x229   : > { %621 = vst.msk [vmem:[%s322_s13] sm:$0xff] %vm457_vm0, %v619_v57 }
 0x22a   : > { %622 = vst.msk [vmem:[%s322_s13 + $0x8] sm:$0xff] %vm457_vm0, %v620_v58 }
 0x22b PF: > { %s18_s27 = sadd.s32 1, %s807_s27  }
 0x22c   : > { %p15_p4 = scmp.ge.s32.totalorder %s18_s27, 4  }
 0x22e   :  { %17 = sbr.rel (!%p15_p4) target bundleno = 1 (0x1), region = 85 }

// kernel: vae_forward.51
= control target key start
LH: loop header
LB: loop body
LE: loop exit
PB: predicated region body
PF: predicated region fallthrough
CT: control target
= control target key end

     0   :  { %s548_s15 = smov 0   ;;  %s592_s0 = inlined_call_operand.vmem [shape: f32[2,16,82], index: 0, kind: input, shape index: {}]   ;;  %s593_s1 = inlined_call_operand.vmem [shape: bf16[8,144], index: 1, kind: input, shape index: {}]   ;;  %s594_s2 = inlined_call_operand.vmem [shape: f32[8,1], index: 2, kind: input, shape index: {}]   ;;  %s595_s3 = inlined_call_operand.vmem [shape: f32[3,64], index: 3, kind: input, shape index: {}]   ;;  %s596_s4 = inlined_call_operand.vmem [shape: f32[2,8,64], index: 4, kind: output, shape index: {}]  }
   0x1 LB: > { %s419_s16 = sadd.s32 4294967295, %s507_s15   ;;  %p423_p0 = scmp.ge.s32.totalorder %s507_s15, 1  ;;  %s507_s15 = sphi %s548_s15, %s14_s15  }
   0x2   : > { %p162_p1 = scmp.lt.s32.totalorder %s507_s15, 3 }
   0x4   : > { %p163_p2 = pnand %p423_p0, %p162_p1 }
   0x5   : > { %v428_v0 = vld [vmem:[%s595_s3 + $0x2] ss:$0 sm:$0xff] (!%p163_p2)  ;;  %s509_s19 = smov (!%p163_p2), 2   ;;  %v427_v1 = vld [vmem:[%s595_s3] ss:$0 sm:$0xff] (!%p163_p2)  ;;  %s510_s22 = smov (!%p163_p2), 10  }
   0x6   : > { %166 = sbr.rel (%p163_p2) target bundleno = 486 (0x1e6), region = 36  ;;  %212 = vrot.lane.b32.xlu0 (!%p163_p2), %v428_v0, %s509_s19  ;;  %223 = vrot.lane.b32.xlu1 (!%p163_p2), %v428_v0, %s510_s22  ;;  %p187_p3 = scmp.lt.s32.totalorder (!%p163_p2), %s419_s16, 1  ;;  %v512_v2 = vmov (!%p163_p2), 0   ;;  %v298_v33 = vld [vmem:[%s593_s1] sm:$0xff] (!%p163_p2)  ;;  %vm320_vm0 = vcmask (!%p163_p2), 130048   ;;  %vm364_vm1 = vcmask (!%p163_p2), 523264  }
   0x7   : > { %s511_s23 = smov (!%p163_p2), 8   ;;  %324 = vmatprep.subr.bf16.mxu0 (!%p163_p2), %v512_v2  ;;  %s513_s24 = smov (!%p163_p2), 16   ;;  %498 = vset.pattern.permute.xlu0 (!%p163_p2), %v512_v2  ;;  %v430_v34 = vcombine.high (!%p163_p2), %v298_v33, %v298_v33  ;;  %v308_v35 = vld [vmem:[%s594_s2] sm:$0xff] (!%p163_p2) }
   0x8   : > { %497 = vset.pattern.permute.xlu1 (!%p163_p2), %v512_v2  ;;  %s514_s29 = smov (!%p163_p2), 18   ;;  %s515_s30 = smov (!%p163_p2), 127  }
   0x9   : > { %s516_s5 = smov (!%p163_p2), 126   ;;  %s517_s6 = smov (!%p163_p2), 120   ;;  %431 = vmatprep.mubr.msk.bf16.mxu0 (!%p163_p2), %vm320_vm0, %v430_v34 }
   0xa   : > { %218 = vrot.lane.b32.xlu0 (!%p163_p2), %v427_v1, %s511_s23  ;;  %228 = vrot.lane.b32.xlu1 (!%p163_p2), %v427_v1, %s513_s24  ;;  %s518_s7 = smov (!%p163_p2), 119   ;;  %s519_s8 = smov (!%p163_p2), 118  }
   0xb   : > { %s520_s9 = smov (!%p163_p2), 112   ;;  %s521_s10 = smov (!%p163_p2), 111  }
   0xc   : > { %s522_s11 = smov (!%p163_p2), 110  }
   0xd   : > { %s598_s16 = smov (!%p187_p3, %s419_s16), 1 }
   0xe   : > { %s434_s25 = sshll.u32 %s598_s16, 4  ;;  %233 = vrot.lane.b32.xlu0 %v428_v0, %s514_s29  ;;  %v429_v0 = vcombine.low %v298_v33, %v298_v33  ;;  %s426_s18 = sshll.u32 %s598_s16, 3 }
   0xf   : > { %s191_s28 = scalar_lea.vmem %s592_s0, %s434_s25  ;;  %s195_s21 = scalar_lea.vmem %s596_s4, %s426_s18 }
  0x10   : > { %v197_v3 = vld [vmem:[%s191_s28] sm:$0xff]  ;;  %v198_v4 = vld [vmem:[%s191_s28 + $0x8] sm:$0xff] }
  0x11   : > { %v457_v5 = vpack.i.bf16 %v198_v4, %v197_v3  ;;  %v204_v6 = vmul.f32 %v427_v1, %v197_v3  ;;  %v205_v7 = vmul.f32 %v427_v1, %v198_v4 }
  0x13   : > { %458 = vrot.lane.b32.xlu1 %v457_v5, %s515_s30  ;;  %v299_v8 = vpack.c.bf16 %v205_v7, %v204_v6 }
  0x15   : > { %325 = vmatpush1.bf16.msra.mxu0 %v299_v8 }
  0x16   : > { %326 = vmatprep.subr.bf16.mxu0 %v512_v2 }
  0x78   : > { %v213_v9 = vpop.permute.xlu0 %212  ;;  %v224_v12 = vpop.permute.xlu1 %223 }
  0x79   : > { %v215_v10 = vmul.f32 %v213_v9, %v197_v3  ;;  %v216_v11 = vmul.f32 %v213_v9, %v198_v4  ;;  %v226_v15 = vmul.f32 %v224_v12, %v197_v3  ;;  %v227_v16 = vmul.f32 %v224_v12, %v198_v4 }
  0x7b   : > { %v462_v13 = vpack.i.bf16 %v216_v11, %v215_v10  ;;  %v477_v23 = vpack.i.bf16 %v227_v16, %v226_v15 }
  0x7c   : > { %v219_v14 = vpop.permute.xlu0 %218  ;;  %v229_v19 = vpop.permute.xlu1 %228 }
  0x7d   : > { %v221_v17 = vmul.f32 %v219_v14, %v197_v3  ;;  %v222_v18 = vmul.f32 %v219_v14, %v198_v4  ;;  %463 = vrot.lane.b32.xlu0 %v462_v13, %s516_s5  ;;  %v231_v20 = vmul.f32 %v229_v19, %v197_v3  ;;  %v232_v21 = vmul.f32 %v229_v19, %v198_v4 }
  0x7f   : > { %v467_v22 = vpack.i.bf16 %v222_v18, %v221_v17  ;;  %v482_v25 = vpack.i.bf16 %v232_v21, %v231_v20 }
  0x80   : > { %v234_v24 = vpop.permute.xlu0 %233 }
  0x81   : > { %468 = vrot.lane.b32.xlu1 %v467_v22, %s517_s6  ;;  %473 = vrot.lane.b32.xlu0 %v457_v5, %s518_s7  ;;  %v236_v26 = vmul.f32 %v234_v24, %v197_v3  ;;  %v237_v27 = vmul.f32 %v234_v24, %v198_v4 }
  0x83   : > { %v492_v31 = vpack.i.bf16 %v237_v27, %v236_v26 }
  0x85   : > { %v459_v28 = vpop.permute.xlu1 %458  ;;  %478 = vrot.lane.b32.xlu1 %v477_v23, %s519_s8  ;;  %483 = vrot.lane.b32.xlu0 %v482_v25, %s520_s9 }
  0x86   : > { %v461_v29 = vunpack.i.h.bf16 %v459_v28  ;;  %v460_v30 = vunpack.i.l.bf16 %v459_v28 }
  0x88   : > { %v300_v32 = vpack.c.bf16 %v461_v29, %v460_v30 }
  0x89   : > { %488 = vrot.lane.b32.xlu1 %v457_v5, %s521_s10  ;;  %493 = vrot.lane.b32.xlu0 %v492_v31, %s522_s11 }
  0x8a   : > { %327 = vmatpush1.bf16.msra.mxu0 %v300_v32 }
  0x8b   : > { %328 = vmatprep.subr.bf16.mxu0 %v512_v2 }
  0x8d   : > { %311 = vperm.xlu1 %497, %v308_v35  }
  0xef   : > { %v464_v36 = vpop.permute.xlu0 %463 }
  0xf0   : > { %v466_v37 = vunpack.i.h.bf16 %v464_v36  ;;  %v465_v38 = vunpack.i.l.bf16 %v464_v36 }
  0xf2   : > { %v301_v39 = vpack.c.bf16 %v466_v37, %v465_v38 }
  0xf3   : > { %v469_v40 = vpop.permute.xlu1 %468  ;;  %v474_v41 = vpop.permute.xlu0 %473 }
  0xf4   : > { %v471_v42 = vunpack.i.h.bf16 %v469_v40  ;;  %v470_v43 = vunpack.i.l.bf16 %v469_v40  ;;  %329 = vmatpush1.bf16.msra.mxu0 %v301_v39  ;;  %v476_v44 = vunpack.i.h.bf16 %v474_v41  ;;  %v475_v45 = vunpack.i.l.bf16 %v474_v41 }
  0xf5   : > { %330 = vmatprep.subr.bf16.mxu0 %v512_v2 }
  0xf6   : > { %v302_v46 = vpack.c.bf16 %v471_v42, %v470_v43  ;;  %v303_v48 = vpack.c.bf16 %v476_v44, %v475_v45 }
  0xf7   : > { %v479_v47 = vpop.permute.xlu1 %478  ;;  %v484_v51 = vpop.permute.xlu0 %483 }
  0xf8   : > { %331 = vmatpush1.bf16.msra.mxu0 %v302_v46  ;;  %v481_v49 = vunpack.i.h.bf16 %v479_v47  ;;  %v480_v50 = vunpack.i.l.bf16 %v479_v47  ;;  %v486_v53 = vunpack.i.h.bf16 %v484_v51  ;;  %v485_v54 = vunpack.i.l.bf16 %v484_v51 }
  0xf9   : > { %332 = vmatprep.subr.bf16.mxu0 %v512_v2 }
  0xfa   : > { %v304_v52 = vpack.c.bf16 %v481_v49, %v480_v50  ;;  %v305_v56 = vpack.c.bf16 %v486_v53, %v485_v54 }
  0xfb   : > { %v489_v55 = vpop.permute.xlu1 %488  ;;  %v494_v59 = vpop.permute.xlu0 %493 }
  0xfc   : > { %333 = vmatpush1.bf16.msra.mxu0 %v303_v48  ;;  %v491_v57 = vunpack.i.h.bf16 %v489_v55  ;;  %v490_v58 = vunpack.i.l.bf16 %v489_v55  ;;  %v496_v61 = vunpack.i.h.bf16 %v494_v59  ;;  %v495_v62 = vunpack.i.l.bf16 %v494_v59 }
  0xfd   : > { %334 = vmatprep.subr.bf16.mxu0 %v512_v2 }
  0xfe   : > { %v306_v60 = vpack.c.bf16 %v491_v57, %v490_v58  ;;  %v307_v63 = vpack.c.bf16 %v496_v61, %v495_v62 }
 0x100   : > { %335 = vmatpush1.bf16.msra.mxu0 %v304_v52 }
 0x101   : > { %336 = vmatprep.subr.bf16.mxu0 %v512_v2 }
 0x104   : > { %337 = vmatpush1.bf16.msra.mxu0 %v305_v56 }
 0x105   : > { %338 = vmatprep.subr.bf16.mxu0 %v512_v2 }
 0x108   : > { %339 = vmatpush1.bf16.msra.mxu0 %v306_v60 }
 0x109   : > { %340 = vmatprep.subr.bf16.mxu0 %v512_v2 }
 0x10c   : > { %341 = vmatpush1.bf16.msra.mxu0 %v307_v63  ;;  %v312_v1 = vpop.permute.xlu1 %311 }
 0x10f   : > { %357 = vmatmul.mubr.bf16.vlgmr.msra.gmra.mrb[0].mxu0 %v429_v0 }
 0x1e2   : > { %v358_v3 = vpop.f32.mrb[0].mxu0 }
 0x1e3   : > { %v359_v4 = vadd.f32 %v358_v3, %v312_v1  ;;  %v360_v5 = vpop.f32.mrb[1].mxu0 }
 0x1e4   : > { %v361_v6 = vpop.f32.mrb[2].mxu0 }
 0x1e5   : > { %365 = vst.msk [vmem:[%s195_s21] sm:$0xff] %vm364_vm1, %v359_v4  ;;  %v362_v7 = vpop.f32.mrb[3].mxu0 }
 0x1e6 PF: > { %s14_s15 = sadd.s32 1, %s507_s15  }
 0x1e7   : > { %p11_p4 = scmp.ge.s32.totalorder %s14_s15, 4  }
 0x1e9   :  { %13 = sbr.rel (!%p11_p4) target bundleno = 1 (0x1), region = 66 }

// kernel: vae_forward.56
= control target key start
LH: loop header
LB: loop body
LE: loop exit
PB: predicated region body
PF: predicated region fallthrough
CT: control target
= control target key end

     0   :  { %s644_s15 = smov 0   ;;  %s723_s0 = inlined_call_operand.vmem [shape: f32[2,8,290], index: 0, kind: input, shape index: {}]   ;;  %s724_s1 = inlined_call_operand.vmem [shape: bf16[8,72], index: 1, kind: input, shape index: {}]   ;;  %s725_s2 = inlined_call_operand.vmem [shape: f32[8,1], index: 2, kind: input, shape index: {}]   ;;  %s726_s3 = inlined_call_operand.vmem [shape: f32[3,256], index: 3, kind: input, shape index: {}]   ;;  %s727_s4 = inlined_call_operand.vmem [shape: f32[2,8,256], index: 4, kind: output, shape index: {}]  }
   0x1 LB: > { %s519_s16 = sadd.s32 4294967295, %s603_s15   ;;  %p523_p0 = scmp.ge.s32.totalorder %s603_s15, 1  ;;  %s603_s15 = sphi %s644_s15, %s14_s15  }
   0x2   : > { %p162_p1 = scmp.lt.s32.totalorder %s603_s15, 3 }
   0x4   : > { %p163_p2 = pnand %p523_p0, %p162_p1 }
   0x5   : > { %v204_v0 = vlaneseq (!%p163_p2)  ;;  %v527_v2 = vld [vmem:[%s726_s3 + $0x2] ss:$4 sm:$0x3] (!%p163_p2)  ;;  %v202_v3 = vld [vmem:[%s726_s3] ss:$4 sm:$0x3] (!%p163_p2) }
   0x6   : > { %166 = sbr.rel (%p163_p2) target bundleno = 494 (0x1ee), region = 36  ;;  %p188_p3 = scmp.lt.s32.totalorder (!%p163_p2), %s519_s16, 1  ;;  %vm231_vm0 = vcmask (!%p163_p2), 15360   ;;  %vm243_vm1 = vcmask (!%p163_p2), 130048   ;;  %vm255_vm2 = vcmask (!%p163_p2), 146432   ;;  %vm267_vm3 = vcmask (!%p163_p2), 261120  }
   0x7   : > { %v205_v1 = vshrl.u32 (!%p163_p2), %v204_v0, 7  ;;  %s605_s21 = smov (!%p163_p2), 2   ;;  %s606_s22 = smov (!%p163_p2), 16   ;;  %vm279_vm4 = vcmask (!%p163_p2), 277504   ;;  %vm296_vm5 = vcmask (!%p163_p2), 1039360   ;;  %v617_v54 = vmov (!%p163_p2), 0  }
   0x8   : > { %s607_s24 = smov (!%p163_p2), 18   ;;  %s608_s28 = smov (!%p163_p2), 32   ;;  %453 = vmatprep.mubr.bf16.mxu0 (!%p163_p2), %v617_v54  ;;  %596 = vset.pattern.permute.xlu0 (!%p163_p2), %v617_v54  ;;  %v404_v60 = vld [vmem:[%s725_s2] sm:$0xff] (!%p163_p2)  ;;  %vm310_vm6 = vcmask (!%p163_p2), 1031168   ;;  %vm324_vm7 = vcmask (!%p163_p2), 916480   ;;  %vm335_vm8 = vcmask (!%p163_p2), 908288  }
   0x9   : > { %v206_v4 = vsub.s32 (!%p163_p2), 0, %v205_v1  ;;  %v210_v5 = vsub.s32 (!%p163_p2), 1, %v205_v1  ;;  %s609_s29 = smov (!%p163_p2), 34   ;;  %s610_s30 = smov (!%p163_p2), 127   ;;  %vm363_vm9 = vcmask (!%p163_p2), 785408   ;;  %vm349_vm10 = vcmask (!%p163_p2), 900096  }
   0xa   : > { %s611_s5 = smov (!%p163_p2), 111   ;;  %s612_s6 = smov (!%p163_p2), 95   ;;  %vm374_vm11 = vcmask (!%p163_p2), 777216   ;;  %vm388_vm12 = vcmask (!%p163_p2), 769024   ;;  %vm414_vm13 = vcmask (!%p163_p2), 1043456   ;;  %vm410_vm14 = vcmask (!%p163_p2), 588800  }
   0xb   : > { %v222_v6 = vrot.slane (!%p163_p2), %v527_v2, %v206_v4  ;;  %v658_v7 = vrot.slane (!%p163_p2), %v202_v3, %v206_v4  ;;  %v226_v8 = vrot.slane (!%p163_p2), %v527_v2, %v210_v5  ;;  %v661_v9 = vrot.slane (!%p163_p2), %v202_v3, %v210_v5  ;;  %s613_s7 = smov (!%p163_p2), 126   ;;  %s614_s8 = smov (!%p163_p2), 112  }
   0xc   : > { %s615_s9 = smov (!%p163_p2), 110   ;;  %s616_s10 = smov (!%p163_p2), 96  }
   0xd   : > { %227 = vrot.lane.b32.xlu0 %v222_v6, %s605_s21  ;;  %239 = vrot.lane.b32.xlu1 %v658_v7, %s606_s22  ;;  %s729_s16 = smov (!%p188_p3, %s519_s16), 1  ;;  %s618_s11 = smov 94  }
   0xe   : > { %s533_s23 = smul.u32 24, %s729_s16  ;;  %s532_s18 = sshll.u32 %s729_s16, 4 }
  0x10   : > { %s192_s27 = scalar_lea.vmem %s723_s0, %s533_s23 }
  0x11   : > { %229 = vrot.lane.b32.xlu0 %v226_v8, %s605_s21  ;;  %241 = vrot.lane.b32.xlu1 %v661_v9, %s606_s22  ;;  %v672_v10 = vld [vmem:[%s192_s27 + $0x8] sm:$0xff]  ;;  %v674_v11 = vld [vmem:[%s192_s27 + $0x10] sm:$0xff]  ;;  %s197_s21 = scalar_lea.vmem %s727_s4, %s532_s18 }
  0x12   : > { %v556_v12 = vpack.i.bf16 %v674_v11, %v672_v10  ;;  %v678_v13 = vld [vmem:[%s192_s27] sm:$0xff]  ;;  %v215_v50 = vmul.f32 %v661_v9, %v672_v10 }
  0x13   : > { %v214_v51 = vmul.f32 %v658_v7, %v678_v13 }
  0x15   : > { %251 = vrot.lane.b32.xlu0 %v222_v6, %s607_s24  ;;  %253 = vrot.lane.b32.xlu1 %v226_v8, %s607_s24 }
  0x19   : > { %263 = vrot.lane.b32.xlu0 %v658_v7, %s608_s28  ;;  %265 = vrot.lane.b32.xlu1 %v661_v9, %s608_s28 }
  0x1d   : > { %275 = vrot.lane.b32.xlu0 %v222_v6, %s609_s29  ;;  %277 = vrot.lane.b32.xlu1 %v226_v8, %s609_s29 }
  0x21   : > { %557 = vrot.lane.b32.xlu0 %v556_v12, %s610_s30  ;;  %290 = vrot.lane.b32.xlu1 %v678_v13, %s610_s30 }
  0x25   : > { %562 = vrot.lane.b32.xlu0 %v556_v12, %s611_s5  ;;  %567 = vrot.lane.b32.xlu1 %v556_v12, %s612_s6 }
  0x29   : > { %329 = vrot.lane.b32.xlu0 %v678_v13, %s611_s5 }
  0x7f   : > { %v228_v14 = vpop.permute.xlu0 %227  ;;  %v240_v15 = vpop.permute.xlu1 %239 }
  0x80   : > { %v236_v16 = vmul.f32 %v228_v14, %v678_v13  ;;  %v248_v17 = vmul.f32 %v240_v15, %v678_v13 }
  0x82   : > { %304 = vrot.lane.b32.xlu0 %v236_v16, %s613_s7  ;;  %318 = vrot.lane.b32.xlu1 %v248_v17, %s614_s8 }
  0x83   : > { %v230_v18 = vpop.permute.xlu0 %229  ;;  %v242_v19 = vpop.permute.xlu1 %241 }
  0x84   : > { %v232_v20 = vsel %vm231_vm0, %v228_v14, %v230_v18  ;;  %v238_v21 = vmul.f32 %v230_v18, %v674_v11  ;;  %v244_v22 = vsel %vm243_vm1, %v240_v15, %v242_v19  ;;  %v250_v26 = vmul.f32 %v242_v19, %v674_v11 }
  0x85   : > { %v237_v23 = vmul.f32 %v232_v20, %v672_v10  ;;  %v249_v25 = vmul.f32 %v244_v22, %v672_v10 }
  0x87   : > { %v571_v24 = vpack.i.bf16 %v238_v21, %v237_v23  ;;  %v252_v27 = vpop.permute.xlu0 %251  ;;  %v254_v28 = vpop.permute.xlu1 %253  ;;  %v576_v31 = vpack.i.bf16 %v250_v26, %v249_v25 }
  0x88   : > { %v260_v29 = vmul.f32 %v252_v27, %v678_v13  ;;  %v256_v30 = vsel %vm255_vm2, %v252_v27, %v254_v28  ;;  %v262_v32 = vmul.f32 %v254_v28, %v674_v11 }
  0x89   : > { %572 = vrot.lane.b32.xlu0 %v571_v24, %s613_s7  ;;  %v261_v35 = vmul.f32 %v256_v30, %v672_v10 }
  0x8a   : > { %343 = vrot.lane.b32.xlu1 %v260_v29, %s615_s9 }
  0x8b   : > { %v264_v33 = vpop.permute.xlu0 %263  ;;  %v266_v34 = vpop.permute.xlu1 %265  ;;  %v581_v43 = vpack.i.bf16 %v262_v32, %v261_v35 }
  0x8c   : > { %v272_v36 = vmul.f32 %v264_v33, %v678_v13  ;;  %v268_v37 = vsel %vm267_vm3, %v264_v33, %v266_v34  ;;  %v274_v38 = vmul.f32 %v266_v34, %v674_v11 }
  0x8d   : > { %v273_v39 = vmul.f32 %v268_v37, %v672_v10 }
  0x8e   : > { %577 = vrot.lane.b32.xlu1 %v576_v31, %s614_s8  ;;  %357 = vrot.lane.b32.xlu0 %v272_v36, %s616_s10 }
  0x8f   : > { %v586_v40 = vpack.i.bf16 %v274_v38, %v273_v39  ;;  %v276_v41 = vpop.permute.xlu0 %275  ;;  %v278_v42 = vpop.permute.xlu1 %277 }
  0x90   : > { %v284_v44 = vmul.f32 %v276_v41, %v678_v13  ;;  %v280_v45 = vsel %vm279_vm4, %v276_v41, %v278_v42  ;;  %v286_v59 = vmul.f32 %v278_v42, %v674_v11 }
  0x91   : > { %v285_v46 = vmul.f32 %v280_v45, %v672_v10 }
  0x92   : > { %582 = vrot.lane.b32.xlu1 %v581_v43, %s615_s9  ;;  %587 = vrot.lane.b32.xlu0 %v586_v40, %s616_s10 }
  0x93   : > { %v591_v47 = vpack.i.bf16 %v285_v46, %v284_v44  ;;  %v558_v48 = vpop.permute.xlu0 %557  ;;  %v291_v49 = vpop.permute.xlu1 %290 }
  0x94   : > { %v560_v52 = vunpack.i.h.bf16 %v558_v48  ;;  %v559_v53 = vunpack.i.l.bf16 %v558_v48  ;;  %v393_v48 = vld [vmem:[%s724_s1] sm:$0xf] }
  0x96   : > { %368 = vrot.lane.b32.xlu1 %v678_v13, %s612_s6  ;;  %592 = vrot.lane.b32.xlu0 %v591_v47, %s618_s11  ;;  %v297_v55 = vsel %vm296_vm5, %v291_v49, %v559_v53  ;;  %v298_v56 = vsel %vm296_vm5, %v559_v53, %v560_v52 }
  0x97   : > { %v395_v57 = vpack.c.bf16 %v298_v56, %v215_v50  ;;  %v394_v58 = vpack.c.bf16 %v297_v55, %v214_v51  ;;  %v563_v61 = vpop.permute.xlu0 %562  ;;  %v568_v62 = vpop.permute.xlu1 %567 }
  0x98   : > { %v565_v10 = vunpack.i.h.bf16 %v563_v61  ;;  %v564_v11 = vunpack.i.l.bf16 %v563_v61  ;;  %v570_v16 = vunpack.i.h.bf16 %v568_v62  ;;  %v569_v17 = vunpack.i.l.bf16 %v568_v62 }
  0x99   : > { %421 = vmatprep.subr.bf16.mxu0 %v395_v57 }
  0x9a   : > { %386 = vrot.lane.b32.xlu1 %v286_v59, %s618_s11  ;;  %422 = vmatpush1.bf16.msra.mxu0 %v394_v58  ;;  %v337_v26 = vsel %vm335_vm8, %v564_v11, %v565_v10  ;;  %v376_v37 = vsel %vm374_vm11, %v569_v17, %v570_v16 }
  0x9b   : > { %407 = vperm.xlu0 %596, %v404_v60   ;;  %v330_v63 = vpop.permute.xlu0 %329 }
  0x9c   : > { %v336_v27 = vsel %vm335_vm8, %v330_v63, %v564_v11 }
  0xf4   : > { %v319_v0 = vpop.permute.xlu1 %318  ;;  %v305_v1 = vpop.permute.xlu0 %304 }
  0xfb   : > { %v573_v2 = vpop.permute.xlu0 %572 }
  0xfc   : > { %v344_v3 = vpop.permute.xlu1 %343  ;;  %v575_v4 = vunpack.i.h.bf16 %v573_v2  ;;  %v574_v5 = vunpack.i.l.bf16 %v573_v2 }
  0xfe   : > { %v312_v12 = vsel %vm310_vm6, %v574_v5, %v575_v4  ;;  %v311_v14 = vsel %vm310_vm6, %v305_v1, %v574_v5 }
 0x100   : > { %v578_v6 = vpop.permute.xlu1 %577  ;;  %v358_v7 = vpop.permute.xlu0 %357 }
 0x101   : > { %v580_v8 = vunpack.i.h.bf16 %v578_v6  ;;  %v579_v9 = vunpack.i.l.bf16 %v578_v6 }
 0x103   : > { %v326_v13 = vsel %vm324_vm7, %v579_v9, %v580_v8  ;;  %v325_v15 = vsel %vm324_vm7, %v319_v0, %v579_v9 }
 0x104   : > { %v583_v18 = vpop.permute.xlu1 %582  ;;  %v588_v19 = vpop.permute.xlu0 %587  ;;  %v397_v20 = vpack.c.bf16 %v326_v13, %v312_v12  ;;  %v396_v21 = vpack.c.bf16 %v325_v15, %v311_v14 }
 0x105   : > { %v585_v22 = vunpack.i.h.bf16 %v583_v18  ;;  %v584_v23 = vunpack.i.l.bf16 %v583_v18  ;;  %v590_v24 = vunpack.i.h.bf16 %v588_v19  ;;  %v589_v25 = vunpack.i.l.bf16 %v588_v19 }
 0x106   : > { %423 = vmatprep.subr.bf16.mxu0 %v397_v20 }
 0x107   : > { %424 = vmatpush1.bf16.msra.mxu0 %v396_v21  ;;  %v351_v28 = vsel %vm349_vm10, %v584_v23, %v585_v22  ;;  %v350_v29 = vsel %vm349_vm10, %v344_v3, %v584_v23  ;;  %v365_v30 = vsel %vm363_vm9, %v589_v25, %v590_v24  ;;  %v364_v41 = vsel %vm363_vm9, %v358_v7, %v589_v25 }
 0x108   : > { %v369_v31 = vpop.permute.xlu1 %368  ;;  %v593_v32 = vpop.permute.xlu0 %592  ;;  %v399_v33 = vpack.c.bf16 %v351_v28, %v337_v26  ;;  %v398_v34 = vpack.c.bf16 %v350_v29, %v336_v27  ;;  %v401_v39 = vpack.c.bf16 %v376_v37, %v365_v30 }
 0x109   : > { %v595_v35 = vunpack.i.h.bf16 %v593_v32  ;;  %v594_v36 = vunpack.i.l.bf16 %v593_v32  ;;  %v375_v38 = vsel %vm374_vm11, %v369_v31, %v569_v17 }
 0x10a   : > { %425 = vmatprep.subr.bf16.mxu0 %v399_v33  ;;  %v400_v44 = vpack.c.bf16 %v375_v38, %v364_v41 }
 0x10b   : > { %426 = vmatpush1.bf16.msra.mxu0 %v398_v34  ;;  %v389_v40 = vsel %vm388_vm12, %v594_v36, %v595_v35 }
 0x10c   : > { %v387_v42 = vpop.permute.xlu1 %386  ;;  %427 = vmatprep.subr.bf16.mxu0 %v401_v39  ;;  %v402_v43 = vpack.c.bf16 %v389_v40, %v389_v40 }
 0x10d   : > { %v390_v45 = vsel %vm388_vm12, %v595_v35, %v387_v42 }
 0x10e   : > { %v403_v46 = vpack.c.bf16 %v390_v45, %v390_v45  ;;  %v416_v47 = vsel %vm414_vm13, %v402_v43, 0 }
 0x10f   : > { %428 = vmatpush1.bf16.msra.mxu0 %v400_v44 }
 0x110   : > { %528 = vmatprep.subr.msk.bf16.mxu0 %vm414_vm13, %v403_v46 }
 0x113   : > { %430 = vmatpush1.bf16.msra.mxu0 %v416_v47 }
 0x116   : > { %529 = vmatmul.mubr.msk.bf16.vlgmr.msra.gmra.mrb[0].mxu0 %vm410_vm14, %v393_v48 }
 0x11a   : > { %v408_v49 = vpop.permute.xlu0 %407 }
 0x1e9   : > { %v455_v50 = vpop.f32.mrb[0].mxu0 }
 0x1ea   : > { %v456_v51 = vadd.f32 %v455_v50, %v408_v49  ;;  %v457_v52 = vpop.f32.mrb[1].mxu0 }
 0x1eb   : > { %v458_v53 = vadd.f32 %v457_v52, %v408_v49  ;;  %v459_v54 = vpop.f32.mrb[2].mxu0 }
 0x1ec   : > { %462 = vst [vmem:[%s197_s21] sm:$0xff] %v456_v51  ;;  %v460_v55 = vpop.f32.mrb[3].mxu0 }
 0x1ed   : > { %463 = vst [vmem:[%s197_s21 + $0x8] sm:$0xff] %v458_v53 }
 0x1ee PF: > { %s14_s15 = sadd.s32 1, %s603_s15  }
 0x1ef   : > { %p11_p4 = scmp.ge.s32.totalorder %s14_s15, 4  }
 0x1f1   :  { %13 = sbr.rel (!%p11_p4) target bundleno = 1 (0x1), region = 67 }

// kernel: vae_forward.59
= control target key start
LH: loop header
LB: loop body
LE: loop exit
PB: predicated region body
PF: predicated region fallthrough
CT: control target
= control target key end

     0   :  { %s355_s12 = smov 0   ;;  %s378_s0 = inlined_call_operand.vmem [shape: f32[2,8,256], index: 0, kind: input, shape index: {}]   ;;  %s379_s1 = inlined_call_operand.vmem [shape: bf16[3,8], index: 1, kind: input, shape index: {}]   ;;  %s380_s2 = inlined_call_operand.vmem [shape: f32[3,1], index: 2, kind: input, shape index: {}]   ;;  %s381_s3 = inlined_call_operand.vmem [shape: f32[2,3,256], index: 3, kind: output, shape index: {}]  }
   0x1 LB: > { %s297_s13 = sadd.s32 4294967295, %s332_s12   ;;  %p301_p0 = scmp.ge.s32.totalorder %s332_s12, 1  ;;  %s332_s12 = sphi %s355_s12, %s13_s12  }
   0x2   : > { %p137_p1 = scmp.lt.s32.totalorder %s332_s12, 3 }
   0x4   : > { %p138_p2 = pnand %p301_p0, %p137_p1 }
   0x5   : > { %p161_p3 = scmp.lt.s32.totalorder (!%p138_p2), %s297_s13, 1  ;;  %v334_v0 = vmov (!%p138_p2), 0   ;;  %v177_v1 = vld [vmem:[%s380_s2] sm:$0x7] (!%p138_p2)  ;;  %vm187_vm0 = vcmask (!%p138_p2), 1043456   ;;  %vm183_vm1 = vcmask (!%p138_p2), 64512  }
   0x6   : > { %141 = sbr.rel (%p138_p2) target bundleno = 252 (0xfc), region = 32  ;;  %226 = vmatprep.mubr.bf16.mxu0 (!%p138_p2), %v334_v0  ;;  %321 = vset.pattern.permute.xlu0 (!%p138_p2), %v334_v0  ;;  %v174_v7 = vld [vmem:[%s379_s1] sm:$0x3] (!%p138_p2) }
   0x7   : > { %180 = vperm.xlu0 (!%p138_p2), %321, %v177_v1  }
   0xd   : > { %s383_s13 = smov (!%p161_p3, %s297_s13), 1 }
   0xe   : > { %s310_s16 = sshll.u32 %s383_s13, 4  ;;  %s311_s22 = sshll.u32 %s383_s13, 3 }
   0xf   : > { %s165_s19 = scalar_lea.vmem %s378_s0, %s310_s16  ;;  %s170_s25 = scalar_lea.vmem %s381_s3, %s311_s22 }
  0x10   : > { %v173_v2 = vld [vmem:[%s165_s19 + $0x8] sm:$0xff]  ;;  %v172_v3 = vld [vmem:[%s165_s19] sm:$0xff] }
  0x11   : > { %v176_v4 = vpack.c.bf16 %v173_v2, %v173_v2  ;;  %v175_v5 = vpack.c.bf16 %v172_v3, %v172_v3 }
  0x13   : > { %306 = vmatprep.subr.msk.bf16.mxu0 %vm187_vm0, %v176_v4  ;;  %v189_v6 = vsel %vm187_vm0, %v175_v5, 0 }
  0x14   : > { %195 = vmatpush1.bf16.msra.mxu0 %v189_v6 }
  0x17   : > { %307 = vmatmul.mubr.msk.bf16.vlgmr.msra.gmra.mrb[0].mxu0 %vm183_vm1, %v174_v7 }
  0x86   : > { %v181_v8 = vpop.permute.xlu0 %180 }
  0xea   : > { %v228_v9 = vpop.f32.mrb[0].mxu0 }
  0xeb   : > { %v229_v10 = vadd.f32 %v228_v9, %v181_v8  ;;  %v230_v11 = vpop.f32.mrb[1].mxu0 }
  0xec   : > { %v231_v12 = vadd.f32 %v230_v11, %v181_v8  ;;  %v232_v13 = vpop.f32.mrb[2].mxu0 }
  0xed   : > { %322 = vtanh.f32 %v229_v10  ;;  %v233_v14 = vpop.f32.mrb[3].mxu0 }
  0xee   : > { %324 = vtanh.f32 %v231_v12 }
  0xf7   : > { %v323_v15 = vpop.eup %322 }
  0xf8   : > { %v325_v16 = vpop.eup %324 }
  0xf9   : > { %v239_v17 = vcombine.low %v323_v15, %v325_v16 }
  0xfb   : > { %241 = vst [vmem:[%s170_s25] sm:$0x77] %v239_v17 }
  0xfc PF: > { %s13_s12 = sadd.s32 1, %s332_s12  }
  0xfd   : > { %p10_p4 = scmp.ge.s32.totalorder %s13_s12, 4  }
  0xff   :  { %12 = sbr.rel (!%p10_p4) target bundleno = 1 (0x1), region = 62 }

</bundles_post_ra>
